<compile_context>
chip_gen: v6e
topology: v6e:2x2x1
jax: 0.10.0
libtpu: 0.0.40
codegen_flags: <defaults>
</compile_context>

<pallas_src>
import jax
import jax.numpy as jnp
from jax import lax
from jax.experimental import pallas as pl
from jax.experimental.pallas import tpu as pltpu


# ------------------------------- fused kernel ------------------------------ #
def _fused_cnn_kernel(xp4_ref, w1c_ref, b1c_ref, w2c_ref, b2c_ref,
                      w1l_ref, b1l_ref, w2l_ref, b2l_ref,
                      out_ref, y1p_ref):
    """Fused conv1+ReLU -> conv2+ReLU -> flatten -> fc1 -> fc2.

    xp4_ref : (16, N, 8, 8) VMEM  stride-4 phase split of the padded input:
              xp4[4*su+sv, n, a, b] == xpad32[n, 4a+su, 4b+sv].
    w1c_ref : (48,)  SMEM  conv1 weight flattened as (co, ci, kh, kw).
    b1c_ref : (3,)   SMEM  conv1 bias.
    w2c_ref : (144,) SMEM  conv2 weight flattened as (co, ci, kh, kw).
    b2c_ref : (3,)   SMEM  conv2 bias.
    w1l_ref : (21, 7, 256) VMEM  fc1 weight laid out as [ci*7+oh, ow, out].
    b1l_ref : (1, 256) VMEM.
    w2l_ref : (256, 10) VMEM  (pre-transposed fc2 weight).
    b2l_ref : (1, 10)  VMEM.
    out_ref : (N, 10)  VMEM  output.
    y1p_ref : (4, 3, N, 8, 8) VMEM scratch: stride-2 phase split of the
              zero-padded conv1 output:
              y1p[2*py+px, c, n, i, j] == pad1(relu(conv1(x)))[n, c, 2i+py, 2j+px].
    """
    n = out_ref.shape[0]
    f32 = jnp.float32

    # Zero the phase buffer once; the 7x7 interior blocks are overwritten below
    # and the untouched border rows/cols provide conv2's zero padding.
    y1p_ref[...] = jnp.zeros_like(y1p_ref)

    # ---- Conv1 (1->3, k=4, s=2, p=1) + ReLU, one output parity phase at a time.
    # Output phase (ry, rx) holds y1[:, :, 2i+ry, 2j+rx] for i, j in [0, 7).
    for ry in range(2):
        for rx in range(2):
            acc = [jnp.zeros((n, 7, 7), f32) for _ in range(3)]
            for kh in range(4):
                u = 2 * ry + kh
                su, du = u % 4, u // 4
                for kw in range(4):
                    v = 2 * rx + kw
                    sv, dv = v % 4, v // 4
                    tile = xp4_ref[su * 4 + sv, :, du:du + 7, dv:dv + 7]  # (N,7,7)
                    for co in range(3):
                        w = w1c_ref[co * 16 + kh * 4 + kw]
                        acc[co] = acc[co] + w * tile
            # pad1(y1)[2i+py, 2j+px] = y1[2i+py-1, 2j+px-1]
            #   => output phase (ry, rx) lands in buffer (1-ry, 1-rx) at offset (ry, rx).
            ph = (1 - ry) * 2 + (1 - rx)
            for co in range(3):
                val = jnp.maximum(acc[co] + b1c_ref[co], 0.0)
                y1p_ref[ph, co, :, ry:ry + 7, rx:rx + 7] = val

    # ---- Conv2 (3->3, k=4, s=2, p=1) + ReLU, reading the phase-decomposed buffer:
    #   pad1(y1)[2oh+kh, 2ow+kw] == y1p[kh%2, kw%2][oh + kh//2, ow + kw//2].
    y2 = [jnp.zeros((n, 7, 7), f32) for _ in range(3)]
    for ci in range(3):
        for kh in range(4):
            py, qh = kh % 2, kh // 2
            for kw in range(4):
                px, qw = kw % 2, kw // 2
                tile = y1p_ref[py * 2 + px, ci, :, qh:qh + 7, qw:qw + 7]  # (N,7,7)
                for co in range(3):
                    w = w2c_ref[co * 48 + ci * 16 + kh * 4 + kw]
                    y2[co] = y2[co] + w * tile
    y2 = [jnp.maximum(y2[co] + b2c_ref[co], 0.0) for co in range(3)]

    # ---- Flatten (N, 3*7*7) + Linear(147 -> 256) as 21 small MXU dots, so the
    # conv activations never need a cross-lane reshape.
    hidden = w1l_ref.shape[-1]
    h = jnp.zeros((n, hidden), f32)
    for ci in range(3):
        for oh in range(7):
            h = h + jnp.dot(y2[ci][:, oh, :], w1l_ref[ci * 7 + oh],
                            preferred_element_type=f32)
    h = h + b1l_ref[...]

    # ---- Linear(256 -> 10).
    out = jnp.dot(h, w2l_ref[...], preferred_element_type=f32) + b2l_ref[...]
    out_ref[...] = out.astype(out_ref.dtype)


# ----------------------------- parameter prep ------------------------------ #
def prepare_params(convs, linears):
    """One-time layout conversion (torch parameter layouts -> kernel layouts)."""
    (w1c, b1c), (w2c, b2c) = convs
    (w1l, b1l), (w2l, b2l) = linears
    cout = w1c.shape[0]                      # 3
    hid, feat = w1l.shape                    # 256, 147
    assert feat == cout * 7 * 7
    return dict(
        w1c=w1c.reshape(-1).astype(jnp.float32),            # (48,)  SMEM scalars
        b1c=b1c.astype(jnp.float32),                        # (3,)
        w2c=w2c.reshape(-1).astype(jnp.float32),            # (144,)
        b2c=b2c.astype(jnp.float32),                        # (3,)
        w1l=(w1l.reshape(hid, cout, 7, 7)
                .transpose(1, 2, 3, 0)
                .reshape(cout * 7, 7, hid)).astype(jnp.float32),   # (21,7,256)
        b1l=b1l.reshape(1, hid).astype(jnp.float32),        # (1, 256)
        w2l=w2l.T.astype(jnp.float32),                      # (256, 10)
        b2l=b2l.reshape(1, -1).astype(jnp.float32),         # (1, 10)
    )


# ------------------------------ model forward ------------------------------ #
@jax.jit
def cnn_forward(x, p):
    """Forward of cnn_model(layers=2, padding=1, stride=2, linear=True)."""
    n = x.shape[0]
    assert x.shape[1:] == (1, 28, 28)
    # Pad H, W by 1 (the conv padding) and extend with never-read zeros to 32
    # so the stride-4 phase split is a clean reshape.  This is the only per-call
    # host-side prep and touches just the ~6 KiB input.
    xpad = jnp.pad(x[:, 0], ((0, 0), (1, 3), (1, 3)))               # (N, 32, 32)
    xp4 = (xpad.reshape(n, 8, 4, 8, 4)
               .transpose(2, 4, 0, 1, 3)
               .reshape(16, n, 8, 8))                               # (16, N, 8, 8)

    n_out = p["w2l"].shape[1]
    vmem = pl.BlockSpec(memory_space=pltpu.MemorySpace.VMEM)
    smem = pl.BlockSpec(memory_space=pltpu.MemorySpace.SMEM)
    # TODO(synk): for large batches add a batch grid axis (block xp4/out over N,
    # mark it "parallel") so the working set keeps fitting v7x VMEM and both TCs
    # get work; at N=2 a grid is pure overhead.
    return pl.pallas_call(
        _fused_cnn_kernel,
        out_shape=jax.ShapeDtypeStruct((n, n_out), jnp.float32),
        in_specs=[vmem, smem, smem, smem, smem, vmem, vmem, vmem, vmem],
        out_specs=vmem,
        scratch_shapes=[pltpu.VMEM((4, 3, n, 8, 8), jnp.float32)],
    )(xp4, p["w1c"], p["b1c"], p["w2c"], p["b2c"],
      p["w1l"], p["b1l"], p["w2l"], p["b2l"])


# ------------------------------ pure-JAX ref -------------------------------- #
def reference_forward(x, convs, linears):
    y = x
    for (w, b) in convs:
        y = lax.conv_general_dilated(
            y, w, window_strides=(2, 2), padding=((1, 1), (1, 1)),
            dimension_numbers=("NCHW", "OIHW", "NCHW"))
        y = jnp.maximum(y + b.reshape(1, -1, 1, 1), 0.0)
    y = y.reshape(y.shape[0], -1)
    (w1, b1), (w2, b2) = linears
    y = y @ w1.T + b1
    y = y @ w2.T + b2
    return y


# ---------------------------------- main ------------------------------------ #
if __name__ == "__main__":
    layers, padding, stride, linear = 2, 1, 2, True
    key = jax.random.PRNGKey(0)

    # Deterministic parameters (same shapes as the torch module).
    channel, length = 1, 28
    convs = []
    for _ in range(layers):
        key, kw, kb = jax.random.split(key, 3)
        w = jax.random.normal(kw, (3, channel, 4, 4), jnp.float32) * 0.1
        b = jax.random.normal(kb, (3,), jnp.float32) * 0.1
        convs.append((w, b))
        channel = 3
        length = (length + 2 * padding - 4) // stride + 1
        assert length > 0

    linears = []
    if linear:
        key, k1, k2, k3, k4 = jax.random.split(key, 5)
        w1 = jax.random.normal(k1, (256, 3 * length * length), jnp.float32) * 0.05
        b1 = jax.random.normal(k2, (256,), jnp.float32) * 0.05
        w2 = jax.random.normal(k3, (10, 256), jnp.float32) * 0.05
        b2 = jax.random.normal(k4, (10,), jnp.float32) * 0.05
        linears = [(w1, b1), (w2, b2)]

    key, kx = jax.random.split(key)
    x = jax.random.normal(kx, (2, 1, 28, 28), jnp.float32)  # NCHW input

    params = prepare_params(convs, linears)
    out = jax.block_until_ready(cnn_forward(x, params))
    assert out.shape == (2, 10), out.shape

    ref = jax.block_until_ready(reference_forward(x, convs, linears))
    assert bool(jnp.allclose(out, ref, rtol=5e-3, atol=5e-3)), \
        float(jnp.max(jnp.abs(out - ref)))

    print("KERNEL_OK")
</pallas_src>

<mosaic_0001>
module attributes {stable_mosaic.version = 11 : i64} {
  func.func @_fused_cnn_kernel(%arg0: memref<16x2x8x8xf32, #tpu.memory_space<vmem>>, %arg1: memref<48xf32, #tpu.memory_space<smem>>, %arg2: memref<3xf32, #tpu.memory_space<smem>>, %arg3: memref<144xf32, #tpu.memory_space<smem>>, %arg4: memref<3xf32, #tpu.memory_space<smem>>, %arg5: memref<21x7x256xf32, #tpu.memory_space<vmem>>, %arg6: memref<1x256xf32, #tpu.memory_space<vmem>>, %arg7: memref<256x10xf32, #tpu.memory_space<vmem>>, %arg8: memref<1x10xf32, #tpu.memory_space<vmem>>, %arg9: memref<2x10xf32, #tpu.memory_space<vmem>>, %arg10: memref<4x3x2x8x8xf32, #tpu.memory_space<vmem>>) attributes {dimension_semantics = [], scalar_prefetch = 0 : i64, scratch_operands = 1 : i64, tpu.core_type = #tpu.core_type<tc>} {
    %cst = arith.constant 0.000000e+00 : f32
    %0 = vector.broadcast %cst : f32 to vector<4x3x2x8x8xf32>
    %c0 = arith.constant 0 : index
    %c0_0 = arith.constant 0 : index
    %c0_1 = arith.constant 0 : index
    %c0_2 = arith.constant 0 : index
    %c0_3 = arith.constant 0 : index
    %1 = vector.load %arg10[%c0, %c0_0, %c0_1, %c0_2, %c0_3] : memref<4x3x2x8x8xf32, #tpu.memory_space<vmem>>, vector<4x3x2x8x8xf32>
    tpu.vector_store %arg10[%c0, %c0_0, %c0_1, %c0_2, %c0_3], %0 {strides = array<i32>} : memref<4x3x2x8x8xf32, #tpu.memory_space<vmem>>, vector<4x3x2x8x8xf32>,
    %cst_4 = arith.constant 0.000000e+00 : f32
    %2 = vector.broadcast %cst_4 : f32 to vector<2x7x7xf32>
    %cst_5 = arith.constant 0.000000e+00 : f32
    %3 = vector.broadcast %cst_5 : f32 to vector<2x7x7xf32>
    %cst_6 = arith.constant 0.000000e+00 : f32
    %4 = vector.broadcast %cst_6 : f32 to vector<2x7x7xf32>
    %c0_7 = arith.constant 0 : index
    %c0_8 = arith.constant 0 : index
    %c0_9 = arith.constant 0 : index
    %c0_10 = arith.constant 0 : index
    %5 = vector.load %arg0[%c0_7, %c0_8, %c0_9, %c0_10] : memref<16x2x8x8xf32, #tpu.memory_space<vmem>>, vector<1x2x7x7xf32>
    %6 = vector.shape_cast %5 : vector<1x2x7x7xf32> to vector<2x7x7xf32>
    %c0_11 = arith.constant 0 : index
    %7 = memref.load %arg1[%c0_11] : memref<48xf32, #tpu.memory_space<smem>>
    %8 = vector.broadcast %7 : f32 to vector<2x7x7xf32>
    %9 = arith.mulf %8, %6 : vector<2x7x7xf32>
    %10 = arith.addf %2, %9 : vector<2x7x7xf32>
    %c16 = arith.constant 16 : index
    %11 = memref.load %arg1[%c16] : memref<48xf32, #tpu.memory_space<smem>>
    %12 = vector.broadcast %11 : f32 to vector<2x7x7xf32>
    %13 = arith.mulf %12, %6 : vector<2x7x7xf32>
    %14 = arith.addf %3, %13 : vector<2x7x7xf32>
    %c32 = arith.constant 32 : index
    %15 = memref.load %arg1[%c32] : memref<48xf32, #tpu.memory_space<smem>>
    %16 = vector.broadcast %15 : f32 to vector<2x7x7xf32>
    %17 = arith.mulf %16, %6 : vector<2x7x7xf32>
    %18 = arith.addf %4, %17 : vector<2x7x7xf32>
    %c1 = arith.constant 1 : index
    %c0_12 = arith.constant 0 : index
    %c0_13 = arith.constant 0 : index
    %c0_14 = arith.constant 0 : index
    %19 = vector.load %arg0[%c1, %c0_12, %c0_13, %c0_14] : memref<16x2x8x8xf32, #tpu.memory_space<vmem>>, vector<1x2x7x7xf32>
    %20 = vector.shape_cast %19 : vector<1x2x7x7xf32> to vector<2x7x7xf32>
    %c1_15 = arith.constant 1 : index
    %21 = memref.load %arg1[%c1_15] : memref<48xf32, #tpu.memory_space<smem>>
    %22 = vector.broadcast %21 : f32 to vector<2x7x7xf32>
    %23 = arith.mulf %22, %20 : vector<2x7x7xf32>
    %24 = arith.addf %10, %23 : vector<2x7x7xf32>
    %c17 = arith.constant 17 : index
    %25 = memref.load %arg1[%c17] : memref<48xf32, #tpu.memory_space<smem>>
    %26 = vector.broadcast %25 : f32 to vector<2x7x7xf32>
    %27 = arith.mulf %26, %20 : vector<2x7x7xf32>
    %28 = arith.addf %14, %27 : vector<2x7x7xf32>
    %c33 = arith.constant 33 : index
    %29 = memref.load %arg1[%c33] : memref<48xf32, #tpu.memory_space<smem>>
    %30 = vector.broadcast %29 : f32 to vector<2x7x7xf32>
    %31 = arith.mulf %30, %20 : vector<2x7x7xf32>
    %32 = arith.addf %18, %31 : vector<2x7x7xf32>
    %c2 = arith.constant 2 : index
    %c0_16 = arith.constant 0 : index
    %c0_17 = arith.constant 0 : index
    %c0_18 = arith.constant 0 : index
    %33 = vector.load %arg0[%c2, %c0_16, %c0_17, %c0_18] : memref<16x2x8x8xf32, #tpu.memory_space<vmem>>, vector<1x2x7x7xf32>
    %34 = vector.shape_cast %33 : vector<1x2x7x7xf32> to vector<2x7x7xf32>
    %c2_19 = arith.constant 2 : index
    %35 = memref.load %arg1[%c2_19] : memref<48xf32, #tpu.memory_space<smem>>
    %36 = vector.broadcast %35 : f32 to vector<2x7x7xf32>
    %37 = arith.mulf %36, %34 : vector<2x7x7xf32>
    %38 = arith.addf %24, %37 : vector<2x7x7xf32>
    %c18 = arith.constant 18 : index
    %39 = memref.load %arg1[%c18] : memref<48xf32, #tpu.memory_space<smem>>
    %40 = vector.broadcast %39 : f32 to vector<2x7x7xf32>
    %41 = arith.mulf %40, %34 : vector<2x7x7xf32>
    %42 = arith.addf %28, %41 : vector<2x7x7xf32>
    %c34 = arith.constant 34 : index
    %43 = memref.load %arg1[%c34] : memref<48xf32, #tpu.memory_space<smem>>
    %44 = vector.broadcast %43 : f32 to vector<2x7x7xf32>
    %45 = arith.mulf %44, %34 : vector<2x7x7xf32>
    %46 = arith.addf %32, %45 : vector<2x7x7xf32>
    %c3 = arith.constant 3 : index
    %c0_20 = arith.constant 0 : index
    %c0_21 = arith.constant 0 : index
    %c0_22 = arith.constant 0 : index
    %47 = vector.load %arg0[%c3, %c0_20, %c0_21, %c0_22] : memref<16x2x8x8xf32, #tpu.memory_space<vmem>>, vector<1x2x7x7xf32>
    %48 = vector.shape_cast %47 : vector<1x2x7x7xf32> to vector<2x7x7xf32>
    %c3_23 = arith.constant 3 : index
    %49 = memref.load %arg1[%c3_23] : memref<48xf32, #tpu.memory_space<smem>>
    %50 = vector.broadcast %49 : f32 to vector<2x7x7xf32>
    %51 = arith.mulf %50, %48 : vector<2x7x7xf32>
    %52 = arith.addf %38, %51 : vector<2x7x7xf32>
    %c19 = arith.constant 19 : index
    %53 = memref.load %arg1[%c19] : memref<48xf32, #tpu.memory_space<smem>>
    %54 = vector.broadcast %53 : f32 to vector<2x7x7xf32>
    %55 = arith.mulf %54, %48 : vector<2x7x7xf32>
    %56 = arith.addf %42, %55 : vector<2x7x7xf32>
    %c35 = arith.constant 35 : index
    %57 = memref.load %arg1[%c35] : memref<48xf32, #tpu.memory_space<smem>>
    %58 = vector.broadcast %57 : f32 to vector<2x7x7xf32>
    %59 = arith.mulf %58, %48 : vector<2x7x7xf32>
    %60 = arith.addf %46, %59 : vector<2x7x7xf32>
    %c4 = arith.constant 4 : index
    %c0_24 = arith.constant 0 : index
    %c0_25 = arith.constant 0 : index
    %c0_26 = arith.constant 0 : index
    %61 = vector.load %arg0[%c4, %c0_24, %c0_25, %c0_26] : memref<16x2x8x8xf32, #tpu.memory_space<vmem>>, vector<1x2x7x7xf32>
    %62 = vector.shape_cast %61 : vector<1x2x7x7xf32> to vector<2x7x7xf32>
    %c4_27 = arith.constant 4 : index
    %63 = memref.load %arg1[%c4_27] : memref<48xf32, #tpu.memory_space<smem>>
    %64 = vector.broadcast %63 : f32 to vector<2x7x7xf32>
    %65 = arith.mulf %64, %62 : vector<2x7x7xf32>
    %66 = arith.addf %52, %65 : vector<2x7x7xf32>
    %c20 = arith.constant 20 : index
    %67 = memref.load %arg1[%c20] : memref<48xf32, #tpu.memory_space<smem>>
    %68 = vector.broadcast %67 : f32 to vector<2x7x7xf32>
    %69 = arith.mulf %68, %62 : vector<2x7x7xf32>
    %70 = arith.addf %56, %69 : vector<2x7x7xf32>
    %c36 = arith.constant 36 : index
    %71 = memref.load %arg1[%c36] : memref<48xf32, #tpu.memory_space<smem>>
    %72 = vector.broadcast %71 : f32 to vector<2x7x7xf32>
    %73 = arith.mulf %72, %62 : vector<2x7x7xf32>
    %74 = arith.addf %60, %73 : vector<2x7x7xf32>
    %c5 = arith.constant 5 : index
    %c0_28 = arith.constant 0 : index
    %c0_29 = arith.constant 0 : index
    %c0_30 = arith.constant 0 : index
    %75 = vector.load %arg0[%c5, %c0_28, %c0_29, %c0_30] : memref<16x2x8x8xf32, #tpu.memory_space<vmem>>, vector<1x2x7x7xf32>
    %76 = vector.shape_cast %75 : vector<1x2x7x7xf32> to vector<2x7x7xf32>
    %c5_31 = arith.constant 5 : index
    %77 = memref.load %arg1[%c5_31] : memref<48xf32, #tpu.memory_space<smem>>
    %78 = vector.broadcast %77 : f32 to vector<2x7x7xf32>
    %79 = arith.mulf %78, %76 : vector<2x7x7xf32>
    %80 = arith.addf %66, %79 : vector<2x7x7xf32>
    %c21 = arith.constant 21 : index
    %81 = memref.load %arg1[%c21] : memref<48xf32, #tpu.memory_space<smem>>
    %82 = vector.broadcast %81 : f32 to vector<2x7x7xf32>
    %83 = arith.mulf %82, %76 : vector<2x7x7xf32>
    %84 = arith.addf %70, %83 : vector<2x7x7xf32>
    %c37 = arith.constant 37 : index
    %85 = memref.load %arg1[%c37] : memref<48xf32, #tpu.memory_space<smem>>
    %86 = vector.broadcast %85 : f32 to vector<2x7x7xf32>
    %87 = arith.mulf %86, %76 : vector<2x7x7xf32>
    %88 = arith.addf %74, %87 : vector<2x7x7xf32>
    %c6 = arith.constant 6 : index
    %c0_32 = arith.constant 0 : index
    %c0_33 = arith.constant 0 : index
    %c0_34 = arith.constant 0 : index
    %89 = vector.load %arg0[%c6, %c0_32, %c0_33, %c0_34] : memref<16x2x8x8xf32, #tpu.memory_space<vmem>>, vector<1x2x7x7xf32>
    %90 = vector.shape_cast %89 : vector<1x2x7x7xf32> to vector<2x7x7xf32>
    %c6_35 = arith.constant 6 : index
    %91 = memref.load %arg1[%c6_35] : memref<48xf32, #tpu.memory_space<smem>>
    %92 = vector.broadcast %91 : f32 to vector<2x7x7xf32>
    %93 = arith.mulf %92, %90 : vector<2x7x7xf32>
    %94 = arith.addf %80, %93 : vector<2x7x7xf32>
    %c22 = arith.constant 22 : index
    %95 = memref.load %arg1[%c22] : memref<48xf32, #tpu.memory_space<smem>>
    %96 = vector.broadcast %95 : f32 to vector<2x7x7xf32>
    %97 = arith.mulf %96, %90 : vector<2x7x7xf32>
    %98 = arith.addf %84, %97 : vector<2x7x7xf32>
    %c38 = arith.constant 38 : index
    %99 = memref.load %arg1[%c38] : memref<48xf32, #tpu.memory_space<smem>>
    %100 = vector.broadcast %99 : f32 to vector<2x7x7xf32>
    %101 = arith.mulf %100, %90 : vector<2x7x7xf32>
    %102 = arith.addf %88, %101 : vector<2x7x7xf32>
    %c7 = arith.constant 7 : index
    %c0_36 = arith.constant 0 : index
    %c0_37 = arith.constant 0 : index
    %c0_38 = arith.constant 0 : index
    %103 = vector.load %arg0[%c7, %c0_36, %c0_37, %c0_38] : memref<16x2x8x8xf32, #tpu.memory_space<vmem>>, vector<1x2x7x7xf32>
    %104 = vector.shape_cast %103 : vector<1x2x7x7xf32> to vector<2x7x7xf32>
    %c7_39 = arith.constant 7 : index
    %105 = memref.load %arg1[%c7_39] : memref<48xf32, #tpu.memory_space<smem>>
    %106 = vector.broadcast %105 : f32 to vector<2x7x7xf32>
    %107 = arith.mulf %106, %104 : vector<2x7x7xf32>
    %108 = arith.addf %94, %107 : vector<2x7x7xf32>
    %c23 = arith.constant 23 : index
    %109 = memref.load %arg1[%c23] : memref<48xf32, #tpu.memory_space<smem>>
    %110 = vector.broadcast %109 : f32 to vector<2x7x7xf32>
    %111 = arith.mulf %110, %104 : vector<2x7x7xf32>
    %112 = arith.addf %98, %111 : vector<2x7x7xf32>
    %c39 = arith.constant 39 : index
    %113 = memref.load %arg1[%c39] : memref<48xf32, #tpu.memory_space<smem>>
    %114 = vector.broadcast %113 : f32 to vector<2x7x7xf32>
    %115 = arith.mulf %114, %104 : vector<2x7x7xf32>
    %116 = arith.addf %102, %115 : vector<2x7x7xf32>
    %c8 = arith.constant 8 : index
    %c0_40 = arith.constant 0 : index
    %c0_41 = arith.constant 0 : index
    %c0_42 = arith.constant 0 : index
    %117 = vector.load %arg0[%c8, %c0_40, %c0_41, %c0_42] : memref<16x2x8x8xf32, #tpu.memory_space<vmem>>, vector<1x2x7x7xf32>
    %118 = vector.shape_cast %117 : vector<1x2x7x7xf32> to vector<2x7x7xf32>
    %c8_43 = arith.constant 8 : index
    %119 = memref.load %arg1[%c8_43] : memref<48xf32, #tpu.memory_space<smem>>
    %120 = vector.broadcast %119 : f32 to vector<2x7x7xf32>
    %121 = arith.mulf %120, %118 : vector<2x7x7xf32>
    %122 = arith.addf %108, %121 : vector<2x7x7xf32>
    %c24 = arith.constant 24 : index
    %123 = memref.load %arg1[%c24] : memref<48xf32, #tpu.memory_space<smem>>
    %124 = vector.broadcast %123 : f32 to vector<2x7x7xf32>
    %125 = arith.mulf %124, %118 : vector<2x7x7xf32>
    %126 = arith.addf %112, %125 : vector<2x7x7xf32>
    %c40 = arith.constant 40 : index
    %127 = memref.load %arg1[%c40] : memref<48xf32, #tpu.memory_space<smem>>
    %128 = vector.broadcast %127 : f32 to vector<2x7x7xf32>
    %129 = arith.mulf %128, %118 : vector<2x7x7xf32>
    %130 = arith.addf %116, %129 : vector<2x7x7xf32>
    %c9 = arith.constant 9 : index
    %c0_44 = arith.constant 0 : index
    %c0_45 = arith.constant 0 : index
    %c0_46 = arith.constant 0 : index
    %131 = vector.load %arg0[%c9, %c0_44, %c0_45, %c0_46] : memref<16x2x8x8xf32, #tpu.memory_space<vmem>>, vector<1x2x7x7xf32>
    %132 = vector.shape_cast %131 : vector<1x2x7x7xf32> to vector<2x7x7xf32>
    %c9_47 = arith.constant 9 : index
    %133 = memref.load %arg1[%c9_47] : memref<48xf32, #tpu.memory_space<smem>>
    %134 = vector.broadcast %133 : f32 to vector<2x7x7xf32>
    %135 = arith.mulf %134, %132 : vector<2x7x7xf32>
    %136 = arith.addf %122, %135 : vector<2x7x7xf32>
    %c25 = arith.constant 25 : index
    %137 = memref.load %arg1[%c25] : memref<48xf32, #tpu.memory_space<smem>>
    %138 = vector.broadcast %137 : f32 to vector<2x7x7xf32>
    %139 = arith.mulf %138, %132 : vector<2x7x7xf32>
    %140 = arith.addf %126, %139 : vector<2x7x7xf32>
    %c41 = arith.constant 41 : index
    %141 = memref.load %arg1[%c41] : memref<48xf32, #tpu.memory_space<smem>>
    %142 = vector.broadcast %141 : f32 to vector<2x7x7xf32>
    %143 = arith.mulf %142, %132 : vector<2x7x7xf32>
    %144 = arith.addf %130, %143 : vector<2x7x7xf32>
    %c10 = arith.constant 10 : index
    %c0_48 = arith.constant 0 : index
    %c0_49 = arith.constant 0 : index
    %c0_50 = arith.constant 0 : index
    %145 = vector.load %arg0[%c10, %c0_48, %c0_49, %c0_50] : memref<16x2x8x8xf32, #tpu.memory_space<vmem>>, vector<1x2x7x7xf32>
    %146 = vector.shape_cast %145 : vector<1x2x7x7xf32> to vector<2x7x7xf32>
    %c10_51 = arith.constant 10 : index
    %147 = memref.load %arg1[%c10_51] : memref<48xf32, #tpu.memory_space<smem>>
    %148 = vector.broadcast %147 : f32 to vector<2x7x7xf32>
    %149 = arith.mulf %148, %146 : vector<2x7x7xf32>
    %150 = arith.addf %136, %149 : vector<2x7x7xf32>
    %c26 = arith.constant 26 : index
    %151 = memref.load %arg1[%c26] : memref<48xf32, #tpu.memory_space<smem>>
    %152 = vector.broadcast %151 : f32 to vector<2x7x7xf32>
    %153 = arith.mulf %152, %146 : vector<2x7x7xf32>
    %154 = arith.addf %140, %153 : vector<2x7x7xf32>
    %c42 = arith.constant 42 : index
    %155 = memref.load %arg1[%c42] : memref<48xf32, #tpu.memory_space<smem>>
    %156 = vector.broadcast %155 : f32 to vector<2x7x7xf32>
    %157 = arith.mulf %156, %146 : vector<2x7x7xf32>
    %158 = arith.addf %144, %157 : vector<2x7x7xf32>
    %c11 = arith.constant 11 : index
    %c0_52 = arith.constant 0 : index
    %c0_53 = arith.constant 0 : index
    %c0_54 = arith.constant 0 : index
    %159 = vector.load %arg0[%c11, %c0_52, %c0_53, %c0_54] : memref<16x2x8x8xf32, #tpu.memory_space<vmem>>, vector<1x2x7x7xf32>
    %160 = vector.shape_cast %159 : vector<1x2x7x7xf32> to vector<2x7x7xf32>
    %c11_55 = arith.constant 11 : index
    %161 = memref.load %arg1[%c11_55] : memref<48xf32, #tpu.memory_space<smem>>
    %162 = vector.broadcast %161 : f32 to vector<2x7x7xf32>
    %163 = arith.mulf %162, %160 : vector<2x7x7xf32>
    %164 = arith.addf %150, %163 : vector<2x7x7xf32>
    %c27 = arith.constant 27 : index
    %165 = memref.load %arg1[%c27] : memref<48xf32, #tpu.memory_space<smem>>
    %166 = vector.broadcast %165 : f32 to vector<2x7x7xf32>
    %167 = arith.mulf %166, %160 : vector<2x7x7xf32>
    %168 = arith.addf %154, %167 : vector<2x7x7xf32>
    %c43 = arith.constant 43 : index
    %169 = memref.load %arg1[%c43] : memref<48xf32, #tpu.memory_space<smem>>
    %170 = vector.broadcast %169 : f32 to vector<2x7x7xf32>
    %171 = arith.mulf %170, %160 : vector<2x7x7xf32>
    %172 = arith.addf %158, %171 : vector<2x7x7xf32>
    %c12 = arith.constant 12 : index
    %c0_56 = arith.constant 0 : index
    %c0_57 = arith.constant 0 : index
    %c0_58 = arith.constant 0 : index
    %173 = vector.load %arg0[%c12, %c0_56, %c0_57, %c0_58] : memref<16x2x8x8xf32, #tpu.memory_space<vmem>>, vector<1x2x7x7xf32>
    %174 = vector.shape_cast %173 : vector<1x2x7x7xf32> to vector<2x7x7xf32>
    %c12_59 = arith.constant 12 : index
    %175 = memref.load %arg1[%c12_59] : memref<48xf32, #tpu.memory_space<smem>>
    %176 = vector.broadcast %175 : f32 to vector<2x7x7xf32>
    %177 = arith.mulf %176, %174 : vector<2x7x7xf32>
    %178 = arith.addf %164, %177 : vector<2x7x7xf32>
    %c28 = arith.constant 28 : index
    %179 = memref.load %arg1[%c28] : memref<48xf32, #tpu.memory_space<smem>>
    %180 = vector.broadcast %179 : f32 to vector<2x7x7xf32>
    %181 = arith.mulf %180, %174 : vector<2x7x7xf32>
    %182 = arith.addf %168, %181 : vector<2x7x7xf32>
    %c44 = arith.constant 44 : index
    %183 = memref.load %arg1[%c44] : memref<48xf32, #tpu.memory_space<smem>>
    %184 = vector.broadcast %183 : f32 to vector<2x7x7xf32>
    %185 = arith.mulf %184, %174 : vector<2x7x7xf32>
    %186 = arith.addf %172, %185 : vector<2x7x7xf32>
    %c13 = arith.constant 13 : index
    %c0_60 = arith.constant 0 : index
    %c0_61 = arith.constant 0 : index
    %c0_62 = arith.constant 0 : index
    %187 = vector.load %arg0[%c13, %c0_60, %c0_61, %c0_62] : memref<16x2x8x8xf32, #tpu.memory_space<vmem>>, vector<1x2x7x7xf32>
    %188 = vector.shape_cast %187 : vector<1x2x7x7xf32> to vector<2x7x7xf32>
    %c13_63 = arith.constant 13 : index
    %189 = memref.load %arg1[%c13_63] : memref<48xf32, #tpu.memory_space<smem>>
    %190 = vector.broadcast %189 : f32 to vector<2x7x7xf32>
    %191 = arith.mulf %190, %188 : vector<2x7x7xf32>
    %192 = arith.addf %178, %191 : vector<2x7x7xf32>
    %c29 = arith.constant 29 : index
    %193 = memref.load %arg1[%c29] : memref<48xf32, #tpu.memory_space<smem>>
    %194 = vector.broadcast %193 : f32 to vector<2x7x7xf32>
    %195 = arith.mulf %194, %188 : vector<2x7x7xf32>
    %196 = arith.addf %182, %195 : vector<2x7x7xf32>
    %c45 = arith.constant 45 : index
    %197 = memref.load %arg1[%c45] : memref<48xf32, #tpu.memory_space<smem>>
    %198 = vector.broadcast %197 : f32 to vector<2x7x7xf32>
    %199 = arith.mulf %198, %188 : vector<2x7x7xf32>
    %200 = arith.addf %186, %199 : vector<2x7x7xf32>
    %c14 = arith.constant 14 : index
    %c0_64 = arith.constant 0 : index
    %c0_65 = arith.constant 0 : index
    %c0_66 = arith.constant 0 : index
    %201 = vector.load %arg0[%c14, %c0_64, %c0_65, %c0_66] : memref<16x2x8x8xf32, #tpu.memory_space<vmem>>, vector<1x2x7x7xf32>
    %202 = vector.shape_cast %201 : vector<1x2x7x7xf32> to vector<2x7x7xf32>
    %c14_67 = arith.constant 14 : index
    %203 = memref.load %arg1[%c14_67] : memref<48xf32, #tpu.memory_space<smem>>
    %204 = vector.broadcast %203 : f32 to vector<2x7x7xf32>
    %205 = arith.mulf %204, %202 : vector<2x7x7xf32>
    %206 = arith.addf %192, %205 : vector<2x7x7xf32>
    %c30 = arith.constant 30 : index
    %207 = memref.load %arg1[%c30] : memref<48xf32, #tpu.memory_space<smem>>
    %208 = vector.broadcast %207 : f32 to vector<2x7x7xf32>
    %209 = arith.mulf %208, %202 : vector<2x7x7xf32>
    %210 = arith.addf %196, %209 : vector<2x7x7xf32>
    %c46 = arith.constant 46 : index
    %211 = memref.load %arg1[%c46] : memref<48xf32, #tpu.memory_space<smem>>
    %212 = vector.broadcast %211 : f32 to vector<2x7x7xf32>
    %213 = arith.mulf %212, %202 : vector<2x7x7xf32>
    %214 = arith.addf %200, %213 : vector<2x7x7xf32>
    %c15 = arith.constant 15 : index
    %c0_68 = arith.constant 0 : index
    %c0_69 = arith.constant 0 : index
    %c0_70 = arith.constant 0 : index
    %215 = vector.load %arg0[%c15, %c0_68, %c0_69, %c0_70] : memref<16x2x8x8xf32, #tpu.memory_space<vmem>>, vector<1x2x7x7xf32>
    %216 = vector.shape_cast %215 : vector<1x2x7x7xf32> to vector<2x7x7xf32>
    %c15_71 = arith.constant 15 : index
    %217 = memref.load %arg1[%c15_71] : memref<48xf32, #tpu.memory_space<smem>>
    %218 = vector.broadcast %217 : f32 to vector<2x7x7xf32>
    %219 = arith.mulf %218, %216 : vector<2x7x7xf32>
    %220 = arith.addf %206, %219 : vector<2x7x7xf32>
    %c31 = arith.constant 31 : index
    %221 = memref.load %arg1[%c31] : memref<48xf32, #tpu.memory_space<smem>>
    %222 = vector.broadcast %221 : f32 to vector<2x7x7xf32>
    %223 = arith.mulf %222, %216 : vector<2x7x7xf32>
    %224 = arith.addf %210, %223 : vector<2x7x7xf32>
    %c47 = arith.constant 47 : index
    %225 = memref.load %arg1[%c47] : memref<48xf32, #tpu.memory_space<smem>>
    %226 = vector.broadcast %225 : f32 to vector<2x7x7xf32>
    %227 = arith.mulf %226, %216 : vector<2x7x7xf32>
    %228 = arith.addf %214, %227 : vector<2x7x7xf32>
    %c0_72 = arith.constant 0 : index
    %229 = memref.load %arg2[%c0_72] : memref<3xf32, #tpu.memory_space<smem>>
    %230 = vector.broadcast %229 : f32 to vector<2x7x7xf32>
    %231 = arith.addf %220, %230 : vector<2x7x7xf32>
    %cst_73 = arith.constant 0.000000e+00 : f32
    %232 = vector.broadcast %cst_73 : f32 to vector<2x7x7xf32>
    %233 = arith.maximumf %231, %232 : vector<2x7x7xf32>
    %c3_74 = arith.constant 3 : index
    %c0_75 = arith.constant 0 : index
    %c0_76 = arith.constant 0 : index
    %c0_77 = arith.constant 0 : index
    %c0_78 = arith.constant 0 : index
    %234 = vector.load %arg10[%c3_74, %c0_75, %c0_76, %c0_77, %c0_78] : memref<4x3x2x8x8xf32, #tpu.memory_space<vmem>>, vector<1x1x2x7x7xf32>
    %235 = vector.shape_cast %234 : vector<1x1x2x7x7xf32> to vector<2x7x7xf32>
    %236 = vector.shape_cast %233 : vector<2x7x7xf32> to vector<1x1x2x7x7xf32>
    tpu.vector_store %arg10[%c3_74, %c0_75, %c0_76, %c0_77, %c0_78], %236 {strides = array<i32>} : memref<4x3x2x8x8xf32, #tpu.memory_space<vmem>>, vector<1x1x2x7x7xf32>,
    %c1_79 = arith.constant 1 : index
    %237 = memref.load %arg2[%c1_79] : memref<3xf32, #tpu.memory_space<smem>>
    %238 = vector.broadcast %237 : f32 to vector<2x7x7xf32>
    %239 = arith.addf %224, %238 : vector<2x7x7xf32>
    %cst_80 = arith.constant 0.000000e+00 : f32
    %240 = vector.broadcast %cst_80 : f32 to vector<2x7x7xf32>
    %241 = arith.maximumf %239, %240 : vector<2x7x7xf32>
    %c3_81 = arith.constant 3 : index
    %c1_82 = arith.constant 1 : index
    %c0_83 = arith.constant 0 : index
    %c0_84 = arith.constant 0 : index
    %c0_85 = arith.constant 0 : index
    %242 = vector.load %arg10[%c3_81, %c1_82, %c0_83, %c0_84, %c0_85] : memref<4x3x2x8x8xf32, #tpu.memory_space<vmem>>, vector<1x1x2x7x7xf32>
    %243 = vector.shape_cast %242 : vector<1x1x2x7x7xf32> to vector<2x7x7xf32>
    %244 = vector.shape_cast %241 : vector<2x7x7xf32> to vector<1x1x2x7x7xf32>
    tpu.vector_store %arg10[%c3_81, %c1_82, %c0_83, %c0_84, %c0_85], %244 {strides = array<i32>} : memref<4x3x2x8x8xf32, #tpu.memory_space<vmem>>, vector<1x1x2x7x7xf32>,
    %c2_86 = arith.constant 2 : index
    %245 = memref.load %arg2[%c2_86] : memref<3xf32, #tpu.memory_space<smem>>
    %246 = vector.broadcast %245 : f32 to vector<2x7x7xf32>
    %247 = arith.addf %228, %246 : vector<2x7x7xf32>
    %cst_87 = arith.constant 0.000000e+00 : f32
    %248 = vector.broadcast %cst_87 : f32 to vector<2x7x7xf32>
    %249 = arith.maximumf %247, %248 : vector<2x7x7xf32>
    %c3_88 = arith.constant 3 : index
    %c2_89 = arith.constant 2 : index
    %c0_90 = arith.constant 0 : index
    %c0_91 = arith.constant 0 : index
    %c0_92 = arith.constant 0 : index
    %250 = vector.load %arg10[%c3_88, %c2_89, %c0_90, %c0_91, %c0_92] : memref<4x3x2x8x8xf32, #tpu.memory_space<vmem>>, vector<1x1x2x7x7xf32>
    %251 = vector.shape_cast %250 : vector<1x1x2x7x7xf32> to vector<2x7x7xf32>
    %252 = vector.shape_cast %249 : vector<2x7x7xf32> to vector<1x1x2x7x7xf32>
    tpu.vector_store %arg10[%c3_88, %c2_89, %c0_90, %c0_91, %c0_92], %252 {strides = array<i32>} : memref<4x3x2x8x8xf32, #tpu.memory_space<vmem>>, vector<1x1x2x7x7xf32>,
    %cst_93 = arith.constant 0.000000e+00 : f32
    %253 = vector.broadcast %cst_93 : f32 to vector<2x7x7xf32>
    %cst_94 = arith.constant 0.000000e+00 : f32
    %254 = vector.broadcast %cst_94 : f32 to vector<2x7x7xf32>
    %cst_95 = arith.constant 0.000000e+00 : f32
    %255 = vector.broadcast %cst_95 : f32 to vector<2x7x7xf32>
    %c2_96 = arith.constant 2 : index
    %c0_97 = arith.constant 0 : index
    %c0_98 = arith.constant 0 : index
    %c0_99 = arith.constant 0 : index
    %256 = vector.load %arg0[%c2_96, %c0_97, %c0_98, %c0_99] : memref<16x2x8x8xf32, #tpu.memory_space<vmem>>, vector<1x2x7x7xf32>
    %257 = vector.shape_cast %256 : vector<1x2x7x7xf32> to vector<2x7x7xf32>
    %c0_100 = arith.constant 0 : index
    %258 = memref.load %arg1[%c0_100] : memref<48xf32, #tpu.memory_space<smem>>
    %259 = vector.broadcast %258 : f32 to vector<2x7x7xf32>
    %260 = arith.mulf %259, %257 : vector<2x7x7xf32>
    %261 = arith.addf %253, %260 : vector<2x7x7xf32>
    %c16_101 = arith.constant 16 : index
    %262 = memref.load %arg1[%c16_101] : memref<48xf32, #tpu.memory_space<smem>>
    %263 = vector.broadcast %262 : f32 to vector<2x7x7xf32>
    %264 = arith.mulf %263, %257 : vector<2x7x7xf32>
    %265 = arith.addf %254, %264 : vector<2x7x7xf32>
    %c32_102 = arith.constant 32 : index
    %266 = memref.load %arg1[%c32_102] : memref<48xf32, #tpu.memory_space<smem>>
    %267 = vector.broadcast %266 : f32 to vector<2x7x7xf32>
    %268 = arith.mulf %267, %257 : vector<2x7x7xf32>
    %269 = arith.addf %255, %268 : vector<2x7x7xf32>
    %c3_103 = arith.constant 3 : index
    %c0_104 = arith.constant 0 : index
    %c0_105 = arith.constant 0 : index
    %c0_106 = arith.constant 0 : index
    %270 = vector.load %arg0[%c3_103, %c0_104, %c0_105, %c0_106] : memref<16x2x8x8xf32, #tpu.memory_space<vmem>>, vector<1x2x7x7xf32>
    %271 = vector.shape_cast %270 : vector<1x2x7x7xf32> to vector<2x7x7xf32>
    %c1_107 = arith.constant 1 : index
    %272 = memref.load %arg1[%c1_107] : memref<48xf32, #tpu.memory_space<smem>>
    %273 = vector.broadcast %272 : f32 to vector<2x7x7xf32>
    %274 = arith.mulf %273, %271 : vector<2x7x7xf32>
    %275 = arith.addf %261, %274 : vector<2x7x7xf32>
    %c17_108 = arith.constant 17 : index
    %276 = memref.load %arg1[%c17_108] : memref<48xf32, #tpu.memory_space<smem>>
    %277 = vector.broadcast %276 : f32 to vector<2x7x7xf32>
    %278 = arith.mulf %277, %271 : vector<2x7x7xf32>
    %279 = arith.addf %265, %278 : vector<2x7x7xf32>
    %c33_109 = arith.constant 33 : index
    %280 = memref.load %arg1[%c33_109] : memref<48xf32, #tpu.memory_space<smem>>
    %281 = vector.broadcast %280 : f32 to vector<2x7x7xf32>
    %282 = arith.mulf %281, %271 : vector<2x7x7xf32>
    %283 = arith.addf %269, %282 : vector<2x7x7xf32>
    %c0_110 = arith.constant 0 : index
    %c0_111 = arith.constant 0 : index
    %c0_112 = arith.constant 0 : index
    %c1_113 = arith.constant 1 : index
    %284 = vector.load %arg0[%c0_110, %c0_111, %c0_112, %c1_113] : memref<16x2x8x8xf32, #tpu.memory_space<vmem>>, vector<1x2x7x7xf32>
    %285 = vector.shape_cast %284 : vector<1x2x7x7xf32> to vector<2x7x7xf32>
    %c2_114 = arith.constant 2 : index
    %286 = memref.load %arg1[%c2_114] : memref<48xf32, #tpu.memory_space<smem>>
    %287 = vector.broadcast %286 : f32 to vector<2x7x7xf32>
    %288 = arith.mulf %287, %285 : vector<2x7x7xf32>
    %289 = arith.addf %275, %288 : vector<2x7x7xf32>
    %c18_115 = arith.constant 18 : index
    %290 = memref.load %arg1[%c18_115] : memref<48xf32, #tpu.memory_space<smem>>
    %291 = vector.broadcast %290 : f32 to vector<2x7x7xf32>
    %292 = arith.mulf %291, %285 : vector<2x7x7xf32>
    %293 = arith.addf %279, %292 : vector<2x7x7xf32>
    %c34_116 = arith.constant 34 : index
    %294 = memref.load %arg1[%c34_116] : memref<48xf32, #tpu.memory_space<smem>>
    %295 = vector.broadcast %294 : f32 to vector<2x7x7xf32>
    %296 = arith.mulf %295, %285 : vector<2x7x7xf32>
    %297 = arith.addf %283, %296 : vector<2x7x7xf32>
    %c1_117 = arith.constant 1 : index
    %c0_118 = arith.constant 0 : index
    %c0_119 = arith.constant 0 : index
    %c1_120 = arith.constant 1 : index
    %298 = vector.load %arg0[%c1_117, %c0_118, %c0_119, %c1_120] : memref<16x2x8x8xf32, #tpu.memory_space<vmem>>, vector<1x2x7x7xf32>
    %299 = vector.shape_cast %298 : vector<1x2x7x7xf32> to vector<2x7x7xf32>
    %c3_121 = arith.constant 3 : index
    %300 = memref.load %arg1[%c3_121] : memref<48xf32, #tpu.memory_space<smem>>
    %301 = vector.broadcast %300 : f32 to vector<2x7x7xf32>
    %302 = arith.mulf %301, %299 : vector<2x7x7xf32>
    %303 = arith.addf %289, %302 : vector<2x7x7xf32>
    %c19_122 = arith.constant 19 : index
    %304 = memref.load %arg1[%c19_122] : memref<48xf32, #tpu.memory_space<smem>>
    %305 = vector.broadcast %304 : f32 to vector<2x7x7xf32>
    %306 = arith.mulf %305, %299 : vector<2x7x7xf32>
    %307 = arith.addf %293, %306 : vector<2x7x7xf32>
    %c35_123 = arith.constant 35 : index
    %308 = memref.load %arg1[%c35_123] : memref<48xf32, #tpu.memory_space<smem>>
    %309 = vector.broadcast %308 : f32 to vector<2x7x7xf32>
    %310 = arith.mulf %309, %299 : vector<2x7x7xf32>
    %311 = arith.addf %297, %310 : vector<2x7x7xf32>
    %c6_124 = arith.constant 6 : index
    %c0_125 = arith.constant 0 : index
    %c0_126 = arith.constant 0 : index
    %c0_127 = arith.constant 0 : index
    %312 = vector.load %arg0[%c6_124, %c0_125, %c0_126, %c0_127] : memref<16x2x8x8xf32, #tpu.memory_space<vmem>>, vector<1x2x7x7xf32>
    %313 = vector.shape_cast %312 : vector<1x2x7x7xf32> to vector<2x7x7xf32>
    %c4_128 = arith.constant 4 : index
    %314 = memref.load %arg1[%c4_128] : memref<48xf32, #tpu.memory_space<smem>>
    %315 = vector.broadcast %314 : f32 to vector<2x7x7xf32>
    %316 = arith.mulf %315, %313 : vector<2x7x7xf32>
    %317 = arith.addf %303, %316 : vector<2x7x7xf32>
    %c20_129 = arith.constant 20 : index
    %318 = memref.load %arg1[%c20_129] : memref<48xf32, #tpu.memory_space<smem>>
    %319 = vector.broadcast %318 : f32 to vector<2x7x7xf32>
    %320 = arith.mulf %319, %313 : vector<2x7x7xf32>
    %321 = arith.addf %307, %320 : vector<2x7x7xf32>
    %c36_130 = arith.constant 36 : index
    %322 = memref.load %arg1[%c36_130] : memref<48xf32, #tpu.memory_space<smem>>
    %323 = vector.broadcast %322 : f32 to vector<2x7x7xf32>
    %324 = arith.mulf %323, %313 : vector<2x7x7xf32>
    %325 = arith.addf %311, %324 : vector<2x7x7xf32>
    %c7_131 = arith.constant 7 : index
    %c0_132 = arith.constant 0 : index
    %c0_133 = arith.constant 0 : index
    %c0_134 = arith.constant 0 : index
    %326 = vector.load %arg0[%c7_131, %c0_132, %c0_133, %c0_134] : memref<16x2x8x8xf32, #tpu.memory_space<vmem>>, vector<1x2x7x7xf32>
    %327 = vector.shape_cast %326 : vector<1x2x7x7xf32> to vector<2x7x7xf32>
    %c5_135 = arith.constant 5 : index
    %328 = memref.load %arg1[%c5_135] : memref<48xf32, #tpu.memory_space<smem>>
    %329 = vector.broadcast %328 : f32 to vector<2x7x7xf32>
    %330 = arith.mulf %329, %327 : vector<2x7x7xf32>
    %331 = arith.addf %317, %330 : vector<2x7x7xf32>
    %c21_136 = arith.constant 21 : index
    %332 = memref.load %arg1[%c21_136] : memref<48xf32, #tpu.memory_space<smem>>
    %333 = vector.broadcast %332 : f32 to vector<2x7x7xf32>
    %334 = arith.mulf %333, %327 : vector<2x7x7xf32>
    %335 = arith.addf %321, %334 : vector<2x7x7xf32>
    %c37_137 = arith.constant 37 : index
    %336 = memref.load %arg1[%c37_137] : memref<48xf32, #tpu.memory_space<smem>>
    %337 = vector.broadcast %336 : f32 to vector<2x7x7xf32>
    %338 = arith.mulf %337, %327 : vector<2x7x7xf32>
    %339 = arith.addf %325, %338 : vector<2x7x7xf32>
    %c4_138 = arith.constant 4 : index
    %c0_139 = arith.constant 0 : index
    %c0_140 = arith.constant 0 : index
    %c1_141 = arith.constant 1 : index
    %340 = vector.load %arg0[%c4_138, %c0_139, %c0_140, %c1_141] : memref<16x2x8x8xf32, #tpu.memory_space<vmem>>, vector<1x2x7x7xf32>
    %341 = vector.shape_cast %340 : vector<1x2x7x7xf32> to vector<2x7x7xf32>
    %c6_142 = arith.constant 6 : index
    %342 = memref.load %arg1[%c6_142] : memref<48xf32, #tpu.memory_space<smem>>
    %343 = vector.broadcast %342 : f32 to vector<2x7x7xf32>
    %344 = arith.mulf %343, %341 : vector<2x7x7xf32>
    %345 = arith.addf %331, %344 : vector<2x7x7xf32>
    %c22_143 = arith.constant 22 : index
    %346 = memref.load %arg1[%c22_143] : memref<48xf32, #tpu.memory_space<smem>>
    %347 = vector.broadcast %346 : f32 to vector<2x7x7xf32>
    %348 = arith.mulf %347, %341 : vector<2x7x7xf32>
    %349 = arith.addf %335, %348 : vector<2x7x7xf32>
    %c38_144 = arith.constant 38 : index
    %350 = memref.load %arg1[%c38_144] : memref<48xf32, #tpu.memory_space<smem>>
    %351 = vector.broadcast %350 : f32 to vector<2x7x7xf32>
    %352 = arith.mulf %351, %341 : vector<2x7x7xf32>
    %353 = arith.addf %339, %352 : vector<2x7x7xf32>
    %c5_145 = arith.constant 5 : index
    %c0_146 = arith.constant 0 : index
    %c0_147 = arith.constant 0 : index
    %c1_148 = arith.constant 1 : index
    %354 = vector.load %arg0[%c5_145, %c0_146, %c0_147, %c1_148] : memref<16x2x8x8xf32, #tpu.memory_space<vmem>>, vector<1x2x7x7xf32>
    %355 = vector.shape_cast %354 : vector<1x2x7x7xf32> to vector<2x7x7xf32>
    %c7_149 = arith.constant 7 : index
    %356 = memref.load %arg1[%c7_149] : memref<48xf32, #tpu.memory_space<smem>>
    %357 = vector.broadcast %356 : f32 to vector<2x7x7xf32>
    %358 = arith.mulf %357, %355 : vector<2x7x7xf32>
    %359 = arith.addf %345, %358 : vector<2x7x7xf32>
    %c23_150 = arith.constant 23 : index
    %360 = memref.load %arg1[%c23_150] : memref<48xf32, #tpu.memory_space<smem>>
    %361 = vector.broadcast %360 : f32 to vector<2x7x7xf32>
    %362 = arith.mulf %361, %355 : vector<2x7x7xf32>
    %363 = arith.addf %349, %362 : vector<2x7x7xf32>
    %c39_151 = arith.constant 39 : index
    %364 = memref.load %arg1[%c39_151] : memref<48xf32, #tpu.memory_space<smem>>
    %365 = vector.broadcast %364 : f32 to vector<2x7x7xf32>
    %366 = arith.mulf %365, %355 : vector<2x7x7xf32>
    %367 = arith.addf %353, %366 : vector<2x7x7xf32>
    %c10_152 = arith.constant 10 : index
    %c0_153 = arith.constant 0 : index
    %c0_154 = arith.constant 0 : index
    %c0_155 = arith.constant 0 : index
    %368 = vector.load %arg0[%c10_152, %c0_153, %c0_154, %c0_155] : memref<16x2x8x8xf32, #tpu.memory_space<vmem>>, vector<1x2x7x7xf32>
    %369 = vector.shape_cast %368 : vector<1x2x7x7xf32> to vector<2x7x7xf32>
    %c8_156 = arith.constant 8 : index
    %370 = memref.load %arg1[%c8_156] : memref<48xf32, #tpu.memory_space<smem>>
    %371 = vector.broadcast %370 : f32 to vector<2x7x7xf32>
    %372 = arith.mulf %371, %369 : vector<2x7x7xf32>
    %373 = arith.addf %359, %372 : vector<2x7x7xf32>
    %c24_157 = arith.constant 24 : index
    %374 = memref.load %arg1[%c24_157] : memref<48xf32, #tpu.memory_space<smem>>
    %375 = vector.broadcast %374 : f32 to vector<2x7x7xf32>
    %376 = arith.mulf %375, %369 : vector<2x7x7xf32>
    %377 = arith.addf %363, %376 : vector<2x7x7xf32>
    %c40_158 = arith.constant 40 : index
    %378 = memref.load %arg1[%c40_158] : memref<48xf32, #tpu.memory_space<smem>>
    %379 = vector.broadcast %378 : f32 to vector<2x7x7xf32>
    %380 = arith.mulf %379, %369 : vector<2x7x7xf32>
    %381 = arith.addf %367, %380 : vector<2x7x7xf32>
    %c11_159 = arith.constant 11 : index
    %c0_160 = arith.constant 0 : index
    %c0_161 = arith.constant 0 : index
    %c0_162 = arith.constant 0 : index
    %382 = vector.load %arg0[%c11_159, %c0_160, %c0_161, %c0_162] : memref<16x2x8x8xf32, #tpu.memory_space<vmem>>, vector<1x2x7x7xf32>
    %383 = vector.shape_cast %382 : vector<1x2x7x7xf32> to vector<2x7x7xf32>
    %c9_163 = arith.constant 9 : index
    %384 = memref.load %arg1[%c9_163] : memref<48xf32, #tpu.memory_space<smem>>
    %385 = vector.broadcast %384 : f32 to vector<2x7x7xf32>
    %386 = arith.mulf %385, %383 : vector<2x7x7xf32>
    %387 = arith.addf %373, %386 : vector<2x7x7xf32>
    %c25_164 = arith.constant 25 : index
    %388 = memref.load %arg1[%c25_164] : memref<48xf32, #tpu.memory_space<smem>>
    %389 = vector.broadcast %388 : f32 to vector<2x7x7xf32>
    %390 = arith.mulf %389, %383 : vector<2x7x7xf32>
    %391 = arith.addf %377, %390 : vector<2x7x7xf32>
    %c41_165 = arith.constant 41 : index
    %392 = memref.load %arg1[%c41_165] : memref<48xf32, #tpu.memory_space<smem>>
    %393 = vector.broadcast %392 : f32 to vector<2x7x7xf32>
    %394 = arith.mulf %393, %383 : vector<2x7x7xf32>
    %395 = arith.addf %381, %394 : vector<2x7x7xf32>
    %c8_166 = arith.constant 8 : index
    %c0_167 = arith.constant 0 : index
    %c0_168 = arith.constant 0 : index
    %c1_169 = arith.constant 1 : index
    %396 = vector.load %arg0[%c8_166, %c0_167, %c0_168, %c1_169] : memref<16x2x8x8xf32, #tpu.memory_space<vmem>>, vector<1x2x7x7xf32>
    %397 = vector.shape_cast %396 : vector<1x2x7x7xf32> to vector<2x7x7xf32>
    %c10_170 = arith.constant 10 : index
    %398 = memref.load %arg1[%c10_170] : memref<48xf32, #tpu.memory_space<smem>>
    %399 = vector.broadcast %398 : f32 to vector<2x7x7xf32>
    %400 = arith.mulf %399, %397 : vector<2x7x7xf32>
    %401 = arith.addf %387, %400 : vector<2x7x7xf32>
    %c26_171 = arith.constant 26 : index
    %402 = memref.load %arg1[%c26_171] : memref<48xf32, #tpu.memory_space<smem>>
    %403 = vector.broadcast %402 : f32 to vector<2x7x7xf32>
    %404 = arith.mulf %403, %397 : vector<2x7x7xf32>
    %405 = arith.addf %391, %404 : vector<2x7x7xf32>
    %c42_172 = arith.constant 42 : index
    %406 = memref.load %arg1[%c42_172] : memref<48xf32, #tpu.memory_space<smem>>
    %407 = vector.broadcast %406 : f32 to vector<2x7x7xf32>
    %408 = arith.mulf %407, %397 : vector<2x7x7xf32>
    %409 = arith.addf %395, %408 : vector<2x7x7xf32>
    %c9_173 = arith.constant 9 : index
    %c0_174 = arith.constant 0 : index
    %c0_175 = arith.constant 0 : index
    %c1_176 = arith.constant 1 : index
    %410 = vector.load %arg0[%c9_173, %c0_174, %c0_175, %c1_176] : memref<16x2x8x8xf32, #tpu.memory_space<vmem>>, vector<1x2x7x7xf32>
    %411 = vector.shape_cast %410 : vector<1x2x7x7xf32> to vector<2x7x7xf32>
    %c11_177 = arith.constant 11 : index
    %412 = memref.load %arg1[%c11_177] : memref<48xf32, #tpu.memory_space<smem>>
    %413 = vector.broadcast %412 : f32 to vector<2x7x7xf32>
    %414 = arith.mulf %413, %411 : vector<2x7x7xf32>
    %415 = arith.addf %401, %414 : vector<2x7x7xf32>
    %c27_178 = arith.constant 27 : index
    %416 = memref.load %arg1[%c27_178] : memref<48xf32, #tpu.memory_space<smem>>
    %417 = vector.broadcast %416 : f32 to vector<2x7x7xf32>
    %418 = arith.mulf %417, %411 : vector<2x7x7xf32>
    %419 = arith.addf %405, %418 : vector<2x7x7xf32>
    %c43_179 = arith.constant 43 : index
    %420 = memref.load %arg1[%c43_179] : memref<48xf32, #tpu.memory_space<smem>>
    %421 = vector.broadcast %420 : f32 to vector<2x7x7xf32>
    %422 = arith.mulf %421, %411 : vector<2x7x7xf32>
    %423 = arith.addf %409, %422 : vector<2x7x7xf32>
    %c14_180 = arith.constant 14 : index
    %c0_181 = arith.constant 0 : index
    %c0_182 = arith.constant 0 : index
    %c0_183 = arith.constant 0 : index
    %424 = vector.load %arg0[%c14_180, %c0_181, %c0_182, %c0_183] : memref<16x2x8x8xf32, #tpu.memory_space<vmem>>, vector<1x2x7x7xf32>
    %425 = vector.shape_cast %424 : vector<1x2x7x7xf32> to vector<2x7x7xf32>
    %c12_184 = arith.constant 12 : index
    %426 = memref.load %arg1[%c12_184] : memref<48xf32, #tpu.memory_space<smem>>
    %427 = vector.broadcast %426 : f32 to vector<2x7x7xf32>
    %428 = arith.mulf %427, %425 : vector<2x7x7xf32>
    %429 = arith.addf %415, %428 : vector<2x7x7xf32>
    %c28_185 = arith.constant 28 : index
    %430 = memref.load %arg1[%c28_185] : memref<48xf32, #tpu.memory_space<smem>>
    %431 = vector.broadcast %430 : f32 to vector<2x7x7xf32>
    %432 = arith.mulf %431, %425 : vector<2x7x7xf32>
    %433 = arith.addf %419, %432 : vector<2x7x7xf32>
    %c44_186 = arith.constant 44 : index
    %434 = memref.load %arg1[%c44_186] : memref<48xf32, #tpu.memory_space<smem>>
    %435 = vector.broadcast %434 : f32 to vector<2x7x7xf32>
    %436 = arith.mulf %435, %425 : vector<2x7x7xf32>
    %437 = arith.addf %423, %436 : vector<2x7x7xf32>
    %c15_187 = arith.constant 15 : index
    %c0_188 = arith.constant 0 : index
    %c0_189 = arith.constant 0 : index
    %c0_190 = arith.constant 0 : index
    %438 = vector.load %arg0[%c15_187, %c0_188, %c0_189, %c0_190] : memref<16x2x8x8xf32, #tpu.memory_space<vmem>>, vector<1x2x7x7xf32>
    %439 = vector.shape_cast %438 : vector<1x2x7x7xf32> to vector<2x7x7xf32>
    %c13_191 = arith.constant 13 : index
    %440 = memref.load %arg1[%c13_191] : memref<48xf32, #tpu.memory_space<smem>>
    %441 = vector.broadcast %440 : f32 to vector<2x7x7xf32>
    %442 = arith.mulf %441, %439 : vector<2x7x7xf32>
    %443 = arith.addf %429, %442 : vector<2x7x7xf32>
    %c29_192 = arith.constant 29 : index
    %444 = memref.load %arg1[%c29_192] : memref<48xf32, #tpu.memory_space<smem>>
    %445 = vector.broadcast %444 : f32 to vector<2x7x7xf32>
    %446 = arith.mulf %445, %439 : vector<2x7x7xf32>
    %447 = arith.addf %433, %446 : vector<2x7x7xf32>
    %c45_193 = arith.constant 45 : index
    %448 = memref.load %arg1[%c45_193] : memref<48xf32, #tpu.memory_space<smem>>
    %449 = vector.broadcast %448 : f32 to vector<2x7x7xf32>
    %450 = arith.mulf %449, %439 : vector<2x7x7xf32>
    %451 = arith.addf %437, %450 : vector<2x7x7xf32>
    %c12_194 = arith.constant 12 : index
    %c0_195 = arith.constant 0 : index
    %c0_196 = arith.constant 0 : index
    %c1_197 = arith.constant 1 : index
    %452 = vector.load %arg0[%c12_194, %c0_195, %c0_196, %c1_197] : memref<16x2x8x8xf32, #tpu.memory_space<vmem>>, vector<1x2x7x7xf32>
    %453 = vector.shape_cast %452 : vector<1x2x7x7xf32> to vector<2x7x7xf32>
    %c14_198 = arith.constant 14 : index
    %454 = memref.load %arg1[%c14_198] : memref<48xf32, #tpu.memory_space<smem>>
    %455 = vector.broadcast %454 : f32 to vector<2x7x7xf32>
    %456 = arith.mulf %455, %453 : vector<2x7x7xf32>
    %457 = arith.addf %443, %456 : vector<2x7x7xf32>
    %c30_199 = arith.constant 30 : index
    %458 = memref.load %arg1[%c30_199] : memref<48xf32, #tpu.memory_space<smem>>
    %459 = vector.broadcast %458 : f32 to vector<2x7x7xf32>
    %460 = arith.mulf %459, %453 : vector<2x7x7xf32>
    %461 = arith.addf %447, %460 : vector<2x7x7xf32>
    %c46_200 = arith.constant 46 : index
    %462 = memref.load %arg1[%c46_200] : memref<48xf32, #tpu.memory_space<smem>>
    %463 = vector.broadcast %462 : f32 to vector<2x7x7xf32>
    %464 = arith.mulf %463, %453 : vector<2x7x7xf32>
    %465 = arith.addf %451, %464 : vector<2x7x7xf32>
    %c13_201 = arith.constant 13 : index
    %c0_202 = arith.constant 0 : index
    %c0_203 = arith.constant 0 : index
    %c1_204 = arith.constant 1 : index
    %466 = vector.load %arg0[%c13_201, %c0_202, %c0_203, %c1_204] : memref<16x2x8x8xf32, #tpu.memory_space<vmem>>, vector<1x2x7x7xf32>
    %467 = vector.shape_cast %466 : vector<1x2x7x7xf32> to vector<2x7x7xf32>
    %c15_205 = arith.constant 15 : index
    %468 = memref.load %arg1[%c15_205] : memref<48xf32, #tpu.memory_space<smem>>
    %469 = vector.broadcast %468 : f32 to vector<2x7x7xf32>
    %470 = arith.mulf %469, %467 : vector<2x7x7xf32>
    %471 = arith.addf %457, %470 : vector<2x7x7xf32>
    %c31_206 = arith.constant 31 : index
    %472 = memref.load %arg1[%c31_206] : memref<48xf32, #tpu.memory_space<smem>>
    %473 = vector.broadcast %472 : f32 to vector<2x7x7xf32>
    %474 = arith.mulf %473, %467 : vector<2x7x7xf32>
    %475 = arith.addf %461, %474 : vector<2x7x7xf32>
    %c47_207 = arith.constant 47 : index
    %476 = memref.load %arg1[%c47_207] : memref<48xf32, #tpu.memory_space<smem>>
    %477 = vector.broadcast %476 : f32 to vector<2x7x7xf32>
    %478 = arith.mulf %477, %467 : vector<2x7x7xf32>
    %479 = arith.addf %465, %478 : vector<2x7x7xf32>
    %c0_208 = arith.constant 0 : index
    %480 = memref.load %arg2[%c0_208] : memref<3xf32, #tpu.memory_space<smem>>
    %481 = vector.broadcast %480 : f32 to vector<2x7x7xf32>
    %482 = arith.addf %471, %481 : vector<2x7x7xf32>
    %cst_209 = arith.constant 0.000000e+00 : f32
    %483 = vector.broadcast %cst_209 : f32 to vector<2x7x7xf32>
    %484 = arith.maximumf %482, %483 : vector<2x7x7xf32>
    %c2_210 = arith.constant 2 : index
    %c0_211 = arith.constant 0 : index
    %c0_212 = arith.constant 0 : index
    %c0_213 = arith.constant 0 : index
    %c1_214 = arith.constant 1 : index
    %485 = vector.load %arg10[%c2_210, %c0_211, %c0_212, %c0_213, %c1_214] : memref<4x3x2x8x8xf32, #tpu.memory_space<vmem>>, vector<1x1x2x7x7xf32>
    %486 = vector.shape_cast %485 : vector<1x1x2x7x7xf32> to vector<2x7x7xf32>
    %487 = vector.shape_cast %484 : vector<2x7x7xf32> to vector<1x1x2x7x7xf32>
    tpu.vector_store %arg10[%c2_210, %c0_211, %c0_212, %c0_213, %c1_214], %487 {strides = array<i32>} : memref<4x3x2x8x8xf32, #tpu.memory_space<vmem>>, vector<1x1x2x7x7xf32>,
    %c1_215 = arith.constant 1 : index
    %488 = memref.load %arg2[%c1_215] : memref<3xf32, #tpu.memory_space<smem>>
    %489 = vector.broadcast %488 : f32 to vector<2x7x7xf32>
    %490 = arith.addf %475, %489 : vector<2x7x7xf32>
    %cst_216 = arith.constant 0.000000e+00 : f32
    %491 = vector.broadcast %cst_216 : f32 to vector<2x7x7xf32>
    %492 = arith.maximumf %490, %491 : vector<2x7x7xf32>
    %c2_217 = arith.constant 2 : index
    %c1_218 = arith.constant 1 : index
    %c0_219 = arith.constant 0 : index
    %c0_220 = arith.constant 0 : index
    %c1_221 = arith.constant 1 : index
    %493 = vector.load %arg10[%c2_217, %c1_218, %c0_219, %c0_220, %c1_221] : memref<4x3x2x8x8xf32, #tpu.memory_space<vmem>>, vector<1x1x2x7x7xf32>
    %494 = vector.shape_cast %493 : vector<1x1x2x7x7xf32> to vector<2x7x7xf32>
    %495 = vector.shape_cast %492 : vector<2x7x7xf32> to vector<1x1x2x7x7xf32>
    tpu.vector_store %arg10[%c2_217, %c1_218, %c0_219, %c0_220, %c1_221], %495 {strides = array<i32>} : memref<4x3x2x8x8xf32, #tpu.memory_space<vmem>>, vector<1x1x2x7x7xf32>,
    %c2_222 = arith.constant 2 : index
    %496 = memref.load %arg2[%c2_222] : memref<3xf32, #tpu.memory_space<smem>>
    %497 = vector.broadcast %496 : f32 to vector<2x7x7xf32>
    %498 = arith.addf %479, %497 : vector<2x7x7xf32>
    %cst_223 = arith.constant 0.000000e+00 : f32
    %499 = vector.broadcast %cst_223 : f32 to vector<2x7x7xf32>
    %500 = arith.maximumf %498, %499 : vector<2x7x7xf32>
    %c2_224 = arith.constant 2 : index
    %c2_225 = arith.constant 2 : index
    %c0_226 = arith.constant 0 : index
    %c0_227 = arith.constant 0 : index
    %c1_228 = arith.constant 1 : index
    %501 = vector.load %arg10[%c2_224, %c2_225, %c0_226, %c0_227, %c1_228] : memref<4x3x2x8x8xf32, #tpu.memory_space<vmem>>, vector<1x1x2x7x7xf32>
    %502 = vector.shape_cast %501 : vector<1x1x2x7x7xf32> to vector<2x7x7xf32>
    %503 = vector.shape_cast %500 : vector<2x7x7xf32> to vector<1x1x2x7x7xf32>
    tpu.vector_store %arg10[%c2_224, %c2_225, %c0_226, %c0_227, %c1_228], %503 {strides = array<i32>} : memref<4x3x2x8x8xf32, #tpu.memory_space<vmem>>, vector<1x1x2x7x7xf32>,
    %cst_229 = arith.constant 0.000000e+00 : f32
    %504 = vector.broadcast %cst_229 : f32 to vector<2x7x7xf32>
    %cst_230 = arith.constant 0.000000e+00 : f32
    %505 = vector.broadcast %cst_230 : f32 to vector<2x7x7xf32>
    %cst_231 = arith.constant 0.000000e+00 : f32
    %506 = vector.broadcast %cst_231 : f32 to vector<2x7x7xf32>
    %c8_232 = arith.constant 8 : index
    %c0_233 = arith.constant 0 : index
    %c0_234 = arith.constant 0 : index
    %c0_235 = arith.constant 0 : index
    %507 = vector.load %arg0[%c8_232, %c0_233, %c0_234, %c0_235] : memref<16x2x8x8xf32, #tpu.memory_space<vmem>>, vector<1x2x7x7xf32>
    %508 = vector.shape_cast %507 : vector<1x2x7x7xf32> to vector<2x7x7xf32>
    %c0_236 = arith.constant 0 : index
    %509 = memref.load %arg1[%c0_236] : memref<48xf32, #tpu.memory_space<smem>>
    %510 = vector.broadcast %509 : f32 to vector<2x7x7xf32>
    %511 = arith.mulf %510, %508 : vector<2x7x7xf32>
    %512 = arith.addf %504, %511 : vector<2x7x7xf32>
    %c16_237 = arith.constant 16 : index
    %513 = memref.load %arg1[%c16_237] : memref<48xf32, #tpu.memory_space<smem>>
    %514 = vector.broadcast %513 : f32 to vector<2x7x7xf32>
    %515 = arith.mulf %514, %508 : vector<2x7x7xf32>
    %516 = arith.addf %505, %515 : vector<2x7x7xf32>
    %c32_238 = arith.constant 32 : index
    %517 = memref.load %arg1[%c32_238] : memref<48xf32, #tpu.memory_space<smem>>
    %518 = vector.broadcast %517 : f32 to vector<2x7x7xf32>
    %519 = arith.mulf %518, %508 : vector<2x7x7xf32>
    %520 = arith.addf %506, %519 : vector<2x7x7xf32>
    %c9_239 = arith.constant 9 : index
    %c0_240 = arith.constant 0 : index
    %c0_241 = arith.constant 0 : index
    %c0_242 = arith.constant 0 : index
    %521 = vector.load %arg0[%c9_239, %c0_240, %c0_241, %c0_242] : memref<16x2x8x8xf32, #tpu.memory_space<vmem>>, vector<1x2x7x7xf32>
    %522 = vector.shape_cast %521 : vector<1x2x7x7xf32> to vector<2x7x7xf32>
    %c1_243 = arith.constant 1 : index
    %523 = memref.load %arg1[%c1_243] : memref<48xf32, #tpu.memory_space<smem>>
    %524 = vector.broadcast %523 : f32 to vector<2x7x7xf32>
    %525 = arith.mulf %524, %522 : vector<2x7x7xf32>
    %526 = arith.addf %512, %525 : vector<2x7x7xf32>
    %c17_244 = arith.constant 17 : index
    %527 = memref.load %arg1[%c17_244] : memref<48xf32, #tpu.memory_space<smem>>
    %528 = vector.broadcast %527 : f32 to vector<2x7x7xf32>
    %529 = arith.mulf %528, %522 : vector<2x7x7xf32>
    %530 = arith.addf %516, %529 : vector<2x7x7xf32>
    %c33_245 = arith.constant 33 : index
    %531 = memref.load %arg1[%c33_245] : memref<48xf32, #tpu.memory_space<smem>>
    %532 = vector.broadcast %531 : f32 to vector<2x7x7xf32>
    %533 = arith.mulf %532, %522 : vector<2x7x7xf32>
    %534 = arith.addf %520, %533 : vector<2x7x7xf32>
    %c10_246 = arith.constant 10 : index
    %c0_247 = arith.constant 0 : index
    %c0_248 = arith.constant 0 : index
    %c0_249 = arith.constant 0 : index
    %535 = vector.load %arg0[%c10_246, %c0_247, %c0_248, %c0_249] : memref<16x2x8x8xf32, #tpu.memory_space<vmem>>, vector<1x2x7x7xf32>
    %536 = vector.shape_cast %535 : vector<1x2x7x7xf32> to vector<2x7x7xf32>
    %c2_250 = arith.constant 2 : index
    %537 = memref.load %arg1[%c2_250] : memref<48xf32, #tpu.memory_space<smem>>
    %538 = vector.broadcast %537 : f32 to vector<2x7x7xf32>
    %539 = arith.mulf %538, %536 : vector<2x7x7xf32>
    %540 = arith.addf %526, %539 : vector<2x7x7xf32>
    %c18_251 = arith.constant 18 : index
    %541 = memref.load %arg1[%c18_251] : memref<48xf32, #tpu.memory_space<smem>>
    %542 = vector.broadcast %541 : f32 to vector<2x7x7xf32>
    %543 = arith.mulf %542, %536 : vector<2x7x7xf32>
    %544 = arith.addf %530, %543 : vector<2x7x7xf32>
    %c34_252 = arith.constant 34 : index
    %545 = memref.load %arg1[%c34_252] : memref<48xf32, #tpu.memory_space<smem>>
    %546 = vector.broadcast %545 : f32 to vector<2x7x7xf32>
    %547 = arith.mulf %546, %536 : vector<2x7x7xf32>
    %548 = arith.addf %534, %547 : vector<2x7x7xf32>
    %c11_253 = arith.constant 11 : index
    %c0_254 = arith.constant 0 : index
    %c0_255 = arith.constant 0 : index
    %c0_256 = arith.constant 0 : index
    %549 = vector.load %arg0[%c11_253, %c0_254, %c0_255, %c0_256] : memref<16x2x8x8xf32, #tpu.memory_space<vmem>>, vector<1x2x7x7xf32>
    %550 = vector.shape_cast %549 : vector<1x2x7x7xf32> to vector<2x7x7xf32>
    %c3_257 = arith.constant 3 : index
    %551 = memref.load %arg1[%c3_257] : memref<48xf32, #tpu.memory_space<smem>>
    %552 = vector.broadcast %551 : f32 to vector<2x7x7xf32>
    %553 = arith.mulf %552, %550 : vector<2x7x7xf32>
    %554 = arith.addf %540, %553 : vector<2x7x7xf32>
    %c19_258 = arith.constant 19 : index
    %555 = memref.load %arg1[%c19_258] : memref<48xf32, #tpu.memory_space<smem>>
    %556 = vector.broadcast %555 : f32 to vector<2x7x7xf32>
    %557 = arith.mulf %556, %550 : vector<2x7x7xf32>
    %558 = arith.addf %544, %557 : vector<2x7x7xf32>
    %c35_259 = arith.constant 35 : index
    %559 = memref.load %arg1[%c35_259] : memref<48xf32, #tpu.memory_space<smem>>
    %560 = vector.broadcast %559 : f32 to vector<2x7x7xf32>
    %561 = arith.mulf %560, %550 : vector<2x7x7xf32>
    %562 = arith.addf %548, %561 : vector<2x7x7xf32>
    %c12_260 = arith.constant 12 : index
    %c0_261 = arith.constant 0 : index
    %c0_262 = arith.constant 0 : index
    %c0_263 = arith.constant 0 : index
    %563 = vector.load %arg0[%c12_260, %c0_261, %c0_262, %c0_263] : memref<16x2x8x8xf32, #tpu.memory_space<vmem>>, vector<1x2x7x7xf32>
    %564 = vector.shape_cast %563 : vector<1x2x7x7xf32> to vector<2x7x7xf32>
    %c4_264 = arith.constant 4 : index
    %565 = memref.load %arg1[%c4_264] : memref<48xf32, #tpu.memory_space<smem>>
    %566 = vector.broadcast %565 : f32 to vector<2x7x7xf32>
    %567 = arith.mulf %566, %564 : vector<2x7x7xf32>
    %568 = arith.addf %554, %567 : vector<2x7x7xf32>
    %c20_265 = arith.constant 20 : index
    %569 = memref.load %arg1[%c20_265] : memref<48xf32, #tpu.memory_space<smem>>
    %570 = vector.broadcast %569 : f32 to vector<2x7x7xf32>
    %571 = arith.mulf %570, %564 : vector<2x7x7xf32>
    %572 = arith.addf %558, %571 : vector<2x7x7xf32>
    %c36_266 = arith.constant 36 : index
    %573 = memref.load %arg1[%c36_266] : memref<48xf32, #tpu.memory_space<smem>>
    %574 = vector.broadcast %573 : f32 to vector<2x7x7xf32>
    %575 = arith.mulf %574, %564 : vector<2x7x7xf32>
    %576 = arith.addf %562, %575 : vector<2x7x7xf32>
    %c13_267 = arith.constant 13 : index
    %c0_268 = arith.constant 0 : index
    %c0_269 = arith.constant 0 : index
    %c0_270 = arith.constant 0 : index
    %577 = vector.load %arg0[%c13_267, %c0_268, %c0_269, %c0_270] : memref<16x2x8x8xf32, #tpu.memory_space<vmem>>, vector<1x2x7x7xf32>
    %578 = vector.shape_cast %577 : vector<1x2x7x7xf32> to vector<2x7x7xf32>
    %c5_271 = arith.constant 5 : index
    %579 = memref.load %arg1[%c5_271] : memref<48xf32, #tpu.memory_space<smem>>
    %580 = vector.broadcast %579 : f32 to vector<2x7x7xf32>
    %581 = arith.mulf %580, %578 : vector<2x7x7xf32>
    %582 = arith.addf %568, %581 : vector<2x7x7xf32>
    %c21_272 = arith.constant 21 : index
    %583 = memref.load %arg1[%c21_272] : memref<48xf32, #tpu.memory_space<smem>>
    %584 = vector.broadcast %583 : f32 to vector<2x7x7xf32>
    %585 = arith.mulf %584, %578 : vector<2x7x7xf32>
    %586 = arith.addf %572, %585 : vector<2x7x7xf32>
    %c37_273 = arith.constant 37 : index
    %587 = memref.load %arg1[%c37_273] : memref<48xf32, #tpu.memory_space<smem>>
    %588 = vector.broadcast %587 : f32 to vector<2x7x7xf32>
    %589 = arith.mulf %588, %578 : vector<2x7x7xf32>
    %590 = arith.addf %576, %589 : vector<2x7x7xf32>
    %c14_274 = arith.constant 14 : index
    %c0_275 = arith.constant 0 : index
    %c0_276 = arith.constant 0 : index
    %c0_277 = arith.constant 0 : index
    %591 = vector.load %arg0[%c14_274, %c0_275, %c0_276, %c0_277] : memref<16x2x8x8xf32, #tpu.memory_space<vmem>>, vector<1x2x7x7xf32>
    %592 = vector.shape_cast %591 : vector<1x2x7x7xf32> to vector<2x7x7xf32>
    %c6_278 = arith.constant 6 : index
    %593 = memref.load %arg1[%c6_278] : memref<48xf32, #tpu.memory_space<smem>>
    %594 = vector.broadcast %593 : f32 to vector<2x7x7xf32>
    %595 = arith.mulf %594, %592 : vector<2x7x7xf32>
    %596 = arith.addf %582, %595 : vector<2x7x7xf32>
    %c22_279 = arith.constant 22 : index
    %597 = memref.load %arg1[%c22_279] : memref<48xf32, #tpu.memory_space<smem>>
    %598 = vector.broadcast %597 : f32 to vector<2x7x7xf32>
    %599 = arith.mulf %598, %592 : vector<2x7x7xf32>
    %600 = arith.addf %586, %599 : vector<2x7x7xf32>
    %c38_280 = arith.constant 38 : index
    %601 = memref.load %arg1[%c38_280] : memref<48xf32, #tpu.memory_space<smem>>
    %602 = vector.broadcast %601 : f32 to vector<2x7x7xf32>
    %603 = arith.mulf %602, %592 : vector<2x7x7xf32>
    %604 = arith.addf %590, %603 : vector<2x7x7xf32>
    %c15_281 = arith.constant 15 : index
    %c0_282 = arith.constant 0 : index
    %c0_283 = arith.constant 0 : index
    %c0_284 = arith.constant 0 : index
    %605 = vector.load %arg0[%c15_281, %c0_282, %c0_283, %c0_284] : memref<16x2x8x8xf32, #tpu.memory_space<vmem>>, vector<1x2x7x7xf32>
    %606 = vector.shape_cast %605 : vector<1x2x7x7xf32> to vector<2x7x7xf32>
    %c7_285 = arith.constant 7 : index
    %607 = memref.load %arg1[%c7_285] : memref<48xf32, #tpu.memory_space<smem>>
    %608 = vector.broadcast %607 : f32 to vector<2x7x7xf32>
    %609 = arith.mulf %608, %606 : vector<2x7x7xf32>
    %610 = arith.addf %596, %609 : vector<2x7x7xf32>
    %c23_286 = arith.constant 23 : index
    %611 = memref.load %arg1[%c23_286] : memref<48xf32, #tpu.memory_space<smem>>
    %612 = vector.broadcast %611 : f32 to vector<2x7x7xf32>
    %613 = arith.mulf %612, %606 : vector<2x7x7xf32>
    %614 = arith.addf %600, %613 : vector<2x7x7xf32>
    %c39_287 = arith.constant 39 : index
    %615 = memref.load %arg1[%c39_287] : memref<48xf32, #tpu.memory_space<smem>>
    %616 = vector.broadcast %615 : f32 to vector<2x7x7xf32>
    %617 = arith.mulf %616, %606 : vector<2x7x7xf32>
    %618 = arith.addf %604, %617 : vector<2x7x7xf32>
    %c0_288 = arith.constant 0 : index
    %c0_289 = arith.constant 0 : index
    %c1_290 = arith.constant 1 : index
    %c0_291 = arith.constant 0 : index
    %619 = vector.load %arg0[%c0_288, %c0_289, %c1_290, %c0_291] : memref<16x2x8x8xf32, #tpu.memory_space<vmem>>, vector<1x2x7x7xf32>
    %620 = vector.shape_cast %619 : vector<1x2x7x7xf32> to vector<2x7x7xf32>
    %c8_292 = arith.constant 8 : index
    %621 = memref.load %arg1[%c8_292] : memref<48xf32, #tpu.memory_space<smem>>
    %622 = vector.broadcast %621 : f32 to vector<2x7x7xf32>
    %623 = arith.mulf %622, %620 : vector<2x7x7xf32>
    %624 = arith.addf %610, %623 : vector<2x7x7xf32>
    %c24_293 = arith.constant 24 : index
    %625 = memref.load %arg1[%c24_293] : memref<48xf32, #tpu.memory_space<smem>>
    %626 = vector.broadcast %625 : f32 to vector<2x7x7xf32>
    %627 = arith.mulf %626, %620 : vector<2x7x7xf32>
    %628 = arith.addf %614, %627 : vector<2x7x7xf32>
    %c40_294 = arith.constant 40 : index
    %629 = memref.load %arg1[%c40_294] : memref<48xf32, #tpu.memory_space<smem>>
    %630 = vector.broadcast %629 : f32 to vector<2x7x7xf32>
    %631 = arith.mulf %630, %620 : vector<2x7x7xf32>
    %632 = arith.addf %618, %631 : vector<2x7x7xf32>
    %c1_295 = arith.constant 1 : index
    %c0_296 = arith.constant 0 : index
    %c1_297 = arith.constant 1 : index
    %c0_298 = arith.constant 0 : index
    %633 = vector.load %arg0[%c1_295, %c0_296, %c1_297, %c0_298] : memref<16x2x8x8xf32, #tpu.memory_space<vmem>>, vector<1x2x7x7xf32>
    %634 = vector.shape_cast %633 : vector<1x2x7x7xf32> to vector<2x7x7xf32>
    %c9_299 = arith.constant 9 : index
    %635 = memref.load %arg1[%c9_299] : memref<48xf32, #tpu.memory_space<smem>>
    %636 = vector.broadcast %635 : f32 to vector<2x7x7xf32>
    %637 = arith.mulf %636, %634 : vector<2x7x7xf32>
    %638 = arith.addf %624, %637 : vector<2x7x7xf32>
    %c25_300 = arith.constant 25 : index
    %639 = memref.load %arg1[%c25_300] : memref<48xf32, #tpu.memory_space<smem>>
    %640 = vector.broadcast %639 : f32 to vector<2x7x7xf32>
    %641 = arith.mulf %640, %634 : vector<2x7x7xf32>
    %642 = arith.addf %628, %641 : vector<2x7x7xf32>
    %c41_301 = arith.constant 41 : index
    %643 = memref.load %arg1[%c41_301] : memref<48xf32, #tpu.memory_space<smem>>
    %644 = vector.broadcast %643 : f32 to vector<2x7x7xf32>
    %645 = arith.mulf %644, %634 : vector<2x7x7xf32>
    %646 = arith.addf %632, %645 : vector<2x7x7xf32>
    %c2_302 = arith.constant 2 : index
    %c0_303 = arith.constant 0 : index
    %c1_304 = arith.constant 1 : index
    %c0_305 = arith.constant 0 : index
    %647 = vector.load %arg0[%c2_302, %c0_303, %c1_304, %c0_305] : memref<16x2x8x8xf32, #tpu.memory_space<vmem>>, vector<1x2x7x7xf32>
    %648 = vector.shape_cast %647 : vector<1x2x7x7xf32> to vector<2x7x7xf32>
    %c10_306 = arith.constant 10 : index
    %649 = memref.load %arg1[%c10_306] : memref<48xf32, #tpu.memory_space<smem>>
    %650 = vector.broadcast %649 : f32 to vector<2x7x7xf32>
    %651 = arith.mulf %650, %648 : vector<2x7x7xf32>
    %652 = arith.addf %638, %651 : vector<2x7x7xf32>
    %c26_307 = arith.constant 26 : index
    %653 = memref.load %arg1[%c26_307] : memref<48xf32, #tpu.memory_space<smem>>
    %654 = vector.broadcast %653 : f32 to vector<2x7x7xf32>
    %655 = arith.mulf %654, %648 : vector<2x7x7xf32>
    %656 = arith.addf %642, %655 : vector<2x7x7xf32>
    %c42_308 = arith.constant 42 : index
    %657 = memref.load %arg1[%c42_308] : memref<48xf32, #tpu.memory_space<smem>>
    %658 = vector.broadcast %657 : f32 to vector<2x7x7xf32>
    %659 = arith.mulf %658, %648 : vector<2x7x7xf32>
    %660 = arith.addf %646, %659 : vector<2x7x7xf32>
    %c3_309 = arith.constant 3 : index
    %c0_310 = arith.constant 0 : index
    %c1_311 = arith.constant 1 : index
    %c0_312 = arith.constant 0 : index
    %661 = vector.load %arg0[%c3_309, %c0_310, %c1_311, %c0_312] : memref<16x2x8x8xf32, #tpu.memory_space<vmem>>, vector<1x2x7x7xf32>
    %662 = vector.shape_cast %661 : vector<1x2x7x7xf32> to vector<2x7x7xf32>
    %c11_313 = arith.constant 11 : index
    %663 = memref.load %arg1[%c11_313] : memref<48xf32, #tpu.memory_space<smem>>
    %664 = vector.broadcast %663 : f32 to vector<2x7x7xf32>
    %665 = arith.mulf %664, %662 : vector<2x7x7xf32>
    %666 = arith.addf %652, %665 : vector<2x7x7xf32>
    %c27_314 = arith.constant 27 : index
    %667 = memref.load %arg1[%c27_314] : memref<48xf32, #tpu.memory_space<smem>>
    %668 = vector.broadcast %667 : f32 to vector<2x7x7xf32>
    %669 = arith.mulf %668, %662 : vector<2x7x7xf32>
    %670 = arith.addf %656, %669 : vector<2x7x7xf32>
    %c43_315 = arith.constant 43 : index
    %671 = memref.load %arg1[%c43_315] : memref<48xf32, #tpu.memory_space<smem>>
    %672 = vector.broadcast %671 : f32 to vector<2x7x7xf32>
    %673 = arith.mulf %672, %662 : vector<2x7x7xf32>
    %674 = arith.addf %660, %673 : vector<2x7x7xf32>
    %c4_316 = arith.constant 4 : index
    %c0_317 = arith.constant 0 : index
    %c1_318 = arith.constant 1 : index
    %c0_319 = arith.constant 0 : index
    %675 = vector.load %arg0[%c4_316, %c0_317, %c1_318, %c0_319] : memref<16x2x8x8xf32, #tpu.memory_space<vmem>>, vector<1x2x7x7xf32>
    %676 = vector.shape_cast %675 : vector<1x2x7x7xf32> to vector<2x7x7xf32>
    %c12_320 = arith.constant 12 : index
    %677 = memref.load %arg1[%c12_320] : memref<48xf32, #tpu.memory_space<smem>>
    %678 = vector.broadcast %677 : f32 to vector<2x7x7xf32>
    %679 = arith.mulf %678, %676 : vector<2x7x7xf32>
    %680 = arith.addf %666, %679 : vector<2x7x7xf32>
    %c28_321 = arith.constant 28 : index
    %681 = memref.load %arg1[%c28_321] : memref<48xf32, #tpu.memory_space<smem>>
    %682 = vector.broadcast %681 : f32 to vector<2x7x7xf32>
    %683 = arith.mulf %682, %676 : vector<2x7x7xf32>
    %684 = arith.addf %670, %683 : vector<2x7x7xf32>
    %c44_322 = arith.constant 44 : index
    %685 = memref.load %arg1[%c44_322] : memref<48xf32, #tpu.memory_space<smem>>
    %686 = vector.broadcast %685 : f32 to vector<2x7x7xf32>
    %687 = arith.mulf %686, %676 : vector<2x7x7xf32>
    %688 = arith.addf %674, %687 : vector<2x7x7xf32>
    %c5_323 = arith.constant 5 : index
    %c0_324 = arith.constant 0 : index
    %c1_325 = arith.constant 1 : index
    %c0_326 = arith.constant 0 : index
    %689 = vector.load %arg0[%c5_323, %c0_324, %c1_325, %c0_326] : memref<16x2x8x8xf32, #tpu.memory_space<vmem>>, vector<1x2x7x7xf32>
    %690 = vector.shape_cast %689 : vector<1x2x7x7xf32> to vector<2x7x7xf32>
    %c13_327 = arith.constant 13 : index
    %691 = memref.load %arg1[%c13_327] : memref<48xf32, #tpu.memory_space<smem>>
    %692 = vector.broadcast %691 : f32 to vector<2x7x7xf32>
    %693 = arith.mulf %692, %690 : vector<2x7x7xf32>
    %694 = arith.addf %680, %693 : vector<2x7x7xf32>
    %c29_328 = arith.constant 29 : index
    %695 = memref.load %arg1[%c29_328] : memref<48xf32, #tpu.memory_space<smem>>
    %696 = vector.broadcast %695 : f32 to vector<2x7x7xf32>
    %697 = arith.mulf %696, %690 : vector<2x7x7xf32>
    %698 = arith.addf %684, %697 : vector<2x7x7xf32>
    %c45_329 = arith.constant 45 : index
    %699 = memref.load %arg1[%c45_329] : memref<48xf32, #tpu.memory_space<smem>>
    %700 = vector.broadcast %699 : f32 to vector<2x7x7xf32>
    %701 = arith.mulf %700, %690 : vector<2x7x7xf32>
    %702 = arith.addf %688, %701 : vector<2x7x7xf32>
    %c6_330 = arith.constant 6 : index
    %c0_331 = arith.constant 0 : index
    %c1_332 = arith.constant 1 : index
    %c0_333 = arith.constant 0 : index
    %703 = vector.load %arg0[%c6_330, %c0_331, %c1_332, %c0_333] : memref<16x2x8x8xf32, #tpu.memory_space<vmem>>, vector<1x2x7x7xf32>
    %704 = vector.shape_cast %703 : vector<1x2x7x7xf32> to vector<2x7x7xf32>
    %c14_334 = arith.constant 14 : index
    %705 = memref.load %arg1[%c14_334] : memref<48xf32, #tpu.memory_space<smem>>
    %706 = vector.broadcast %705 : f32 to vector<2x7x7xf32>
    %707 = arith.mulf %706, %704 : vector<2x7x7xf32>
    %708 = arith.addf %694, %707 : vector<2x7x7xf32>
    %c30_335 = arith.constant 30 : index
    %709 = memref.load %arg1[%c30_335] : memref<48xf32, #tpu.memory_space<smem>>
    %710 = vector.broadcast %709 : f32 to vector<2x7x7xf32>
    %711 = arith.mulf %710, %704 : vector<2x7x7xf32>
    %712 = arith.addf %698, %711 : vector<2x7x7xf32>
    %c46_336 = arith.constant 46 : index
    %713 = memref.load %arg1[%c46_336] : memref<48xf32, #tpu.memory_space<smem>>
    %714 = vector.broadcast %713 : f32 to vector<2x7x7xf32>
    %715 = arith.mulf %714, %704 : vector<2x7x7xf32>
    %716 = arith.addf %702, %715 : vector<2x7x7xf32>
    %c7_337 = arith.constant 7 : index
    %c0_338 = arith.constant 0 : index
    %c1_339 = arith.constant 1 : index
    %c0_340 = arith.constant 0 : index
    %717 = vector.load %arg0[%c7_337, %c0_338, %c1_339, %c0_340] : memref<16x2x8x8xf32, #tpu.memory_space<vmem>>, vector<1x2x7x7xf32>
    %718 = vector.shape_cast %717 : vector<1x2x7x7xf32> to vector<2x7x7xf32>
    %c15_341 = arith.constant 15 : index
    %719 = memref.load %arg1[%c15_341] : memref<48xf32, #tpu.memory_space<smem>>
    %720 = vector.broadcast %719 : f32 to vector<2x7x7xf32>
    %721 = arith.mulf %720, %718 : vector<2x7x7xf32>
    %722 = arith.addf %708, %721 : vector<2x7x7xf32>
    %c31_342 = arith.constant 31 : index
    %723 = memref.load %arg1[%c31_342] : memref<48xf32, #tpu.memory_space<smem>>
    %724 = vector.broadcast %723 : f32 to vector<2x7x7xf32>
    %725 = arith.mulf %724, %718 : vector<2x7x7xf32>
    %726 = arith.addf %712, %725 : vector<2x7x7xf32>
    %c47_343 = arith.constant 47 : index
    %727 = memref.load %arg1[%c47_343] : memref<48xf32, #tpu.memory_space<smem>>
    %728 = vector.broadcast %727 : f32 to vector<2x7x7xf32>
    %729 = arith.mulf %728, %718 : vector<2x7x7xf32>
    %730 = arith.addf %716, %729 : vector<2x7x7xf32>
    %c0_344 = arith.constant 0 : index
    %731 = memref.load %arg2[%c0_344] : memref<3xf32, #tpu.memory_space<smem>>
    %732 = vector.broadcast %731 : f32 to vector<2x7x7xf32>
    %733 = arith.addf %722, %732 : vector<2x7x7xf32>
    %cst_345 = arith.constant 0.000000e+00 : f32
    %734 = vector.broadcast %cst_345 : f32 to vector<2x7x7xf32>
    %735 = arith.maximumf %733, %734 : vector<2x7x7xf32>
    %c1_346 = arith.constant 1 : index
    %c0_347 = arith.constant 0 : index
    %c0_348 = arith.constant 0 : index
    %c1_349 = arith.constant 1 : index
    %c0_350 = arith.constant 0 : index
    %736 = vector.load %arg10[%c1_346, %c0_347, %c0_348, %c1_349, %c0_350] : memref<4x3x2x8x8xf32, #tpu.memory_space<vmem>>, vector<1x1x2x7x7xf32>
    %737 = vector.shape_cast %736 : vector<1x1x2x7x7xf32> to vector<2x7x7xf32>
    %738 = vector.shape_cast %735 : vector<2x7x7xf32> to vector<1x1x2x7x7xf32>
    tpu.vector_store %arg10[%c1_346, %c0_347, %c0_348, %c1_349, %c0_350], %738 {strides = array<i32>} : memref<4x3x2x8x8xf32, #tpu.memory_space<vmem>>, vector<1x1x2x7x7xf32>,
    %c1_351 = arith.constant 1 : index
    %739 = memref.load %arg2[%c1_351] : memref<3xf32, #tpu.memory_space<smem>>
    %740 = vector.broadcast %739 : f32 to vector<2x7x7xf32>
    %741 = arith.addf %726, %740 : vector<2x7x7xf32>
    %cst_352 = arith.constant 0.000000e+00 : f32
    %742 = vector.broadcast %cst_352 : f32 to vector<2x7x7xf32>
    %743 = arith.maximumf %741, %742 : vector<2x7x7xf32>
    %c1_353 = arith.constant 1 : index
    %c1_354 = arith.constant 1 : index
    %c0_355 = arith.constant 0 : index
    %c1_356 = arith.constant 1 : index
    %c0_357 = arith.constant 0 : index
    %744 = vector.load %arg10[%c1_353, %c1_354, %c0_355, %c1_356, %c0_357] : memref<4x3x2x8x8xf32, #tpu.memory_space<vmem>>, vector<1x1x2x7x7xf32>
    %745 = vector.shape_cast %744 : vector<1x1x2x7x7xf32> to vector<2x7x7xf32>
    %746 = vector.shape_cast %743 : vector<2x7x7xf32> to vector<1x1x2x7x7xf32>
    tpu.vector_store %arg10[%c1_353, %c1_354, %c0_355, %c1_356, %c0_357], %746 {strides = array<i32>} : memref<4x3x2x8x8xf32, #tpu.memory_space<vmem>>, vector<1x1x2x7x7xf32>,
    %c2_358 = arith.constant 2 : index
    %747 = memref.load %arg2[%c2_358] : memref<3xf32, #tpu.memory_space<smem>>
    %748 = vector.broadcast %747 : f32 to vector<2x7x7xf32>
    %749 = arith.addf %730, %748 : vector<2x7x7xf32>
    %cst_359 = arith.constant 0.000000e+00 : f32
    %750 = vector.broadcast %cst_359 : f32 to vector<2x7x7xf32>
    %751 = arith.maximumf %749, %750 : vector<2x7x7xf32>
    %c1_360 = arith.constant 1 : index
    %c2_361 = arith.constant 2 : index
    %c0_362 = arith.constant 0 : index
    %c1_363 = arith.constant 1 : index
    %c0_364 = arith.constant 0 : index
    %752 = vector.load %arg10[%c1_360, %c2_361, %c0_362, %c1_363, %c0_364] : memref<4x3x2x8x8xf32, #tpu.memory_space<vmem>>, vector<1x1x2x7x7xf32>
    %753 = vector.shape_cast %752 : vector<1x1x2x7x7xf32> to vector<2x7x7xf32>
    %754 = vector.shape_cast %751 : vector<2x7x7xf32> to vector<1x1x2x7x7xf32>
    tpu.vector_store %arg10[%c1_360, %c2_361, %c0_362, %c1_363, %c0_364], %754 {strides = array<i32>} : memref<4x3x2x8x8xf32, #tpu.memory_space<vmem>>, vector<1x1x2x7x7xf32>,
    %cst_365 = arith.constant 0.000000e+00 : f32
    %755 = vector.broadcast %cst_365 : f32 to vector<2x7x7xf32>
    %cst_366 = arith.constant 0.000000e+00 : f32
    %756 = vector.broadcast %cst_366 : f32 to vector<2x7x7xf32>
    %cst_367 = arith.constant 0.000000e+00 : f32
    %757 = vector.broadcast %cst_367 : f32 to vector<2x7x7xf32>
    %c10_368 = arith.constant 10 : index
    %c0_369 = arith.constant 0 : index
    %c0_370 = arith.constant 0 : index
    %c0_371 = arith.constant 0 : index
    %758 = vector.load %arg0[%c10_368, %c0_369, %c0_370, %c0_371] : memref<16x2x8x8xf32, #tpu.memory_space<vmem>>, vector<1x2x7x7xf32>
    %759 = vector.shape_cast %758 : vector<1x2x7x7xf32> to vector<2x7x7xf32>
    %c0_372 = arith.constant 0 : index
    %760 = memref.load %arg1[%c0_372] : memref<48xf32, #tpu.memory_space<smem>>
    %761 = vector.broadcast %760 : f32 to vector<2x7x7xf32>
    %762 = arith.mulf %761, %759 : vector<2x7x7xf32>
    %763 = arith.addf %755, %762 : vector<2x7x7xf32>
    %c16_373 = arith.constant 16 : index
    %764 = memref.load %arg1[%c16_373] : memref<48xf32, #tpu.memory_space<smem>>
    %765 = vector.broadcast %764 : f32 to vector<2x7x7xf32>
    %766 = arith.mulf %765, %759 : vector<2x7x7xf32>
    %767 = arith.addf %756, %766 : vector<2x7x7xf32>
    %c32_374 = arith.constant 32 : index
    %768 = memref.load %arg1[%c32_374] : memref<48xf32, #tpu.memory_space<smem>>
    %769 = vector.broadcast %768 : f32 to vector<2x7x7xf32>
    %770 = arith.mulf %769, %759 : vector<2x7x7xf32>
    %771 = arith.addf %757, %770 : vector<2x7x7xf32>
    %c11_375 = arith.constant 11 : index
    %c0_376 = arith.constant 0 : index
    %c0_377 = arith.constant 0 : index
    %c0_378 = arith.constant 0 : index
    %772 = vector.load %arg0[%c11_375, %c0_376, %c0_377, %c0_378] : memref<16x2x8x8xf32, #tpu.memory_space<vmem>>, vector<1x2x7x7xf32>
    %773 = vector.shape_cast %772 : vector<1x2x7x7xf32> to vector<2x7x7xf32>
    %c1_379 = arith.constant 1 : index
    %774 = memref.load %arg1[%c1_379] : memref<48xf32, #tpu.memory_space<smem>>
    %775 = vector.broadcast %774 : f32 to vector<2x7x7xf32>
    %776 = arith.mulf %775, %773 : vector<2x7x7xf32>
    %777 = arith.addf %763, %776 : vector<2x7x7xf32>
    %c17_380 = arith.constant 17 : index
    %778 = memref.load %arg1[%c17_380] : memref<48xf32, #tpu.memory_space<smem>>
    %779 = vector.broadcast %778 : f32 to vector<2x7x7xf32>
    %780 = arith.mulf %779, %773 : vector<2x7x7xf32>
    %781 = arith.addf %767, %780 : vector<2x7x7xf32>
    %c33_381 = arith.constant 33 : index
    %782 = memref.load %arg1[%c33_381] : memref<48xf32, #tpu.memory_space<smem>>
    %783 = vector.broadcast %782 : f32 to vector<2x7x7xf32>
    %784 = arith.mulf %783, %773 : vector<2x7x7xf32>
    %785 = arith.addf %771, %784 : vector<2x7x7xf32>
    %c8_382 = arith.constant 8 : index
    %c0_383 = arith.constant 0 : index
    %c0_384 = arith.constant 0 : index
    %c1_385 = arith.constant 1 : index
    %786 = vector.load %arg0[%c8_382, %c0_383, %c0_384, %c1_385] : memref<16x2x8x8xf32, #tpu.memory_space<vmem>>, vector<1x2x7x7xf32>
    %787 = vector.shape_cast %786 : vector<1x2x7x7xf32> to vector<2x7x7xf32>
    %c2_386 = arith.constant 2 : index
    %788 = memref.load %arg1[%c2_386] : memref<48xf32, #tpu.memory_space<smem>>
    %789 = vector.broadcast %788 : f32 to vector<2x7x7xf32>
    %790 = arith.mulf %789, %787 : vector<2x7x7xf32>
    %791 = arith.addf %777, %790 : vector<2x7x7xf32>
    %c18_387 = arith.constant 18 : index
    %792 = memref.load %arg1[%c18_387] : memref<48xf32, #tpu.memory_space<smem>>
    %793 = vector.broadcast %792 : f32 to vector<2x7x7xf32>
    %794 = arith.mulf %793, %787 : vector<2x7x7xf32>
    %795 = arith.addf %781, %794 : vector<2x7x7xf32>
    %c34_388 = arith.constant 34 : index
    %796 = memref.load %arg1[%c34_388] : memref<48xf32, #tpu.memory_space<smem>>
    %797 = vector.broadcast %796 : f32 to vector<2x7x7xf32>
    %798 = arith.mulf %797, %787 : vector<2x7x7xf32>
    %799 = arith.addf %785, %798 : vector<2x7x7xf32>
    %c9_389 = arith.constant 9 : index
    %c0_390 = arith.constant 0 : index
    %c0_391 = arith.constant 0 : index
    %c1_392 = arith.constant 1 : index
    %800 = vector.load %arg0[%c9_389, %c0_390, %c0_391, %c1_392] : memref<16x2x8x8xf32, #tpu.memory_space<vmem>>, vector<1x2x7x7xf32>
    %801 = vector.shape_cast %800 : vector<1x2x7x7xf32> to vector<2x7x7xf32>
    %c3_393 = arith.constant 3 : index
    %802 = memref.load %arg1[%c3_393] : memref<48xf32, #tpu.memory_space<smem>>
    %803 = vector.broadcast %802 : f32 to vector<2x7x7xf32>
    %804 = arith.mulf %803, %801 : vector<2x7x7xf32>
    %805 = arith.addf %791, %804 : vector<2x7x7xf32>
    %c19_394 = arith.constant 19 : index
    %806 = memref.load %arg1[%c19_394] : memref<48xf32, #tpu.memory_space<smem>>
    %807 = vector.broadcast %806 : f32 to vector<2x7x7xf32>
    %808 = arith.mulf %807, %801 : vector<2x7x7xf32>
    %809 = arith.addf %795, %808 : vector<2x7x7xf32>
    %c35_395 = arith.constant 35 : index
    %810 = memref.load %arg1[%c35_395] : memref<48xf32, #tpu.memory_space<smem>>
    %811 = vector.broadcast %810 : f32 to vector<2x7x7xf32>
    %812 = arith.mulf %811, %801 : vector<2x7x7xf32>
    %813 = arith.addf %799, %812 : vector<2x7x7xf32>
    %c14_396 = arith.constant 14 : index
    %c0_397 = arith.constant 0 : index
    %c0_398 = arith.constant 0 : index
    %c0_399 = arith.constant 0 : index
    %814 = vector.load %arg0[%c14_396, %c0_397, %c0_398, %c0_399] : memref<16x2x8x8xf32, #tpu.memory_space<vmem>>, vector<1x2x7x7xf32>
    %815 = vector.shape_cast %814 : vector<1x2x7x7xf32> to vector<2x7x7xf32>
    %c4_400 = arith.constant 4 : index
    %816 = memref.load %arg1[%c4_400] : memref<48xf32, #tpu.memory_space<smem>>
    %817 = vector.broadcast %816 : f32 to vector<2x7x7xf32>
    %818 = arith.mulf %817, %815 : vector<2x7x7xf32>
    %819 = arith.addf %805, %818 : vector<2x7x7xf32>
    %c20_401 = arith.constant 20 : index
    %820 = memref.load %arg1[%c20_401] : memref<48xf32, #tpu.memory_space<smem>>
    %821 = vector.broadcast %820 : f32 to vector<2x7x7xf32>
    %822 = arith.mulf %821, %815 : vector<2x7x7xf32>
    %823 = arith.addf %809, %822 : vector<2x7x7xf32>
    %c36_402 = arith.constant 36 : index
    %824 = memref.load %arg1[%c36_402] : memref<48xf32, #tpu.memory_space<smem>>
    %825 = vector.broadcast %824 : f32 to vector<2x7x7xf32>
    %826 = arith.mulf %825, %815 : vector<2x7x7xf32>
    %827 = arith.addf %813, %826 : vector<2x7x7xf32>
    %c15_403 = arith.constant 15 : index
    %c0_404 = arith.constant 0 : index
    %c0_405 = arith.constant 0 : index
    %c0_406 = arith.constant 0 : index
    %828 = vector.load %arg0[%c15_403, %c0_404, %c0_405, %c0_406] : memref<16x2x8x8xf32, #tpu.memory_space<vmem>>, vector<1x2x7x7xf32>
    %829 = vector.shape_cast %828 : vector<1x2x7x7xf32> to vector<2x7x7xf32>
    %c5_407 = arith.constant 5 : index
    %830 = memref.load %arg1[%c5_407] : memref<48xf32, #tpu.memory_space<smem>>
    %831 = vector.broadcast %830 : f32 to vector<2x7x7xf32>
    %832 = arith.mulf %831, %829 : vector<2x7x7xf32>
    %833 = arith.addf %819, %832 : vector<2x7x7xf32>
    %c21_408 = arith.constant 21 : index
    %834 = memref.load %arg1[%c21_408] : memref<48xf32, #tpu.memory_space<smem>>
    %835 = vector.broadcast %834 : f32 to vector<2x7x7xf32>
    %836 = arith.mulf %835, %829 : vector<2x7x7xf32>
    %837 = arith.addf %823, %836 : vector<2x7x7xf32>
    %c37_409 = arith.constant 37 : index
    %838 = memref.load %arg1[%c37_409] : memref<48xf32, #tpu.memory_space<smem>>
    %839 = vector.broadcast %838 : f32 to vector<2x7x7xf32>
    %840 = arith.mulf %839, %829 : vector<2x7x7xf32>
    %841 = arith.addf %827, %840 : vector<2x7x7xf32>
    %c12_410 = arith.constant 12 : index
    %c0_411 = arith.constant 0 : index
    %c0_412 = arith.constant 0 : index
    %c1_413 = arith.constant 1 : index
    %842 = vector.load %arg0[%c12_410, %c0_411, %c0_412, %c1_413] : memref<16x2x8x8xf32, #tpu.memory_space<vmem>>, vector<1x2x7x7xf32>
    %843 = vector.shape_cast %842 : vector<1x2x7x7xf32> to vector<2x7x7xf32>
    %c6_414 = arith.constant 6 : index
    %844 = memref.load %arg1[%c6_414] : memref<48xf32, #tpu.memory_space<smem>>
    %845 = vector.broadcast %844 : f32 to vector<2x7x7xf32>
    %846 = arith.mulf %845, %843 : vector<2x7x7xf32>
    %847 = arith.addf %833, %846 : vector<2x7x7xf32>
    %c22_415 = arith.constant 22 : index
    %848 = memref.load %arg1[%c22_415] : memref<48xf32, #tpu.memory_space<smem>>
    %849 = vector.broadcast %848 : f32 to vector<2x7x7xf32>
    %850 = arith.mulf %849, %843 : vector<2x7x7xf32>
    %851 = arith.addf %837, %850 : vector<2x7x7xf32>
    %c38_416 = arith.constant 38 : index
    %852 = memref.load %arg1[%c38_416] : memref<48xf32, #tpu.memory_space<smem>>
    %853 = vector.broadcast %852 : f32 to vector<2x7x7xf32>
    %854 = arith.mulf %853, %843 : vector<2x7x7xf32>
    %855 = arith.addf %841, %854 : vector<2x7x7xf32>
    %c13_417 = arith.constant 13 : index
    %c0_418 = arith.constant 0 : index
    %c0_419 = arith.constant 0 : index
    %c1_420 = arith.constant 1 : index
    %856 = vector.load %arg0[%c13_417, %c0_418, %c0_419, %c1_420] : memref<16x2x8x8xf32, #tpu.memory_space<vmem>>, vector<1x2x7x7xf32>
    %857 = vector.shape_cast %856 : vector<1x2x7x7xf32> to vector<2x7x7xf32>
    %c7_421 = arith.constant 7 : index
    %858 = memref.load %arg1[%c7_421] : memref<48xf32, #tpu.memory_space<smem>>
    %859 = vector.broadcast %858 : f32 to vector<2x7x7xf32>
    %860 = arith.mulf %859, %857 : vector<2x7x7xf32>
    %861 = arith.addf %847, %860 : vector<2x7x7xf32>
    %c23_422 = arith.constant 23 : index
    %862 = memref.load %arg1[%c23_422] : memref<48xf32, #tpu.memory_space<smem>>
    %863 = vector.broadcast %862 : f32 to vector<2x7x7xf32>
    %864 = arith.mulf %863, %857 : vector<2x7x7xf32>
    %865 = arith.addf %851, %864 : vector<2x7x7xf32>
    %c39_423 = arith.constant 39 : index
    %866 = memref.load %arg1[%c39_423] : memref<48xf32, #tpu.memory_space<smem>>
    %867 = vector.broadcast %866 : f32 to vector<2x7x7xf32>
    %868 = arith.mulf %867, %857 : vector<2x7x7xf32>
    %869 = arith.addf %855, %868 : vector<2x7x7xf32>
    %c2_424 = arith.constant 2 : index
    %c0_425 = arith.constant 0 : index
    %c1_426 = arith.constant 1 : index
    %c0_427 = arith.constant 0 : index
    %870 = vector.load %arg0[%c2_424, %c0_425, %c1_426, %c0_427] : memref<16x2x8x8xf32, #tpu.memory_space<vmem>>, vector<1x2x7x7xf32>
    %871 = vector.shape_cast %870 : vector<1x2x7x7xf32> to vector<2x7x7xf32>
    %c8_428 = arith.constant 8 : index
    %872 = memref.load %arg1[%c8_428] : memref<48xf32, #tpu.memory_space<smem>>
    %873 = vector.broadcast %872 : f32 to vector<2x7x7xf32>
    %874 = arith.mulf %873, %871 : vector<2x7x7xf32>
    %875 = arith.addf %861, %874 : vector<2x7x7xf32>
    %c24_429 = arith.constant 24 : index
    %876 = memref.load %arg1[%c24_429] : memref<48xf32, #tpu.memory_space<smem>>
    %877 = vector.broadcast %876 : f32 to vector<2x7x7xf32>
    %878 = arith.mulf %877, %871 : vector<2x7x7xf32>
    %879 = arith.addf %865, %878 : vector<2x7x7xf32>
    %c40_430 = arith.constant 40 : index
    %880 = memref.load %arg1[%c40_430] : memref<48xf32, #tpu.memory_space<smem>>
    %881 = vector.broadcast %880 : f32 to vector<2x7x7xf32>
    %882 = arith.mulf %881, %871 : vector<2x7x7xf32>
    %883 = arith.addf %869, %882 : vector<2x7x7xf32>
    %c3_431 = arith.constant 3 : index
    %c0_432 = arith.constant 0 : index
    %c1_433 = arith.constant 1 : index
    %c0_434 = arith.constant 0 : index
    %884 = vector.load %arg0[%c3_431, %c0_432, %c1_433, %c0_434] : memref<16x2x8x8xf32, #tpu.memory_space<vmem>>, vector<1x2x7x7xf32>
    %885 = vector.shape_cast %884 : vector<1x2x7x7xf32> to vector<2x7x7xf32>
    %c9_435 = arith.constant 9 : index
    %886 = memref.load %arg1[%c9_435] : memref<48xf32, #tpu.memory_space<smem>>
    %887 = vector.broadcast %886 : f32 to vector<2x7x7xf32>
    %888 = arith.mulf %887, %885 : vector<2x7x7xf32>
    %889 = arith.addf %875, %888 : vector<2x7x7xf32>
    %c25_436 = arith.constant 25 : index
    %890 = memref.load %arg1[%c25_436] : memref<48xf32, #tpu.memory_space<smem>>
    %891 = vector.broadcast %890 : f32 to vector<2x7x7xf32>
    %892 = arith.mulf %891, %885 : vector<2x7x7xf32>
    %893 = arith.addf %879, %892 : vector<2x7x7xf32>
    %c41_437 = arith.constant 41 : index
    %894 = memref.load %arg1[%c41_437] : memref<48xf32, #tpu.memory_space<smem>>
    %895 = vector.broadcast %894 : f32 to vector<2x7x7xf32>
    %896 = arith.mulf %895, %885 : vector<2x7x7xf32>
    %897 = arith.addf %883, %896 : vector<2x7x7xf32>
    %c0_438 = arith.constant 0 : index
    %c0_439 = arith.constant 0 : index
    %c1_440 = arith.constant 1 : index
    %c1_441 = arith.constant 1 : index
    %898 = vector.load %arg0[%c0_438, %c0_439, %c1_440, %c1_441] : memref<16x2x8x8xf32, #tpu.memory_space<vmem>>, vector<1x2x7x7xf32>
    %899 = vector.shape_cast %898 : vector<1x2x7x7xf32> to vector<2x7x7xf32>
    %c10_442 = arith.constant 10 : index
    %900 = memref.load %arg1[%c10_442] : memref<48xf32, #tpu.memory_space<smem>>
    %901 = vector.broadcast %900 : f32 to vector<2x7x7xf32>
    %902 = arith.mulf %901, %899 : vector<2x7x7xf32>
    %903 = arith.addf %889, %902 : vector<2x7x7xf32>
    %c26_443 = arith.constant 26 : index
    %904 = memref.load %arg1[%c26_443] : memref<48xf32, #tpu.memory_space<smem>>
    %905 = vector.broadcast %904 : f32 to vector<2x7x7xf32>
    %906 = arith.mulf %905, %899 : vector<2x7x7xf32>
    %907 = arith.addf %893, %906 : vector<2x7x7xf32>
    %c42_444 = arith.constant 42 : index
    %908 = memref.load %arg1[%c42_444] : memref<48xf32, #tpu.memory_space<smem>>
    %909 = vector.broadcast %908 : f32 to vector<2x7x7xf32>
    %910 = arith.mulf %909, %899 : vector<2x7x7xf32>
    %911 = arith.addf %897, %910 : vector<2x7x7xf32>
    %c1_445 = arith.constant 1 : index
    %c0_446 = arith.constant 0 : index
    %c1_447 = arith.constant 1 : index
    %c1_448 = arith.constant 1 : index
    %912 = vector.load %arg0[%c1_445, %c0_446, %c1_447, %c1_448] : memref<16x2x8x8xf32, #tpu.memory_space<vmem>>, vector<1x2x7x7xf32>
    %913 = vector.shape_cast %912 : vector<1x2x7x7xf32> to vector<2x7x7xf32>
    %c11_449 = arith.constant 11 : index
    %914 = memref.load %arg1[%c11_449] : memref<48xf32, #tpu.memory_space<smem>>
    %915 = vector.broadcast %914 : f32 to vector<2x7x7xf32>
    %916 = arith.mulf %915, %913 : vector<2x7x7xf32>
    %917 = arith.addf %903, %916 : vector<2x7x7xf32>
    %c27_450 = arith.constant 27 : index
    %918 = memref.load %arg1[%c27_450] : memref<48xf32, #tpu.memory_space<smem>>
    %919 = vector.broadcast %918 : f32 to vector<2x7x7xf32>
    %920 = arith.mulf %919, %913 : vector<2x7x7xf32>
    %921 = arith.addf %907, %920 : vector<2x7x7xf32>
    %c43_451 = arith.constant 43 : index
    %922 = memref.load %arg1[%c43_451] : memref<48xf32, #tpu.memory_space<smem>>
    %923 = vector.broadcast %922 : f32 to vector<2x7x7xf32>
    %924 = arith.mulf %923, %913 : vector<2x7x7xf32>
    %925 = arith.addf %911, %924 : vector<2x7x7xf32>
    %c6_452 = arith.constant 6 : index
    %c0_453 = arith.constant 0 : index
    %c1_454 = arith.constant 1 : index
    %c0_455 = arith.constant 0 : index
    %926 = vector.load %arg0[%c6_452, %c0_453, %c1_454, %c0_455] : memref<16x2x8x8xf32, #tpu.memory_space<vmem>>, vector<1x2x7x7xf32>
    %927 = vector.shape_cast %926 : vector<1x2x7x7xf32> to vector<2x7x7xf32>
    %c12_456 = arith.constant 12 : index
    %928 = memref.load %arg1[%c12_456] : memref<48xf32, #tpu.memory_space<smem>>
    %929 = vector.broadcast %928 : f32 to vector<2x7x7xf32>
    %930 = arith.mulf %929, %927 : vector<2x7x7xf32>
    %931 = arith.addf %917, %930 : vector<2x7x7xf32>
    %c28_457 = arith.constant 28 : index
    %932 = memref.load %arg1[%c28_457] : memref<48xf32, #tpu.memory_space<smem>>
    %933 = vector.broadcast %932 : f32 to vector<2x7x7xf32>
    %934 = arith.mulf %933, %927 : vector<2x7x7xf32>
    %935 = arith.addf %921, %934 : vector<2x7x7xf32>
    %c44_458 = arith.constant 44 : index
    %936 = memref.load %arg1[%c44_458] : memref<48xf32, #tpu.memory_space<smem>>
    %937 = vector.broadcast %936 : f32 to vector<2x7x7xf32>
    %938 = arith.mulf %937, %927 : vector<2x7x7xf32>
    %939 = arith.addf %925, %938 : vector<2x7x7xf32>
    %c7_459 = arith.constant 7 : index
    %c0_460 = arith.constant 0 : index
    %c1_461 = arith.constant 1 : index
    %c0_462 = arith.constant 0 : index
    %940 = vector.load %arg0[%c7_459, %c0_460, %c1_461, %c0_462] : memref<16x2x8x8xf32, #tpu.memory_space<vmem>>, vector<1x2x7x7xf32>
    %941 = vector.shape_cast %940 : vector<1x2x7x7xf32> to vector<2x7x7xf32>
    %c13_463 = arith.constant 13 : index
    %942 = memref.load %arg1[%c13_463] : memref<48xf32, #tpu.memory_space<smem>>
    %943 = vector.broadcast %942 : f32 to vector<2x7x7xf32>
    %944 = arith.mulf %943, %941 : vector<2x7x7xf32>
    %945 = arith.addf %931, %944 : vector<2x7x7xf32>
    %c29_464 = arith.constant 29 : index
    %946 = memref.load %arg1[%c29_464] : memref<48xf32, #tpu.memory_space<smem>>
    %947 = vector.broadcast %946 : f32 to vector<2x7x7xf32>
    %948 = arith.mulf %947, %941 : vector<2x7x7xf32>
    %949 = arith.addf %935, %948 : vector<2x7x7xf32>
    %c45_465 = arith.constant 45 : index
    %950 = memref.load %arg1[%c45_465] : memref<48xf32, #tpu.memory_space<smem>>
    %951 = vector.broadcast %950 : f32 to vector<2x7x7xf32>
    %952 = arith.mulf %951, %941 : vector<2x7x7xf32>
    %953 = arith.addf %939, %952 : vector<2x7x7xf32>
    %c4_466 = arith.constant 4 : index
    %c0_467 = arith.constant 0 : index
    %c1_468 = arith.constant 1 : index
    %c1_469 = arith.constant 1 : index
    %954 = vector.load %arg0[%c4_466, %c0_467, %c1_468, %c1_469] : memref<16x2x8x8xf32, #tpu.memory_space<vmem>>, vector<1x2x7x7xf32>
    %955 = vector.shape_cast %954 : vector<1x2x7x7xf32> to vector<2x7x7xf32>
    %c14_470 = arith.constant 14 : index
    %956 = memref.load %arg1[%c14_470] : memref<48xf32, #tpu.memory_space<smem>>
    %957 = vector.broadcast %956 : f32 to vector<2x7x7xf32>
    %958 = arith.mulf %957, %955 : vector<2x7x7xf32>
    %959 = arith.addf %945, %958 : vector<2x7x7xf32>
    %c30_471 = arith.constant 30 : index
    %960 = memref.load %arg1[%c30_471] : memref<48xf32, #tpu.memory_space<smem>>
    %961 = vector.broadcast %960 : f32 to vector<2x7x7xf32>
    %962 = arith.mulf %961, %955 : vector<2x7x7xf32>
    %963 = arith.addf %949, %962 : vector<2x7x7xf32>
    %c46_472 = arith.constant 46 : index
    %964 = memref.load %arg1[%c46_472] : memref<48xf32, #tpu.memory_space<smem>>
    %965 = vector.broadcast %964 : f32 to vector<2x7x7xf32>
    %966 = arith.mulf %965, %955 : vector<2x7x7xf32>
    %967 = arith.addf %953, %966 : vector<2x7x7xf32>
    %c5_473 = arith.constant 5 : index
    %c0_474 = arith.constant 0 : index
    %c1_475 = arith.constant 1 : index
    %c1_476 = arith.constant 1 : index
    %968 = vector.load %arg0[%c5_473, %c0_474, %c1_475, %c1_476] : memref<16x2x8x8xf32, #tpu.memory_space<vmem>>, vector<1x2x7x7xf32>
    %969 = vector.shape_cast %968 : vector<1x2x7x7xf32> to vector<2x7x7xf32>
    %c15_477 = arith.constant 15 : index
    %970 = memref.load %arg1[%c15_477] : memref<48xf32, #tpu.memory_space<smem>>
    %971 = vector.broadcast %970 : f32 to vector<2x7x7xf32>
    %972 = arith.mulf %971, %969 : vector<2x7x7xf32>
    %973 = arith.addf %959, %972 : vector<2x7x7xf32>
    %c31_478 = arith.constant 31 : index
    %974 = memref.load %arg1[%c31_478] : memref<48xf32, #tpu.memory_space<smem>>
    %975 = vector.broadcast %974 : f32 to vector<2x7x7xf32>
    %976 = arith.mulf %975, %969 : vector<2x7x7xf32>
    %977 = arith.addf %963, %976 : vector<2x7x7xf32>
    %c47_479 = arith.constant 47 : index
    %978 = memref.load %arg1[%c47_479] : memref<48xf32, #tpu.memory_space<smem>>
    %979 = vector.broadcast %978 : f32 to vector<2x7x7xf32>
    %980 = arith.mulf %979, %969 : vector<2x7x7xf32>
    %981 = arith.addf %967, %980 : vector<2x7x7xf32>
    %c0_480 = arith.constant 0 : index
    %982 = memref.load %arg2[%c0_480] : memref<3xf32, #tpu.memory_space<smem>>
    %983 = vector.broadcast %982 : f32 to vector<2x7x7xf32>
    %984 = arith.addf %973, %983 : vector<2x7x7xf32>
    %cst_481 = arith.constant 0.000000e+00 : f32
    %985 = vector.broadcast %cst_481 : f32 to vector<2x7x7xf32>
    %986 = arith.maximumf %984, %985 : vector<2x7x7xf32>
    %c0_482 = arith.constant 0 : index
    %c0_483 = arith.constant 0 : index
    %c0_484 = arith.constant 0 : index
    %c1_485 = arith.constant 1 : index
    %c1_486 = arith.constant 1 : index
    %987 = vector.load %arg10[%c0_482, %c0_483, %c0_484, %c1_485, %c1_486] : memref<4x3x2x8x8xf32, #tpu.memory_space<vmem>>, vector<1x1x2x7x7xf32>
    %988 = vector.shape_cast %987 : vector<1x1x2x7x7xf32> to vector<2x7x7xf32>
    %989 = vector.shape_cast %986 : vector<2x7x7xf32> to vector<1x1x2x7x7xf32>
    tpu.vector_store %arg10[%c0_482, %c0_483, %c0_484, %c1_485, %c1_486], %989 {strides = array<i32>} : memref<4x3x2x8x8xf32, #tpu.memory_space<vmem>>, vector<1x1x2x7x7xf32>,
    %c1_487 = arith.constant 1 : index
    %990 = memref.load %arg2[%c1_487] : memref<3xf32, #tpu.memory_space<smem>>
    %991 = vector.broadcast %990 : f32 to vector<2x7x7xf32>
    %992 = arith.addf %977, %991 : vector<2x7x7xf32>
    %cst_488 = arith.constant 0.000000e+00 : f32
    %993 = vector.broadcast %cst_488 : f32 to vector<2x7x7xf32>
    %994 = arith.maximumf %992, %993 : vector<2x7x7xf32>
    %c0_489 = arith.constant 0 : index
    %c1_490 = arith.constant 1 : index
    %c0_491 = arith.constant 0 : index
    %c1_492 = arith.constant 1 : index
    %c1_493 = arith.constant 1 : index
    %995 = vector.load %arg10[%c0_489, %c1_490, %c0_491, %c1_492, %c1_493] : memref<4x3x2x8x8xf32, #tpu.memory_space<vmem>>, vector<1x1x2x7x7xf32>
    %996 = vector.shape_cast %995 : vector<1x1x2x7x7xf32> to vector<2x7x7xf32>
    %997 = vector.shape_cast %994 : vector<2x7x7xf32> to vector<1x1x2x7x7xf32>
    tpu.vector_store %arg10[%c0_489, %c1_490, %c0_491, %c1_492, %c1_493], %997 {strides = array<i32>} : memref<4x3x2x8x8xf32, #tpu.memory_space<vmem>>, vector<1x1x2x7x7xf32>,
    %c2_494 = arith.constant 2 : index
    %998 = memref.load %arg2[%c2_494] : memref<3xf32, #tpu.memory_space<smem>>
    %999 = vector.broadcast %998 : f32 to vector<2x7x7xf32>
    %1000 = arith.addf %981, %999 : vector<2x7x7xf32>
    %cst_495 = arith.constant 0.000000e+00 : f32
    %1001 = vector.broadcast %cst_495 : f32 to vector<2x7x7xf32>
    %1002 = arith.maximumf %1000, %1001 : vector<2x7x7xf32>
    %c0_496 = arith.constant 0 : index
    %c2_497 = arith.constant 2 : index
    %c0_498 = arith.constant 0 : index
    %c1_499 = arith.constant 1 : index
    %c1_500 = arith.constant 1 : index
    %1003 = vector.load %arg10[%c0_496, %c2_497, %c0_498, %c1_499, %c1_500] : memref<4x3x2x8x8xf32, #tpu.memory_space<vmem>>, vector<1x1x2x7x7xf32>
    %1004 = vector.shape_cast %1003 : vector<1x1x2x7x7xf32> to vector<2x7x7xf32>
    %1005 = vector.shape_cast %1002 : vector<2x7x7xf32> to vector<1x1x2x7x7xf32>
    tpu.vector_store %arg10[%c0_496, %c2_497, %c0_498, %c1_499, %c1_500], %1005 {strides = array<i32>} : memref<4x3x2x8x8xf32, #tpu.memory_space<vmem>>, vector<1x1x2x7x7xf32>,
    %cst_501 = arith.constant 0.000000e+00 : f32
    %1006 = vector.broadcast %cst_501 : f32 to vector<2x7x7xf32>
    %cst_502 = arith.constant 0.000000e+00 : f32
    %1007 = vector.broadcast %cst_502 : f32 to vector<2x7x7xf32>
    %cst_503 = arith.constant 0.000000e+00 : f32
    %1008 = vector.broadcast %cst_503 : f32 to vector<2x7x7xf32>
    %c0_504 = arith.constant 0 : index
    %c0_505 = arith.constant 0 : index
    %c0_506 = arith.constant 0 : index
    %c0_507 = arith.constant 0 : index
    %c0_508 = arith.constant 0 : index
    %1009 = vector.load %arg10[%c0_504, %c0_505, %c0_506, %c0_507, %c0_508] : memref<4x3x2x8x8xf32, #tpu.memory_space<vmem>>, vector<1x1x2x7x7xf32>
    %1010 = vector.shape_cast %1009 : vector<1x1x2x7x7xf32> to vector<2x7x7xf32>
    %c0_509 = arith.constant 0 : index
    %1011 = memref.load %arg3[%c0_509] : memref<144xf32, #tpu.memory_space<smem>>
    %1012 = vector.broadcast %1011 : f32 to vector<2x7x7xf32>
    %1013 = arith.mulf %1012, %1010 : vector<2x7x7xf32>
    %1014 = arith.addf %1006, %1013 : vector<2x7x7xf32>
    %c48 = arith.constant 48 : index
    %1015 = memref.load %arg3[%c48] : memref<144xf32, #tpu.memory_space<smem>>
    %1016 = vector.broadcast %1015 : f32 to vector<2x7x7xf32>
    %1017 = arith.mulf %1016, %1010 : vector<2x7x7xf32>
    %1018 = arith.addf %1007, %1017 : vector<2x7x7xf32>
    %c96 = arith.constant 96 : index
    %1019 = memref.load %arg3[%c96] : memref<144xf32, #tpu.memory_space<smem>>
    %1020 = vector.broadcast %1019 : f32 to vector<2x7x7xf32>
    %1021 = arith.mulf %1020, %1010 : vector<2x7x7xf32>
    %1022 = arith.addf %1008, %1021 : vector<2x7x7xf32>
    %c1_510 = arith.constant 1 : index
    %c0_511 = arith.constant 0 : index
    %c0_512 = arith.constant 0 : index
    %c0_513 = arith.constant 0 : index
    %c0_514 = arith.constant 0 : index
    %1023 = vector.load %arg10[%c1_510, %c0_511, %c0_512, %c0_513, %c0_514] : memref<4x3x2x8x8xf32, #tpu.memory_space<vmem>>, vector<1x1x2x7x7xf32>
    %1024 = vector.shape_cast %1023 : vector<1x1x2x7x7xf32> to vector<2x7x7xf32>
    %c1_515 = arith.constant 1 : index
    %1025 = memref.load %arg3[%c1_515] : memref<144xf32, #tpu.memory_space<smem>>
    %1026 = vector.broadcast %1025 : f32 to vector<2x7x7xf32>
    %1027 = arith.mulf %1026, %1024 : vector<2x7x7xf32>
    %1028 = arith.addf %1014, %1027 : vector<2x7x7xf32>
    %c49 = arith.constant 49 : index
    %1029 = memref.load %arg3[%c49] : memref<144xf32, #tpu.memory_space<smem>>
    %1030 = vector.broadcast %1029 : f32 to vector<2x7x7xf32>
    %1031 = arith.mulf %1030, %1024 : vector<2x7x7xf32>
    %1032 = arith.addf %1018, %1031 : vector<2x7x7xf32>
    %c97 = arith.constant 97 : index
    %1033 = memref.load %arg3[%c97] : memref<144xf32, #tpu.memory_space<smem>>
    %1034 = vector.broadcast %1033 : f32 to vector<2x7x7xf32>
    %1035 = arith.mulf %1034, %1024 : vector<2x7x7xf32>
    %1036 = arith.addf %1022, %1035 : vector<2x7x7xf32>
    %c0_516 = arith.constant 0 : index
    %c0_517 = arith.constant 0 : index
    %c0_518 = arith.constant 0 : index
    %c0_519 = arith.constant 0 : index
    %c1_520 = arith.constant 1 : index
    %1037 = vector.load %arg10[%c0_516, %c0_517, %c0_518, %c0_519, %c1_520] : memref<4x3x2x8x8xf32, #tpu.memory_space<vmem>>, vector<1x1x2x7x7xf32>
    %1038 = vector.shape_cast %1037 : vector<1x1x2x7x7xf32> to vector<2x7x7xf32>
    %c2_521 = arith.constant 2 : index
    %1039 = memref.load %arg3[%c2_521] : memref<144xf32, #tpu.memory_space<smem>>
    %1040 = vector.broadcast %1039 : f32 to vector<2x7x7xf32>
    %1041 = arith.mulf %1040, %1038 : vector<2x7x7xf32>
    %1042 = arith.addf %1028, %1041 : vector<2x7x7xf32>
    %c50 = arith.constant 50 : index
    %1043 = memref.load %arg3[%c50] : memref<144xf32, #tpu.memory_space<smem>>
    %1044 = vector.broadcast %1043 : f32 to vector<2x7x7xf32>
    %1045 = arith.mulf %1044, %1038 : vector<2x7x7xf32>
    %1046 = arith.addf %1032, %1045 : vector<2x7x7xf32>
    %c98 = arith.constant 98 : index
    %1047 = memref.load %arg3[%c98] : memref<144xf32, #tpu.memory_space<smem>>
    %1048 = vector.broadcast %1047 : f32 to vector<2x7x7xf32>
    %1049 = arith.mulf %1048, %1038 : vector<2x7x7xf32>
    %1050 = arith.addf %1036, %1049 : vector<2x7x7xf32>
    %c1_522 = arith.constant 1 : index
    %c0_523 = arith.constant 0 : index
    %c0_524 = arith.constant 0 : index
    %c0_525 = arith.constant 0 : index
    %c1_526 = arith.constant 1 : index
    %1051 = vector.load %arg10[%c1_522, %c0_523, %c0_524, %c0_525, %c1_526] : memref<4x3x2x8x8xf32, #tpu.memory_space<vmem>>, vector<1x1x2x7x7xf32>
    %1052 = vector.shape_cast %1051 : vector<1x1x2x7x7xf32> to vector<2x7x7xf32>
    %c3_527 = arith.constant 3 : index
    %1053 = memref.load %arg3[%c3_527] : memref<144xf32, #tpu.memory_space<smem>>
    %1054 = vector.broadcast %1053 : f32 to vector<2x7x7xf32>
    %1055 = arith.mulf %1054, %1052 : vector<2x7x7xf32>
    %1056 = arith.addf %1042, %1055 : vector<2x7x7xf32>
    %c51 = arith.constant 51 : index
    %1057 = memref.load %arg3[%c51] : memref<144xf32, #tpu.memory_space<smem>>
    %1058 = vector.broadcast %1057 : f32 to vector<2x7x7xf32>
    %1059 = arith.mulf %1058, %1052 : vector<2x7x7xf32>
    %1060 = arith.addf %1046, %1059 : vector<2x7x7xf32>
    %c99 = arith.constant 99 : index
    %1061 = memref.load %arg3[%c99] : memref<144xf32, #tpu.memory_space<smem>>
    %1062 = vector.broadcast %1061 : f32 to vector<2x7x7xf32>
    %1063 = arith.mulf %1062, %1052 : vector<2x7x7xf32>
    %1064 = arith.addf %1050, %1063 : vector<2x7x7xf32>
    %c2_528 = arith.constant 2 : index
    %c0_529 = arith.constant 0 : index
    %c0_530 = arith.constant 0 : index
    %c0_531 = arith.constant 0 : index
    %c0_532 = arith.constant 0 : index
    %1065 = vector.load %arg10[%c2_528, %c0_529, %c0_530, %c0_531, %c0_532] : memref<4x3x2x8x8xf32, #tpu.memory_space<vmem>>, vector<1x1x2x7x7xf32>
    %1066 = vector.shape_cast %1065 : vector<1x1x2x7x7xf32> to vector<2x7x7xf32>
    %c4_533 = arith.constant 4 : index
    %1067 = memref.load %arg3[%c4_533] : memref<144xf32, #tpu.memory_space<smem>>
    %1068 = vector.broadcast %1067 : f32 to vector<2x7x7xf32>
    %1069 = arith.mulf %1068, %1066 : vector<2x7x7xf32>
    %1070 = arith.addf %1056, %1069 : vector<2x7x7xf32>
    %c52 = arith.constant 52 : index
    %1071 = memref.load %arg3[%c52] : memref<144xf32, #tpu.memory_space<smem>>
    %1072 = vector.broadcast %1071 : f32 to vector<2x7x7xf32>
    %1073 = arith.mulf %1072, %1066 : vector<2x7x7xf32>
    %1074 = arith.addf %1060, %1073 : vector<2x7x7xf32>
    %c100 = arith.constant 100 : index
    %1075 = memref.load %arg3[%c100] : memref<144xf32, #tpu.memory_space<smem>>
    %1076 = vector.broadcast %1075 : f32 to vector<2x7x7xf32>
    %1077 = arith.mulf %1076, %1066 : vector<2x7x7xf32>
    %1078 = arith.addf %1064, %1077 : vector<2x7x7xf32>
    %c3_534 = arith.constant 3 : index
    %c0_535 = arith.constant 0 : index
    %c0_536 = arith.constant 0 : index
    %c0_537 = arith.constant 0 : index
    %c0_538 = arith.constant 0 : index
    %1079 = vector.load %arg10[%c3_534, %c0_535, %c0_536, %c0_537, %c0_538] : memref<4x3x2x8x8xf32, #tpu.memory_space<vmem>>, vector<1x1x2x7x7xf32>
    %1080 = vector.shape_cast %1079 : vector<1x1x2x7x7xf32> to vector<2x7x7xf32>
    %c5_539 = arith.constant 5 : index
    %1081 = memref.load %arg3[%c5_539] : memref<144xf32, #tpu.memory_space<smem>>
    %1082 = vector.broadcast %1081 : f32 to vector<2x7x7xf32>
    %1083 = arith.mulf %1082, %1080 : vector<2x7x7xf32>
    %1084 = arith.addf %1070, %1083 : vector<2x7x7xf32>
    %c53 = arith.constant 53 : index
    %1085 = memref.load %arg3[%c53] : memref<144xf32, #tpu.memory_space<smem>>
    %1086 = vector.broadcast %1085 : f32 to vector<2x7x7xf32>
    %1087 = arith.mulf %1086, %1080 : vector<2x7x7xf32>
    %1088 = arith.addf %1074, %1087 : vector<2x7x7xf32>
    %c101 = arith.constant 101 : index
    %1089 = memref.load %arg3[%c101] : memref<144xf32, #tpu.memory_space<smem>>
    %1090 = vector.broadcast %1089 : f32 to vector<2x7x7xf32>
    %1091 = arith.mulf %1090, %1080 : vector<2x7x7xf32>
    %1092 = arith.addf %1078, %1091 : vector<2x7x7xf32>
    %c2_540 = arith.constant 2 : index
    %c0_541 = arith.constant 0 : index
    %c0_542 = arith.constant 0 : index
    %c0_543 = arith.constant 0 : index
    %c1_544 = arith.constant 1 : index
    %1093 = vector.load %arg10[%c2_540, %c0_541, %c0_542, %c0_543, %c1_544] : memref<4x3x2x8x8xf32, #tpu.memory_space<vmem>>, vector<1x1x2x7x7xf32>
    %1094 = vector.shape_cast %1093 : vector<1x1x2x7x7xf32> to vector<2x7x7xf32>
    %c6_545 = arith.constant 6 : index
    %1095 = memref.load %arg3[%c6_545] : memref<144xf32, #tpu.memory_space<smem>>
    %1096 = vector.broadcast %1095 : f32 to vector<2x7x7xf32>
    %1097 = arith.mulf %1096, %1094 : vector<2x7x7xf32>
    %1098 = arith.addf %1084, %1097 : vector<2x7x7xf32>
    %c54 = arith.constant 54 : index
    %1099 = memref.load %arg3[%c54] : memref<144xf32, #tpu.memory_space<smem>>
    %1100 = vector.broadcast %1099 : f32 to vector<2x7x7xf32>
    %1101 = arith.mulf %1100, %1094 : vector<2x7x7xf32>
    %1102 = arith.addf %1088, %1101 : vector<2x7x7xf32>
    %c102 = arith.constant 102 : index
    %1103 = memref.load %arg3[%c102] : memref<144xf32, #tpu.memory_space<smem>>
    %1104 = vector.broadcast %1103 : f32 to vector<2x7x7xf32>
    %1105 = arith.mulf %1104, %1094 : vector<2x7x7xf32>
    %1106 = arith.addf %1092, %1105 : vector<2x7x7xf32>
    %c3_546 = arith.constant 3 : index
    %c0_547 = arith.constant 0 : index
    %c0_548 = arith.constant 0 : index
    %c0_549 = arith.constant 0 : index
    %c1_550 = arith.constant 1 : index
    %1107 = vector.load %arg10[%c3_546, %c0_547, %c0_548, %c0_549, %c1_550] : memref<4x3x2x8x8xf32, #tpu.memory_space<vmem>>, vector<1x1x2x7x7xf32>
    %1108 = vector.shape_cast %1107 : vector<1x1x2x7x7xf32> to vector<2x7x7xf32>
    %c7_551 = arith.constant 7 : index
    %1109 = memref.load %arg3[%c7_551] : memref<144xf32, #tpu.memory_space<smem>>
    %1110 = vector.broadcast %1109 : f32 to vector<2x7x7xf32>
    %1111 = arith.mulf %1110, %1108 : vector<2x7x7xf32>
    %1112 = arith.addf %1098, %1111 : vector<2x7x7xf32>
    %c55 = arith.constant 55 : index
    %1113 = memref.load %arg3[%c55] : memref<144xf32, #tpu.memory_space<smem>>
    %1114 = vector.broadcast %1113 : f32 to vector<2x7x7xf32>
    %1115 = arith.mulf %1114, %1108 : vector<2x7x7xf32>
    %1116 = arith.addf %1102, %1115 : vector<2x7x7xf32>
    %c103 = arith.constant 103 : index
    %1117 = memref.load %arg3[%c103] : memref<144xf32, #tpu.memory_space<smem>>
    %1118 = vector.broadcast %1117 : f32 to vector<2x7x7xf32>
    %1119 = arith.mulf %1118, %1108 : vector<2x7x7xf32>
    %1120 = arith.addf %1106, %1119 : vector<2x7x7xf32>
    %c0_552 = arith.constant 0 : index
    %c0_553 = arith.constant 0 : index
    %c0_554 = arith.constant 0 : index
    %c1_555 = arith.constant 1 : index
    %c0_556 = arith.constant 0 : index
    %1121 = vector.load %arg10[%c0_552, %c0_553, %c0_554, %c1_555, %c0_556] : memref<4x3x2x8x8xf32, #tpu.memory_space<vmem>>, vector<1x1x2x7x7xf32>
    %1122 = vector.shape_cast %1121 : vector<1x1x2x7x7xf32> to vector<2x7x7xf32>
    %c8_557 = arith.constant 8 : index
    %1123 = memref.load %arg3[%c8_557] : memref<144xf32, #tpu.memory_space<smem>>
    %1124 = vector.broadcast %1123 : f32 to vector<2x7x7xf32>
    %1125 = arith.mulf %1124, %1122 : vector<2x7x7xf32>
    %1126 = arith.addf %1112, %1125 : vector<2x7x7xf32>
    %c56 = arith.constant 56 : index
    %1127 = memref.load %arg3[%c56] : memref<144xf32, #tpu.memory_space<smem>>
    %1128 = vector.broadcast %1127 : f32 to vector<2x7x7xf32>
    %1129 = arith.mulf %1128, %1122 : vector<2x7x7xf32>
    %1130 = arith.addf %1116, %1129 : vector<2x7x7xf32>
    %c104 = arith.constant 104 : index
    %1131 = memref.load %arg3[%c104] : memref<144xf32, #tpu.memory_space<smem>>
    %1132 = vector.broadcast %1131 : f32 to vector<2x7x7xf32>
    %1133 = arith.mulf %1132, %1122 : vector<2x7x7xf32>
    %1134 = arith.addf %1120, %1133 : vector<2x7x7xf32>
    %c1_558 = arith.constant 1 : index
    %c0_559 = arith.constant 0 : index
    %c0_560 = arith.constant 0 : index
    %c1_561 = arith.constant 1 : index
    %c0_562 = arith.constant 0 : index
    %1135 = vector.load %arg10[%c1_558, %c0_559, %c0_560, %c1_561, %c0_562] : memref<4x3x2x8x8xf32, #tpu.memory_space<vmem>>, vector<1x1x2x7x7xf32>
    %1136 = vector.shape_cast %1135 : vector<1x1x2x7x7xf32> to vector<2x7x7xf32>
    %c9_563 = arith.constant 9 : index
    %1137 = memref.load %arg3[%c9_563] : memref<144xf32, #tpu.memory_space<smem>>
    %1138 = vector.broadcast %1137 : f32 to vector<2x7x7xf32>
    %1139 = arith.mulf %1138, %1136 : vector<2x7x7xf32>
    %1140 = arith.addf %1126, %1139 : vector<2x7x7xf32>
    %c57 = arith.constant 57 : index
    %1141 = memref.load %arg3[%c57] : memref<144xf32, #tpu.memory_space<smem>>
    %1142 = vector.broadcast %1141 : f32 to vector<2x7x7xf32>
    %1143 = arith.mulf %1142, %1136 : vector<2x7x7xf32>
    %1144 = arith.addf %1130, %1143 : vector<2x7x7xf32>
    %c105 = arith.constant 105 : index
    %1145 = memref.load %arg3[%c105] : memref<144xf32, #tpu.memory_space<smem>>
    %1146 = vector.broadcast %1145 : f32 to vector<2x7x7xf32>
    %1147 = arith.mulf %1146, %1136 : vector<2x7x7xf32>
    %1148 = arith.addf %1134, %1147 : vector<2x7x7xf32>
    %c0_564 = arith.constant 0 : index
    %c0_565 = arith.constant 0 : index
    %c0_566 = arith.constant 0 : index
    %c1_567 = arith.constant 1 : index
    %c1_568 = arith.constant 1 : index
    %1149 = vector.load %arg10[%c0_564, %c0_565, %c0_566, %c1_567, %c1_568] : memref<4x3x2x8x8xf32, #tpu.memory_space<vmem>>, vector<1x1x2x7x7xf32>
    %1150 = vector.shape_cast %1149 : vector<1x1x2x7x7xf32> to vector<2x7x7xf32>
    %c10_569 = arith.constant 10 : index
    %1151 = memref.load %arg3[%c10_569] : memref<144xf32, #tpu.memory_space<smem>>
    %1152 = vector.broadcast %1151 : f32 to vector<2x7x7xf32>
    %1153 = arith.mulf %1152, %1150 : vector<2x7x7xf32>
    %1154 = arith.addf %1140, %1153 : vector<2x7x7xf32>
    %c58 = arith.constant 58 : index
    %1155 = memref.load %arg3[%c58] : memref<144xf32, #tpu.memory_space<smem>>
    %1156 = vector.broadcast %1155 : f32 to vector<2x7x7xf32>
    %1157 = arith.mulf %1156, %1150 : vector<2x7x7xf32>
    %1158 = arith.addf %1144, %1157 : vector<2x7x7xf32>
    %c106 = arith.constant 106 : index
    %1159 = memref.load %arg3[%c106] : memref<144xf32, #tpu.memory_space<smem>>
    %1160 = vector.broadcast %1159 : f32 to vector<2x7x7xf32>
    %1161 = arith.mulf %1160, %1150 : vector<2x7x7xf32>
    %1162 = arith.addf %1148, %1161 : vector<2x7x7xf32>
    %c1_570 = arith.constant 1 : index
    %c0_571 = arith.constant 0 : index
    %c0_572 = arith.constant 0 : index
    %c1_573 = arith.constant 1 : index
    %c1_574 = arith.constant 1 : index
    %1163 = vector.load %arg10[%c1_570, %c0_571, %c0_572, %c1_573, %c1_574] : memref<4x3x2x8x8xf32, #tpu.memory_space<vmem>>, vector<1x1x2x7x7xf32>
    %1164 = vector.shape_cast %1163 : vector<1x1x2x7x7xf32> to vector<2x7x7xf32>
    %c11_575 = arith.constant 11 : index
    %1165 = memref.load %arg3[%c11_575] : memref<144xf32, #tpu.memory_space<smem>>
    %1166 = vector.broadcast %1165 : f32 to vector<2x7x7xf32>
    %1167 = arith.mulf %1166, %1164 : vector<2x7x7xf32>
    %1168 = arith.addf %1154, %1167 : vector<2x7x7xf32>
    %c59 = arith.constant 59 : index
    %1169 = memref.load %arg3[%c59] : memref<144xf32, #tpu.memory_space<smem>>
    %1170 = vector.broadcast %1169 : f32 to vector<2x7x7xf32>
    %1171 = arith.mulf %1170, %1164 : vector<2x7x7xf32>
    %1172 = arith.addf %1158, %1171 : vector<2x7x7xf32>
    %c107 = arith.constant 107 : index
    %1173 = memref.load %arg3[%c107] : memref<144xf32, #tpu.memory_space<smem>>
    %1174 = vector.broadcast %1173 : f32 to vector<2x7x7xf32>
    %1175 = arith.mulf %1174, %1164 : vector<2x7x7xf32>
    %1176 = arith.addf %1162, %1175 : vector<2x7x7xf32>
    %c2_576 = arith.constant 2 : index
    %c0_577 = arith.constant 0 : index
    %c0_578 = arith.constant 0 : index
    %c1_579 = arith.constant 1 : index
    %c0_580 = arith.constant 0 : index
    %1177 = vector.load %arg10[%c2_576, %c0_577, %c0_578, %c1_579, %c0_580] : memref<4x3x2x8x8xf32, #tpu.memory_space<vmem>>, vector<1x1x2x7x7xf32>
    %1178 = vector.shape_cast %1177 : vector<1x1x2x7x7xf32> to vector<2x7x7xf32>
    %c12_581 = arith.constant 12 : index
    %1179 = memref.load %arg3[%c12_581] : memref<144xf32, #tpu.memory_space<smem>>
    %1180 = vector.broadcast %1179 : f32 to vector<2x7x7xf32>
    %1181 = arith.mulf %1180, %1178 : vector<2x7x7xf32>
    %1182 = arith.addf %1168, %1181 : vector<2x7x7xf32>
    %c60 = arith.constant 60 : index
    %1183 = memref.load %arg3[%c60] : memref<144xf32, #tpu.memory_space<smem>>
    %1184 = vector.broadcast %1183 : f32 to vector<2x7x7xf32>
    %1185 = arith.mulf %1184, %1178 : vector<2x7x7xf32>
    %1186 = arith.addf %1172, %1185 : vector<2x7x7xf32>
    %c108 = arith.constant 108 : index
    %1187 = memref.load %arg3[%c108] : memref<144xf32, #tpu.memory_space<smem>>
    %1188 = vector.broadcast %1187 : f32 to vector<2x7x7xf32>
    %1189 = arith.mulf %1188, %1178 : vector<2x7x7xf32>
    %1190 = arith.addf %1176, %1189 : vector<2x7x7xf32>
    %c3_582 = arith.constant 3 : index
    %c0_583 = arith.constant 0 : index
    %c0_584 = arith.constant 0 : index
    %c1_585 = arith.constant 1 : index
    %c0_586 = arith.constant 0 : index
    %1191 = vector.load %arg10[%c3_582, %c0_583, %c0_584, %c1_585, %c0_586] : memref<4x3x2x8x8xf32, #tpu.memory_space<vmem>>, vector<1x1x2x7x7xf32>
    %1192 = vector.shape_cast %1191 : vector<1x1x2x7x7xf32> to vector<2x7x7xf32>
    %c13_587 = arith.constant 13 : index
    %1193 = memref.load %arg3[%c13_587] : memref<144xf32, #tpu.memory_space<smem>>
    %1194 = vector.broadcast %1193 : f32 to vector<2x7x7xf32>
    %1195 = arith.mulf %1194, %1192 : vector<2x7x7xf32>
    %1196 = arith.addf %1182, %1195 : vector<2x7x7xf32>
    %c61 = arith.constant 61 : index
    %1197 = memref.load %arg3[%c61] : memref<144xf32, #tpu.memory_space<smem>>
    %1198 = vector.broadcast %1197 : f32 to vector<2x7x7xf32>
    %1199 = arith.mulf %1198, %1192 : vector<2x7x7xf32>
    %1200 = arith.addf %1186, %1199 : vector<2x7x7xf32>
    %c109 = arith.constant 109 : index
    %1201 = memref.load %arg3[%c109] : memref<144xf32, #tpu.memory_space<smem>>
    %1202 = vector.broadcast %1201 : f32 to vector<2x7x7xf32>
    %1203 = arith.mulf %1202, %1192 : vector<2x7x7xf32>
    %1204 = arith.addf %1190, %1203 : vector<2x7x7xf32>
    %c2_588 = arith.constant 2 : index
    %c0_589 = arith.constant 0 : index
    %c0_590 = arith.constant 0 : index
    %c1_591 = arith.constant 1 : index
    %c1_592 = arith.constant 1 : index
    %1205 = vector.load %arg10[%c2_588, %c0_589, %c0_590, %c1_591, %c1_592] : memref<4x3x2x8x8xf32, #tpu.memory_space<vmem>>, vector<1x1x2x7x7xf32>
    %1206 = vector.shape_cast %1205 : vector<1x1x2x7x7xf32> to vector<2x7x7xf32>
    %c14_593 = arith.constant 14 : index
    %1207 = memref.load %arg3[%c14_593] : memref<144xf32, #tpu.memory_space<smem>>
    %1208 = vector.broadcast %1207 : f32 to vector<2x7x7xf32>
    %1209 = arith.mulf %1208, %1206 : vector<2x7x7xf32>
    %1210 = arith.addf %1196, %1209 : vector<2x7x7xf32>
    %c62 = arith.constant 62 : index
    %1211 = memref.load %arg3[%c62] : memref<144xf32, #tpu.memory_space<smem>>
    %1212 = vector.broadcast %1211 : f32 to vector<2x7x7xf32>
    %1213 = arith.mulf %1212, %1206 : vector<2x7x7xf32>
    %1214 = arith.addf %1200, %1213 : vector<2x7x7xf32>
    %c110 = arith.constant 110 : index
    %1215 = memref.load %arg3[%c110] : memref<144xf32, #tpu.memory_space<smem>>
    %1216 = vector.broadcast %1215 : f32 to vector<2x7x7xf32>
    %1217 = arith.mulf %1216, %1206 : vector<2x7x7xf32>
    %1218 = arith.addf %1204, %1217 : vector<2x7x7xf32>
    %c3_594 = arith.constant 3 : index
    %c0_595 = arith.constant 0 : index
    %c0_596 = arith.constant 0 : index
    %c1_597 = arith.constant 1 : index
    %c1_598 = arith.constant 1 : index
    %1219 = vector.load %arg10[%c3_594, %c0_595, %c0_596, %c1_597, %c1_598] : memref<4x3x2x8x8xf32, #tpu.memory_space<vmem>>, vector<1x1x2x7x7xf32>
    %1220 = vector.shape_cast %1219 : vector<1x1x2x7x7xf32> to vector<2x7x7xf32>
    %c15_599 = arith.constant 15 : index
    %1221 = memref.load %arg3[%c15_599] : memref<144xf32, #tpu.memory_space<smem>>
    %1222 = vector.broadcast %1221 : f32 to vector<2x7x7xf32>
    %1223 = arith.mulf %1222, %1220 : vector<2x7x7xf32>
    %1224 = arith.addf %1210, %1223 : vector<2x7x7xf32>
    %c63 = arith.constant 63 : index
    %1225 = memref.load %arg3[%c63] : memref<144xf32, #tpu.memory_space<smem>>
    %1226 = vector.broadcast %1225 : f32 to vector<2x7x7xf32>
    %1227 = arith.mulf %1226, %1220 : vector<2x7x7xf32>
    %1228 = arith.addf %1214, %1227 : vector<2x7x7xf32>
    %c111 = arith.constant 111 : index
    %1229 = memref.load %arg3[%c111] : memref<144xf32, #tpu.memory_space<smem>>
    %1230 = vector.broadcast %1229 : f32 to vector<2x7x7xf32>
    %1231 = arith.mulf %1230, %1220 : vector<2x7x7xf32>
    %1232 = arith.addf %1218, %1231 : vector<2x7x7xf32>
    %c0_600 = arith.constant 0 : index
    %c1_601 = arith.constant 1 : index
    %c0_602 = arith.constant 0 : index
    %c0_603 = arith.constant 0 : index
    %c0_604 = arith.constant 0 : index
    %1233 = vector.load %arg10[%c0_600, %c1_601, %c0_602, %c0_603, %c0_604] : memref<4x3x2x8x8xf32, #tpu.memory_space<vmem>>, vector<1x1x2x7x7xf32>
    %1234 = vector.shape_cast %1233 : vector<1x1x2x7x7xf32> to vector<2x7x7xf32>
    %c16_605 = arith.constant 16 : index
    %1235 = memref.load %arg3[%c16_605] : memref<144xf32, #tpu.memory_space<smem>>
    %1236 = vector.broadcast %1235 : f32 to vector<2x7x7xf32>
    %1237 = arith.mulf %1236, %1234 : vector<2x7x7xf32>
    %1238 = arith.addf %1224, %1237 : vector<2x7x7xf32>
    %c64 = arith.constant 64 : index
    %1239 = memref.load %arg3[%c64] : memref<144xf32, #tpu.memory_space<smem>>
    %1240 = vector.broadcast %1239 : f32 to vector<2x7x7xf32>
    %1241 = arith.mulf %1240, %1234 : vector<2x7x7xf32>
    %1242 = arith.addf %1228, %1241 : vector<2x7x7xf32>
    %c112 = arith.constant 112 : index
    %1243 = memref.load %arg3[%c112] : memref<144xf32, #tpu.memory_space<smem>>
    %1244 = vector.broadcast %1243 : f32 to vector<2x7x7xf32>
    %1245 = arith.mulf %1244, %1234 : vector<2x7x7xf32>
    %1246 = arith.addf %1232, %1245 : vector<2x7x7xf32>
    %c1_606 = arith.constant 1 : index
    %c1_607 = arith.constant 1 : index
    %c0_608 = arith.constant 0 : index
    %c0_609 = arith.constant 0 : index
    %c0_610 = arith.constant 0 : index
    %1247 = vector.load %arg10[%c1_606, %c1_607, %c0_608, %c0_609, %c0_610] : memref<4x3x2x8x8xf32, #tpu.memory_space<vmem>>, vector<1x1x2x7x7xf32>
    %1248 = vector.shape_cast %1247 : vector<1x1x2x7x7xf32> to vector<2x7x7xf32>
    %c17_611 = arith.constant 17 : index
    %1249 = memref.load %arg3[%c17_611] : memref<144xf32, #tpu.memory_space<smem>>
    %1250 = vector.broadcast %1249 : f32 to vector<2x7x7xf32>
    %1251 = arith.mulf %1250, %1248 : vector<2x7x7xf32>
    %1252 = arith.addf %1238, %1251 : vector<2x7x7xf32>
    %c65 = arith.constant 65 : index
    %1253 = memref.load %arg3[%c65] : memref<144xf32, #tpu.memory_space<smem>>
    %1254 = vector.broadcast %1253 : f32 to vector<2x7x7xf32>
    %1255 = arith.mulf %1254, %1248 : vector<2x7x7xf32>
    %1256 = arith.addf %1242, %1255 : vector<2x7x7xf32>
    %c113 = arith.constant 113 : index
    %1257 = memref.load %arg3[%c113] : memref<144xf32, #tpu.memory_space<smem>>
    %1258 = vector.broadcast %1257 : f32 to vector<2x7x7xf32>
    %1259 = arith.mulf %1258, %1248 : vector<2x7x7xf32>
    %1260 = arith.addf %1246, %1259 : vector<2x7x7xf32>
    %c0_612 = arith.constant 0 : index
    %c1_613 = arith.constant 1 : index
    %c0_614 = arith.constant 0 : index
    %c0_615 = arith.constant 0 : index
    %c1_616 = arith.constant 1 : index
    %1261 = vector.load %arg10[%c0_612, %c1_613, %c0_614, %c0_615, %c1_616] : memref<4x3x2x8x8xf32, #tpu.memory_space<vmem>>, vector<1x1x2x7x7xf32>
    %1262 = vector.shape_cast %1261 : vector<1x1x2x7x7xf32> to vector<2x7x7xf32>
    %c18_617 = arith.constant 18 : index
    %1263 = memref.load %arg3[%c18_617] : memref<144xf32, #tpu.memory_space<smem>>
    %1264 = vector.broadcast %1263 : f32 to vector<2x7x7xf32>
    %1265 = arith.mulf %1264, %1262 : vector<2x7x7xf32>
    %1266 = arith.addf %1252, %1265 : vector<2x7x7xf32>
    %c66 = arith.constant 66 : index
    %1267 = memref.load %arg3[%c66] : memref<144xf32, #tpu.memory_space<smem>>
    %1268 = vector.broadcast %1267 : f32 to vector<2x7x7xf32>
    %1269 = arith.mulf %1268, %1262 : vector<2x7x7xf32>
    %1270 = arith.addf %1256, %1269 : vector<2x7x7xf32>
    %c114 = arith.constant 114 : index
    %1271 = memref.load %arg3[%c114] : memref<144xf32, #tpu.memory_space<smem>>
    %1272 = vector.broadcast %1271 : f32 to vector<2x7x7xf32>
    %1273 = arith.mulf %1272, %1262 : vector<2x7x7xf32>
    %1274 = arith.addf %1260, %1273 : vector<2x7x7xf32>
    %c1_618 = arith.constant 1 : index
    %c1_619 = arith.constant 1 : index
    %c0_620 = arith.constant 0 : index
    %c0_621 = arith.constant 0 : index
    %c1_622 = arith.constant 1 : index
    %1275 = vector.load %arg10[%c1_618, %c1_619, %c0_620, %c0_621, %c1_622] : memref<4x3x2x8x8xf32, #tpu.memory_space<vmem>>, vector<1x1x2x7x7xf32>
    %1276 = vector.shape_cast %1275 : vector<1x1x2x7x7xf32> to vector<2x7x7xf32>
    %c19_623 = arith.constant 19 : index
    %1277 = memref.load %arg3[%c19_623] : memref<144xf32, #tpu.memory_space<smem>>
    %1278 = vector.broadcast %1277 : f32 to vector<2x7x7xf32>
    %1279 = arith.mulf %1278, %1276 : vector<2x7x7xf32>
    %1280 = arith.addf %1266, %1279 : vector<2x7x7xf32>
    %c67 = arith.constant 67 : index
    %1281 = memref.load %arg3[%c67] : memref<144xf32, #tpu.memory_space<smem>>
    %1282 = vector.broadcast %1281 : f32 to vector<2x7x7xf32>
    %1283 = arith.mulf %1282, %1276 : vector<2x7x7xf32>
    %1284 = arith.addf %1270, %1283 : vector<2x7x7xf32>
    %c115 = arith.constant 115 : index
    %1285 = memref.load %arg3[%c115] : memref<144xf32, #tpu.memory_space<smem>>
    %1286 = vector.broadcast %1285 : f32 to vector<2x7x7xf32>
    %1287 = arith.mulf %1286, %1276 : vector<2x7x7xf32>
    %1288 = arith.addf %1274, %1287 : vector<2x7x7xf32>
    %c2_624 = arith.constant 2 : index
    %c1_625 = arith.constant 1 : index
    %c0_626 = arith.constant 0 : index
    %c0_627 = arith.constant 0 : index
    %c0_628 = arith.constant 0 : index
    %1289 = vector.load %arg10[%c2_624, %c1_625, %c0_626, %c0_627, %c0_628] : memref<4x3x2x8x8xf32, #tpu.memory_space<vmem>>, vector<1x1x2x7x7xf32>
    %1290 = vector.shape_cast %1289 : vector<1x1x2x7x7xf32> to vector<2x7x7xf32>
    %c20_629 = arith.constant 20 : index
    %1291 = memref.load %arg3[%c20_629] : memref<144xf32, #tpu.memory_space<smem>>
    %1292 = vector.broadcast %1291 : f32 to vector<2x7x7xf32>
    %1293 = arith.mulf %1292, %1290 : vector<2x7x7xf32>
    %1294 = arith.addf %1280, %1293 : vector<2x7x7xf32>
    %c68 = arith.constant 68 : index
    %1295 = memref.load %arg3[%c68] : memref<144xf32, #tpu.memory_space<smem>>
    %1296 = vector.broadcast %1295 : f32 to vector<2x7x7xf32>
    %1297 = arith.mulf %1296, %1290 : vector<2x7x7xf32>
    %1298 = arith.addf %1284, %1297 : vector<2x7x7xf32>
    %c116 = arith.constant 116 : index
    %1299 = memref.load %arg3[%c116] : memref<144xf32, #tpu.memory_space<smem>>
    %1300 = vector.broadcast %1299 : f32 to vector<2x7x7xf32>
    %1301 = arith.mulf %1300, %1290 : vector<2x7x7xf32>
    %1302 = arith.addf %1288, %1301 : vector<2x7x7xf32>
    %c3_630 = arith.constant 3 : index
    %c1_631 = arith.constant 1 : index
    %c0_632 = arith.constant 0 : index
    %c0_633 = arith.constant 0 : index
    %c0_634 = arith.constant 0 : index
    %1303 = vector.load %arg10[%c3_630, %c1_631, %c0_632, %c0_633, %c0_634] : memref<4x3x2x8x8xf32, #tpu.memory_space<vmem>>, vector<1x1x2x7x7xf32>
    %1304 = vector.shape_cast %1303 : vector<1x1x2x7x7xf32> to vector<2x7x7xf32>
    %c21_635 = arith.constant 21 : index
    %1305 = memref.load %arg3[%c21_635] : memref<144xf32, #tpu.memory_space<smem>>
    %1306 = vector.broadcast %1305 : f32 to vector<2x7x7xf32>
    %1307 = arith.mulf %1306, %1304 : vector<2x7x7xf32>
    %1308 = arith.addf %1294, %1307 : vector<2x7x7xf32>
    %c69 = arith.constant 69 : index
    %1309 = memref.load %arg3[%c69] : memref<144xf32, #tpu.memory_space<smem>>
    %1310 = vector.broadcast %1309 : f32 to vector<2x7x7xf32>
    %1311 = arith.mulf %1310, %1304 : vector<2x7x7xf32>
    %1312 = arith.addf %1298, %1311 : vector<2x7x7xf32>
    %c117 = arith.constant 117 : index
    %1313 = memref.load %arg3[%c117] : memref<144xf32, #tpu.memory_space<smem>>
    %1314 = vector.broadcast %1313 : f32 to vector<2x7x7xf32>
    %1315 = arith.mulf %1314, %1304 : vector<2x7x7xf32>
    %1316 = arith.addf %1302, %1315 : vector<2x7x7xf32>
    %c2_636 = arith.constant 2 : index
    %c1_637 = arith.constant 1 : index
    %c0_638 = arith.constant 0 : index
    %c0_639 = arith.constant 0 : index
    %c1_640 = arith.constant 1 : index
    %1317 = vector.load %arg10[%c2_636, %c1_637, %c0_638, %c0_639, %c1_640] : memref<4x3x2x8x8xf32, #tpu.memory_space<vmem>>, vector<1x1x2x7x7xf32>
    %1318 = vector.shape_cast %1317 : vector<1x1x2x7x7xf32> to vector<2x7x7xf32>
    %c22_641 = arith.constant 22 : index
    %1319 = memref.load %arg3[%c22_641] : memref<144xf32, #tpu.memory_space<smem>>
    %1320 = vector.broadcast %1319 : f32 to vector<2x7x7xf32>
    %1321 = arith.mulf %1320, %1318 : vector<2x7x7xf32>
    %1322 = arith.addf %1308, %1321 : vector<2x7x7xf32>
    %c70 = arith.constant 70 : index
    %1323 = memref.load %arg3[%c70] : memref<144xf32, #tpu.memory_space<smem>>
    %1324 = vector.broadcast %1323 : f32 to vector<2x7x7xf32>
    %1325 = arith.mulf %1324, %1318 : vector<2x7x7xf32>
    %1326 = arith.addf %1312, %1325 : vector<2x7x7xf32>
    %c118 = arith.constant 118 : index
    %1327 = memref.load %arg3[%c118] : memref<144xf32, #tpu.memory_space<smem>>
    %1328 = vector.broadcast %1327 : f32 to vector<2x7x7xf32>
    %1329 = arith.mulf %1328, %1318 : vector<2x7x7xf32>
    %1330 = arith.addf %1316, %1329 : vector<2x7x7xf32>
    %c3_642 = arith.constant 3 : index
    %c1_643 = arith.constant 1 : index
    %c0_644 = arith.constant 0 : index
    %c0_645 = arith.constant 0 : index
    %c1_646 = arith.constant 1 : index
    %1331 = vector.load %arg10[%c3_642, %c1_643, %c0_644, %c0_645, %c1_646] : memref<4x3x2x8x8xf32, #tpu.memory_space<vmem>>, vector<1x1x2x7x7xf32>
    %1332 = vector.shape_cast %1331 : vector<1x1x2x7x7xf32> to vector<2x7x7xf32>
    %c23_647 = arith.constant 23 : index
    %1333 = memref.load %arg3[%c23_647] : memref<144xf32, #tpu.memory_space<smem>>
    %1334 = vector.broadcast %1333 : f32 to vector<2x7x7xf32>
    %1335 = arith.mulf %1334, %1332 : vector<2x7x7xf32>
    %1336 = arith.addf %1322, %1335 : vector<2x7x7xf32>
    %c71 = arith.constant 71 : index
    %1337 = memref.load %arg3[%c71] : memref<144xf32, #tpu.memory_space<smem>>
    %1338 = vector.broadcast %1337 : f32 to vector<2x7x7xf32>
    %1339 = arith.mulf %1338, %1332 : vector<2x7x7xf32>
    %1340 = arith.addf %1326, %1339 : vector<2x7x7xf32>
    %c119 = arith.constant 119 : index
    %1341 = memref.load %arg3[%c119] : memref<144xf32, #tpu.memory_space<smem>>
    %1342 = vector.broadcast %1341 : f32 to vector<2x7x7xf32>
    %1343 = arith.mulf %1342, %1332 : vector<2x7x7xf32>
    %1344 = arith.addf %1330, %1343 : vector<2x7x7xf32>
    %c0_648 = arith.constant 0 : index
    %c1_649 = arith.constant 1 : index
    %c0_650 = arith.constant 0 : index
    %c1_651 = arith.constant 1 : index
    %c0_652 = arith.constant 0 : index
    %1345 = vector.load %arg10[%c0_648, %c1_649, %c0_650, %c1_651, %c0_652] : memref<4x3x2x8x8xf32, #tpu.memory_space<vmem>>, vector<1x1x2x7x7xf32>
    %1346 = vector.shape_cast %1345 : vector<1x1x2x7x7xf32> to vector<2x7x7xf32>
    %c24_653 = arith.constant 24 : index
    %1347 = memref.load %arg3[%c24_653] : memref<144xf32, #tpu.memory_space<smem>>
    %1348 = vector.broadcast %1347 : f32 to vector<2x7x7xf32>
    %1349 = arith.mulf %1348, %1346 : vector<2x7x7xf32>
    %1350 = arith.addf %1336, %1349 : vector<2x7x7xf32>
    %c72 = arith.constant 72 : index
    %1351 = memref.load %arg3[%c72] : memref<144xf32, #tpu.memory_space<smem>>
    %1352 = vector.broadcast %1351 : f32 to vector<2x7x7xf32>
    %1353 = arith.mulf %1352, %1346 : vector<2x7x7xf32>
    %1354 = arith.addf %1340, %1353 : vector<2x7x7xf32>
    %c120 = arith.constant 120 : index
    %1355 = memref.load %arg3[%c120] : memref<144xf32, #tpu.memory_space<smem>>
    %1356 = vector.broadcast %1355 : f32 to vector<2x7x7xf32>
    %1357 = arith.mulf %1356, %1346 : vector<2x7x7xf32>
    %1358 = arith.addf %1344, %1357 : vector<2x7x7xf32>
    %c1_654 = arith.constant 1 : index
    %c1_655 = arith.constant 1 : index
    %c0_656 = arith.constant 0 : index
    %c1_657 = arith.constant 1 : index
    %c0_658 = arith.constant 0 : index
    %1359 = vector.load %arg10[%c1_654, %c1_655, %c0_656, %c1_657, %c0_658] : memref<4x3x2x8x8xf32, #tpu.memory_space<vmem>>, vector<1x1x2x7x7xf32>
    %1360 = vector.shape_cast %1359 : vector<1x1x2x7x7xf32> to vector<2x7x7xf32>
    %c25_659 = arith.constant 25 : index
    %1361 = memref.load %arg3[%c25_659] : memref<144xf32, #tpu.memory_space<smem>>
    %1362 = vector.broadcast %1361 : f32 to vector<2x7x7xf32>
    %1363 = arith.mulf %1362, %1360 : vector<2x7x7xf32>
    %1364 = arith.addf %1350, %1363 : vector<2x7x7xf32>
    %c73 = arith.constant 73 : index
    %1365 = memref.load %arg3[%c73] : memref<144xf32, #tpu.memory_space<smem>>
    %1366 = vector.broadcast %1365 : f32 to vector<2x7x7xf32>
    %1367 = arith.mulf %1366, %1360 : vector<2x7x7xf32>
    %1368 = arith.addf %1354, %1367 : vector<2x7x7xf32>
    %c121 = arith.constant 121 : index
    %1369 = memref.load %arg3[%c121] : memref<144xf32, #tpu.memory_space<smem>>
    %1370 = vector.broadcast %1369 : f32 to vector<2x7x7xf32>
    %1371 = arith.mulf %1370, %1360 : vector<2x7x7xf32>
    %1372 = arith.addf %1358, %1371 : vector<2x7x7xf32>
    %c0_660 = arith.constant 0 : index
    %c1_661 = arith.constant 1 : index
    %c0_662 = arith.constant 0 : index
    %c1_663 = arith.constant 1 : index
    %c1_664 = arith.constant 1 : index
    %1373 = vector.load %arg10[%c0_660, %c1_661, %c0_662, %c1_663, %c1_664] : memref<4x3x2x8x8xf32, #tpu.memory_space<vmem>>, vector<1x1x2x7x7xf32>
    %1374 = vector.shape_cast %1373 : vector<1x1x2x7x7xf32> to vector<2x7x7xf32>
    %c26_665 = arith.constant 26 : index
    %1375 = memref.load %arg3[%c26_665] : memref<144xf32, #tpu.memory_space<smem>>
    %1376 = vector.broadcast %1375 : f32 to vector<2x7x7xf32>
    %1377 = arith.mulf %1376, %1374 : vector<2x7x7xf32>
    %1378 = arith.addf %1364, %1377 : vector<2x7x7xf32>
    %c74 = arith.constant 74 : index
    %1379 = memref.load %arg3[%c74] : memref<144xf32, #tpu.memory_space<smem>>
    %1380 = vector.broadcast %1379 : f32 to vector<2x7x7xf32>
    %1381 = arith.mulf %1380, %1374 : vector<2x7x7xf32>
    %1382 = arith.addf %1368, %1381 : vector<2x7x7xf32>
    %c122 = arith.constant 122 : index
    %1383 = memref.load %arg3[%c122] : memref<144xf32, #tpu.memory_space<smem>>
    %1384 = vector.broadcast %1383 : f32 to vector<2x7x7xf32>
    %1385 = arith.mulf %1384, %1374 : vector<2x7x7xf32>
    %1386 = arith.addf %1372, %1385 : vector<2x7x7xf32>
    %c1_666 = arith.constant 1 : index
    %c1_667 = arith.constant 1 : index
    %c0_668 = arith.constant 0 : index
    %c1_669 = arith.constant 1 : index
    %c1_670 = arith.constant 1 : index
    %1387 = vector.load %arg10[%c1_666, %c1_667, %c0_668, %c1_669, %c1_670] : memref<4x3x2x8x8xf32, #tpu.memory_space<vmem>>, vector<1x1x2x7x7xf32>
    %1388 = vector.shape_cast %1387 : vector<1x1x2x7x7xf32> to vector<2x7x7xf32>
    %c27_671 = arith.constant 27 : index
    %1389 = memref.load %arg3[%c27_671] : memref<144xf32, #tpu.memory_space<smem>>
    %1390 = vector.broadcast %1389 : f32 to vector<2x7x7xf32>
    %1391 = arith.mulf %1390, %1388 : vector<2x7x7xf32>
    %1392 = arith.addf %1378, %1391 : vector<2x7x7xf32>
    %c75 = arith.constant 75 : index
    %1393 = memref.load %arg3[%c75] : memref<144xf32, #tpu.memory_space<smem>>
    %1394 = vector.broadcast %1393 : f32 to vector<2x7x7xf32>
    %1395 = arith.mulf %1394, %1388 : vector<2x7x7xf32>
    %1396 = arith.addf %1382, %1395 : vector<2x7x7xf32>
    %c123 = arith.constant 123 : index
    %1397 = memref.load %arg3[%c123] : memref<144xf32, #tpu.memory_space<smem>>
    %1398 = vector.broadcast %1397 : f32 to vector<2x7x7xf32>
    %1399 = arith.mulf %1398, %1388 : vector<2x7x7xf32>
    %1400 = arith.addf %1386, %1399 : vector<2x7x7xf32>
    %c2_672 = arith.constant 2 : index
    %c1_673 = arith.constant 1 : index
    %c0_674 = arith.constant 0 : index
    %c1_675 = arith.constant 1 : index
    %c0_676 = arith.constant 0 : index
    %1401 = vector.load %arg10[%c2_672, %c1_673, %c0_674, %c1_675, %c0_676] : memref<4x3x2x8x8xf32, #tpu.memory_space<vmem>>, vector<1x1x2x7x7xf32>
    %1402 = vector.shape_cast %1401 : vector<1x1x2x7x7xf32> to vector<2x7x7xf32>
    %c28_677 = arith.constant 28 : index
    %1403 = memref.load %arg3[%c28_677] : memref<144xf32, #tpu.memory_space<smem>>
    %1404 = vector.broadcast %1403 : f32 to vector<2x7x7xf32>
    %1405 = arith.mulf %1404, %1402 : vector<2x7x7xf32>
    %1406 = arith.addf %1392, %1405 : vector<2x7x7xf32>
    %c76 = arith.constant 76 : index
    %1407 = memref.load %arg3[%c76] : memref<144xf32, #tpu.memory_space<smem>>
    %1408 = vector.broadcast %1407 : f32 to vector<2x7x7xf32>
    %1409 = arith.mulf %1408, %1402 : vector<2x7x7xf32>
    %1410 = arith.addf %1396, %1409 : vector<2x7x7xf32>
    %c124 = arith.constant 124 : index
    %1411 = memref.load %arg3[%c124] : memref<144xf32, #tpu.memory_space<smem>>
    %1412 = vector.broadcast %1411 : f32 to vector<2x7x7xf32>
    %1413 = arith.mulf %1412, %1402 : vector<2x7x7xf32>
    %1414 = arith.addf %1400, %1413 : vector<2x7x7xf32>
    %c3_678 = arith.constant 3 : index
    %c1_679 = arith.constant 1 : index
    %c0_680 = arith.constant 0 : index
    %c1_681 = arith.constant 1 : index
    %c0_682 = arith.constant 0 : index
    %1415 = vector.load %arg10[%c3_678, %c1_679, %c0_680, %c1_681, %c0_682] : memref<4x3x2x8x8xf32, #tpu.memory_space<vmem>>, vector<1x1x2x7x7xf32>
    %1416 = vector.shape_cast %1415 : vector<1x1x2x7x7xf32> to vector<2x7x7xf32>
    %c29_683 = arith.constant 29 : index
    %1417 = memref.load %arg3[%c29_683] : memref<144xf32, #tpu.memory_space<smem>>
    %1418 = vector.broadcast %1417 : f32 to vector<2x7x7xf32>
    %1419 = arith.mulf %1418, %1416 : vector<2x7x7xf32>
    %1420 = arith.addf %1406, %1419 : vector<2x7x7xf32>
    %c77 = arith.constant 77 : index
    %1421 = memref.load %arg3[%c77] : memref<144xf32, #tpu.memory_space<smem>>
    %1422 = vector.broadcast %1421 : f32 to vector<2x7x7xf32>
    %1423 = arith.mulf %1422, %1416 : vector<2x7x7xf32>
    %1424 = arith.addf %1410, %1423 : vector<2x7x7xf32>
    %c125 = arith.constant 125 : index
    %1425 = memref.load %arg3[%c125] : memref<144xf32, #tpu.memory_space<smem>>
    %1426 = vector.broadcast %1425 : f32 to vector<2x7x7xf32>
    %1427 = arith.mulf %1426, %1416 : vector<2x7x7xf32>
    %1428 = arith.addf %1414, %1427 : vector<2x7x7xf32>
    %c2_684 = arith.constant 2 : index
    %c1_685 = arith.constant 1 : index
    %c0_686 = arith.constant 0 : index
    %c1_687 = arith.constant 1 : index
    %c1_688 = arith.constant 1 : index
    %1429 = vector.load %arg10[%c2_684, %c1_685, %c0_686, %c1_687, %c1_688] : memref<4x3x2x8x8xf32, #tpu.memory_space<vmem>>, vector<1x1x2x7x7xf32>
    %1430 = vector.shape_cast %1429 : vector<1x1x2x7x7xf32> to vector<2x7x7xf32>
    %c30_689 = arith.constant 30 : index
    %1431 = memref.load %arg3[%c30_689] : memref<144xf32, #tpu.memory_space<smem>>
    %1432 = vector.broadcast %1431 : f32 to vector<2x7x7xf32>
    %1433 = arith.mulf %1432, %1430 : vector<2x7x7xf32>
    %1434 = arith.addf %1420, %1433 : vector<2x7x7xf32>
    %c78 = arith.constant 78 : index
    %1435 = memref.load %arg3[%c78] : memref<144xf32, #tpu.memory_space<smem>>
    %1436 = vector.broadcast %1435 : f32 to vector<2x7x7xf32>
    %1437 = arith.mulf %1436, %1430 : vector<2x7x7xf32>
    %1438 = arith.addf %1424, %1437 : vector<2x7x7xf32>
    %c126 = arith.constant 126 : index
    %1439 = memref.load %arg3[%c126] : memref<144xf32, #tpu.memory_space<smem>>
    %1440 = vector.broadcast %1439 : f32 to vector<2x7x7xf32>
    %1441 = arith.mulf %1440, %1430 : vector<2x7x7xf32>
    %1442 = arith.addf %1428, %1441 : vector<2x7x7xf32>
    %c3_690 = arith.constant 3 : index
    %c1_691 = arith.constant 1 : index
    %c0_692 = arith.constant 0 : index
    %c1_693 = arith.constant 1 : index
    %c1_694 = arith.constant 1 : index
    %1443 = vector.load %arg10[%c3_690, %c1_691, %c0_692, %c1_693, %c1_694] : memref<4x3x2x8x8xf32, #tpu.memory_space<vmem>>, vector<1x1x2x7x7xf32>
    %1444 = vector.shape_cast %1443 : vector<1x1x2x7x7xf32> to vector<2x7x7xf32>
    %c31_695 = arith.constant 31 : index
    %1445 = memref.load %arg3[%c31_695] : memref<144xf32, #tpu.memory_space<smem>>
    %1446 = vector.broadcast %1445 : f32 to vector<2x7x7xf32>
    %1447 = arith.mulf %1446, %1444 : vector<2x7x7xf32>
    %1448 = arith.addf %1434, %1447 : vector<2x7x7xf32>
    %c79 = arith.constant 79 : index
    %1449 = memref.load %arg3[%c79] : memref<144xf32, #tpu.memory_space<smem>>
    %1450 = vector.broadcast %1449 : f32 to vector<2x7x7xf32>
    %1451 = arith.mulf %1450, %1444 : vector<2x7x7xf32>
    %1452 = arith.addf %1438, %1451 : vector<2x7x7xf32>
    %c127 = arith.constant 127 : index
    %1453 = memref.load %arg3[%c127] : memref<144xf32, #tpu.memory_space<smem>>
    %1454 = vector.broadcast %1453 : f32 to vector<2x7x7xf32>
    %1455 = arith.mulf %1454, %1444 : vector<2x7x7xf32>
    %1456 = arith.addf %1442, %1455 : vector<2x7x7xf32>
    %c0_696 = arith.constant 0 : index
    %c2_697 = arith.constant 2 : index
    %c0_698 = arith.constant 0 : index
    %c0_699 = arith.constant 0 : index
    %c0_700 = arith.constant 0 : index
    %1457 = vector.load %arg10[%c0_696, %c2_697, %c0_698, %c0_699, %c0_700] : memref<4x3x2x8x8xf32, #tpu.memory_space<vmem>>, vector<1x1x2x7x7xf32>
    %1458 = vector.shape_cast %1457 : vector<1x1x2x7x7xf32> to vector<2x7x7xf32>
    %c32_701 = arith.constant 32 : index
    %1459 = memref.load %arg3[%c32_701] : memref<144xf32, #tpu.memory_space<smem>>
    %1460 = vector.broadcast %1459 : f32 to vector<2x7x7xf32>
    %1461 = arith.mulf %1460, %1458 : vector<2x7x7xf32>
    %1462 = arith.addf %1448, %1461 : vector<2x7x7xf32>
    %c80 = arith.constant 80 : index
    %1463 = memref.load %arg3[%c80] : memref<144xf32, #tpu.memory_space<smem>>
    %1464 = vector.broadcast %1463 : f32 to vector<2x7x7xf32>
    %1465 = arith.mulf %1464, %1458 : vector<2x7x7xf32>
    %1466 = arith.addf %1452, %1465 : vector<2x7x7xf32>
    %c128 = arith.constant 128 : index
    %1467 = memref.load %arg3[%c128] : memref<144xf32, #tpu.memory_space<smem>>
    %1468 = vector.broadcast %1467 : f32 to vector<2x7x7xf32>
    %1469 = arith.mulf %1468, %1458 : vector<2x7x7xf32>
    %1470 = arith.addf %1456, %1469 : vector<2x7x7xf32>
    %c1_702 = arith.constant 1 : index
    %c2_703 = arith.constant 2 : index
    %c0_704 = arith.constant 0 : index
    %c0_705 = arith.constant 0 : index
    %c0_706 = arith.constant 0 : index
    %1471 = vector.load %arg10[%c1_702, %c2_703, %c0_704, %c0_705, %c0_706] : memref<4x3x2x8x8xf32, #tpu.memory_space<vmem>>, vector<1x1x2x7x7xf32>
    %1472 = vector.shape_cast %1471 : vector<1x1x2x7x7xf32> to vector<2x7x7xf32>
    %c33_707 = arith.constant 33 : index
    %1473 = memref.load %arg3[%c33_707] : memref<144xf32, #tpu.memory_space<smem>>
    %1474 = vector.broadcast %1473 : f32 to vector<2x7x7xf32>
    %1475 = arith.mulf %1474, %1472 : vector<2x7x7xf32>
    %1476 = arith.addf %1462, %1475 : vector<2x7x7xf32>
    %c81 = arith.constant 81 : index
    %1477 = memref.load %arg3[%c81] : memref<144xf32, #tpu.memory_space<smem>>
    %1478 = vector.broadcast %1477 : f32 to vector<2x7x7xf32>
    %1479 = arith.mulf %1478, %1472 : vector<2x7x7xf32>
    %1480 = arith.addf %1466, %1479 : vector<2x7x7xf32>
    %c129 = arith.constant 129 : index
    %1481 = memref.load %arg3[%c129] : memref<144xf32, #tpu.memory_space<smem>>
    %1482 = vector.broadcast %1481 : f32 to vector<2x7x7xf32>
    %1483 = arith.mulf %1482, %1472 : vector<2x7x7xf32>
    %1484 = arith.addf %1470, %1483 : vector<2x7x7xf32>
    %c0_708 = arith.constant 0 : index
    %c2_709 = arith.constant 2 : index
    %c0_710 = arith.constant 0 : index
    %c0_711 = arith.constant 0 : index
    %c1_712 = arith.constant 1 : index
    %1485 = vector.load %arg10[%c0_708, %c2_709, %c0_710, %c0_711, %c1_712] : memref<4x3x2x8x8xf32, #tpu.memory_space<vmem>>, vector<1x1x2x7x7xf32>
    %1486 = vector.shape_cast %1485 : vector<1x1x2x7x7xf32> to vector<2x7x7xf32>
    %c34_713 = arith.constant 34 : index
    %1487 = memref.load %arg3[%c34_713] : memref<144xf32, #tpu.memory_space<smem>>
    %1488 = vector.broadcast %1487 : f32 to vector<2x7x7xf32>
    %1489 = arith.mulf %1488, %1486 : vector<2x7x7xf32>
    %1490 = arith.addf %1476, %1489 : vector<2x7x7xf32>
    %c82 = arith.constant 82 : index
    %1491 = memref.load %arg3[%c82] : memref<144xf32, #tpu.memory_space<smem>>
    %1492 = vector.broadcast %1491 : f32 to vector<2x7x7xf32>
    %1493 = arith.mulf %1492, %1486 : vector<2x7x7xf32>
    %1494 = arith.addf %1480, %1493 : vector<2x7x7xf32>
    %c130 = arith.constant 130 : index
    %1495 = memref.load %arg3[%c130] : memref<144xf32, #tpu.memory_space<smem>>
    %1496 = vector.broadcast %1495 : f32 to vector<2x7x7xf32>
    %1497 = arith.mulf %1496, %1486 : vector<2x7x7xf32>
    %1498 = arith.addf %1484, %1497 : vector<2x7x7xf32>
    %c1_714 = arith.constant 1 : index
    %c2_715 = arith.constant 2 : index
    %c0_716 = arith.constant 0 : index
    %c0_717 = arith.constant 0 : index
    %c1_718 = arith.constant 1 : index
    %1499 = vector.load %arg10[%c1_714, %c2_715, %c0_716, %c0_717, %c1_718] : memref<4x3x2x8x8xf32, #tpu.memory_space<vmem>>, vector<1x1x2x7x7xf32>
    %1500 = vector.shape_cast %1499 : vector<1x1x2x7x7xf32> to vector<2x7x7xf32>
    %c35_719 = arith.constant 35 : index
    %1501 = memref.load %arg3[%c35_719] : memref<144xf32, #tpu.memory_space<smem>>
    %1502 = vector.broadcast %1501 : f32 to vector<2x7x7xf32>
    %1503 = arith.mulf %1502, %1500 : vector<2x7x7xf32>
    %1504 = arith.addf %1490, %1503 : vector<2x7x7xf32>
    %c83 = arith.constant 83 : index
    %1505 = memref.load %arg3[%c83] : memref<144xf32, #tpu.memory_space<smem>>
    %1506 = vector.broadcast %1505 : f32 to vector<2x7x7xf32>
    %1507 = arith.mulf %1506, %1500 : vector<2x7x7xf32>
    %1508 = arith.addf %1494, %1507 : vector<2x7x7xf32>
    %c131 = arith.constant 131 : index
    %1509 = memref.load %arg3[%c131] : memref<144xf32, #tpu.memory_space<smem>>
    %1510 = vector.broadcast %1509 : f32 to vector<2x7x7xf32>
    %1511 = arith.mulf %1510, %1500 : vector<2x7x7xf32>
    %1512 = arith.addf %1498, %1511 : vector<2x7x7xf32>
    %c2_720 = arith.constant 2 : index
    %c2_721 = arith.constant 2 : index
    %c0_722 = arith.constant 0 : index
    %c0_723 = arith.constant 0 : index
    %c0_724 = arith.constant 0 : index
    %1513 = vector.load %arg10[%c2_720, %c2_721, %c0_722, %c0_723, %c0_724] : memref<4x3x2x8x8xf32, #tpu.memory_space<vmem>>, vector<1x1x2x7x7xf32>
    %1514 = vector.shape_cast %1513 : vector<1x1x2x7x7xf32> to vector<2x7x7xf32>
    %c36_725 = arith.constant 36 : index
    %1515 = memref.load %arg3[%c36_725] : memref<144xf32, #tpu.memory_space<smem>>
    %1516 = vector.broadcast %1515 : f32 to vector<2x7x7xf32>
    %1517 = arith.mulf %1516, %1514 : vector<2x7x7xf32>
    %1518 = arith.addf %1504, %1517 : vector<2x7x7xf32>
    %c84 = arith.constant 84 : index
    %1519 = memref.load %arg3[%c84] : memref<144xf32, #tpu.memory_space<smem>>
    %1520 = vector.broadcast %1519 : f32 to vector<2x7x7xf32>
    %1521 = arith.mulf %1520, %1514 : vector<2x7x7xf32>
    %1522 = arith.addf %1508, %1521 : vector<2x7x7xf32>
    %c132 = arith.constant 132 : index
    %1523 = memref.load %arg3[%c132] : memref<144xf32, #tpu.memory_space<smem>>
    %1524 = vector.broadcast %1523 : f32 to vector<2x7x7xf32>
    %1525 = arith.mulf %1524, %1514 : vector<2x7x7xf32>
    %1526 = arith.addf %1512, %1525 : vector<2x7x7xf32>
    %c3_726 = arith.constant 3 : index
    %c2_727 = arith.constant 2 : index
    %c0_728 = arith.constant 0 : index
    %c0_729 = arith.constant 0 : index
    %c0_730 = arith.constant 0 : index
    %1527 = vector.load %arg10[%c3_726, %c2_727, %c0_728, %c0_729, %c0_730] : memref<4x3x2x8x8xf32, #tpu.memory_space<vmem>>, vector<1x1x2x7x7xf32>
    %1528 = vector.shape_cast %1527 : vector<1x1x2x7x7xf32> to vector<2x7x7xf32>
    %c37_731 = arith.constant 37 : index
    %1529 = memref.load %arg3[%c37_731] : memref<144xf32, #tpu.memory_space<smem>>
    %1530 = vector.broadcast %1529 : f32 to vector<2x7x7xf32>
    %1531 = arith.mulf %1530, %1528 : vector<2x7x7xf32>
    %1532 = arith.addf %1518, %1531 : vector<2x7x7xf32>
    %c85 = arith.constant 85 : index
    %1533 = memref.load %arg3[%c85] : memref<144xf32, #tpu.memory_space<smem>>
    %1534 = vector.broadcast %1533 : f32 to vector<2x7x7xf32>
    %1535 = arith.mulf %1534, %1528 : vector<2x7x7xf32>
    %1536 = arith.addf %1522, %1535 : vector<2x7x7xf32>
    %c133 = arith.constant 133 : index
    %1537 = memref.load %arg3[%c133] : memref<144xf32, #tpu.memory_space<smem>>
    %1538 = vector.broadcast %1537 : f32 to vector<2x7x7xf32>
    %1539 = arith.mulf %1538, %1528 : vector<2x7x7xf32>
    %1540 = arith.addf %1526, %1539 : vector<2x7x7xf32>
    %c2_732 = arith.constant 2 : index
    %c2_733 = arith.constant 2 : index
    %c0_734 = arith.constant 0 : index
    %c0_735 = arith.constant 0 : index
    %c1_736 = arith.constant 1 : index
    %1541 = vector.load %arg10[%c2_732, %c2_733, %c0_734, %c0_735, %c1_736] : memref<4x3x2x8x8xf32, #tpu.memory_space<vmem>>, vector<1x1x2x7x7xf32>
    %1542 = vector.shape_cast %1541 : vector<1x1x2x7x7xf32> to vector<2x7x7xf32>
    %c38_737 = arith.constant 38 : index
    %1543 = memref.load %arg3[%c38_737] : memref<144xf32, #tpu.memory_space<smem>>
    %1544 = vector.broadcast %1543 : f32 to vector<2x7x7xf32>
    %1545 = arith.mulf %1544, %1542 : vector<2x7x7xf32>
    %1546 = arith.addf %1532, %1545 : vector<2x7x7xf32>
    %c86 = arith.constant 86 : index
    %1547 = memref.load %arg3[%c86] : memref<144xf32, #tpu.memory_space<smem>>
    %1548 = vector.broadcast %1547 : f32 to vector<2x7x7xf32>
    %1549 = arith.mulf %1548, %1542 : vector<2x7x7xf32>
    %1550 = arith.addf %1536, %1549 : vector<2x7x7xf32>
    %c134 = arith.constant 134 : index
    %1551 = memref.load %arg3[%c134] : memref<144xf32, #tpu.memory_space<smem>>
    %1552 = vector.broadcast %1551 : f32 to vector<2x7x7xf32>
    %1553 = arith.mulf %1552, %1542 : vector<2x7x7xf32>
    %1554 = arith.addf %1540, %1553 : vector<2x7x7xf32>
    %c3_738 = arith.constant 3 : index
    %c2_739 = arith.constant 2 : index
    %c0_740 = arith.constant 0 : index
    %c0_741 = arith.constant 0 : index
    %c1_742 = arith.constant 1 : index
    %1555 = vector.load %arg10[%c3_738, %c2_739, %c0_740, %c0_741, %c1_742] : memref<4x3x2x8x8xf32, #tpu.memory_space<vmem>>, vector<1x1x2x7x7xf32>
    %1556 = vector.shape_cast %1555 : vector<1x1x2x7x7xf32> to vector<2x7x7xf32>
    %c39_743 = arith.constant 39 : index
    %1557 = memref.load %arg3[%c39_743] : memref<144xf32, #tpu.memory_space<smem>>
    %1558 = vector.broadcast %1557 : f32 to vector<2x7x7xf32>
    %1559 = arith.mulf %1558, %1556 : vector<2x7x7xf32>
    %1560 = arith.addf %1546, %1559 : vector<2x7x7xf32>
    %c87 = arith.constant 87 : index
    %1561 = memref.load %arg3[%c87] : memref<144xf32, #tpu.memory_space<smem>>
    %1562 = vector.broadcast %1561 : f32 to vector<2x7x7xf32>
    %1563 = arith.mulf %1562, %1556 : vector<2x7x7xf32>
    %1564 = arith.addf %1550, %1563 : vector<2x7x7xf32>
    %c135 = arith.constant 135 : index
    %1565 = memref.load %arg3[%c135] : memref<144xf32, #tpu.memory_space<smem>>
    %1566 = vector.broadcast %1565 : f32 to vector<2x7x7xf32>
    %1567 = arith.mulf %1566, %1556 : vector<2x7x7xf32>
    %1568 = arith.addf %1554, %1567 : vector<2x7x7xf32>
    %c0_744 = arith.constant 0 : index
    %c2_745 = arith.constant 2 : index
    %c0_746 = arith.constant 0 : index
    %c1_747 = arith.constant 1 : index
    %c0_748 = arith.constant 0 : index
    %1569 = vector.load %arg10[%c0_744, %c2_745, %c0_746, %c1_747, %c0_748] : memref<4x3x2x8x8xf32, #tpu.memory_space<vmem>>, vector<1x1x2x7x7xf32>
    %1570 = vector.shape_cast %1569 : vector<1x1x2x7x7xf32> to vector<2x7x7xf32>
    %c40_749 = arith.constant 40 : index
    %1571 = memref.load %arg3[%c40_749] : memref<144xf32, #tpu.memory_space<smem>>
    %1572 = vector.broadcast %1571 : f32 to vector<2x7x7xf32>
    %1573 = arith.mulf %1572, %1570 : vector<2x7x7xf32>
    %1574 = arith.addf %1560, %1573 : vector<2x7x7xf32>
    %c88 = arith.constant 88 : index
    %1575 = memref.load %arg3[%c88] : memref<144xf32, #tpu.memory_space<smem>>
    %1576 = vector.broadcast %1575 : f32 to vector<2x7x7xf32>
    %1577 = arith.mulf %1576, %1570 : vector<2x7x7xf32>
    %1578 = arith.addf %1564, %1577 : vector<2x7x7xf32>
    %c136 = arith.constant 136 : index
    %1579 = memref.load %arg3[%c136] : memref<144xf32, #tpu.memory_space<smem>>
    %1580 = vector.broadcast %1579 : f32 to vector<2x7x7xf32>
    %1581 = arith.mulf %1580, %1570 : vector<2x7x7xf32>
    %1582 = arith.addf %1568, %1581 : vector<2x7x7xf32>
    %c1_750 = arith.constant 1 : index
    %c2_751 = arith.constant 2 : index
    %c0_752 = arith.constant 0 : index
    %c1_753 = arith.constant 1 : index
    %c0_754 = arith.constant 0 : index
    %1583 = vector.load %arg10[%c1_750, %c2_751, %c0_752, %c1_753, %c0_754] : memref<4x3x2x8x8xf32, #tpu.memory_space<vmem>>, vector<1x1x2x7x7xf32>
    %1584 = vector.shape_cast %1583 : vector<1x1x2x7x7xf32> to vector<2x7x7xf32>
    %c41_755 = arith.constant 41 : index
    %1585 = memref.load %arg3[%c41_755] : memref<144xf32, #tpu.memory_space<smem>>
    %1586 = vector.broadcast %1585 : f32 to vector<2x7x7xf32>
    %1587 = arith.mulf %1586, %1584 : vector<2x7x7xf32>
    %1588 = arith.addf %1574, %1587 : vector<2x7x7xf32>
    %c89 = arith.constant 89 : index
    %1589 = memref.load %arg3[%c89] : memref<144xf32, #tpu.memory_space<smem>>
    %1590 = vector.broadcast %1589 : f32 to vector<2x7x7xf32>
    %1591 = arith.mulf %1590, %1584 : vector<2x7x7xf32>
    %1592 = arith.addf %1578, %1591 : vector<2x7x7xf32>
    %c137 = arith.constant 137 : index
    %1593 = memref.load %arg3[%c137] : memref<144xf32, #tpu.memory_space<smem>>
    %1594 = vector.broadcast %1593 : f32 to vector<2x7x7xf32>
    %1595 = arith.mulf %1594, %1584 : vector<2x7x7xf32>
    %1596 = arith.addf %1582, %1595 : vector<2x7x7xf32>
    %c0_756 = arith.constant 0 : index
    %c2_757 = arith.constant 2 : index
    %c0_758 = arith.constant 0 : index
    %c1_759 = arith.constant 1 : index
    %c1_760 = arith.constant 1 : index
    %1597 = vector.load %arg10[%c0_756, %c2_757, %c0_758, %c1_759, %c1_760] : memref<4x3x2x8x8xf32, #tpu.memory_space<vmem>>, vector<1x1x2x7x7xf32>
    %1598 = vector.shape_cast %1597 : vector<1x1x2x7x7xf32> to vector<2x7x7xf32>
    %c42_761 = arith.constant 42 : index
    %1599 = memref.load %arg3[%c42_761] : memref<144xf32, #tpu.memory_space<smem>>
    %1600 = vector.broadcast %1599 : f32 to vector<2x7x7xf32>
    %1601 = arith.mulf %1600, %1598 : vector<2x7x7xf32>
    %1602 = arith.addf %1588, %1601 : vector<2x7x7xf32>
    %c90 = arith.constant 90 : index
    %1603 = memref.load %arg3[%c90] : memref<144xf32, #tpu.memory_space<smem>>
    %1604 = vector.broadcast %1603 : f32 to vector<2x7x7xf32>
    %1605 = arith.mulf %1604, %1598 : vector<2x7x7xf32>
    %1606 = arith.addf %1592, %1605 : vector<2x7x7xf32>
    %c138 = arith.constant 138 : index
    %1607 = memref.load %arg3[%c138] : memref<144xf32, #tpu.memory_space<smem>>
    %1608 = vector.broadcast %1607 : f32 to vector<2x7x7xf32>
    %1609 = arith.mulf %1608, %1598 : vector<2x7x7xf32>
    %1610 = arith.addf %1596, %1609 : vector<2x7x7xf32>
    %c1_762 = arith.constant 1 : index
    %c2_763 = arith.constant 2 : index
    %c0_764 = arith.constant 0 : index
    %c1_765 = arith.constant 1 : index
    %c1_766 = arith.constant 1 : index
    %1611 = vector.load %arg10[%c1_762, %c2_763, %c0_764, %c1_765, %c1_766] : memref<4x3x2x8x8xf32, #tpu.memory_space<vmem>>, vector<1x1x2x7x7xf32>
    %1612 = vector.shape_cast %1611 : vector<1x1x2x7x7xf32> to vector<2x7x7xf32>
    %c43_767 = arith.constant 43 : index
    %1613 = memref.load %arg3[%c43_767] : memref<144xf32, #tpu.memory_space<smem>>
    %1614 = vector.broadcast %1613 : f32 to vector<2x7x7xf32>
    %1615 = arith.mulf %1614, %1612 : vector<2x7x7xf32>
    %1616 = arith.addf %1602, %1615 : vector<2x7x7xf32>
    %c91 = arith.constant 91 : index
    %1617 = memref.load %arg3[%c91] : memref<144xf32, #tpu.memory_space<smem>>
    %1618 = vector.broadcast %1617 : f32 to vector<2x7x7xf32>
    %1619 = arith.mulf %1618, %1612 : vector<2x7x7xf32>
    %1620 = arith.addf %1606, %1619 : vector<2x7x7xf32>
    %c139 = arith.constant 139 : index
    %1621 = memref.load %arg3[%c139] : memref<144xf32, #tpu.memory_space<smem>>
    %1622 = vector.broadcast %1621 : f32 to vector<2x7x7xf32>
    %1623 = arith.mulf %1622, %1612 : vector<2x7x7xf32>
    %1624 = arith.addf %1610, %1623 : vector<2x7x7xf32>
    %c2_768 = arith.constant 2 : index
    %c2_769 = arith.constant 2 : index
    %c0_770 = arith.constant 0 : index
    %c1_771 = arith.constant 1 : index
    %c0_772 = arith.constant 0 : index
    %1625 = vector.load %arg10[%c2_768, %c2_769, %c0_770, %c1_771, %c0_772] : memref<4x3x2x8x8xf32, #tpu.memory_space<vmem>>, vector<1x1x2x7x7xf32>
    %1626 = vector.shape_cast %1625 : vector<1x1x2x7x7xf32> to vector<2x7x7xf32>
    %c44_773 = arith.constant 44 : index
    %1627 = memref.load %arg3[%c44_773] : memref<144xf32, #tpu.memory_space<smem>>
    %1628 = vector.broadcast %1627 : f32 to vector<2x7x7xf32>
    %1629 = arith.mulf %1628, %1626 : vector<2x7x7xf32>
    %1630 = arith.addf %1616, %1629 : vector<2x7x7xf32>
    %c92 = arith.constant 92 : index
    %1631 = memref.load %arg3[%c92] : memref<144xf32, #tpu.memory_space<smem>>
    %1632 = vector.broadcast %1631 : f32 to vector<2x7x7xf32>
    %1633 = arith.mulf %1632, %1626 : vector<2x7x7xf32>
    %1634 = arith.addf %1620, %1633 : vector<2x7x7xf32>
    %c140 = arith.constant 140 : index
    %1635 = memref.load %arg3[%c140] : memref<144xf32, #tpu.memory_space<smem>>
    %1636 = vector.broadcast %1635 : f32 to vector<2x7x7xf32>
    %1637 = arith.mulf %1636, %1626 : vector<2x7x7xf32>
    %1638 = arith.addf %1624, %1637 : vector<2x7x7xf32>
    %c3_774 = arith.constant 3 : index
    %c2_775 = arith.constant 2 : index
    %c0_776 = arith.constant 0 : index
    %c1_777 = arith.constant 1 : index
    %c0_778 = arith.constant 0 : index
    %1639 = vector.load %arg10[%c3_774, %c2_775, %c0_776, %c1_777, %c0_778] : memref<4x3x2x8x8xf32, #tpu.memory_space<vmem>>, vector<1x1x2x7x7xf32>
    %1640 = vector.shape_cast %1639 : vector<1x1x2x7x7xf32> to vector<2x7x7xf32>
    %c45_779 = arith.constant 45 : index
    %1641 = memref.load %arg3[%c45_779] : memref<144xf32, #tpu.memory_space<smem>>
    %1642 = vector.broadcast %1641 : f32 to vector<2x7x7xf32>
    %1643 = arith.mulf %1642, %1640 : vector<2x7x7xf32>
    %1644 = arith.addf %1630, %1643 : vector<2x7x7xf32>
    %c93 = arith.constant 93 : index
    %1645 = memref.load %arg3[%c93] : memref<144xf32, #tpu.memory_space<smem>>
    %1646 = vector.broadcast %1645 : f32 to vector<2x7x7xf32>
    %1647 = arith.mulf %1646, %1640 : vector<2x7x7xf32>
    %1648 = arith.addf %1634, %1647 : vector<2x7x7xf32>
    %c141 = arith.constant 141 : index
    %1649 = memref.load %arg3[%c141] : memref<144xf32, #tpu.memory_space<smem>>
    %1650 = vector.broadcast %1649 : f32 to vector<2x7x7xf32>
    %1651 = arith.mulf %1650, %1640 : vector<2x7x7xf32>
    %1652 = arith.addf %1638, %1651 : vector<2x7x7xf32>
    %c2_780 = arith.constant 2 : index
    %c2_781 = arith.constant 2 : index
    %c0_782 = arith.constant 0 : index
    %c1_783 = arith.constant 1 : index
    %c1_784 = arith.constant 1 : index
    %1653 = vector.load %arg10[%c2_780, %c2_781, %c0_782, %c1_783, %c1_784] : memref<4x3x2x8x8xf32, #tpu.memory_space<vmem>>, vector<1x1x2x7x7xf32>
    %1654 = vector.shape_cast %1653 : vector<1x1x2x7x7xf32> to vector<2x7x7xf32>
    %c46_785 = arith.constant 46 : index
    %1655 = memref.load %arg3[%c46_785] : memref<144xf32, #tpu.memory_space<smem>>
    %1656 = vector.broadcast %1655 : f32 to vector<2x7x7xf32>
    %1657 = arith.mulf %1656, %1654 : vector<2x7x7xf32>
    %1658 = arith.addf %1644, %1657 : vector<2x7x7xf32>
    %c94 = arith.constant 94 : index
    %1659 = memref.load %arg3[%c94] : memref<144xf32, #tpu.memory_space<smem>>
    %1660 = vector.broadcast %1659 : f32 to vector<2x7x7xf32>
    %1661 = arith.mulf %1660, %1654 : vector<2x7x7xf32>
    %1662 = arith.addf %1648, %1661 : vector<2x7x7xf32>
    %c142 = arith.constant 142 : index
    %1663 = memref.load %arg3[%c142] : memref<144xf32, #tpu.memory_space<smem>>
    %1664 = vector.broadcast %1663 : f32 to vector<2x7x7xf32>
    %1665 = arith.mulf %1664, %1654 : vector<2x7x7xf32>
    %1666 = arith.addf %1652, %1665 : vector<2x7x7xf32>
    %c3_786 = arith.constant 3 : index
    %c2_787 = arith.constant 2 : index
    %c0_788 = arith.constant 0 : index
    %c1_789 = arith.constant 1 : index
    %c1_790 = arith.constant 1 : index
    %1667 = vector.load %arg10[%c3_786, %c2_787, %c0_788, %c1_789, %c1_790] : memref<4x3x2x8x8xf32, #tpu.memory_space<vmem>>, vector<1x1x2x7x7xf32>
    %1668 = vector.shape_cast %1667 : vector<1x1x2x7x7xf32> to vector<2x7x7xf32>
    %c47_791 = arith.constant 47 : index
    %1669 = memref.load %arg3[%c47_791] : memref<144xf32, #tpu.memory_space<smem>>
    %1670 = vector.broadcast %1669 : f32 to vector<2x7x7xf32>
    %1671 = arith.mulf %1670, %1668 : vector<2x7x7xf32>
    %1672 = arith.addf %1658, %1671 : vector<2x7x7xf32>
    %c95 = arith.constant 95 : index
    %1673 = memref.load %arg3[%c95] : memref<144xf32, #tpu.memory_space<smem>>
    %1674 = vector.broadcast %1673 : f32 to vector<2x7x7xf32>
    %1675 = arith.mulf %1674, %1668 : vector<2x7x7xf32>
    %1676 = arith.addf %1662, %1675 : vector<2x7x7xf32>
    %c143 = arith.constant 143 : index
    %1677 = memref.load %arg3[%c143] : memref<144xf32, #tpu.memory_space<smem>>
    %1678 = vector.broadcast %1677 : f32 to vector<2x7x7xf32>
    %1679 = arith.mulf %1678, %1668 : vector<2x7x7xf32>
    %1680 = arith.addf %1666, %1679 : vector<2x7x7xf32>
    %c0_792 = arith.constant 0 : index
    %1681 = memref.load %arg4[%c0_792] : memref<3xf32, #tpu.memory_space<smem>>
    %1682 = vector.broadcast %1681 : f32 to vector<2x7x7xf32>
    %1683 = arith.addf %1672, %1682 : vector<2x7x7xf32>
    %cst_793 = arith.constant 0.000000e+00 : f32
    %1684 = vector.broadcast %cst_793 : f32 to vector<2x7x7xf32>
    %1685 = arith.maximumf %1683, %1684 : vector<2x7x7xf32>
    %c1_794 = arith.constant 1 : index
    %1686 = memref.load %arg4[%c1_794] : memref<3xf32, #tpu.memory_space<smem>>
    %1687 = vector.broadcast %1686 : f32 to vector<2x7x7xf32>
    %1688 = arith.addf %1676, %1687 : vector<2x7x7xf32>
    %cst_795 = arith.constant 0.000000e+00 : f32
    %1689 = vector.broadcast %cst_795 : f32 to vector<2x7x7xf32>
    %1690 = arith.maximumf %1688, %1689 : vector<2x7x7xf32>
    %c2_796 = arith.constant 2 : index
    %1691 = memref.load %arg4[%c2_796] : memref<3xf32, #tpu.memory_space<smem>>
    %1692 = vector.broadcast %1691 : f32 to vector<2x7x7xf32>
    %1693 = arith.addf %1680, %1692 : vector<2x7x7xf32>
    %cst_797 = arith.constant 0.000000e+00 : f32
    %1694 = vector.broadcast %cst_797 : f32 to vector<2x7x7xf32>
    %1695 = arith.maximumf %1693, %1694 : vector<2x7x7xf32>
    %cst_798 = arith.constant 0.000000e+00 : f32
    %1696 = vector.broadcast %cst_798 : f32 to vector<2x256xf32>
    %1697 = vector.extract_strided_slice %1685 {offsets = [0, 0, 0], sizes = [2, 1, 7], strides = [1, 1, 1]} : vector<2x7x7xf32> to vector<2x1x7xf32>
    %1698 = vector.shape_cast %1697 : vector<2x1x7xf32> to vector<2x7xf32>
    %c0_799 = arith.constant 0 : index
    %c0_800 = arith.constant 0 : index
    %c0_801 = arith.constant 0 : index
    %1699 = vector.load %arg5[%c0_799, %c0_800, %c0_801] : memref<21x7x256xf32, #tpu.memory_space<vmem>>, vector<1x7x256xf32>
    %1700 = vector.shape_cast %1699 : vector<1x7x256xf32> to vector<7x256xf32>
    %cst_802 = arith.constant dense<0.000000e+00> : vector<2x256xf32>
    %1701 = tpu.matmul %1698, %1700, %cst_802 {dimension_numbers = #tpu.dot_dimension_numbers<[1], [0], [0], [1], [0, 0, 1, 1], [], []>} : vector<2x7xf32>, vector<7x256xf32>, vector<2x256xf32> -> vector<2x256xf32>
    %1702 = arith.addf %1696, %1701 : vector<2x256xf32>
    %1703 = vector.extract_strided_slice %1685 {offsets = [0, 1, 0], sizes = [2, 1, 7], strides = [1, 1, 1]} : vector<2x7x7xf32> to vector<2x1x7xf32>
    %1704 = vector.shape_cast %1703 : vector<2x1x7xf32> to vector<2x7xf32>
    %c1_803 = arith.constant 1 : index
    %c0_804 = arith.constant 0 : index
    %c0_805 = arith.constant 0 : index
    %1705 = vector.load %arg5[%c1_803, %c0_804, %c0_805] : memref<21x7x256xf32, #tpu.memory_space<vmem>>, vector<1x7x256xf32>
    %1706 = vector.shape_cast %1705 : vector<1x7x256xf32> to vector<7x256xf32>
    %cst_806 = arith.constant dense<0.000000e+00> : vector<2x256xf32>
    %1707 = tpu.matmul %1704, %1706, %cst_806 {dimension_numbers = #tpu.dot_dimension_numbers<[1], [0], [0], [1], [0, 0, 1, 1], [], []>} : vector<2x7xf32>, vector<7x256xf32>, vector<2x256xf32> -> vector<2x256xf32>
    %1708 = arith.addf %1702, %1707 : vector<2x256xf32>
    %1709 = vector.extract_strided_slice %1685 {offsets = [0, 2, 0], sizes = [2, 1, 7], strides = [1, 1, 1]} : vector<2x7x7xf32> to vector<2x1x7xf32>
    %1710 = vector.shape_cast %1709 : vector<2x1x7xf32> to vector<2x7xf32>
    %c2_807 = arith.constant 2 : index
    %c0_808 = arith.constant 0 : index
    %c0_809 = arith.constant 0 : index
    %1711 = vector.load %arg5[%c2_807, %c0_808, %c0_809] : memref<21x7x256xf32, #tpu.memory_space<vmem>>, vector<1x7x256xf32>
    %1712 = vector.shape_cast %1711 : vector<1x7x256xf32> to vector<7x256xf32>
    %cst_810 = arith.constant dense<0.000000e+00> : vector<2x256xf32>
    %1713 = tpu.matmul %1710, %1712, %cst_810 {dimension_numbers = #tpu.dot_dimension_numbers<[1], [0], [0], [1], [0, 0, 1, 1], [], []>} : vector<2x7xf32>, vector<7x256xf32>, vector<2x256xf32> -> vector<2x256xf32>
    %1714 = arith.addf %1708, %1713 : vector<2x256xf32>
    %1715 = vector.extract_strided_slice %1685 {offsets = [0, 3, 0], sizes = [2, 1, 7], strides = [1, 1, 1]} : vector<2x7x7xf32> to vector<2x1x7xf32>
    %1716 = vector.shape_cast %1715 : vector<2x1x7xf32> to vector<2x7xf32>
    %c3_811 = arith.constant 3 : index
    %c0_812 = arith.constant 0 : index
    %c0_813 = arith.constant 0 : index
    %1717 = vector.load %arg5[%c3_811, %c0_812, %c0_813] : memref<21x7x256xf32, #tpu.memory_space<vmem>>, vector<1x7x256xf32>
    %1718 = vector.shape_cast %1717 : vector<1x7x256xf32> to vector<7x256xf32>
    %cst_814 = arith.constant dense<0.000000e+00> : vector<2x256xf32>
    %1719 = tpu.matmul %1716, %1718, %cst_814 {dimension_numbers = #tpu.dot_dimension_numbers<[1], [0], [0], [1], [0, 0, 1, 1], [], []>} : vector<2x7xf32>, vector<7x256xf32>, vector<2x256xf32> -> vector<2x256xf32>
    %1720 = arith.addf %1714, %1719 : vector<2x256xf32>
    %1721 = vector.extract_strided_slice %1685 {offsets = [0, 4, 0], sizes = [2, 1, 7], strides = [1, 1, 1]} : vector<2x7x7xf32> to vector<2x1x7xf32>
    %1722 = vector.shape_cast %1721 : vector<2x1x7xf32> to vector<2x7xf32>
    %c4_815 = arith.constant 4 : index
    %c0_816 = arith.constant 0 : index
    %c0_817 = arith.constant 0 : index
    %1723 = vector.load %arg5[%c4_815, %c0_816, %c0_817] : memref<21x7x256xf32, #tpu.memory_space<vmem>>, vector<1x7x256xf32>
    %1724 = vector.shape_cast %1723 : vector<1x7x256xf32> to vector<7x256xf32>
    %cst_818 = arith.constant dense<0.000000e+00> : vector<2x256xf32>
    %1725 = tpu.matmul %1722, %1724, %cst_818 {dimension_numbers = #tpu.dot_dimension_numbers<[1], [0], [0], [1], [0, 0, 1, 1], [], []>} : vector<2x7xf32>, vector<7x256xf32>, vector<2x256xf32> -> vector<2x256xf32>
    %1726 = arith.addf %1720, %1725 : vector<2x256xf32>
    %1727 = vector.extract_strided_slice %1685 {offsets = [0, 5, 0], sizes = [2, 1, 7], strides = [1, 1, 1]} : vector<2x7x7xf32> to vector<2x1x7xf32>
    %1728 = vector.shape_cast %1727 : vector<2x1x7xf32> to vector<2x7xf32>
    %c5_819 = arith.constant 5 : index
    %c0_820 = arith.constant 0 : index
    %c0_821 = arith.constant 0 : index
    %1729 = vector.load %arg5[%c5_819, %c0_820, %c0_821] : memref<21x7x256xf32, #tpu.memory_space<vmem>>, vector<1x7x256xf32>
    %1730 = vector.shape_cast %1729 : vector<1x7x256xf32> to vector<7x256xf32>
    %cst_822 = arith.constant dense<0.000000e+00> : vector<2x256xf32>
    %1731 = tpu.matmul %1728, %1730, %cst_822 {dimension_numbers = #tpu.dot_dimension_numbers<[1], [0], [0], [1], [0, 0, 1, 1], [], []>} : vector<2x7xf32>, vector<7x256xf32>, vector<2x256xf32> -> vector<2x256xf32>
    %1732 = arith.addf %1726, %1731 : vector<2x256xf32>
    %1733 = vector.extract_strided_slice %1685 {offsets = [0, 6, 0], sizes = [2, 1, 7], strides = [1, 1, 1]} : vector<2x7x7xf32> to vector<2x1x7xf32>
    %1734 = vector.shape_cast %1733 : vector<2x1x7xf32> to vector<2x7xf32>
    %c6_823 = arith.constant 6 : index
    %c0_824 = arith.constant 0 : index
    %c0_825 = arith.constant 0 : index
    %1735 = vector.load %arg5[%c6_823, %c0_824, %c0_825] : memref<21x7x256xf32, #tpu.memory_space<vmem>>, vector<1x7x256xf32>
    %1736 = vector.shape_cast %1735 : vector<1x7x256xf32> to vector<7x256xf32>
    %cst_826 = arith.constant dense<0.000000e+00> : vector<2x256xf32>
    %1737 = tpu.matmul %1734, %1736, %cst_826 {dimension_numbers = #tpu.dot_dimension_numbers<[1], [0], [0], [1], [0, 0, 1, 1], [], []>} : vector<2x7xf32>, vector<7x256xf32>, vector<2x256xf32> -> vector<2x256xf32>
    %1738 = arith.addf %1732, %1737 : vector<2x256xf32>
    %1739 = vector.extract_strided_slice %1690 {offsets = [0, 0, 0], sizes = [2, 1, 7], strides = [1, 1, 1]} : vector<2x7x7xf32> to vector<2x1x7xf32>
    %1740 = vector.shape_cast %1739 : vector<2x1x7xf32> to vector<2x7xf32>
    %c7_827 = arith.constant 7 : index
    %c0_828 = arith.constant 0 : index
    %c0_829 = arith.constant 0 : index
    %1741 = vector.load %arg5[%c7_827, %c0_828, %c0_829] : memref<21x7x256xf32, #tpu.memory_space<vmem>>, vector<1x7x256xf32>
    %1742 = vector.shape_cast %1741 : vector<1x7x256xf32> to vector<7x256xf32>
    %cst_830 = arith.constant dense<0.000000e+00> : vector<2x256xf32>
    %1743 = tpu.matmul %1740, %1742, %cst_830 {dimension_numbers = #tpu.dot_dimension_numbers<[1], [0], [0], [1], [0, 0, 1, 1], [], []>} : vector<2x7xf32>, vector<7x256xf32>, vector<2x256xf32> -> vector<2x256xf32>
    %1744 = arith.addf %1738, %1743 : vector<2x256xf32>
    %1745 = vector.extract_strided_slice %1690 {offsets = [0, 1, 0], sizes = [2, 1, 7], strides = [1, 1, 1]} : vector<2x7x7xf32> to vector<2x1x7xf32>
    %1746 = vector.shape_cast %1745 : vector<2x1x7xf32> to vector<2x7xf32>
    %c8_831 = arith.constant 8 : index
    %c0_832 = arith.constant 0 : index
    %c0_833 = arith.constant 0 : index
    %1747 = vector.load %arg5[%c8_831, %c0_832, %c0_833] : memref<21x7x256xf32, #tpu.memory_space<vmem>>, vector<1x7x256xf32>
    %1748 = vector.shape_cast %1747 : vector<1x7x256xf32> to vector<7x256xf32>
    %cst_834 = arith.constant dense<0.000000e+00> : vector<2x256xf32>
    %1749 = tpu.matmul %1746, %1748, %cst_834 {dimension_numbers = #tpu.dot_dimension_numbers<[1], [0], [0], [1], [0, 0, 1, 1], [], []>} : vector<2x7xf32>, vector<7x256xf32>, vector<2x256xf32> -> vector<2x256xf32>
    %1750 = arith.addf %1744, %1749 : vector<2x256xf32>
    %1751 = vector.extract_strided_slice %1690 {offsets = [0, 2, 0], sizes = [2, 1, 7], strides = [1, 1, 1]} : vector<2x7x7xf32> to vector<2x1x7xf32>
    %1752 = vector.shape_cast %1751 : vector<2x1x7xf32> to vector<2x7xf32>
    %c9_835 = arith.constant 9 : index
    %c0_836 = arith.constant 0 : index
    %c0_837 = arith.constant 0 : index
    %1753 = vector.load %arg5[%c9_835, %c0_836, %c0_837] : memref<21x7x256xf32, #tpu.memory_space<vmem>>, vector<1x7x256xf32>
    %1754 = vector.shape_cast %1753 : vector<1x7x256xf32> to vector<7x256xf32>
    %cst_838 = arith.constant dense<0.000000e+00> : vector<2x256xf32>
    %1755 = tpu.matmul %1752, %1754, %cst_838 {dimension_numbers = #tpu.dot_dimension_numbers<[1], [0], [0], [1], [0, 0, 1, 1], [], []>} : vector<2x7xf32>, vector<7x256xf32>, vector<2x256xf32> -> vector<2x256xf32>
    %1756 = arith.addf %1750, %1755 : vector<2x256xf32>
    %1757 = vector.extract_strided_slice %1690 {offsets = [0, 3, 0], sizes = [2, 1, 7], strides = [1, 1, 1]} : vector<2x7x7xf32> to vector<2x1x7xf32>
    %1758 = vector.shape_cast %1757 : vector<2x1x7xf32> to vector<2x7xf32>
    %c10_839 = arith.constant 10 : index
    %c0_840 = arith.constant 0 : index
    %c0_841 = arith.constant 0 : index
    %1759 = vector.load %arg5[%c10_839, %c0_840, %c0_841] : memref<21x7x256xf32, #tpu.memory_space<vmem>>, vector<1x7x256xf32>
    %1760 = vector.shape_cast %1759 : vector<1x7x256xf32> to vector<7x256xf32>
    %cst_842 = arith.constant dense<0.000000e+00> : vector<2x256xf32>
    %1761 = tpu.matmul %1758, %1760, %cst_842 {dimension_numbers = #tpu.dot_dimension_numbers<[1], [0], [0], [1], [0, 0, 1, 1], [], []>} : vector<2x7xf32>, vector<7x256xf32>, vector<2x256xf32> -> vector<2x256xf32>
    %1762 = arith.addf %1756, %1761 : vector<2x256xf32>
    %1763 = vector.extract_strided_slice %1690 {offsets = [0, 4, 0], sizes = [2, 1, 7], strides = [1, 1, 1]} : vector<2x7x7xf32> to vector<2x1x7xf32>
    %1764 = vector.shape_cast %1763 : vector<2x1x7xf32> to vector<2x7xf32>
    %c11_843 = arith.constant 11 : index
    %c0_844 = arith.constant 0 : index
    %c0_845 = arith.constant 0 : index
    %1765 = vector.load %arg5[%c11_843, %c0_844, %c0_845] : memref<21x7x256xf32, #tpu.memory_space<vmem>>, vector<1x7x256xf32>
    %1766 = vector.shape_cast %1765 : vector<1x7x256xf32> to vector<7x256xf32>
    %cst_846 = arith.constant dense<0.000000e+00> : vector<2x256xf32>
    %1767 = tpu.matmul %1764, %1766, %cst_846 {dimension_numbers = #tpu.dot_dimension_numbers<[1], [0], [0], [1], [0, 0, 1, 1], [], []>} : vector<2x7xf32>, vector<7x256xf32>, vector<2x256xf32> -> vector<2x256xf32>
    %1768 = arith.addf %1762, %1767 : vector<2x256xf32>
    %1769 = vector.extract_strided_slice %1690 {offsets = [0, 5, 0], sizes = [2, 1, 7], strides = [1, 1, 1]} : vector<2x7x7xf32> to vector<2x1x7xf32>
    %1770 = vector.shape_cast %1769 : vector<2x1x7xf32> to vector<2x7xf32>
    %c12_847 = arith.constant 12 : index
    %c0_848 = arith.constant 0 : index
    %c0_849 = arith.constant 0 : index
    %1771 = vector.load %arg5[%c12_847, %c0_848, %c0_849] : memref<21x7x256xf32, #tpu.memory_space<vmem>>, vector<1x7x256xf32>
    %1772 = vector.shape_cast %1771 : vector<1x7x256xf32> to vector<7x256xf32>
    %cst_850 = arith.constant dense<0.000000e+00> : vector<2x256xf32>
    %1773 = tpu.matmul %1770, %1772, %cst_850 {dimension_numbers = #tpu.dot_dimension_numbers<[1], [0], [0], [1], [0, 0, 1, 1], [], []>} : vector<2x7xf32>, vector<7x256xf32>, vector<2x256xf32> -> vector<2x256xf32>
    %1774 = arith.addf %1768, %1773 : vector<2x256xf32>
    %1775 = vector.extract_strided_slice %1690 {offsets = [0, 6, 0], sizes = [2, 1, 7], strides = [1, 1, 1]} : vector<2x7x7xf32> to vector<2x1x7xf32>
    %1776 = vector.shape_cast %1775 : vector<2x1x7xf32> to vector<2x7xf32>
    %c13_851 = arith.constant 13 : index
    %c0_852 = arith.constant 0 : index
    %c0_853 = arith.constant 0 : index
    %1777 = vector.load %arg5[%c13_851, %c0_852, %c0_853] : memref<21x7x256xf32, #tpu.memory_space<vmem>>, vector<1x7x256xf32>
    %1778 = vector.shape_cast %1777 : vector<1x7x256xf32> to vector<7x256xf32>
    %cst_854 = arith.constant dense<0.000000e+00> : vector<2x256xf32>
    %1779 = tpu.matmul %1776, %1778, %cst_854 {dimension_numbers = #tpu.dot_dimension_numbers<[1], [0], [0], [1], [0, 0, 1, 1], [], []>} : vector<2x7xf32>, vector<7x256xf32>, vector<2x256xf32> -> vector<2x256xf32>
    %1780 = arith.addf %1774, %1779 : vector<2x256xf32>
    %1781 = vector.extract_strided_slice %1695 {offsets = [0, 0, 0], sizes = [2, 1, 7], strides = [1, 1, 1]} : vector<2x7x7xf32> to vector<2x1x7xf32>
    %1782 = vector.shape_cast %1781 : vector<2x1x7xf32> to vector<2x7xf32>
    %c14_855 = arith.constant 14 : index
    %c0_856 = arith.constant 0 : index
    %c0_857 = arith.constant 0 : index
    %1783 = vector.load %arg5[%c14_855, %c0_856, %c0_857] : memref<21x7x256xf32, #tpu.memory_space<vmem>>, vector<1x7x256xf32>
    %1784 = vector.shape_cast %1783 : vector<1x7x256xf32> to vector<7x256xf32>
    %cst_858 = arith.constant dense<0.000000e+00> : vector<2x256xf32>
    %1785 = tpu.matmul %1782, %1784, %cst_858 {dimension_numbers = #tpu.dot_dimension_numbers<[1], [0], [0], [1], [0, 0, 1, 1], [], []>} : vector<2x7xf32>, vector<7x256xf32>, vector<2x256xf32> -> vector<2x256xf32>
    %1786 = arith.addf %1780, %1785 : vector<2x256xf32>
    %1787 = vector.extract_strided_slice %1695 {offsets = [0, 1, 0], sizes = [2, 1, 7], strides = [1, 1, 1]} : vector<2x7x7xf32> to vector<2x1x7xf32>
    %1788 = vector.shape_cast %1787 : vector<2x1x7xf32> to vector<2x7xf32>
    %c15_859 = arith.constant 15 : index
    %c0_860 = arith.constant 0 : index
    %c0_861 = arith.constant 0 : index
    %1789 = vector.load %arg5[%c15_859, %c0_860, %c0_861] : memref<21x7x256xf32, #tpu.memory_space<vmem>>, vector<1x7x256xf32>
    %1790 = vector.shape_cast %1789 : vector<1x7x256xf32> to vector<7x256xf32>
    %cst_862 = arith.constant dense<0.000000e+00> : vector<2x256xf32>
    %1791 = tpu.matmul %1788, %1790, %cst_862 {dimension_numbers = #tpu.dot_dimension_numbers<[1], [0], [0], [1], [0, 0, 1, 1], [], []>} : vector<2x7xf32>, vector<7x256xf32>, vector<2x256xf32> -> vector<2x256xf32>
    %1792 = arith.addf %1786, %1791 : vector<2x256xf32>
    %1793 = vector.extract_strided_slice %1695 {offsets = [0, 2, 0], sizes = [2, 1, 7], strides = [1, 1, 1]} : vector<2x7x7xf32> to vector<2x1x7xf32>
    %1794 = vector.shape_cast %1793 : vector<2x1x7xf32> to vector<2x7xf32>
    %c16_863 = arith.constant 16 : index
    %c0_864 = arith.constant 0 : index
    %c0_865 = arith.constant 0 : index
    %1795 = vector.load %arg5[%c16_863, %c0_864, %c0_865] : memref<21x7x256xf32, #tpu.memory_space<vmem>>, vector<1x7x256xf32>
    %1796 = vector.shape_cast %1795 : vector<1x7x256xf32> to vector<7x256xf32>
    %cst_866 = arith.constant dense<0.000000e+00> : vector<2x256xf32>
    %1797 = tpu.matmul %1794, %1796, %cst_866 {dimension_numbers = #tpu.dot_dimension_numbers<[1], [0], [0], [1], [0, 0, 1, 1], [], []>} : vector<2x7xf32>, vector<7x256xf32>, vector<2x256xf32> -> vector<2x256xf32>
    %1798 = arith.addf %1792, %1797 : vector<2x256xf32>
    %1799 = vector.extract_strided_slice %1695 {offsets = [0, 3, 0], sizes = [2, 1, 7], strides = [1, 1, 1]} : vector<2x7x7xf32> to vector<2x1x7xf32>
    %1800 = vector.shape_cast %1799 : vector<2x1x7xf32> to vector<2x7xf32>
    %c17_867 = arith.constant 17 : index
    %c0_868 = arith.constant 0 : index
    %c0_869 = arith.constant 0 : index
    %1801 = vector.load %arg5[%c17_867, %c0_868, %c0_869] : memref<21x7x256xf32, #tpu.memory_space<vmem>>, vector<1x7x256xf32>
    %1802 = vector.shape_cast %1801 : vector<1x7x256xf32> to vector<7x256xf32>
    %cst_870 = arith.constant dense<0.000000e+00> : vector<2x256xf32>
    %1803 = tpu.matmul %1800, %1802, %cst_870 {dimension_numbers = #tpu.dot_dimension_numbers<[1], [0], [0], [1], [0, 0, 1, 1], [], []>} : vector<2x7xf32>, vector<7x256xf32>, vector<2x256xf32> -> vector<2x256xf32>
    %1804 = arith.addf %1798, %1803 : vector<2x256xf32>
    %1805 = vector.extract_strided_slice %1695 {offsets = [0, 4, 0], sizes = [2, 1, 7], strides = [1, 1, 1]} : vector<2x7x7xf32> to vector<2x1x7xf32>
    %1806 = vector.shape_cast %1805 : vector<2x1x7xf32> to vector<2x7xf32>
    %c18_871 = arith.constant 18 : index
    %c0_872 = arith.constant 0 : index
    %c0_873 = arith.constant 0 : index
    %1807 = vector.load %arg5[%c18_871, %c0_872, %c0_873] : memref<21x7x256xf32, #tpu.memory_space<vmem>>, vector<1x7x256xf32>
    %1808 = vector.shape_cast %1807 : vector<1x7x256xf32> to vector<7x256xf32>
    %cst_874 = arith.constant dense<0.000000e+00> : vector<2x256xf32>
    %1809 = tpu.matmul %1806, %1808, %cst_874 {dimension_numbers = #tpu.dot_dimension_numbers<[1], [0], [0], [1], [0, 0, 1, 1], [], []>} : vector<2x7xf32>, vector<7x256xf32>, vector<2x256xf32> -> vector<2x256xf32>
    %1810 = arith.addf %1804, %1809 : vector<2x256xf32>
    %1811 = vector.extract_strided_slice %1695 {offsets = [0, 5, 0], sizes = [2, 1, 7], strides = [1, 1, 1]} : vector<2x7x7xf32> to vector<2x1x7xf32>
    %1812 = vector.shape_cast %1811 : vector<2x1x7xf32> to vector<2x7xf32>
    %c19_875 = arith.constant 19 : index
    %c0_876 = arith.constant 0 : index
    %c0_877 = arith.constant 0 : index
    %1813 = vector.load %arg5[%c19_875, %c0_876, %c0_877] : memref<21x7x256xf32, #tpu.memory_space<vmem>>, vector<1x7x256xf32>
    %1814 = vector.shape_cast %1813 : vector<1x7x256xf32> to vector<7x256xf32>
    %cst_878 = arith.constant dense<0.000000e+00> : vector<2x256xf32>
    %1815 = tpu.matmul %1812, %1814, %cst_878 {dimension_numbers = #tpu.dot_dimension_numbers<[1], [0], [0], [1], [0, 0, 1, 1], [], []>} : vector<2x7xf32>, vector<7x256xf32>, vector<2x256xf32> -> vector<2x256xf32>
    %1816 = arith.addf %1810, %1815 : vector<2x256xf32>
    %1817 = vector.extract_strided_slice %1695 {offsets = [0, 6, 0], sizes = [2, 1, 7], strides = [1, 1, 1]} : vector<2x7x7xf32> to vector<2x1x7xf32>
    %1818 = vector.shape_cast %1817 : vector<2x1x7xf32> to vector<2x7xf32>
    %c20_879 = arith.constant 20 : index
    %c0_880 = arith.constant 0 : index
    %c0_881 = arith.constant 0 : index
    %1819 = vector.load %arg5[%c20_879, %c0_880, %c0_881] : memref<21x7x256xf32, #tpu.memory_space<vmem>>, vector<1x7x256xf32>
    %1820 = vector.shape_cast %1819 : vector<1x7x256xf32> to vector<7x256xf32>
    %cst_882 = arith.constant dense<0.000000e+00> : vector<2x256xf32>
    %1821 = tpu.matmul %1818, %1820, %cst_882 {dimension_numbers = #tpu.dot_dimension_numbers<[1], [0], [0], [1], [0, 0, 1, 1], [], []>} : vector<2x7xf32>, vector<7x256xf32>, vector<2x256xf32> -> vector<2x256xf32>
    %1822 = arith.addf %1816, %1821 : vector<2x256xf32>
    %c0_883 = arith.constant 0 : index
    %c0_884 = arith.constant 0 : index
    %1823 = vector.load %arg6[%c0_883, %c0_884] : memref<1x256xf32, #tpu.memory_space<vmem>>, vector<1x256xf32>
    %1824 = vector.broadcast %1823 : vector<1x256xf32> to vector<2x256xf32>
    %1825 = arith.addf %1822, %1824 : vector<2x256xf32>
    %c0_885 = arith.constant 0 : index
    %c0_886 = arith.constant 0 : index
    %1826 = vector.load %arg7[%c0_885, %c0_886] : memref<256x10xf32, #tpu.memory_space<vmem>>, vector<256x10xf32>
    %cst_887 = arith.constant dense<0.000000e+00> : vector<2x10xf32>
    %1827 = tpu.matmul %1825, %1826, %cst_887 {dimension_numbers = #tpu.dot_dimension_numbers<[1], [0], [0], [1], [0, 0, 1, 1], [], []>} : vector<2x256xf32>, vector<256x10xf32>, vector<2x10xf32> -> vector<2x10xf32>
    %c0_888 = arith.constant 0 : index
    %c0_889 = arith.constant 0 : index
    %1828 = vector.load %arg8[%c0_888, %c0_889] : memref<1x10xf32, #tpu.memory_space<vmem>>, vector<1x10xf32>
    %1829 = vector.broadcast %1828 : vector<1x10xf32> to vector<2x10xf32>
    %1830 = arith.addf %1827, %1829 : vector<2x10xf32>
    %c0_890 = arith.constant 0 : index
    %c0_891 = arith.constant 0 : index
    %1831 = vector.load %arg9[%c0_890, %c0_891] : memref<2x10xf32, #tpu.memory_space<vmem>>, vector<2x10xf32>
    tpu.vector_store %arg9[%c0_890, %c0_891], %1830 {strides = array<i32>} : memref<2x10xf32, #tpu.memory_space<vmem>>, vector<2x10xf32>,
    return
  }
}

</mosaic_0001>

<bundles_post_ra>
// kernel: cnn_forward.1
= control target key start
LH: loop header
LB: loop body
LE: loop exit
PB: predicated region body
PF: predicated region fallthrough
CT: control target
= control target key end

     0   :  { %14 = vsyncpa [#allocation5], 0  ;;  %s10378_s0 = inlined_call_operand.vmem [shape: f32[16,2,8,8], index: 0, kind: input, shape index: {}]   ;;  %s10379_s1 = inlined_call_operand.vmem [shape: f32[48], index: 1, kind: input, shape index: {}]   ;;  %s10380_s2 = inlined_call_operand.vmem [shape: f32[3], index: 2, kind: input, shape index: {}]   ;;  %s10381_s3 = inlined_call_operand.vmem [shape: f32[144], index: 3, kind: input, shape index: {}]   ;;  %s10382_s4 = inlined_call_operand.vmem [shape: f32[3], index: 4, kind: input, shape index: {}]   ;;  %s10383_s5 = inlined_call_operand.vmem [shape: f32[21,7,256], index: 5, kind: input, shape index: {}]   ;;  %s10384_s6 = inlined_call_operand.vmem [shape: f32[1,256], index: 6, kind: input, shape index: {}]   ;;  %s10385_s7 = inlined_call_operand.vmem [shape: f32[256,10], index: 7, kind: input, shape index: {}]   ;;  %s10386_s8 = inlined_call_operand.vmem [shape: f32[1,10], index: 8, kind: input, shape index: {}]   ;;  %s10387_s9 = inlined_call_operand.hbm [shape: f32[2,10], index: 9, kind: output, shape index: {}]  }
   0x1   :  { %15 = vsyncpa [#allocation7], 0 }
   0x2   :  { %16 = vsyncpa [#allocation10], 0  ;;  %s36_s11 = sshll.u32 %s10380_s2, 4  ;;  %s37_s11 = int_to_ptr.vmem [resolvable:$true] %s36_s11 }
   0x3   :  { %17 = vsyncpa [#allocation4], 0  ;;  %s26_s14 = sshll.u32 %s10379_s1, 4  ;;  %s6166_s15 = scalar_lea.vmem %s37_s11, 16  ;;  %s27_s14 = int_to_ptr.vmem [resolvable:$true] %s26_s14 }
   0x4   :  { %p6167_p0 = scmp.ne.s32.totalorder %s37_s11, %s6166_s15  ;;  %p6171_p1 = scmp.lt.s32.totalorder %s37_s11, %s37_s11 }
   0x5   :  { %p6172_p2 = scmp.lt.s32.totalorder %s6166_s15, %s6166_s15 }
   0x7   :  { %p6173_p3 = por %p6172_p2, %p6171_p1 }
   0x9   :  { %p6174_p4 = pnand %p6173_p3, %p6167_p0 }
   0xb   :  { %6177 = shalt.err (!%p6174_p4)
}
   0xc   :  { %s6242_s16 = smov [#allocation6]   ;;  %s6178_s17 = scalar_lea.vmem %s27_s14, 16 }
   0xd   :  { %39 = dma.vmem_to_smem %s37_s11, 16, %s6242_s16, [#allocation7]  }
   0xe   :  { %p6179_p5 = scmp.ne.s32.totalorder %s27_s14, %s6178_s17  ;;  %p6183_p6 = scmp.lt.s32.totalorder %s27_s14, %s27_s14 }
   0xf   :  { %p6184_p7 = scmp.lt.s32.totalorder %s6178_s17, %s6178_s17 }
  0x11   :  { %p6185_p8 = por %p6184_p7, %p6183_p6 }
  0x13   :  { %p6186_p9 = pnand %p6185_p8, %p6179_p5 }
  0x15   :  { %6189 = shalt.err (!%p6186_p9)
}
  0x16   :  { %s6243_s2 = smov [#allocation3]   ;;  %s46_s19 = sshll.u32 %s10381_s3, 4  ;;  %s47_s19 = int_to_ptr.vmem [resolvable:$true] %s46_s19 }
  0x17   :  { %29 = dma.vmem_to_smem %s27_s14, 16, %s6243_s2, [#allocation5]  }
  0x18   :  { %s56_s22 = sshll.u32 %s10382_s4, 4  ;;  %s6190_s23 = scalar_lea.vmem %s47_s19, 32  ;;  %s57_s22 = int_to_ptr.vmem [resolvable:$true] %s56_s22 }
  0x19   :  { %p6191_p10 = scmp.ne.s32.totalorder %s47_s19, %s6190_s23  ;;  %p6195_p11 = scmp.lt.s32.totalorder %s47_s19, %s47_s19 }
  0x1a   :  { %p6196_p12 = scmp.lt.s32.totalorder %s6190_s23, %s6190_s23 }
  0x1c   :  { %p6197_p13 = por %p6196_p12, %p6195_p11 }
  0x1e   :  { %p6198_p0 = pnand %p6197_p13, %p6191_p10 }
  0x20   :  { %6201 = shalt.err (!%p6198_p0)
}
  0x21   :  { %s6244_s24 = smov [#allocation8]   ;;  %s6202_s25 = scalar_lea.vmem %s57_s22, 16 }
  0x22   :  { %49 = dma.vmem_to_smem %s47_s19, 32, %s6244_s24, [#allocation7]  }
  0x23   :  { %p6203_p1 = scmp.ne.s32.totalorder %s57_s22, %s6202_s25  ;;  %p6207_p2 = scmp.lt.s32.totalorder %s57_s22, %s57_s22 }
  0x24   :  { %p6208_p3 = scmp.lt.s32.totalorder %s6202_s25, %s6202_s25 }
  0x26   :  { %p6209_p4 = por %p6208_p3, %p6207_p2 }
  0x28   :  { %p6210_p5 = pnand %p6209_p4, %p6203_p1 }
  0x2a   :  { %6213 = shalt.err (!%p6210_p5)
}
  0x2b   :  { %s6245_s3 = smov [#allocation9]  }
  0x2c   :  { %59 = dma.vmem_to_smem %s57_s22, 16, %s6245_s3, [#allocation10]  }
  0x2d   :  { %6234 = dma.done.wait [#allocation5], 16  }
  0x2e   :  { %6235 = vsyncadd [#allocation5], 4294967280 }
  0x2f   :  { %6236 = dma.done.wait [#allocation7], 48  }
  0x30   :  { %6237 = vsyncadd [#allocation7], 4294967248 }
  0x31   :  { %6238 = dma.done.wait [#allocation10], 16  }
  0x32   :  { %6239 = vsyncadd [#allocation10], 4294967280 }
  0x33   :  { %80 = sfence }
  0x34   :  { %s5668_s4 = sld [smem:[#allocation3 + $0x3]]  ;;  %v6315_v0 = vld [vmem:[%s10378_s0 + $0x90] sm:$0x7f]  ;;  %v6320_v1 = vld [vmem:[%s10378_s0 + $0x80] sm:$0x7f]  ;;  %s6246_s15 = smov 127  }
  0x35   :  { %s5663_s26 = sld [smem:[#allocation3 + $0x2]]  ;;  %v6325_v2 = vld [vmem:[%s10378_s0 + $0x98] sm:$0x7f]  ;;  %v6331_v5 = vld [vmem:[%s10378_s0 + $0x88] sm:$0x7f]  ;;  %vm81_vm0 = vcmask 64512  }
  0x36   :  { %s5683_s27 = sld [smem:[#allocation3 + $0x6]]  ;;  %v6341_v10 = vld [vmem:[%s10378_s0 + $0xc0] sm:$0x7f]  ;;  %v6355_v15 = vld [vmem:[%s10378_s0 + $0x10] sm:$0x7f]  ;;  %vm448_vm1 = vcmask 55296  }
  0x37   :  { %s5688_s2 = sld [smem:[#allocation3 + $0x7]]  ;;  %v6346_v12 = vld [vmem:[%s10378_s0] sm:$0x7f]  ;;  %v6360_v16 = vld [vmem:[%s10378_s0 + $0x8] sm:$0x7f]  ;;  %vm996_vm2 = vcmask 63496  }
  0x38   :  { %v6369_v19 = vld [vmem:[%s10378_s0 + $0xd0] sm:$0x7f]  ;;  %s5701_s25 = sld [smem:[#allocation3 + $0xa]]  ;;  %v6374_v21 = vld [vmem:[%s10378_s0 + $0xc8] sm:$0x7f]  ;;  %vm3461_vm3 = vcmask 1046528  }
  0x39   :  { %v6383_v24 = vld [vmem:[%s10378_s0 + $0xd8] sm:$0x7f]  ;;  %v6397_v28 = vld [vmem:[%s10378_s0 + $0x1] sm:$0x7f]  ;;  %s5706_s11 = sld [smem:[#allocation3 + $0xb]]  ;;  %vm3456_vm4 = vcmask 1041409  }
  0x3a   :  { %v1467_v3 = vstv %s5668_s4  ;;  %v6388_v25 = vld [vmem:[%s10378_s0 + $0x18] sm:$0x7f]  ;;  %v6402_v30 = vld [vmem:[%s10378_s0 + $0x40] sm:$0x7f]  ;;  %v6411_v33 = vld [vmem:[%s10378_s0 + $0x50] sm:$0x7f] }
  0x3b   :  { %v1468_v4 = vmul.f32 %v6315_v0, %v1467_v3  ;;  %v1423_v6 = vstv %s5663_s26  ;;  %v1469_v8 = vmul.f32 %v6325_v2, %v1467_v3  ;;  %v557_v17 = vmul.f32 %v6355_v15, %v1467_v3  ;;  %v6416_v34 = vld [vmem:[%s10378_s0 + $0x48] sm:$0x7f]  ;;  %v6425_v37 = vld [vmem:[%s10378_s0 + $0x11] sm:$0x7f]  ;;  %s5721_s19 = sld [smem:[#allocation3 + $0xe]] }
  0x3c   :  { %v1424_v7 = vmul.f32 %v6320_v1, %v1423_v6  ;;  %v1425_v9 = vmul.f32 %v6331_v5, %v1423_v6  ;;  %v1551_v11 = vstv %s5683_s27  ;;  %v513_v14 = vmul.f32 %v1423_v6, %v6346_v12  ;;  %v6430_v39 = vld [vmem:[%s10378_s0 + $0x9] sm:$0x7f]  ;;  %v6439_v42 = vld [vmem:[%s10378_s0 + $0x19] sm:$0x7f]  ;;  %v6453_v46 = vld [vmem:[%s10378_s0 + $0x41] sm:$0x7f] }
  0x3d   :  { %1472 = vrot.lane.b32.xlu1 %v1468_v4, %s6246_s15  ;;  %v1552_v13 = vmul.f32 %v6341_v10, %v1551_v11  ;;  %v514_v18 = vmul.f32 %v1423_v6, %v6360_v16  ;;  %v1595_v20 = vstv %s5688_s2  ;;  %v1553_v23 = vmul.f32 %v6374_v21, %v1551_v11  ;;  %v6444_v43 = vld [vmem:[%s10378_s0 + $0x58] sm:$0x7f]  ;;  %s5726_s26 = sld [smem:[#allocation3 + $0xf]]  ;;  %v6458_v48 = vld [vmem:[%s10378_s0 + $0x80] sm:$0x7f] }
  0x3e   :  { %1428 = vrot.lane.b32.xlu0 %v1424_v7, %s6246_s15  ;;  %v1596_v22 = vmul.f32 %v6369_v19, %v1595_v20  ;;  %v1597_v26 = vmul.f32 %v6383_v24, %v1595_v20  ;;  %v558_v27 = vmul.f32 %v6388_v25, %v1467_v3  ;;  %v1679_v29 = vstv %s5701_s25  ;;  %v6467_v51 = vld [vmem:[%s10378_s0 + $0x90] sm:$0x7f]  ;;  %v6472_v52 = vld [vmem:[%s10378_s0 + $0x88] sm:$0x7f]  ;;  %s5664_s14 = sld [smem:[#allocation3 + $0x12]] }
  0x3f   :  { %v1680_v31 = vmul.f32 %v1679_v29, %v6397_v28  ;;  %v641_v32 = vmul.f32 %v6402_v30, %v1551_v11  ;;  %v685_v35 = vmul.f32 %v6411_v33, %v1595_v20  ;;  %v642_v36 = vmul.f32 %v6416_v34, %v1551_v11  ;;  %v6481_v55 = vld [vmem:[%s10378_s0 + $0x51] sm:$0x7f]  ;;  %v6486_v57 = vld [vmem:[%s10378_s0 + $0x49] sm:$0x7f]  ;;  %v6495_v60 = vld [vmem:[%s10378_s0 + $0x59] sm:$0x7f] }
  0x40   :  { %v1723_v38 = vstv %s5706_s11  ;;  %v1681_v41 = vmul.f32 %v1679_v29, %v6430_v39  ;;  %v686_v45 = vmul.f32 %v6444_v43, %v1595_v20  ;;  %v769_v50 = vmul.f32 %v6458_v48, %v1679_v29  ;;  %10489 = vst [vmem:[#allocation16_spill] sm:$0xff] %v6495_v60  ;;  %v6500_v61 = vld [vmem:[%s10378_s0 + $0x98] sm:$0x7f]  ;;  %s5669_s20 = sld [smem:[#allocation3 + $0x13]]  ;;  %v6509_v4 = vld [vmem:[%s10378_s0 + $0xc0] sm:$0x7f] }
  0x41   :  { %1474 = vrot.lane.b32.xlu1 %v1469_v8, %s6246_s15  ;;  %v1724_v40 = vmul.f32 %v6425_v37, %v1723_v38  ;;  %v1725_v44 = vmul.f32 %v6439_v42, %v1723_v38  ;;  %v1807_v47 = vstv %s5721_s19  ;;  %v813_v53 = vmul.f32 %v6467_v51, %v1723_v38  ;;  %10490 = vst [vmem:[#allocation17_spill] sm:$0xff] %v6509_v4  ;;  %v6518_v8 = vld [vmem:[%s10378_s0 + $0xd0] sm:$0x7f]  ;;  %s5684_s4 = sld [smem:[#allocation3 + $0x16]]  ;;  %v6536_v20 = vld [vmem:[%s10378_s0 + $0xd8] sm:$0x7f] }
  0x42   :  { %1430 = vrot.lane.b32.xlu0 %v1425_v9, %s6246_s15  ;;  %v1808_v49 = vmul.f32 %v6453_v46, %v1807_v47  ;;  %v770_v54 = vmul.f32 %v6472_v52, %v1679_v29  ;;  %v1809_v59 = vmul.f32 %v6486_v57, %v1807_v47  ;;  %v814_v63 = vmul.f32 %v6500_v61, %v1723_v38  ;;  %v6523_v9 = vld [vmem:[%s10378_s0 + $0xc8] sm:$0x7f]  ;;  %s5689_s28 = sld [smem:[#allocation3 + $0x17]] }
  0x43   :  { %v1851_v56 = vstv %s5726_s26  ;;  %v897_v7 = vmul.f32 %v6509_v4, %v1807_v47  ;;  %10491 = vst [vmem:[#allocation18_spill] sm:$0xff] %v6523_v9  ;;  %s5702_s29 = sld [smem:[#allocation3 + $0x1a]]  ;;  %vm3458_vm5 = vcmask 56320   ;;  %vm5396_vm6 = vcmask 74752  }
  0x44   :  { %v1852_v58 = vmul.f32 %v6481_v55, %v1851_v56  ;;  %v1853_v62 = vmul.f32 %v6495_v60, %v1851_v56  ;;  %v1437_v3 = vstv %s5664_s14  ;;  %v941_v11 = vmul.f32 %v6518_v8, %v1851_v56  ;;  %s5707_s30 = sld [smem:[#allocation3 + $0x1b]] }
  0x45   :  { %1556 = vrot.lane.b32.xlu1 %v1552_v13, %s6246_s15  ;;  %v1438_v6 = vmul.f32 %v6320_v1, %v1437_v3  ;;  %v898_v13 = vmul.f32 %v6523_v9, %v1807_v47  ;;  %v527_v29 = vmul.f32 %v1437_v3, %v6346_v12  ;;  %s5722_s10 = sld [smem:[#allocation3 + $0x1e]] }
  0x46   :  { %517 = vrot.lane.b32.xlu0 %v513_v14, %s6246_s15  ;;  %v1481_v14 = vstv %s5669_s20  ;;  %s5727_s11 = sld [smem:[#allocation3 + $0x1f]] }
  0x47   :  { %s1382_s12 = sld [smem:[#allocation3]] }
  0x48   :  { %s5658_s13 = sld [smem:[#allocation3 + $0x1]] }
  0x49   :  { %561 = vrot.lane.b32.xlu1 %v557_v17, %s6246_s15  ;;  %v1482_v17 = vmul.f32 %v6315_v0, %v1481_v14  ;;  %s6579_s14 = sld [smem:[#allocation3 + $0x22]] }
  0x4a   :  { %519 = vrot.lane.b32.xlu0 %v514_v18, %s6246_s15  ;;  %v1439_v18 = vmul.f32 %v6331_v5, %v1437_v3  ;;  %s6583_s16 = sld [smem:[#allocation3 + $0x4]] }
  0x4b   :  { %s6585_s17 = sld [smem:[#allocation3 + $0x5]] }
  0x4c   :  { %s6599_s20 = sld [smem:[#allocation3 + $0x23]] }
  0x4d   :  { %1600 = vrot.lane.b32.xlu1 %v1596_v22, %s6246_s15  ;;  %v1483_v22 = vmul.f32 %v6325_v2, %v1481_v14  ;;  %s6615_s25 = sld [smem:[#allocation3 + $0x8]] }
  0x4e   :  { %1558 = vrot.lane.b32.xlu0 %v1553_v23, %s6246_s15  ;;  %v942_v23 = vmul.f32 %v6536_v20, %v1851_v56  ;;  %s6617_s3 = sld [smem:[#allocation3 + $0x26]] }
  0x4f   :  { %s6670_s19 = sld [smem:[#allocation3 + $0x27]] }
  0x50   :  { %s6684_s21 = sld [smem:[#allocation3 + $0xc]] }
  0x51   :  { %1602 = vrot.lane.b32.xlu1 %v1597_v26, %s6246_s15  ;;  %v1565_v26 = vstv %s5684_s4  ;;  %s6718_s4 = sld [smem:[#allocation3 + $0xd]] }
  0x52   :  { %563 = vrot.lane.b32.xlu0 %v558_v27, %s6246_s15  ;;  %v1566_v27 = vmul.f32 %v6341_v10, %v1565_v26  ;;  %v1567_v38 = vmul.f32 %v6374_v21, %v1565_v26  ;;  %v655_v47 = vmul.f32 %v6402_v30, %v1565_v26  ;;  %s6783_s2 = sld [smem:[#allocation3 + $0x2b]] }
  0x53   :  { %s6921_s22 = sld [smem:[#allocation3 + $0x1]] }
  0x54   :  { %s6942_s24 = sld [smem:[#allocation3 + $0x2]] }
  0x55   :  { %1684 = vrot.lane.b32.xlu1 %v1680_v31, %s6246_s15  ;;  %v571_v31 = vmul.f32 %v6355_v15, %v1481_v14  ;;  %s6960_s26 = sld [smem:[#allocation3 + $0x2f]] }
  0x56   :  { %645 = vrot.lane.b32.xlu0 %v641_v32, %s6246_s15  ;;  %v528_v32 = vmul.f32 %v1437_v3, %v6360_v16  ;;  %s7079_s1 = sld [smem:[#allocation3 + $0x6]] }
  0x57   :  { %s7250_s23 = sld [smem:[#allocation3 + $0xb]] }
  0x58   :  { %s7279_s27 = sld [smem:[#allocation3 + $0xc]] }
  0x59   :  { %689 = vrot.lane.b32.xlu1 %v685_v35, %s6246_s15  ;;  %v1609_v35 = vstv %s5689_s28  ;;  %s6851_s28 = sld [smem:[#allocation3 + $0x10]] }
  0x5a   :  { %647 = vrot.lane.b32.xlu0 %v642_v36, %s6246_s15  ;;  %v1610_v36 = vmul.f32 %v6369_v19, %v1609_v35  ;;  %s7788_s18 = sld [smem:[#allocation3 + $0x14]] }
  0x5d   :  { %1728 = vrot.lane.b32.xlu1 %v1724_v40, %s6246_s15  ;;  %v1611_v40 = vmul.f32 %v6383_v24, %v1609_v35 }
  0x5e   :  { %1686 = vrot.lane.b32.xlu0 %v1681_v41, %s6246_s15  ;;  %v572_v41 = vmul.f32 %v6388_v25, %v1481_v14  ;;  %v6603_v14 = vstv %s5727_s11  ;;  %s7982_s11 = sld [smem:[#allocation3 + $0x1d]] }
  0x61   :  { %1730 = vrot.lane.b32.xlu1 %v1725_v44, %s6246_s15  ;;  %v1693_v44 = vstv %s5702_s29  ;;  %s6634_s29 = sld [smem:[#allocation3 + $0x9]] }
  0x62   :  { %691 = vrot.lane.b32.xlu0 %v686_v45, %s6246_s15  ;;  %v1694_v45 = vmul.f32 %v1693_v44, %v6397_v28  ;;  %v1695_v56 = vmul.f32 %v1693_v44, %v6430_v39  ;;  %v783_v3 = vmul.f32 %v6458_v48, %v1693_v44 }
  0x65   :  { %1812 = vrot.lane.b32.xlu1 %v1808_v49, %s6246_s15  ;;  %v699_v49 = vmul.f32 %v6411_v33, %v1609_v35 }
  0x66   :  { %773 = vrot.lane.b32.xlu0 %v769_v50, %s6246_s15  ;;  %v656_v50 = vmul.f32 %v6416_v34, %v1565_v26  ;;  %v1866_v26 = vmul.f32 %v6481_v55, %v6603_v14 }
  0x69   :  { %817 = vrot.lane.b32.xlu1 %v813_v53, %s6246_s15  ;;  %v1737_v53 = vstv %s5707_s30  ;;  %s7149_s30 = sld [smem:[#allocation3 + $0x8]] }
  0x6a   :  { %775 = vrot.lane.b32.xlu0 %v770_v54, %s6246_s15  ;;  %v1738_v54 = vmul.f32 %v6425_v37, %v1737_v53 }
  0x6d   :  { %1856 = vrot.lane.b32.xlu1 %v1852_v58, %s6246_s15  ;;  %v1739_v58 = vmul.f32 %v6439_v42, %v1737_v53 }
  0x6e   :  { %1814 = vrot.lane.b32.xlu0 %v1809_v59, %s6246_s15  ;;  %v700_v59 = vmul.f32 %v6444_v43, %v1609_v35 }
  0x71   :  { %1858 = vrot.lane.b32.xlu1 %v1853_v62, %s6246_s15  ;;  %v6574_v62 = vstv %s5722_s10  ;;  %s5601_s10 = sld [smem:[#allocation3 + $0x25]] }
  0x72   :  { %819 = vrot.lane.b32.xlu0 %v814_v63, %s6246_s15  ;;  %v1822_v63 = vmul.f32 %v6453_v46, %v6574_v62  ;;  %v1823_v35 = vmul.f32 %v6486_v57, %v6574_v62 }
  0x75   :  { %1442 = vrot.lane.b32.xlu1 %v1438_v6, %s6246_s15  ;;  %v827_v6 = vmul.f32 %v6467_v51, %v1737_v53 }
  0x76   :  { %901 = vrot.lane.b32.xlu0 %v897_v7, %s6246_s15  ;;  %v6592_v7 = vld [vmem:[%s10378_s0 + $0xa0] sm:$0x7f] }
  0x79   :  { %945 = vrot.lane.b32.xlu1 %v941_v11, %s6246_s15  ;;  %v6597_v11 = vld [vmem:[%s10378_s0 + $0xb0] sm:$0x7f] }
  0x7a   :  { %903 = vrot.lane.b32.xlu0 %v898_v13, %s6246_s15  ;;  %v784_v13 = vmul.f32 %v6472_v52, %v1693_v44  ;;  %v6654_v44 = vld [vmem:[%s10378_s0 + $0x38] sm:$0x7f] }
  0x7b   :  { %10495 = vst [vmem:[#allocation22_spill] sm:$0xff] %v6654_v44 }
  0x7d   :  { %1486 = vrot.lane.b32.xlu1 %v1482_v17, %s6246_s15  ;;  %v1383_v17 = vstv %s1382_s12  ;;  %s7035_s12 = sld [smem:[#allocation3 + $0x4]] }
  0x7e   :  { %1444 = vrot.lane.b32.xlu0 %v1439_v18, %s6246_s15  ;;  %v1403_v18 = vstv %s5658_s13  ;;  %s7054_s13 = sld [smem:[#allocation3 + $0x5]] }
  0x81   :  { %1488 = vrot.lane.b32.xlu1 %v1483_v22, %s6246_s15  ;;  %v6608_v22 = vld [vmem:[%s10378_s0 + $0xa8] sm:$0x7f] }
  0x82   :  { %947 = vrot.lane.b32.xlu0 %v942_v23, %s6246_s15  ;;  %v6613_v23 = vld [vmem:[%s10378_s0 + $0xb8] sm:$0x7f] }
  0x85   :  { %1570 = vrot.lane.b32.xlu1 %v1566_v27, %s6246_s15  ;;  %v1384_v27 = vmul.f32 %v6592_v7, %v1383_v17 }
  0x86   :  { %531 = vrot.lane.b32.xlu0 %v527_v29, %s6246_s15  ;;  %v1404_v29 = vmul.f32 %v6597_v11, %v1403_v18 }
  0x89   :  { %575 = vrot.lane.b32.xlu1 %v571_v31, %s6246_s15  ;;  %v6627_v31 = vld [vmem:[%s10378_s0 + $0x20] sm:$0x7f] }
  0x8a   :  { %533 = vrot.lane.b32.xlu0 %v528_v32, %s6246_s15  ;;  %10492 = vst [vmem:[#allocation19_spill] sm:$0xff] %v6627_v31  ;;  %v6632_v32 = vld [vmem:[%s10378_s0 + $0x30] sm:$0x7f] }
  0x8b   :  { %10493 = vst [vmem:[#allocation20_spill] sm:$0xff] %v6632_v32 }
  0x8d   :  { %1614 = vrot.lane.b32.xlu1 %v1610_v36, %s6246_s15  ;;  %v1385_v36 = vmul.f32 %v6608_v22, %v1383_v17 }
  0x8e   :  { %1572 = vrot.lane.b32.xlu0 %v1567_v38, %s6246_s15  ;;  %v1405_v38 = vmul.f32 %v6613_v23, %v1403_v18 }
  0x91   :  { %1616 = vrot.lane.b32.xlu1 %v1611_v40, %s6246_s15  ;;  %v6644_v40 = vld [vmem:[%s10378_s0 + $0xe0] sm:$0x7f] }
  0x92   :  { %577 = vrot.lane.b32.xlu0 %v572_v41, %s6246_s15  ;;  %v6649_v41 = vld [vmem:[%s10378_s0 + $0x28] sm:$0x7f] }
  0x93   :  { %10494 = vst [vmem:[#allocation21_spill] sm:$0xff] %v6649_v41 }
  0x95   :  { %1698 = vrot.lane.b32.xlu1 %v1694_v45, %s6246_s15  ;;  %v1867_v45 = vmul.f32 %v6495_v60, %v6603_v14  ;;  %v6697_v60 = vadd.f32 %v1405_v38, %v1385_v36  ;;  %v6736_v38 = vld [vmem:[%s10378_s0 + $0x21] sm:$0x7f] }
  0x96   :  { %659 = vrot.lane.b32.xlu0 %v655_v47, %s6246_s15  ;;  %v6659_v47 = vstv %s6579_s14  ;;  %10501 = vst [vmem:[#allocation28_spill] sm:$0xff] %v6736_v38  ;;  %s6248_s14 = smov 1  }
  0x99   :  { %703 = vrot.lane.b32.xlu1 %v699_v49, %s6246_s15  ;;  %v1511_v49 = vstv %s6583_s16  ;;  %s6807_s16 = sld [smem:[#allocation6]] }
  0x9a   :  { %661 = vrot.lane.b32.xlu0 %v656_v50, %s6246_s15  ;;  %v6665_v50 = vld [vmem:[%s10378_s0 + $0xf0] sm:$0x7f] }
  0x9b   :  { %10496 = vst [vmem:[#allocation23_spill] sm:$0xff] %v6665_v50 }
  0x9d   :  { %1742 = vrot.lane.b32.xlu1 %v1738_v54, %s6246_s15  ;;  %v6668_v54 = vstv %s6585_s17  ;;  %s6694_s17 = sld [smem:[#allocation3 + $0x2a]] }
  0x9e   :  { %1700 = vrot.lane.b32.xlu0 %v1695_v56, %s6246_s15  ;;  %v828_v56 = vmul.f32 %v6500_v61, %v1737_v53  ;;  %v474_v53 = vmul.f32 %v6649_v41, %v1383_v17 }
  0xa1   :  { %1744 = vrot.lane.b32.xlu1 %v1739_v58, %s6246_s15  ;;  %v6675_v58 = vmul.f32 %v6509_v4, %v6574_v62  ;;  %v6692_v4 = vstv %s6599_s20  ;;  %s6827_s20 = sld [smem:[#allocation3 + $0x2e]] }
  0xa2   :  { %705 = vrot.lane.b32.xlu0 %v700_v59, %s6246_s15  ;;  %v473_v59 = vmul.f32 %v6627_v31, %v1383_v17  ;;  %v6706_v17 = vmul.f32 %v6665_v50, %v6668_v54  ;;  %v6760_v31 = vstv %s6617_s3  ;;  %s7341_s3 = sld [smem:[#allocation3 + $0xf]] }
  0xa5   :  { %1826 = vrot.lane.b32.xlu1 %v1822_v63, %s6246_s15  ;;  %v493_v63 = vmul.f32 %v6632_v32, %v1403_v18  ;;  %v1452_v32 = vmul.f32 %v6320_v1, %v6659_v47 }
  0xa6   :  { %787 = vrot.lane.b32.xlu0 %v783_v3, %s6246_s15  ;;  %v6682_v3 = vld [vmem:[%s10378_s0 + $0x60] sm:$0x7f] }
  0xa7   :  { %10497 = vst [vmem:[#allocation24_spill] sm:$0xff] %v6682_v3  ;;  %v6731_v36 = vmul.f32 %v6682_v3, %v1511_v49  ;;  %v6746_v50 = vadd.f32 %v493_v63, %v473_v59  ;;  %v6754_v3 = vmul.f32 %v6331_v5, %v6659_v47  ;;  %v5696_v5 = vld [vmem:[%s10378_s0 + $0x31] sm:$0x7f]  ;;  %v6776_v63 = vstv %s6634_s29  ;;  %s6897_s29 = sld [smem:[#allocation3]] }
  0xa9   :  { %831 = vrot.lane.b32.xlu1 %v827_v6, %s6246_s15  ;;  %v6687_v6 = vadd.f32 %v1404_v29, %v1384_v27  ;;  %v6716_v27 = vld [vmem:[%s10378_s0 + $0xf8] sm:$0x7f]  ;;  %v6724_v29 = vmul.f32 %v6518_v8, %v6603_v14  ;;  %10500 = vst [vmem:[#allocation27_spill] sm:$0xff] %v6731_v36  ;;  %v5692_v8 = vld [vmem:[%s10378_s0 + $0x29] sm:$0x7f] }
  0xaa   :  { %789 = vrot.lane.b32.xlu0 %v784_v13, %s6246_s15  ;;  %v494_v13 = vmul.f32 %v6654_v44, %v1403_v18  ;;  %v6711_v18 = vld [vmem:[%s10378_s0 + $0xe8] sm:$0x7f]  ;;  %10499 = vst [vmem:[#allocation26_spill] sm:$0xff] %v6716_v27  ;;  %v6739_v44 = vstv %s6615_s25  ;;  %s6873_s25 = sld [smem:[#allocation3 + $0x11]] }
  0xab   :  { %10498 = vst [vmem:[#allocation25_spill] sm:$0xff] %v6711_v18  ;;  %v6766_v59 = vmul.f32 %v6711_v18, %v1511_v49  ;;  %v6868_v18 = vstv %s6694_s17  ;;  %s8460_s17 = sld [smem:[#allocation8 + $0x7]] }
  0xac   :  { %v6763_v36 = vadd.f32 %v494_v13, %v474_v53  ;;  %v6788_v53 = vmul.f32 %v6736_v38, %v6739_v44  ;;  %v6792_v13 = vmul.f32 %v6325_v2, %v6692_v4  ;;  %v5517_v38 = vld [vmem:[%s10378_s0 + $0x78] sm:$0x7f] }
  0xad   :  { %1870 = vrot.lane.b32.xlu1 %v1866_v26, %s6246_s15  ;;  %v6702_v26 = vmul.f32 %v6644_v40, %v1511_v49 }
  0xae   :  { %1828 = vrot.lane.b32.xlu0 %v1823_v35, %s6246_s15  ;;  %v6728_v35 = vmul.f32 %v6523_v9, %v6574_v62  ;;  %v6750_v62 = vmul.f32 %v6315_v0, %v6692_v4  ;;  %v5512_v9 = vld [vmem:[%s10378_s0 + $0x68] sm:$0x7f]  ;;  %10502 = vst [vmem:[#allocation29_spill] sm:$0xff] %v6763_v36  ;;  %v6770_v0 = vmul.f32 %v6716_v27, %v6668_v54  ;;  %10505 = vst [vmem:[#allocation32_spill] sm:$0xff] %v6788_v53 }
  0xaf   :  { %v6720_v1 = vpop.permute.xlu1 %1472  ;;  %v6796_v27 = vmul.f32 %v6536_v20, %v6603_v14  ;;  %v6811_v53 = vmul.f32 %v5512_v9, %v1511_v49  ;;  %v6815_v20 = vmul.f32 %v6341_v10, %v6760_v31  ;;  %v6819_v14 = vmul.f32 %v6659_v47, %v6346_v12  ;;  %v5709_v49 = vld [vmem:[%s10378_s0 + $0x61] sm:$0x7f] }
  0xb0   :  { %v6744_v41 = vpop.permute.xlu0 %1428  ;;  %10503 = vst [vmem:[#allocation30_spill] sm:$0xff] %v6770_v0  ;;  %v6799_v0 = vmul.f32 %v5692_v8, %v6739_v44  ;;  %v6822_v8 = vstv %s6670_s19  ;;  %v6832_v9 = vmul.f32 %v5696_v5, %v6776_v63  ;;  %v6840_v12 = vmul.f32 %v6355_v15, %v6692_v4  ;;  %v5710_v5 = vld [vmem:[%s10378_s0 + $0x69] sm:$0x7f]  ;;  %s7396_s19 = sld [smem:[#allocation6]] }
  0xb1   :  { %1872 = vrot.lane.b32.xlu1 %v1867_v45, %s6246_s15  ;;  %v6781_v45 = vld [vmem:[%s10378_s0 + $0x70] sm:$0x7f]  ;;  %10507 = vst [vmem:[#allocation34_spill] sm:$0xff] %v6811_v53  ;;  %v6846_v53 = vstv %s6684_s21  ;;  %s6993_s21 = sld [smem:[#allocation3 + $0x3]] }
  0xb2   :  { %10504 = vst [vmem:[#allocation31_spill] sm:$0xff] %v6781_v45  ;;  %833 = vrot.lane.b32.xlu0 %v828_v56, %s6246_s15  ;;  %10506 = vst [vmem:[#allocation33_spill] sm:$0xff] %v6799_v0  ;;  %v5531_v56 = vld [vmem:[%s10378_s0 + $0xa0] sm:$0x7f]  ;;  %v5697_v0 = vld [vmem:[%s10378_s0 + $0x39] sm:$0x7f]  ;;  %v6836_v10 = vmul.f32 %v6781_v45, %v6668_v54  ;;  %v6856_v45 = vmul.f32 %v6659_v47, %v6360_v16  ;;  %v6879_v16 = vmul.f32 %v6369_v19, %v6822_v8 }
  0xb3   :  { %v6809_v2 = vpop.permute.xlu1 %1474  ;;  %10508 = vst [vmem:[#allocation35_spill] sm:$0xff] %v6832_v9  ;;  %v6859_v15 = vmul.f32 %v5531_v56, %v6739_v44  ;;  %v6862_v9 = vmul.f32 %v5517_v38, %v6668_v54  ;;  %v6883_v47 = vmul.f32 %v6374_v21, %v6760_v31  ;;  %v6886_v54 = vmul.f32 %v5697_v0, %v6776_v63  ;;  %v5714_v38 = vld [vmem:[%s10378_s0 + $0x71] sm:$0x7f] }
  0xb4   :  { %v6829_v36 = vpop.permute.xlu0 %1430  ;;  %10509 = vst [vmem:[#allocation36_spill] sm:$0xff] %v6836_v10  ;;  %v5532_v10 = vld [vmem:[%s10378_s0 + $0xa8] sm:$0x7f]  ;;  %v6892_v56 = vstv %s6718_s4  ;;  %v6902_v21 = vmul.f32 %v5709_v49, %v6846_v53  ;;  %v6906_v0 = vmul.f32 %v6383_v24, %v6822_v8  ;;  %v5715_v49 = vld [vmem:[%s10378_s0 + $0x79] sm:$0x7f]  ;;  %s9008_s4 = sld [smem:[#allocation8 + $0x1b]] }
  0xb5   :  { %1456 = vrot.lane.b32.xlu1 %v1452_v32, %s6246_s15  ;;  %10510 = vst [vmem:[#allocation37_spill] sm:$0xff] %v6859_v15  ;;  %10511 = vst [vmem:[#allocation38_spill] sm:$0xff] %v6862_v9  ;;  %v5536_v32 = vld [vmem:[%s10378_s0 + $0xb0] sm:$0x7f]  ;;  %v6913_v15 = vmul.f32 %v5710_v5, %v6846_v53  ;;  %v5551_v9 = vld [vmem:[%s10378_s0 + $0xe0] sm:$0x7f] }
  0xb6   :  { %915 = vrot.lane.b32.xlu0 %v6675_v58, %s6246_s15  ;;  %10512 = vst [vmem:[#allocation39_spill] sm:$0xff] %v6886_v54  ;;  %v5537_v58 = vld [vmem:[%s10378_s0 + $0xb8] sm:$0x7f]  ;;  %10513 = vst [vmem:[#allocation40_spill] sm:$0xff] %v6902_v21  ;;  %v6910_v54 = vmul.f32 %v6388_v25, %v6692_v4  ;;  %v6926_v21 = vmul.f32 %v5532_v10, %v6739_v44  ;;  %v6930_v25 = vmul.f32 %v6868_v18, %v6397_v28 }
  0xb7   :  { %v6899_v19 = vpop.permute.xlu1 %1556  ;;  %10514 = vst [vmem:[#allocation41_spill] sm:$0xff] %v6913_v15  ;;  %v6934_v4 = vmul.f32 %v6402_v30, %v6760_v31  ;;  %v6937_v5 = vmul.f32 %v5536_v32, %v6776_v63  ;;  %v5556_v15 = vld [vmem:[%s10378_s0 + $0xf0] sm:$0x7f]  ;;  %v6947_v28 = vmul.f32 %v5714_v38, %v6892_v56  ;;  %v6951_v30 = vmul.f32 %v6411_v33, %v6822_v8 }
  0xb8   :  { %v6923_v24 = vpop.permute.xlu0 %517  ;;  %v6955_v44 = vmul.f32 %v6416_v34, %v6760_v31  ;;  %v6958_v10 = vstv %s6783_s2  ;;  %v6968_v32 = vmul.f32 %v5537_v58, %v6776_v63  ;;  %v6972_v33 = vmul.f32 %v6868_v18, %v6430_v39  ;;  %v5552_v63 = vld [vmem:[%s10378_s0 + $0xe8] sm:$0x7f]  ;;  %s7714_s2 = sld [smem:[#allocation3 + $0x11]] }
  0xb9   :  { %959 = vrot.lane.b32.xlu1 %v6724_v29, %s6246_s15  ;;  %10515 = vst [vmem:[#allocation42_spill] sm:$0xff] %v6947_v28  ;;  %v6965_v29 = vmul.f32 %v5551_v9, %v6846_v53  ;;  %v6975_v34 = vmul.f32 %v5715_v49, %v6892_v56  ;;  %v1434_v31 = vadd.f32 %v6744_v41, %v6687_v6  ;;  %v6988_v9 = vstv %s6827_s20  ;;  %s5591_s20 = sld [smem:[#allocation3 + $0x23]] }
  0xba   :  { %917 = vrot.lane.b32.xlu0 %v6728_v35, %s6246_s15  ;;  %10517 = vst [vmem:[#allocation44_spill] sm:$0xff] %v6968_v32  ;;  %v6982_v35 = vstv %s6807_s16  ;;  %v6991_v39 = vmul.f32 %v5556_v15, %v6892_v56  ;;  %v6999_v41 = vmul.f32 %v6425_v37, %v6958_v10  ;;  %v7003_v6 = vmul.f32 %v6439_v42, %v6958_v10  ;;  %s7008_s16 = sld [smem:[#allocation3 + $0x14]]  ;;  %v5573_v15 = vld [vmem:[%s10378_s0 + $0x80] sm:$0x7f]  ;;  %v5577_v37 = vld [vmem:[%s10378_s0 + $0x90] sm:$0x7f] }
  0xbb   :  { %10516 = vst [vmem:[#allocation43_spill] sm:$0xff] %v6965_v29  ;;  %10518 = vst [vmem:[#allocation45_spill] sm:$0xff] %v6975_v34  ;;  %v6979_v38 = vpop.permute.xlu1 %561  ;;  %v7006_v49 = vstv %s6851_s28  ;;  %v7023_v42 = vmul.f32 %v6444_v43, %v6822_v8  ;;  %v5557_v29 = vld [vmem:[%s10378_s0 + $0xf8] sm:$0x7f]  ;;  %v7033_v32 = vstv %s6921_s22  ;;  %v7045_v43 = vmul.f32 %v6458_v48, %v6868_v18  ;;  %s7184_s28 = sld [smem:[#allocation3 + $0x15]] }
  0xbc   :  { %10519 = vst [vmem:[#allocation46_spill] sm:$0xff] %v6982_v35  ;;  %10520 = vst [vmem:[#allocation47_spill] sm:$0xff] %v6991_v39  ;;  %v6995_v58 = vpop.permute.xlu0 %519  ;;  %v7014_v39 = vstv %s6897_s29  ;;  %v7026_v35 = vstv %s6873_s25  ;;  %v1057_v8 = vmul.f32 %v5577_v37, %v7033_v32  ;;  %v7052_v28 = vstv %s6942_s24  ;;  %s7590_s24 = sld [smem:[#allocation3 + $0x18]] }
  0xbd   :  { %10521 = vst [vmem:[#allocation48_spill] sm:$0xff] %v7003_v6  ;;  %1500 = vrot.lane.b32.xlu1 %v6750_v62, %s6246_s15  ;;  %10522 = vst [vmem:[#allocation49_spill] sm:$0xff] %v7023_v42  ;;  %v1037_v34 = vmul.f32 %v5573_v15, %v7014_v39  ;;  %v7041_v62 = vmul.f32 %v6453_v46, %v6988_v9  ;;  %v5582_v15 = vld [vmem:[%s10378_s0 + $0xa0] sm:$0x7f]  ;;  %v7060_v46 = vmul.f32 %v5552_v63, %v6846_v53  ;;  %v5587_v53 = vld [vmem:[%s10378_s0 + $0xb0] sm:$0x7f] }
  0xbe   :  { %1458 = vrot.lane.b32.xlu0 %v6754_v3, %s6246_s15  ;;  %10524 = vst [vmem:[#allocation51_spill] sm:$0xff] %v7045_v43  ;;  %v1478_v3 = vadd.f32 %v6720_v1, %v1434_v31  ;;  %v1390_v48 = vmul.f32 %v6592_v7, %v7006_v49  ;;  %v1077_v37 = vmul.f32 %v5582_v15, %v7052_v28  ;;  %v7084_v7 = vld [vmem:[%s10378_s0 + $0x88] sm:$0x7f]  ;;  %s7772_s29 = sld [smem:[#allocation3 + $0x13]] }
  0xbf   :  { %10523 = vst [vmem:[#allocation50_spill] sm:$0xff] %v7041_v62  ;;  %v7057_v42 = vpop.permute.xlu1 %1600  ;;  %v1410_v62 = vmul.f32 %v6597_v11, %v7026_v35  ;;  %v7071_v1 = vmul.f32 %v6467_v51, %v6958_v10  ;;  %v7074_v31 = vmul.f32 %v5557_v29, %v6892_v56  ;;  %v1059_v6 = vadd.f32 %v1057_v8, %v1037_v34  ;;  %v7103_v34 = vld [vmem:[%s10378_s0 + $0x98] sm:$0x7f]  ;;  %s7927_s22 = sld [smem:[#allocation3 + $0x1b]] }
  0xc0   :  { %v7065_v43 = vpop.permute.xlu0 %1558  ;;  %10526 = vst [vmem:[#allocation53_spill] sm:$0xff] %v7084_v7  ;;  %v1435_v11 = vadd.f32 %v6829_v36, %v6697_v60  ;;  %v7092_v51 = vmul.f32 %v6472_v52, %v6868_v18  ;;  %v7095_v56 = vstv %s6960_s26  ;;  %v7098_v29 = vstv %s6993_s21  ;;  %10527 = vst [vmem:[#allocation54_spill] sm:$0xff] %v7103_v34  ;;  %v5592_v18 = vld [vmem:[%s10378_s0 + $0xc0] sm:$0x7f]  ;;  %s7114_s26 = sld [smem:[#allocation3 + $0x7]] }
  0xc1   :  { %10525 = vst [vmem:[#allocation52_spill] sm:$0xff] %v7074_v31  ;;  %1502 = vrot.lane.b32.xlu1 %v6792_v13, %s6246_s15  ;;  %v1391_v60 = vmul.f32 %v6608_v22, %v7006_v49  ;;  %v1411_v36 = vmul.f32 %v6613_v23, %v7026_v35  ;;  %v1079_v52 = vadd.f32 %v1077_v37, %v1059_v6  ;;  %v7123_v8 = vstv %s7035_s12  ;;  %v7130_v6 = vld [vmem:[%s10378_s0 + $0xa8] sm:$0x7f]  ;;  %v7189_v31 = vld [vmem:[%s10378_s0 + $0xb8] sm:$0x7f]  ;;  %s7321_s12 = sld [smem:[#allocation3 + $0xe]] }
  0xc2   :  { %961 = vrot.lane.b32.xlu0 %v6796_v27, %s6246_s15  ;;  %v1038_v13 = vmul.f32 %v7084_v7, %v7014_v39  ;;  %v1514_v27 = vadd.f32 %v6702_v26, %v1478_v3  ;;  %v1097_v22 = vmul.f32 %v5587_v53, %v7098_v29  ;;  %v1058_v23 = vmul.f32 %v7103_v34, %v7033_v32  ;;  %v7144_v53 = vld [vmem:[%s10378_s0 + $0xd0] sm:$0x7f]  ;;  %s7950_s21 = sld [smem:[#allocation3 + $0x1c]] }
  0xc3   :  { %v7119_v63 = vpop.permute.xlu1 %1602  ;;  %10528 = vst [vmem:[#allocation55_spill] sm:$0xff] %v7130_v6  ;;  %v7134_v37 = vadd.f32 %v1410_v62, %v1390_v48  ;;  %v7138_v26 = vmul.f32 %v6481_v55, %v7095_v56  ;;  %v1117_v3 = vmul.f32 %v5592_v18, %v7123_v8  ;;  %10530 = vst [vmem:[#allocation57_spill] sm:$0xff] %v7144_v53  ;;  %v7147_v34 = vstv %s7054_s13  ;;  %s7211_s13 = sld [smem:[#allocation3 + $0xa]] }
  0xc4   :  { %v7132_v15 = vpop.permute.xlu0 %563  ;;  %v1479_v7 = vadd.f32 %v6809_v2, %v1435_v11  ;;  %v7155_v62 = vstv %s7008_s16  ;;  %v1099_v55 = vadd.f32 %v1097_v22, %v1079_v52  ;;  %v1137_v48 = vmul.f32 %v7144_v53, %v7147_v34  ;;  %v7168_v2 = vld [vmem:[%s10378_s0 + $0xe0] sm:$0x7f]  ;;  %s7173_s16 = sld [smem:[#allocation3 + $0x9]]  ;;  %10533 = vst [vmem:[#allocation60_spill] sm:$0xff] %v7189_v31 }
  0xc5   :  { %10529 = vst [vmem:[#allocation56_spill] sm:$0xff] %v7134_v37  ;;  %1584 = vrot.lane.b32.xlu1 %v6815_v20, %s6246_s15  ;;  %v7163_v18 = vmul.f32 %v6486_v57, %v6988_v9  ;;  %10531 = vst [vmem:[#allocation58_spill] sm:$0xff] %v7168_v2  ;;  %v7171_v11 = vstv %s7079_s1  ;;  %v1060_v20 = vadd.f32 %v1058_v23, %v1038_v13  ;;  %s8474_s25 = sld [smem:[#allocation3 + $0x28]] }
  0xc6   :  { %545 = vrot.lane.b32.xlu0 %v6819_v14, %s6246_s15  ;;  %v1078_v52 = vmul.f32 %v7130_v6, %v7052_v28  ;;  %v1534_v14 = vadd.f32 %v6706_v17, %v1514_v27  ;;  %v523_v57 = vadd.f32 %v6923_v24, %v6746_v50  ;;  %v7182_v53 = vadd.f32 %v1411_v36, %v1391_v60  ;;  %v7206_v60 = vld [vmem:[%s10378_s0 + $0xf0] sm:$0x7f]  ;;  %s8495_s1 = sld [smem:[#allocation8 + $0xb]] }
  0xc7   :  { %v7180_v22 = vpop.permute.xlu1 %1684  ;;  %v1119_v37 = vadd.f32 %v1117_v3, %v1099_v55  ;;  %v7195_v17 = vmul.f32 %v6644_v40, %v7155_v62  ;;  %v7199_v50 = vmul.f32 %v6500_v61, %v6958_v10  ;;  %v1157_v24 = vmul.f32 %v7168_v2, %v7171_v11  ;;  %10535 = vst [vmem:[#allocation62_spill] sm:$0xff] %v7206_v60  ;;  %v7216_v40 = vld [vmem:[%s10378_s0 + $0xc8] sm:$0x7f]  ;;  %v7229_v55 = vld [vmem:[%s10378_s0 + $0xd8] sm:$0x7f] }
  0xc8   :  { %10532 = vst [vmem:[#allocation59_spill] sm:$0xff] %v7182_v53  ;;  %v7191_v13 = vpop.permute.xlu0 %645  ;;  %v7209_v36 = vstv %s7114_s26  ;;  %10536 = vst [vmem:[#allocation63_spill] sm:$0xff] %v7216_v40  ;;  %v567_v61 = vadd.f32 %v6979_v38, %v523_v57  ;;  %v1515_v10 = vadd.f32 %v6766_v59, %v1479_v7  ;;  %v10537_v27 = vld [vmem:[#allocation25_spill] sm:$0xff]  ;;  %v7241_v38 = vstv %s7149_s30  ;;  %s7293_s30 = sld [smem:[#allocation3 + $0xd]]  ;;  %v10553_v53 = vld [vmem:[#allocation34_spill] sm:$0xff] }
  0xc9   :  { %10534 = vst [vmem:[#allocation61_spill] sm:$0xff] %v7195_v17  ;;  %589 = vrot.lane.b32.xlu1 %v6840_v12, %s6246_s15  ;;  %v7224_v23 = vmul.f32 %v10537_v27, %v7155_v62  ;;  %v1139_v3 = vadd.f32 %v1137_v48, %v1119_v37  ;;  %10539 = vst [vmem:[#allocation64_spill] sm:$0xff] %v7229_v55  ;;  %v1177_v59 = vmul.f32 %v7206_v60, %v7209_v36  ;;  %v7238_v12 = vld [vmem:[%s10378_s0 + $0x1] sm:$0x7f]  ;;  %v10541_v2 = vld [vmem:[#allocation29_spill] sm:$0xff]  ;;  %s7802_s26 = sld [smem:[#allocation3 + $0x19]] }
  0xca   :  { %547 = vrot.lane.b32.xlu0 %v6856_v45, %s6246_s15  ;;  %10540 = vst [vmem:[#allocation65_spill] sm:$0xff] %v7238_v12  ;;  %v1080_v7 = vadd.f32 %v1078_v52, %v1060_v20  ;;  %v1098_v37 = vmul.f32 %v7189_v31, %v7098_v29  ;;  %v1562_v48 = vadd.f32 %v6899_v19, %v1534_v14  ;;  %v7261_v19 = vld [vmem:[%s10378_s0 + $0x11] sm:$0x7f]  ;;  %v7264_v52 = vstv %s7173_s16  ;;  %s7745_s16 = sld [smem:[#allocation3 + $0x12]] }
  0xcb   :  { %10538 = vst [vmem:[#allocation25_spill] sm:$0xff] %v7224_v23  ;;  %v7246_v57 = vpop.permute.xlu1 %689  ;;  %v1159_v27 = vadd.f32 %v1157_v24, %v1139_v3  ;;  %v1197_v45 = vmul.f32 %v7241_v38, %v7238_v12  ;;  %v1118_v60 = vmul.f32 %v7216_v40, %v7123_v8  ;;  %v524_v23 = vadd.f32 %v6995_v58, %v10541_v2  ;;  %v7271_v3 = vld [vmem:[%s10378_s0 + $0xe8] sm:$0x7f]  ;;  %v10544_v58 = vld [vmem:[#allocation27_spill] sm:$0xff]  ;;  %v10545_v12 = vld [vmem:[#allocation30_spill] sm:$0xff] }
  0xcc   :  { %v7256_v20 = vpop.permute.xlu0 %647  ;;  %10542 = vst [vmem:[#allocation29_spill] sm:$0xff] %v7261_v19  ;;  %v1100_v14 = vadd.f32 %v1098_v37, %v1080_v7  ;;  %v1138_v24 = vmul.f32 %v7229_v55, %v7147_v34  ;;  %10543 = vst [vmem:[#allocation66_spill] sm:$0xff] %v7271_v3  ;;  %v603_v2 = vadd.f32 %v10544_v58, %v567_v61  ;;  %v7288_v61 = vld [vmem:[%s10378_s0 + $0x21] sm:$0x7f] }
  0xcd   :  { %v1535_v17 = vadd.f32 %v10545_v12, %v1515_v10  ;;  %1628 = vrot.lane.b32.xlu1 %v6879_v16, %s6246_s15  ;;  %v1179_v40 = vadd.f32 %v1177_v59, %v1159_v27  ;;  %v1217_v31 = vmul.f32 %v7261_v19, %v7264_v52  ;;  %v1606_v7 = vadd.f32 %v7057_v42, %v1562_v48 }
  0xce   :  { %v568_v37 = vadd.f32 %v7132_v15, %v524_v23  ;;  %1586 = vrot.lane.b32.xlu0 %v6883_v47, %s6246_s15  ;;  %10546 = vst [vmem:[#allocation27_spill] sm:$0xff] %v7288_v61  ;;  %v7291_v16 = vstv %s7211_s13  ;;  %v1120_v10 = vadd.f32 %v1118_v60, %v1100_v14  ;;  %v1158_v47 = vmul.f32 %v7271_v3, %v7171_v11  ;;  %v7305_v23 = vld [vmem:[%s10378_s0 + $0xf8] sm:$0x7f]  ;;  %s5680_s13 = sld [smem:[#allocation3 + $0x25]] }
  0xcf   :  { %v1563_v59 = vadd.f32 %v7065_v43, %v1535_v17  ;;  %v7296_v12 = vpop.permute.xlu1 %1728  ;;  %v1199_v42 = vadd.f32 %v1197_v45, %v1179_v40  ;;  %v1237_v15 = vmul.f32 %v7288_v61, %v7291_v16  ;;  %10547 = vst [vmem:[#allocation30_spill] sm:$0xff] %v7305_v23  ;;  %v7310_v60 = vstv %s7184_s28  ;;  %v10548_v43 = vld [vmem:[#allocation19_spill] sm:$0xff]  ;;  %v10549_v40 = vld [vmem:[#allocation20_spill] sm:$0xff]  ;;  %v7319_v45 = vld [vmem:[%s10378_s0 + $0x31] sm:$0x7f]  ;;  %s8003_s28 = sld [smem:[#allocation3 + $0x1e]] }
  0xd0   :  { %v7307_v48 = vpop.permute.xlu0 %1686  ;;  %v479_v17 = vmul.f32 %v10548_v43, %v7006_v49  ;;  %v499_v27 = vmul.f32 %v10549_v40, %v7026_v35  ;;  %10550 = vst [vmem:[#allocation19_spill] sm:$0xff] %v7319_v45  ;;  %v1140_v14 = vadd.f32 %v1138_v24, %v1120_v10  ;;  %v10551_v61 = vld [vmem:[#allocation36_spill] sm:$0xff]  ;;  %v7328_v3 = vstv %s7250_s23  ;;  %s8509_s23 = sld [smem:[#allocation3 + $0x2b]] }
  0xd1   :  { %v1607_v58 = vadd.f32 %v7119_v63, %v1563_v59  ;;  %v623_v19 = vadd.f32 %v10551_v61, %v603_v2  ;;  %1630 = vrot.lane.b32.xlu1 %v6906_v0, %s6246_s15  ;;  %v1219_v43 = vadd.f32 %v1217_v31, %v1199_v42  ;;  %v10552_v40 = vld [vmem:[#allocation32_spill] sm:$0xff]  ;;  %v604_v6 = vadd.f32 %v10553_v53, %v568_v37  ;;  %v10557_v42 = vld [vmem:[#allocation23_spill] sm:$0xff] }
  0xd2   :  { %v1642_v55 = vadd.f32 %v10552_v40, %v1606_v7  ;;  %591 = vrot.lane.b32.xlu0 %v6910_v54, %s6246_s15  ;;  %v1257_v24 = vmul.f32 %v7319_v45, %v7328_v3  ;;  %v7339_v63 = vld [vmem:[%s10378_s0 + $0x41] sm:$0x7f]  ;;  %v1178_v0 = vmul.f32 %v7305_v23, %v7209_v36  ;;  %v7349_v54 = vstv %s7279_s27  ;;  %v7354_v37 = vld [vmem:[%s10378_s0 + $0x9] sm:$0x7f]  ;;  %s5581_s27 = sld [smem:[#allocation3 + $0x21]] }
  0xd3   :  { %10554 = vst [vmem:[#allocation20_spill] sm:$0xff] %v7339_v63  ;;  %v651_v31 = vadd.f32 %v7191_v13, %v623_v19  ;;  %v7346_v53 = vpop.permute.xlu1 %1730  ;;  %v1239_v2 = vadd.f32 %v1237_v15, %v1219_v43  ;;  %v1160_v7 = vadd.f32 %v1158_v47, %v1140_v14  ;;  %10555 = vst [vmem:[#allocation36_spill] sm:$0xff] %v7354_v37  ;;  %v10556_v10 = vld [vmem:[#allocation16_spill] sm:$0xff]  ;;  %v7369_v15 = vld [vmem:[%s10378_s0 + $0x51] sm:$0x7f]  ;;  %v7372_v47 = vstv %s7293_s30  ;;  %s8252_s30 = sld [smem:[#allocation3 + $0x20]] }
  0xd4   :  { %v692_v61 = vpop.permute.xlu0 %691  ;;  %v7358_v59 = vmul.f32 %v10556_v10, %v7095_v56  ;;  %v7362_v13 = vmul.f32 %v10557_v42, %v7310_v60  ;;  %v1277_v19 = vmul.f32 %v7339_v63, %v7349_v54  ;;  %10559 = vst [vmem:[#allocation34_spill] sm:$0xff] %v7369_v15  ;;  %v10560_v14 = vld [vmem:[#allocation33_spill] sm:$0xff]  ;;  %v1297_v42 = vmul.f32 %v7369_v15, %v7372_v47  ;;  %v7383_v63 = vld [vmem:[%s10378_s0 + $0x19] sm:$0x7f] }
  0xd5   :  { %v1643_v43 = vadd.f32 %v10560_v14, %v1607_v58  ;;  %v695_v40 = vadd.f32 %v7246_v57, %v651_v31  ;;  %1712 = vrot.lane.b32.xlu1 %v6930_v25, %s6246_s15  ;;  %v1259_v10 = vadd.f32 %v1257_v24, %v1239_v2  ;;  %10561 = vst [vmem:[#allocation16_spill] sm:$0xff] %v7383_v63  ;;  %v10562_v45 = vld [vmem:[#allocation35_spill] sm:$0xff]  ;;  %v7394_v25 = vstv %s7321_s12  ;;  %v10564_v31 = vld [vmem:[#allocation38_spill] sm:$0xff]  ;;  %v7412_v23 = vld [vmem:[%s10378_s0 + $0x29] sm:$0x7f]  ;;  %s7851_s12 = sld [smem:[#allocation3 + $0x17]] }
  0xd6   :  { %10558 = vst [vmem:[#allocation32_spill] sm:$0xff] %v7362_v13  ;;  %v1662_v13 = vadd.f32 %v10562_v45, %v1642_v55  ;;  %673 = vrot.lane.b32.xlu0 %v6934_v4, %s6246_s15  ;;  %v7391_v57 = vld [vmem:[%s10378_s0 + $0x61] sm:$0x7f]  ;;  %v1180_v58 = vadd.f32 %v1178_v0, %v1160_v7  ;;  %v1198_v24 = vmul.f32 %v7241_v38, %v7354_v37  ;;  %v10565_v4 = vld [vmem:[#allocation26_spill] sm:$0xff]  ;;  %10567 = vst [vmem:[#allocation35_spill] sm:$0xff] %v7412_v23 }
  0xd7   :  { %10563 = vst [vmem:[#allocation23_spill] sm:$0xff] %v7391_v57  ;;  %v624_v2 = vadd.f32 %v10564_v31, %v604_v6  ;;  %v7401_v55 = vpop.permute.xlu1 %1812  ;;  %v7403_v45 = vadd.f32 %v499_v27, %v479_v17  ;;  %v7407_v14 = vmul.f32 %v10565_v4, %v7310_v60  ;;  %v1279_v15 = vadd.f32 %v1277_v19, %v1259_v10  ;;  %v7417_v0 = vld [vmem:[%s10378_s0] sm:$0x7f]  ;;  %v7427_v27 = vld [vmem:[%s10378_s0 + $0x71] sm:$0x7f] }
  0xd8   :  { %10568 = vst [vmem:[#allocation38_spill] sm:$0xff] %v7417_v0  ;;  %v1690_v6 = vadd.f32 %v7180_v22, %v1662_v13  ;;  %v7420_v7 = vpop.permute.xlu0 %773  ;;  %v1317_v17 = vmul.f32 %v7391_v57, %v7394_v25  ;;  %10569 = vst [vmem:[#allocation26_spill] sm:$0xff] %v7427_v27  ;;  %v7430_v19 = vstv %s7341_s3  ;;  %v1218_v10 = vmul.f32 %v7383_v63, %v7264_v52  ;;  %v10570_v31 = vld [vmem:[#allocation37_spill] sm:$0xff]  ;;  %v10571_v22 = vld [vmem:[#allocation39_spill] sm:$0xff]  ;;  %s7887_s3 = sld [smem:[#allocation3 + $0x19]] }
  0xd9   :  { %10566 = vst [vmem:[#allocation33_spill] sm:$0xff] %v7407_v14  ;;  %v731_v4 = vadd.f32 %v10570_v31, %v695_v40  ;;  %v652_v14 = vadd.f32 %v7256_v20, %v624_v2  ;;  %v1663_v13 = vadd.f32 %v10571_v22, %v1643_v43  ;;  %717 = vrot.lane.b32.xlu1 %v6951_v30, %s6246_s15  ;;  %v7442_v37 = vld [vmem:[%s10378_s0 + $0x39] sm:$0x7f]  ;;  %v7447_v63 = vld [vmem:[%s10378_s0 + $0x10] sm:$0x7f] }
  0xda   :  { %v1299_v57 = vadd.f32 %v1297_v42, %v1279_v15  ;;  %10572 = vst [vmem:[#allocation37_spill] sm:$0xff] %v7447_v63  ;;  %675 = vrot.lane.b32.xlu0 %v6955_v44, %s6246_s15  ;;  %v1337_v20 = vmul.f32 %v7427_v27, %v7430_v19  ;;  %v1200_v43 = vadd.f32 %v1198_v24, %v1180_v58  ;;  %v7460_v40 = vld [vmem:[%s10378_s0 + $0x20] sm:$0x7f]  ;;  %v7469_v58 = vld [vmem:[%s10378_s0 + $0x49] sm:$0x7f]  ;;  %v7474_v27 = vstv %s7396_s19  ;;  %s7702_s19 = sld [smem:[#allocation3 + $0x10]] }
  0xdb   :  { %v1238_v30 = vmul.f32 %v7412_v23, %v7291_v16  ;;  %v110_v15 = vmul.f32 %v7014_v39, %v7417_v0  ;;  %10573 = vst [vmem:[#allocation39_spill] sm:$0xff] %v7460_v40  ;;  %v1734_v42 = vadd.f32 %v7296_v12, %v1690_v6  ;;  %v1691_v2 = vadd.f32 %v7307_v48, %v1663_v13  ;;  %v7464_v31 = vpop.permute.xlu1 %817  ;;  %v7483_v48 = vld [vmem:[%s10378_s0 + $0x30] sm:$0x7f] }
  0xdc   :  { %v696_v44 = vadd.f32 %v692_v61, %v652_v14  ;;  %v1319_v22 = vadd.f32 %v1317_v17, %v1299_v57  ;;  %10574 = vst [vmem:[#allocation67_spill] sm:$0xff] %v7469_v58  ;;  %v7471_v24 = vpop.permute.xlu0 %775  ;;  %v1220_v0 = vadd.f32 %v1218_v10, %v1200_v43  ;;  %v1258_v23 = vmul.f32 %v7442_v37, %v7328_v3  ;;  %v10576_v57 = vld [vmem:[#allocation21_spill] sm:$0xff] }
  0xdd   :  { %v131_v12 = vmul.f32 %v7447_v63, %v7033_v32  ;;  %10575 = vst [vmem:[#allocation68_spill] sm:$0xff] %v7483_v48  ;;  %v751_v61 = vadd.f32 %v6937_v5, %v731_v4  ;;  %1756 = vrot.lane.b32.xlu1 %v6999_v41, %s6246_s15  ;;  %v7490_v14 = vmul.f32 %v10576_v57, %v7006_v49  ;;  %v7502_v41 = vld [vmem:[%s10378_s0 + $0x59] sm:$0x7f]  ;;  %v7507_v4 = vld [vmem:[%s10378_s0 + $0x40] sm:$0x7f] }
  0xde   :  { %v1339_v6 = vadd.f32 %v1337_v20, %v1319_v22  ;;  %v152_v17 = vmul.f32 %v7460_v40, %v7052_v28  ;;  %v1735_v10 = vadd.f32 %v7346_v53, %v1691_v2  ;;  %1714 = vrot.lane.b32.xlu0 %v6972_v33, %s6246_s15  ;;  %v1240_v13 = vadd.f32 %v1238_v30, %v1220_v0  ;;  %v10579_v0 = vld [vmem:[#allocation40_spill] sm:$0xff]  ;;  %v10583_v40 = vld [vmem:[#allocation49_spill] sm:$0xff] }
  0xdf   :  { %v1278_v5 = vmul.f32 %v7469_v58, %v7349_v54  ;;  %10577 = vst [vmem:[#allocation21_spill] sm:$0xff] %v7502_v41  ;;  %v133_v49 = vadd.f32 %v131_v12, %v110_v15  ;;  %10578 = vst [vmem:[#allocation69_spill] sm:$0xff] %v7507_v4  ;;  %v7509_v20 = vpop.permute.xlu1 %1856  ;;  %v173_v53 = vmul.f32 %v7483_v48, %v7098_v29  ;;  %v10427_v15 = vmov 0.0   ;;  %v10581_v22 = vld [vmem:[#allocation48_spill] sm:$0xff]  ;;  %v10588_v58 = vld [vmem:[#allocation18_spill] sm:$0xff] }
  0xe0   :  { %v1355_v33 = vadd.f32 %v7474_v27, %v1339_v6  ;;  %v1770_v43 = vadd.f32 %v10579_v0, %v1734_v42  ;;  %v732_v30 = vadd.f32 %v6926_v21, %v696_v44  ;;  %v7516_v2 = vpop.permute.xlu0 %1814  ;;  %82 = vst.msk [vmem:[#allocation2] sm:$0xff] %vm81_vm0, %v10427_v15  ;;  %83 = vst.msk [vmem:[#allocation2 + $0x8] sm:$0xff] %vm81_vm0, %v10427_v15  ;;  %v7569_v42 = vld [vmem:[%s10378_s0 + $0x69] sm:$0x7f]  ;;  %v7574_v44 = vld [vmem:[%s10378_s0 + $0x50] sm:$0x7f]  ;;  %3532 = vmatprep.mubr.f32.mxu0 %v10427_v15 }
  0xe1   :  { %84 = vst.msk [vmem:[#allocation2 + $0x10] sm:$0xff] %vm81_vm0, %v10427_v15  ;;  %85 = vst.msk [vmem:[#allocation2 + $0x18] sm:$0xff] %vm81_vm0, %v10427_v15  ;;  %v1260_v21 = vadd.f32 %v1258_v23, %v1240_v13  ;;  %4134 = vmatprep.mubr.f32.mxu1 %v10427_v15  ;;  %1758 = vrot.lane.b32.xlu1 %v10581_v22, %s6246_s15  ;;  %v1298_v23 = vmul.f32 %v7502_v41, %v7372_v47  ;;  %v10582_v13 = vld [vmem:[#allocation41_spill] sm:$0xff] }
  0xe2   :  { %86 = vst.msk [vmem:[#allocation2 + $0x20] sm:$0xff] %vm81_vm0, %v10427_v15  ;;  %87 = vst.msk [vmem:[#allocation2 + $0x28] sm:$0xff] %vm81_vm0, %v10427_v15  ;;  %v1357_v12 = vmax.f32 %v1355_v33, 0.0  ;;  %v154_v57 = vadd.f32 %v152_v17, %v133_v49  ;;  %v194_v6 = vmul.f32 %v7507_v4, %v7123_v8  ;;  %v1771_v0 = vadd.f32 %v10582_v13, %v1735_v10  ;;  %v7595_v17 = vld [vmem:[%s10378_s0 + $0x79] sm:$0x7f]  ;;  %v10587_v13 = vld [vmem:[#allocation44_spill] sm:$0xff] }
  0xe3   :  { %88 = vst.msk [vmem:[#allocation2 + $0x30] sm:$0xff] %vm81_vm0, %v10427_v15  ;;  %89 = vst.msk [vmem:[#allocation2 + $0x38] sm:$0xff] %vm81_vm0, %v10427_v15  ;;  %v779_v48 = vadd.f32 %v7420_v7, %v751_v61  ;;  %719 = vrot.lane.b32.xlu0 %v10583_v40, %s6246_s15  ;;  %v1280_v33 = vadd.f32 %v1278_v5, %v1260_v21  ;;  %v7600_v10 = vld [vmem:[%s10378_s0 + $0x60] sm:$0x7f]  ;;  %v1859_v7 = vpop.permute.xlu1 %1858  ;;  %v10585_v61 = vld [vmem:[#allocation17_spill] sm:$0xff]  ;;  %v215_v49 = vmul.f32 %v7574_v44, %v7147_v34 }
  0xe4   :  { %90 = vst.msk [vmem:[#allocation2 + $0x40] sm:$0xff] %vm81_vm0, %v10427_v15  ;;  %91 = vst.msk [vmem:[#allocation2 + $0x48] sm:$0xff] %vm81_vm0, %v10427_v15  ;;  %v7604_v40 = vmul.f32 %v10585_v61, %v6988_v9  ;;  %v175_v5 = vadd.f32 %v173_v53, %v154_v57  ;;  %v752_v4 = vadd.f32 %v10587_v13, %v732_v30  ;;  %v820_v41 = vpop.permute.xlu0 %819  ;;  %v10590_v53 = vld [vmem:[#allocation50_spill] sm:$0xff]  ;;  %v10593_v13 = vld [vmem:[#allocation24_spill] sm:$0xff] }
  0xe5   :  { %92 = vst.msk [vmem:[#allocation2 + $0x50] sm:$0xff] %vm81_vm0, %v10427_v15  ;;  %93 = vst.msk [vmem:[#allocation2 + $0x58] sm:$0xff] %vm81_vm0, %v10427_v15  ;;  %v823_v22 = vadd.f32 %v7464_v31, %v779_v48  ;;  %v7616_v61 = vmul.f32 %v10588_v58, %v6988_v9  ;;  %1840 = vrot.lane.b32.xlu1 %v10590_v53, %s6246_s15  ;;  %v1300_v57 = vadd.f32 %v1298_v23, %v1280_v33  ;;  %v10591_v9 = vld [vmem:[#allocation45_spill] sm:$0xff] }
  0xe6   :  { %94 = vst.msk [vmem:[#allocation2 + $0x60] sm:$0xff] %vm81_vm0, %v10427_v15  ;;  %95 = vst.msk [vmem:[#allocation2 + $0x68] sm:$0xff] %vm81_vm0, %v10427_v15  ;;  %v196_v31 = vadd.f32 %v194_v6, %v175_v5  ;;  %v236_v48 = vmul.f32 %v7600_v10, %v7171_v11  ;;  %v1791_v58 = vadd.f32 %v10591_v9, %v1771_v0  ;;  %v7643_v6 = vld [vmem:[%s10378_s0 + $0x80] sm:$0x7f]  ;;  %v7653_v53 = vld [vmem:[%s10378_s0 + $0x8] sm:$0x7f] }
  0xe7   :  { %96 = vst.msk [vmem:[#allocation2 + $0x70] sm:$0xff] %vm81_vm0, %v10427_v15  ;;  %97 = vst.msk [vmem:[#allocation2 + $0x78] sm:$0xff] %vm81_vm0, %v10427_v15  ;;  %v780_v33 = vadd.f32 %v7471_v24, %v752_v4 }
  0xe8   :  { %98 = vst.msk [vmem:[#allocation2 + $0x80] sm:$0xff] %vm81_vm0, %v10427_v15  ;;  %99 = vst.msk [vmem:[#allocation2 + $0x88] sm:$0xff] %vm81_vm0, %v10427_v15  ;;  %v217_v5 = vadd.f32 %v215_v49, %v196_v31  ;;  %v1819_v4 = vadd.f32 %v7516_v2, %v1791_v58  ;;  %v6023_v49 = vld [vmem:[%s10378_s0 + $0xd0] sm:$0x7f]  ;;  %v278_v58 = vmul.f32 %v7643_v6, %v7241_v38 }
  0xe9   :  { %100 = vst.msk [vmem:[#allocation2 + $0x90] sm:$0xff] %vm81_vm0, %v10427_v15  ;;  %101 = vst.msk [vmem:[#allocation2 + $0x98] sm:$0xff] %vm81_vm0, %v10427_v15  ;;  %v7672_v31 = vld [vmem:[%s10378_s0 + $0x90] sm:$0x7f]  ;;  %845 = vrot.lane.b32.xlu1 %v7071_v1, %s6246_s15  ;;  %v7696_v1 = vld [vmem:[%s10378_s0 + $0xa0] sm:$0x7f] }
  0xea   :  { %102 = vst.msk [vmem:[#allocation2 + $0xa0] sm:$0xff] %vm81_vm0, %v10427_v15  ;;  %103 = vst.msk [vmem:[#allocation2 + $0xa8] sm:$0xff] %vm81_vm0, %v10427_v15 }
  0xeb   :  { %104 = vst.msk [vmem:[#allocation2 + $0xb0] sm:$0xff] %vm81_vm0, %v10427_v15  ;;  %105 = vst.msk [vmem:[#allocation2 + $0xb8] sm:$0xff] %vm81_vm0, %v10427_v15  ;;  %v10584_v15 = vld [vmem:[#allocation22_spill] sm:$0xff] }
  0xec   :  { %10580 = vst [vmem:[#allocation40_spill] sm:$0xff] %v7574_v44  ;;  %v500_v63 = vmul.f32 %v10584_v15, %v7026_v35  ;;  %1360 = vst.msk [vmem:[#allocation2 + $0x31] sm:$0x7f] %vm448_vm1, %v1357_v12  ;;  %v1318_v35 = vmul.f32 %v7569_v42, %v7394_v25  ;;  %v10586_v15 = vld [vmem:[#allocation42_spill] sm:$0xff]  ;;  %v7635_v44 = vmul.f32 %v10593_v13, %v7155_v62 }
  0xed   :  { %v1790_v21 = vadd.f32 %v10586_v15, %v1770_v43  ;;  %v7621_v12 = vld [vmem:[%s10378_s0 + $0x70] sm:$0x7f]  ;;  %v1338_v43 = vmul.f32 %v7595_v17, %v7430_v19  ;;  %v10592_v15 = vld [vmem:[#allocation51_spill] sm:$0xff]  ;;  %10594 = vst [vmem:[#allocation41_spill] sm:$0xff] %v7643_v6  ;;  %10596 = vst [vmem:[#allocation49_spill] sm:$0xff] %v7672_v31  ;;  %v1863_v13 = vadd.f32 %v1859_v7, %v1819_v4  ;;  %1884 = vrot.lane.b32.xlu1 %v7138_v26, %s6246_s15 }
  0xee   :  { %10589 = vst [vmem:[#allocation48_spill] sm:$0xff] %v7621_v12  ;;  %801 = vrot.lane.b32.xlu0 %v10592_v15, %s6246_s15  ;;  %v7638_v23 = vadd.f32 %v500_v63, %v7490_v14  ;;  %v1320_v0 = vadd.f32 %v1318_v35, %v1300_v57  ;;  %v7658_v63 = vld [vmem:[%s10378_s0 + $0x18] sm:$0x7f]  ;;  %v902_v35 = vpop.permute.xlu0 %901  ;;  %v7667_v57 = vmul.f32 %v6023_v49, %v7095_v56  ;;  %10597 = vst [vmem:[#allocation22_spill] sm:$0xff] %v7696_v1 }
  0xef   :  { %v1818_v30 = vadd.f32 %v7401_v55, %v1790_v21  ;;  %v7646_v55 = vpop.permute.xlu1 %1442  ;;  %v257_v21 = vmul.f32 %v7621_v12, %v7209_v36  ;;  %v10595_v14 = vld [vmem:[#allocation43_spill] sm:$0xff] }
  0xf0   :  { %v859_v9 = vadd.f32 %v10595_v14, %v823_v22  ;;  %v7677_v22 = vld [vmem:[%s10378_s0 + $0x28] sm:$0x7f]  ;;  %v1340_v2 = vadd.f32 %v1338_v43, %v1320_v0  ;;  %v7686_v15 = vld [vmem:[%s10378_s0 + $0x38] sm:$0x7f]  ;;  %v7691_v14 = vstv %s7590_s24  ;;  %v132_v43 = vmul.f32 %v7658_v63, %v7033_v32  ;;  %s7800_s24 = sld [smem:[#allocation3 + $0x15]] }
  0xf1   :  { %v1862_v24 = vadd.f32 %v7509_v20, %v1818_v30  ;;  %v824_v20 = vadd.f32 %v820_v41, %v780_v33  ;;  %v238_v30 = vadd.f32 %v236_v48, %v217_v5  ;;  %v111_v41 = vmul.f32 %v7014_v39, %v7653_v53  ;;  %v7712_v5 = vld [vmem:[%s10378_s0 + $0x48] sm:$0x7f]  ;;  %v10598_v32 = vld [vmem:[#allocation46_spill] sm:$0xff]  ;;  %v10599_v4 = vld [vmem:[#allocation47_spill] sm:$0xff]  ;;  %847 = vrot.lane.b32.xlu1 %v7199_v50, %s6246_s15 }
  0xf2   :  { %803 = vrot.lane.b32.xlu0 %v7092_v51, %s6246_s15  ;;  %v1356_v7 = vadd.f32 %v7474_v27, %v1340_v2  ;;  %v299_v51 = vmul.f32 %v7672_v31, %v7264_v52  ;;  %v153_v0 = vmul.f32 %v7677_v22, %v7052_v28  ;;  %v879_v49 = vadd.f32 %v10599_v4, %v859_v9  ;;  %v904_v6 = vpop.permute.xlu0 %903 }
  0xf3   :  { %v946_v48 = vpop.permute.xlu1 %945  ;;  %v259_v33 = vadd.f32 %v257_v21, %v238_v30  ;;  %v1894_v39 = vadd.f32 %v10598_v32, %v1862_v24  ;;  %v7721_v21 = vld [vmem:[%s10378_s0 + $0xb0] sm:$0x7f]  ;;  %v134_v2 = vadd.f32 %v132_v43, %v111_v41  ;;  %v174_v28 = vmul.f32 %v7686_v15, %v7098_v29  ;;  %v7733_v24 = vld [vmem:[%s10378_s0 + $0x58] sm:$0x7f] }
  0xf4   :  { %10600 = vst [vmem:[#allocation17_spill] sm:$0xff] %v7721_v21  ;;  %v860_v30 = vadd.f32 %v7060_v46, %v824_v20  ;;  %v1358_v31 = vmax.f32 %v1356_v7, 0.0  ;;  %v320_v9 = vmul.f32 %v7696_v1, %v7291_v16  ;;  %v1895_v41 = vadd.f32 %v10598_v32, %v1863_v13  ;;  %v7741_v46 = vld [vmem:[%s10378_s0 + $0xc0] sm:$0x7f] }
  0xf5   :  { %v280_v12 = vadd.f32 %v278_v58, %v259_v33  ;;  %v907_v43 = vadd.f32 %v902_v35, %v879_v49  ;;  %10601 = vst [vmem:[#allocation42_spill] sm:$0xff] %v7741_v46  ;;  %v155_v29 = vadd.f32 %v153_v0, %v134_v2  ;;  %v195_v26 = vmul.f32 %v7712_v5, %v7123_v8  ;;  %v6024_v58 = vld [vmem:[%s10378_s0 + $0xd8] sm:$0x7f]  ;;  %v7763_v33 = vld [vmem:[%s10378_s0 + $0xd0] sm:$0x7f] }
  0xf6   :  { %1842 = vrot.lane.b32.xlu0 %v7163_v18, %s6246_s15  ;;  %v7751_v35 = vmul.f32 %v6024_v58, %v7095_v56  ;;  %v10602_v18 = vld [vmem:[#allocation31_spill] sm:$0xff]  ;;  %1361 = vst.msk [vmem:[#allocation2 + $0x39] sm:$0x7f] %vm448_vm1, %v1358_v31  ;;  %v341_v8 = vmul.f32 %v7721_v21, %v7328_v3  ;;  %10603 = vst [vmem:[#allocation44_spill] sm:$0xff] %v7763_v33  ;;  %v7768_v56 = vld [vmem:[%s10378_s0 + $0x68] sm:$0x7f]  ;;  %v1445_v4 = vpop.permute.xlu0 %1444 }
  0xf7   :  { %v1487_v20 = vpop.permute.xlu1 %1486  ;;  %v7755_v13 = vmul.f32 %v10602_v18, %v7310_v60  ;;  %v301_v7 = vadd.f32 %v299_v51, %v280_v12  ;;  %v951_v0 = vadd.f32 %v946_v48, %v907_v43  ;;  %v1896_v49 = vmax.f32 %v1894_v39, 0.0  ;;  %v10604_v31 = vld [vmem:[#allocation52_spill] sm:$0xff] }
  0xf8   :  { %v176_v2 = vadd.f32 %v174_v28, %v155_v29  ;;  %v216_v12 = vmul.f32 %v7733_v24, %v7147_v34  ;;  %v880_v51 = vadd.f32 %v10604_v31, %v860_v30  ;;  %v10605_v58 = vld [vmem:[#allocation28_spill] sm:$0xff]  ;;  %v362_v48 = vmul.f32 %v7741_v46, %v7349_v54  ;;  %v7786_v34 = vld [vmem:[%s10378_s0 + $0x78] sm:$0x7f] }
  0xf9   :  { %v7779_v18 = vmul.f32 %v10605_v58, %v7691_v14  ;;  %v322_v21 = vadd.f32 %v320_v9, %v301_v7  ;;  %v1897_v50 = vmax.f32 %v1895_v41, 0.0  ;;  %v383_v39 = vmul.f32 %v7763_v33, %v7372_v47  ;;  %v7796_v28 = vld [vmem:[%s10378_s0 + $0xe0] sm:$0x7f]  ;;  %v7807_v41 = vld [vmem:[%s10378_s0 + $0x88] sm:$0x7f] }
  0xfa   :  { %1900 = vrot.lane.b32.xlu0 %v1896_v49, %s6248_s14  ;;  %10606 = vst [vmem:[#allocation18_spill] sm:$0xff] %v7796_v28  ;;  %v197_v30 = vadd.f32 %v195_v26, %v176_v2  ;;  %v237_v9 = vmul.f32 %v7768_v56, %v7171_v11  ;;  %v908_v43 = vadd.f32 %v904_v6, %v880_v51  ;;  %10607 = vst [vmem:[#allocation50_spill] sm:$0xff] %v7807_v41  ;;  %v10608_v26 = vld [vmem:[#allocation56_spill] sm:$0xff]  ;;  %v948_v58 = vpop.permute.xlu0 %947  ;;  %v7821_v6 = vld [vmem:[%s10378_s0 + $0xf0] sm:$0x7f] }
  0xfb   :  { %v1489_v29 = vpop.permute.xlu1 %1488  ;;  %v343_v7 = vadd.f32 %v341_v8, %v322_v21  ;;  %v7810_v49 = vstv %s7702_s19  ;;  %v7813_v31 = vstv %s7714_s2  ;;  %v1448_v2 = vadd.f32 %v7646_v55, %v10608_v26  ;;  %10609 = vst [vmem:[#allocation45_spill] sm:$0xff] %v7821_v6  ;;  %v7828_v51 = vld [vmem:[%s10378_s0 + $0x98] sm:$0x7f]  ;;  %s7830_s2 = sld [smem:[#allocation3 + $0x16]]  ;;  %1902 = vrot.lane.b32.xlu1 %v1897_v50, %s6248_s14 }
  0xfc   :  { %v983_v11 = vadd.f32 %v10598_v32, %v951_v0  ;;  %v218_v21 = vadd.f32 %v216_v12, %v197_v30  ;;  %v258_v8 = vmul.f32 %v7786_v34, %v7209_v36  ;;  %10610 = vst [vmem:[#allocation51_spill] sm:$0xff] %v7828_v51  ;;  %v952_v55 = vadd.f32 %v948_v58, %v908_v43  ;;  %v7838_v12 = vld [vmem:[%s10378_s0 + $0xa8] sm:$0x7f]  ;;  %s7963_s19 = sld [smem:[#allocation3 + $0x1c]] }
  0xfd   :  { %v364_v0 = vadd.f32 %v362_v48, %v343_v7  ;;  %v404_v26 = vmul.f32 %v7796_v28, %v7394_v25  ;;  %10611 = vst [vmem:[#allocation24_spill] sm:$0xff] %v7838_v12  ;;  %v10612_v36 = vld [vmem:[#allocation53_spill] sm:$0xff]  ;;  %v279_v43 = vmul.f32 %v7807_v41, %v7241_v38  ;;  %v10613_v48 = vld [vmem:[#allocation54_spill] sm:$0xff]  ;;  %v7849_v7 = vstv %s7745_s16  ;;  %s7865_s16 = sld [smem:[#allocation3 + $0x18]] }
  0xfe   :  { %v1044_v30 = vmul.f32 %v10612_v36, %v7810_v49  ;;  %1886 = vrot.lane.b32.xlu0 %v7358_v59, %s6246_s15  ;;  %v239_v33 = vadd.f32 %v237_v9, %v218_v21  ;;  %v1064_v50 = vmul.f32 %v10613_v48, %v7813_v31  ;;  %v425_v36 = vmul.f32 %v7821_v6, %v7430_v19  ;;  %v10614_v9 = vld [vmem:[#allocation55_spill] sm:$0xff]  ;;  %v7861_v48 = vpop.permute.xlu0 %531 }
  0xff   :  { %v7853_v58 = vpop.permute.xlu1 %1570  ;;  %v385_v28 = vadd.f32 %v383_v39, %v364_v0  ;;  %v300_v59 = vmul.f32 %v7828_v51, %v7264_v52  ;;  %v1084_v38 = vmul.f32 %v10614_v9, %v7849_v7  ;;  %v1492_v21 = vadd.f32 %v1487_v20, %v1448_v2  ;;  %v10615_v0 = vld [vmem:[#allocation59_spill] sm:$0xff]  ;;  %931 = vrot.lane.b32.xlu1 %v7616_v61, %s6246_s15 }
 0x100   :  { %v985_v46 = vmax.f32 %v983_v11, 0.0  ;;  %v260_v41 = vadd.f32 %v258_v8, %v239_v33  ;;  %v321_v39 = vmul.f32 %v7838_v12, %v7291_v16  ;;  %v1449_v6 = vadd.f32 %v1445_v4, %v10615_v0  ;;  %v7874_v20 = vld [vmem:[%s10378_s0 + $0xb8] sm:$0x7f]  ;;  %v7892_v11 = vld [vmem:[%s10378_s0 + $0xc8] sm:$0x7f] }
 0x101   :  { %v984_v52 = vadd.f32 %v10598_v32, %v952_v55  ;;  %v406_v9 = vadd.f32 %v404_v26, %v385_v28  ;;  %10616 = vst [vmem:[#allocation43_spill] sm:$0xff] %v7874_v20  ;;  %v1066_v33 = vadd.f32 %v1064_v50, %v1044_v30  ;;  %v7879_v2 = vstv %s7772_s29  ;;  %10617 = vst [vmem:[#allocation46_spill] sm:$0xff] %v7892_v11  ;;  %s7908_s29 = sld [smem:[#allocation3 + $0x1a]] }
 0x102   :  { %929 = vrot.lane.b32.xlu0 %v7604_v40, %s6246_s15  ;;  %v281_v16 = vadd.f32 %v279_v43, %v260_v41  ;;  %v7882_v4 = vstv %s7788_s18  ;;  %v7885_v32 = vstv %s7800_s24  ;;  %v10618_v40 = vld [vmem:[#allocation60_spill] sm:$0xff]  ;;  %v10619_v41 = vld [vmem:[#allocation63_spill] sm:$0xff]  ;;  %v7898_v30 = vpop.permute.xlu0 %533  ;;  %v7901_v43 = vstv %s7802_s26  ;;  %s8073_s24 = sld [smem:[#allocation6 + $0x1]] }
 0x103   :  { %v576_v61 = vpop.permute.xlu1 %575  ;;  %v427_v28 = vadd.f32 %v425_v36, %v406_v9  ;;  %v1086_v8 = vadd.f32 %v1084_v38, %v1066_v33  ;;  %v1104_v55 = vmul.f32 %v10618_v40, %v7879_v2  ;;  %v1124_v26 = vmul.f32 %v10619_v41, %v7882_v4  ;;  %989 = vrot.lane.b32.xlu1 %v985_v46, %s6248_s14  ;;  %v7915_v33 = vld [vmem:[%s10378_s0 + $0xd8] sm:$0x7f]  ;;  %v10622_v41 = vld [vmem:[#allocation61_spill] sm:$0xff]  ;;  %s5576_s26 = sld [smem:[#allocation3 + $0x20]] }
 0x104   :  { %v302_v50 = vadd.f32 %v300_v59, %v281_v16  ;;  %v342_v36 = vmul.f32 %v7874_v20, %v7328_v3  ;;  %v7906_v0 = vstv %s7830_s2  ;;  %v1493_v38 = vadd.f32 %v1489_v29, %v1449_v6  ;;  %10620 = vst [vmem:[#allocation47_spill] sm:$0xff] %v7915_v33  ;;  %v10621_v59 = vld [vmem:[#allocation64_spill] sm:$0xff]  ;;  %s8441_s2 = sld [smem:[#allocation8 + $0x3]] }
 0x105   :  { %v443_v9 = vadd.f32 %v7474_v27, %v427_v28  ;;  %v1106_v40 = vadd.f32 %v1104_v55, %v1086_v8  ;;  %v1144_v16 = vmul.f32 %v10621_v59, %v7885_v32  ;;  %v1520_v3 = vadd.f32 %v10622_v41, %v1492_v21  ;;  %v7932_v55 = vld [vmem:[%s10378_s0 + $0xe8] sm:$0x7f]  ;;  %s8675_s18 = sld [smem:[#allocation8 + $0xe]] }
 0x106   :  { %973 = vrot.lane.b32.xlu0 %v7667_v57, %s6246_s15  ;;  %v323_v29 = vadd.f32 %v321_v39, %v302_v50  ;;  %v363_v46 = vmul.f32 %v7892_v11, %v7349_v54  ;;  %v7925_v6 = vstv %s7851_s12  ;;  %v986_v28 = vmax.f32 %v984_v52, 0.0  ;;  %10623 = vst [vmem:[#allocation31_spill] sm:$0xff] %v7932_v55  ;;  %v10624_v57 = vld [vmem:[#allocation66_spill] sm:$0xff]  ;;  %v1573_v39 = vpop.permute.xlu0 %1572  ;;  %v7939_v54 = vld [vmem:[%s10378_s0 + $0x29] sm:$0x7f]  ;;  %s8468_s12 = sld [smem:[#allocation3 + $0x27]] }
 0x107   :  { %v1615_v20 = vpop.permute.xlu1 %1614  ;;  %v445_v8 = vmax.f32 %v443_v9, 0.0  ;;  %v1126_v21 = vadd.f32 %v1124_v26, %v1106_v40  ;;  %v1164_v59 = vmul.f32 %v10624_v57, %v7906_v0  ;;  %10625 = vst [vmem:[#allocation52_spill] sm:$0xff] %v7939_v54  ;;  %v7943_v52 = vmul.f32 %v7939_v54, %v7691_v14  ;;  %v10626_v26 = vld [vmem:[#allocation25_spill] sm:$0xff] }
 0x108   :  { %v344_v50 = vadd.f32 %v342_v36, %v323_v29  ;;  %v384_v9 = vmul.f32 %v7915_v33, %v7372_v47  ;;  %v7948_v41 = vstv %s7865_s16  ;;  %v1521_v40 = vadd.f32 %v10626_v26, %v1493_v38  ;;  %991 = vrot.lane.b32.xlu1 %v986_v28, %s6248_s14  ;;  %v7957_v57 = vld [vmem:[%s10378_s0 + $0x31] sm:$0x7f]  ;;  %v7969_v47 = vld [vmem:[%s10378_s0 + $0xf8] sm:$0x7f]  ;;  %v10630_v33 = vld [vmem:[#allocation32_spill] sm:$0xff]  ;;  %s7994_s16 = sld [smem:[#allocation3 + $0x1d]] }
 0x109   :  { %10627 = vst [vmem:[#allocation28_spill] sm:$0xff] %v7957_v57  ;;  %v7961_v36 = vmul.f32 %v7957_v57, %v7901_v43  ;;  %449 = vst.msk [vmem:[#allocation2 + $0x90] sm:$0x7f] %vm448_vm1, %v445_v8  ;;  %v1146_v38 = vadd.f32 %v1144_v16, %v1126_v21  ;;  %v10629_v29 = vld [vmem:[#allocation30_spill] sm:$0xff]  ;;  %v537_v26 = vadd.f32 %v7861_v48, %v7403_v45  ;;  %v7980_v57 = vstv %s7887_s3  ;;  %s5675_s3 = sld [smem:[#allocation3 + $0x24]] }
 0x10a   :  { %10628 = vst [vmem:[#allocation56_spill] sm:$0xff] %v7969_v47  ;;  %v1184_v28 = vmul.f32 %v10629_v29, %v7925_v6  ;;  %975 = vrot.lane.b32.xlu0 %v7751_v35, %s6246_s15  ;;  %v365_v54 = vadd.f32 %v363_v46, %v344_v50  ;;  %v405_v8 = vmul.f32 %v7932_v55, %v7394_v25  ;;  %v7988_v29 = vld [vmem:[%s10378_s0 + $0x68] sm:$0x7f]  ;;  %v578_v50 = vpop.permute.xlu0 %577  ;;  %v8001_v55 = vstv %s7908_s29  ;;  %s8030_s29 = sld [smem:[#allocation3 + $0x1f]] }
 0x10b   :  { %v1540_v16 = vadd.f32 %v10630_v33, %v1520_v3  ;;  %v1617_v21 = vpop.permute.xlu1 %1616  ;;  %10631 = vst [vmem:[#allocation53_spill] sm:$0xff] %v7988_v29  ;;  %v7992_v45 = vmul.f32 %v7988_v29, %v7155_v62  ;;  %v1166_v35 = vadd.f32 %v1164_v59, %v1146_v38  ;;  %v10632_v25 = vld [vmem:[#allocation36_spill] sm:$0xff]  ;;  %v581_v46 = vadd.f32 %v576_v61, %v537_v26  ;;  %v10634_v29 = vld [vmem:[#allocation33_spill] sm:$0xff]  ;;  %v8012_v61 = vld [vmem:[%s10378_s0 + $0x78] sm:$0x7f] }
 0x10c   :  { %v1204_v48 = vmul.f32 %v7948_v41, %v10632_v25  ;;  %v386_v33 = vadd.f32 %v384_v9, %v365_v54  ;;  %v426_v3 = vmul.f32 %v7969_v47, %v7430_v19  ;;  %10633 = vst [vmem:[#allocation54_spill] sm:$0xff] %v8001_v55  ;;  %v1541_v11 = vadd.f32 %v10634_v29, %v1521_v40  ;;  %v10635_v59 = vld [vmem:[#allocation16_spill] sm:$0xff]  ;;  %v10639_v29 = vld [vmem:[#allocation35_spill] sm:$0xff] }
 0x10d   :  { %v1576_v62 = vadd.f32 %v7853_v58, %v1540_v16  ;;  %v1186_v12 = vadd.f32 %v1184_v28, %v1166_v35  ;;  %v1224_v38 = vmul.f32 %v10635_v59, %v7980_v57  ;;  %10636 = vst [vmem:[#allocation55_spill] sm:$0xff] %v8012_v61  ;;  %v8016_v19 = vmul.f32 %v8012_v61, %v7310_v60  ;;  %v8021_v58 = vld [vmem:[%s10378_s0 + $0x39] sm:$0x7f] }
 0x10e   :  { %10637 = vst [vmem:[#allocation59_spill] sm:$0xff] %v8021_v58  ;;  %v8025_v54 = vmul.f32 %v8021_v58, %v7901_v43  ;;  %v407_v9 = vadd.f32 %v405_v8, %v386_v33  ;;  %v8028_v40 = vstv %s7927_s22  ;;  %v1577_v26 = vadd.f32 %v1573_v39, %v1541_v11  ;;  %v660_v59 = vpop.permute.xlu0 %659  ;;  %v8038_v8 = vld [vmem:[%s10378_s0 + $0xa0] sm:$0x7f]  ;;  %v10645_v58 = vld [vmem:[#allocation21_spill] sm:$0xff]  ;;  %s5718_s22 = sld [smem:[#allocation3 + $0x2d]] }
 0x10f   :  { %10638 = vst [vmem:[#allocation60_spill] sm:$0xff] %v8028_v40  ;;  %v1620_v28 = vadd.f32 %v1615_v20, %v1576_v62  ;;  %v1699_v60 = vpop.permute.xlu1 %1698  ;;  %v1206_v16 = vadd.f32 %v1204_v48, %v1186_v12  ;;  %v1244_v35 = vmul.f32 %v10639_v29, %v8001_v55  ;;  %v609_v25 = vadd.f32 %v7635_v44, %v581_v46  ;;  %v8050_v48 = vld [vmem:[%s10378_s0 + $0xb0] sm:$0x7f] }
 0x110   :  { %10640 = vst [vmem:[#allocation63_spill] sm:$0xff] %v8038_v8  ;;  %v8042_v20 = vmul.f32 %v8038_v8, %v7691_v14  ;;  %v428_v11 = vadd.f32 %v426_v3, %v407_v9  ;;  %v8045_v39 = vstv %s7950_s21  ;;  %v1621_v12 = vadd.f32 %v1617_v21, %v1577_v26  ;;  %10642 = vst [vmem:[#allocation61_spill] sm:$0xff] %v8050_v48  ;;  %s5700_s21 = sld [smem:[#allocation3 + $0x29]] }
 0x111   :  { %10641 = vst [vmem:[#allocation64_spill] sm:$0xff] %v8045_v39  ;;  %v8054_v44 = vmul.f32 %v8050_v48, %v7901_v43  ;;  %v1226_v46 = vadd.f32 %v1224_v38, %v1206_v16  ;;  %v1264_v33 = vmul.f32 %v7442_v37, %v8028_v40  ;;  %v538_v3 = vadd.f32 %v7898_v30, %v7638_v23  ;;  %v10644_v16 = vld [vmem:[#allocation67_spill] sm:$0xff] }
 0x112   :  { %v8061_v62 = vstv %s7963_s19  ;;  %v444_v21 = vadd.f32 %v7474_v27, %v428_v11  ;;  %v8065_v9 = vstv %s7982_s11  ;;  %v1648_v26 = vadd.f32 %v7779_v18, %v1620_v28  ;;  %v8076_v30 = vpop.permute.xlu0 %661  ;;  %s8117_s11 = sld [smem:[#allocation6 + $0x1]] }
 0x113   :  { %v704_v29 = vpop.permute.xlu1 %703  ;;  %v8069_v8 = vstv %s7994_s16  ;;  %v1246_v38 = vadd.f32 %v1244_v35, %v1226_v46  ;;  %v1284_v48 = vmul.f32 %v10644_v16, %v8045_v39  ;;  %v582_v37 = vadd.f32 %v578_v50, %v538_v3  ;;  %v8087_v35 = vld [vmem:[%s10378_s0 + $0x80] sm:$0x7f]  ;;  %s8255_s19 = sld [smem:[#allocation3 + $0x21]] }
 0x114   :  { %10643 = vst [vmem:[#allocation66_spill] sm:$0xff] %v8069_v8  ;;  %v629_v23 = vadd.f32 %v7755_v13, %v609_v25  ;;  %v446_v27 = vmax.f32 %v444_v21, 0.0  ;;  %v8079_v11 = vstv %s8003_s28  ;;  %v1649_v18 = vadd.f32 %v7943_v52, %v1621_v12  ;;  %10646 = vst [vmem:[#allocation25_spill] sm:$0xff] %v8087_v35  ;;  %v8098_v52 = vld [vmem:[%s10378_s0 + $0x90] sm:$0x7f]  ;;  %s8564_s16 = sld [smem:[#allocation3 + $0x2f]] }
 0x115   :  { %v1266_v28 = vadd.f32 %v1264_v33, %v1246_v38  ;;  %v1304_v61 = vmul.f32 %v10645_v58, %v8065_v9  ;;  %v1043_v50 = vmul.f32 %v8087_v35, %v7810_v49  ;;  %v8093_v25 = vstv %s8030_s29  ;;  %10647 = vst [vmem:[#allocation30_spill] sm:$0xff] %v8098_v52  ;;  %v8105_v12 = vld [vmem:[%s10378_s0 + $0xa0] sm:$0x7f]  ;;  %s5713_s29 = sld [smem:[#allocation3 + $0x2c]] }
 0x116   :  { %v665_v13 = vadd.f32 %v660_v59, %v629_v23  ;;  %450 = vst.msk [vmem:[#allocation2 + $0x98] sm:$0x7f] %vm448_vm1, %v446_v27  ;;  %v1063_v58 = vmul.f32 %v8098_v52, %v7813_v31  ;;  %10648 = vst [vmem:[#allocation32_spill] sm:$0xff] %v8105_v12  ;;  %v1083_v59 = vmul.f32 %v8105_v12, %v7849_v7  ;;  %v8113_v33 = vld [vmem:[%s10378_s0 + $0x61] sm:$0x7f]  ;;  %v1701_v27 = vpop.permute.xlu0 %1700  ;;  %s9136_s28 = sld [smem:[#allocation8 + $0x9]] }
 0x117   :  { %v1668_v46 = vadd.f32 %v7961_v36, %v1648_v26  ;;  %10649 = vst [vmem:[#allocation36_spill] sm:$0xff] %v8113_v33  ;;  %v1774_v3 = vmul.f32 %v8113_v33, %v8061_v62  ;;  %v1743_v21 = vpop.permute.xlu1 %1742  ;;  %v1286_v38 = vadd.f32 %v1284_v48, %v1266_v28  ;;  %v1324_v16 = vmul.f32 %v7569_v42, %v8079_v11  ;;  %v8124_v36 = vld [vmem:[%s10378_s0 + $0x69] sm:$0x7f]  ;;  %v8131_v52 = vld [vmem:[%s10378_s0 + $0xb0] sm:$0x7f] }
 0x118   :  { %v709_v23 = vadd.f32 %v704_v29, %v665_v13  ;;  %10650 = vst [vmem:[#allocation33_spill] sm:$0xff] %v8124_v36  ;;  %v1775_v26 = vmul.f32 %v8124_v36, %v8061_v62  ;;  %v1065_v12 = vadd.f32 %v1063_v58, %v1043_v50  ;;  %10651 = vst [vmem:[#allocation16_spill] sm:$0xff] %v8131_v52  ;;  %v8138_v29 = vld [vmem:[%s10378_s0 + $0x71] sm:$0x7f] }
 0x119   :  { %v1103_v48 = vmul.f32 %v8131_v52, %v7879_v2  ;;  %v1704_v42 = vadd.f32 %v1699_v60, %v1668_v46  ;;  %10652 = vst [vmem:[#allocation35_spill] sm:$0xff] %v8138_v29  ;;  %v1794_v28 = vmul.f32 %v8138_v29, %v8069_v8  ;;  %v1306_v13 = vadd.f32 %v1304_v61, %v1286_v38  ;;  %v8149_v60 = vld [vmem:[%s10378_s0 + $0xc0] sm:$0x7f]  ;;  %v8156_v61 = vld [vmem:[%s10378_s0 + $0xa8] sm:$0x7f] }
 0x11a   :  { %v1344_v50 = vmul.f32 %v7595_v17, %v8093_v25  ;;  %v610_v58 = vadd.f32 %v7992_v45, %v582_v37  ;;  %v1669_v36 = vadd.f32 %v8025_v54, %v1649_v18  ;;  %v1085_v35 = vadd.f32 %v1083_v59, %v1065_v12  ;;  %10653 = vst [vmem:[#allocation67_spill] sm:$0xff] %v8149_v60  ;;  %v706_v12 = vpop.permute.xlu0 %705 }
 0x11b   :  { %v1123_v46 = vmul.f32 %v8149_v60, %v7882_v4  ;;  %v1748_v52 = vadd.f32 %v1743_v21, %v1704_v42  ;;  %v1745_v33 = vpop.permute.xlu1 %1744  ;;  %10654 = vst [vmem:[#allocation21_spill] sm:$0xff] %v8156_v61  ;;  %v8160_v17 = vmul.f32 %v8156_v61, %v7691_v14  ;;  %v1326_v45 = vadd.f32 %v1324_v16, %v1306_v13  ;;  %v10656_v21 = vld [vmem:[#allocation57_spill] sm:$0xff]  ;;  %v8171_v42 = vld [vmem:[%s10378_s0 + $0xe0] sm:$0x7f]  ;;  %v8189_v16 = vld [vmem:[%s10378_s0 + $0x79] sm:$0x7f] }
 0x11c   :  { %v8163_v54 = vstv %s8073_s24  ;;  %v737_v37 = vadd.f32 %v8042_v20, %v709_v23  ;;  %v1705_v18 = vadd.f32 %v1701_v27, %v1669_v36  ;;  %v1105_v59 = vadd.f32 %v1103_v48, %v1085_v35  ;;  %10657 = vst [vmem:[#allocation57_spill] sm:$0xff] %v8171_v42  ;;  %v8180_v20 = vld [vmem:[%s10378_s0 + $0xb8] sm:$0x7f]  ;;  %10659 = vst [vmem:[#allocation72_spill] sm:$0xff] %v8189_v16  ;;  %s5695_s24 = sld [smem:[#allocation3 + $0x28]] }
 0x11d   :  { %10655 = vst [vmem:[#allocation70_spill] sm:$0xff] %v8163_v54  ;;  %v1143_v38 = vmul.f32 %v10656_v21, %v7885_v32  ;;  %v8175_v14 = vmul.f32 %v8171_v42, %v8061_v62  ;;  %10658 = vst [vmem:[#allocation71_spill] sm:$0xff] %v8180_v20  ;;  %v8184_v35 = vmul.f32 %v8180_v20, %v7901_v43  ;;  %v10660_v21 = vld [vmem:[#allocation58_spill] sm:$0xff]  ;;  %v8197_v43 = vstv %s8117_s11  ;;  %s5606_s11 = sld [smem:[#allocation3 + $0x26]] }
 0x11e   :  { %v1795_v23 = vmul.f32 %v8189_v16, %v8069_v8  ;;  %v1346_v27 = vadd.f32 %v1344_v50, %v1326_v45  ;;  %v630_v36 = vadd.f32 %v8016_v19, %v610_v58  ;;  %v1749_v48 = vadd.f32 %v1745_v33, %v1705_v18  ;;  %v8202_v20 = vld [vmem:[%s10378_s0 + $0xf0] sm:$0x7f]  ;;  %v788_v50 = vpop.permute.xlu0 %787 }
 0x11f   :  { %v1125_v13 = vadd.f32 %v1123_v46, %v1105_v59  ;;  %v1163_v42 = vmul.f32 %v10660_v21, %v7906_v0  ;;  %v1776_v60 = vadd.f32 %v1774_v3, %v1748_v52  ;;  %v1827_v61 = vpop.permute.xlu1 %1826  ;;  %10661 = vst [vmem:[#allocation58_spill] sm:$0xff] %v8202_v20  ;;  %v8206_v16 = vmul.f32 %v8202_v20, %v8069_v8  ;;  %v10662_v3 = vld [vmem:[#allocation62_spill] sm:$0xff]  ;;  %v10663_v18 = vld [vmem:[#allocation65_spill] sm:$0xff]  ;;  %v10665_v20 = vld [vmem:[#allocation27_spill] sm:$0xff] }
 0x120   :  { %v1365_v19 = vadd.f32 %v8163_v54, %v1346_v27  ;;  %v666_v33 = vadd.f32 %v8076_v30, %v630_v36  ;;  %v757_v58 = vadd.f32 %v8054_v44, %v737_v37  ;;  %v1183_v46 = vmul.f32 %v10662_v3, %v7925_v6  ;;  %v10664_v21 = vld [vmem:[#allocation29_spill] sm:$0xff]  ;;  %v10666_v30 = vld [vmem:[#allocation38_spill] sm:$0xff] }
 0x121   :  { %v1145_v52 = vadd.f32 %v1143_v38, %v1125_v13  ;;  %v1203_v59 = vmul.f32 %v7948_v41, %v10663_v18  ;;  %v1223_v29 = vmul.f32 %v10664_v21, %v7980_v57  ;;  %v1243_v47 = vmul.f32 %v10665_v20, %v8001_v55  ;;  %v10667_v44 = vld [vmem:[#allocation37_spill] sm:$0xff]  ;;  %v10669_v18 = vld [vmem:[#allocation20_spill] sm:$0xff]  ;;  %v10670_v20 = vld [vmem:[#allocation39_spill] sm:$0xff] }
 0x122   :  { %v1367_v45 = vmax.f32 %v1365_v19, 0.0  ;;  %v1777_v27 = vadd.f32 %v1775_v26, %v1749_v48  ;;  %v116_v36 = vmul.f32 %v7810_v49, %v10666_v30  ;;  %v137_v37 = vmul.f32 %v10667_v44, %v7813_v31  ;;  %v10668_v19 = vld [vmem:[#allocation19_spill] sm:$0xff] }
 0x123   :  { %v1165_v54 = vadd.f32 %v1163_v42, %v1145_v52  ;;  %v1796_v38 = vadd.f32 %v1794_v28, %v1776_v60  ;;  %v832_v13 = vpop.permute.xlu1 %831  ;;  %v1263_v3 = vmul.f32 %v10668_v19, %v8028_v40  ;;  %v1283_v21 = vmul.f32 %v10669_v18, %v8045_v39  ;;  %v790_v42 = vpop.permute.xlu0 %789  ;;  %v10671_v52 = vld [vmem:[#allocation34_spill] sm:$0xff]  ;;  %v10672_v28 = vld [vmem:[#allocation68_spill] sm:$0xff]  ;;  %v10673_v19 = vld [vmem:[#allocation23_spill] sm:$0xff] }
 0x124   :  { %1370 = vst.msk [vmem:[#allocation2 + $0x49] sm:$0x7f] %vm448_vm1, %v1367_v45  ;;  %v158_v26 = vmul.f32 %v10670_v20, %v7849_v7  ;;  %v1303_v30 = vmul.f32 %v10671_v52, %v8065_v9  ;;  %v139_v51 = vadd.f32 %v137_v37, %v116_v36  ;;  %v179_v60 = vmul.f32 %v10672_v28, %v7879_v2  ;;  %v10674_v20 = vld [vmem:[#allocation69_spill] sm:$0xff] }
 0x125   :  { %v1185_v48 = vadd.f32 %v1183_v46, %v1165_v54  ;;  %v710_v44 = vadd.f32 %v706_v12, %v666_v33  ;;  %v1832_v45 = vadd.f32 %v1827_v61, %v1796_v38  ;;  %v793_v8 = vadd.f32 %v788_v50, %v757_v58 }
 0x126   :  { %v1323_v40 = vmul.f32 %v10673_v19, %v8079_v11  ;;  %v1797_v1 = vadd.f32 %v1795_v23, %v1777_v27  ;;  %v160_v39 = vadd.f32 %v158_v26, %v139_v51  ;;  %v200_v55 = vmul.f32 %v10674_v20, %v7882_v4  ;;  %v10675_v51 = vld [vmem:[#allocation40_spill] sm:$0xff] }
 0x127   :  { %v1205_v18 = vadd.f32 %v1203_v59, %v1185_v48  ;;  %v837_v54 = vadd.f32 %v832_v13, %v793_v8  ;;  %v1871_v46 = vpop.permute.xlu1 %1870  ;;  %v117_v36 = vmul.f32 %v7810_v49, %v7653_v53  ;;  %v138_v37 = vmul.f32 %v7658_v63, %v7813_v31  ;;  %v1829_v33 = vpop.permute.xlu0 %1828 }
 0x128   :  { %v159_v61 = vmul.f32 %v7677_v22, %v7849_v7  ;;  %v1876_v12 = vadd.f32 %v1871_v46, %v1832_v45  ;;  %v181_v23 = vadd.f32 %v179_v60, %v160_v39  ;;  %v221_v58 = vmul.f32 %v10675_v51, %v7885_v32 }
 0x129   :  { %v1225_v50 = vadd.f32 %v1223_v29, %v1205_v18  ;;  %v738_v59 = vadd.f32 %v8160_v17, %v710_v44  ;;  %v242_v8 = vmul.f32 %v7600_v10, %v7906_v0  ;;  %v140_v27 = vadd.f32 %v138_v37, %v117_v36  ;;  %v10676_v29 = vld [vmem:[#allocation48_spill] sm:$0xff] }
 0x12a   :  { %v180_v53 = vmul.f32 %v7686_v15, %v7879_v2  ;;  %v1910_v63 = vadd.f32 %v8197_v43, %v1876_v12  ;;  %v1833_v49 = vadd.f32 %v1829_v33, %v1797_v1  ;;  %v202_v31 = vadd.f32 %v200_v55, %v181_v23  ;;  %v10677_v55 = vld [vmem:[#allocation26_spill] sm:$0xff] }
 0x12b   :  { %v1245_v22 = vadd.f32 %v1243_v47, %v1225_v50  ;;  %v865_v7 = vadd.f32 %v8175_v14, %v837_v54  ;;  %v1873_v39 = vpop.permute.xlu1 %1872  ;;  %v263_v17 = vmul.f32 %v10676_v29, %v7925_v6  ;;  %v161_v10 = vadd.f32 %v159_v61, %v140_v27  ;;  %v834_v13 = vpop.permute.xlu0 %833  ;;  %v10681_v33 = vld [vmem:[#allocation22_spill] sm:$0xff] }
 0x12c   :  { %v201_v38 = vmul.f32 %v7712_v5, %v7882_v4  ;;  %v1912_v15 = vmax.f32 %v1910_v63, 0.0  ;;  %v1877_v2 = vadd.f32 %v1873_v39, %v1833_v49  ;;  %v223_v26 = vadd.f32 %v221_v58, %v202_v31  ;;  %v10678_v4 = vld [vmem:[#allocation41_spill] sm:$0xff]  ;;  %v10683_v63 = vld [vmem:[#allocation60_spill] sm:$0xff]  ;;  %v8302_v31 = vld [vmem:[%s10378_s0 + $0xf8] sm:$0x7f] }
 0x12d   :  { %v1265_v1 = vadd.f32 %v1263_v3, %v1245_v22  ;;  %v758_v47 = vadd.f32 %v8184_v35, %v738_v59  ;;  %v1343_v14 = vmul.f32 %v10677_v55, %v8093_v25  ;;  %v182_v48 = vadd.f32 %v180_v53, %v161_v10  ;;  %v10679_v35 = vld [vmem:[#allocation49_spill] sm:$0xff] }
 0x12e   :  { %v222_v52 = vmul.f32 %v7733_v24, %v7885_v32  ;;  %v1911_v28 = vadd.f32 %v8197_v43, %v1877_v2  ;;  %1916 = vrot.lane.b32.xlu0 %v1912_v15, %s6248_s14  ;;  %v244_v5 = vadd.f32 %v242_v8, %v223_v26  ;;  %v284_v44 = vmul.f32 %v10678_v4, %v7948_v41  ;;  %v10684_v49 = vld [vmem:[#allocation17_spill] sm:$0xff] }
 0x12f   :  { %v1285_v60 = vadd.f32 %v1283_v21, %v1265_v1  ;;  %v794_v3 = vadd.f32 %v790_v42, %v758_v47  ;;  %v8270_v45 = vpop.permute.xlu1 %1456  ;;  %v305_v19 = vmul.f32 %v10679_v35, %v7980_v57  ;;  %v203_v18 = vadd.f32 %v201_v38, %v182_v48  ;;  %v916_v32 = vpop.permute.xlu0 %915  ;;  %v8280_v42 = vld [vmem:[%s10378_s0 + $0xe8] sm:$0x7f]  ;;  %v10687_v38 = vld [vmem:[#allocation70_spill] sm:$0xff]  ;;  %v6047_v47 = vld [vmem:[%s10378_s0 + $0xa0] sm:$0x7f] }
 0x130   :  { %v243_v20 = vmul.f32 %v7768_v56, %v7906_v0  ;;  %v1913_v24 = vmax.f32 %v1911_v28, 0.0  ;;  %v885_v21 = vadd.f32 %v8206_v16, %v865_v7  ;;  %v265_v46 = vadd.f32 %v263_v17, %v244_v5  ;;  %v10685_v7 = vld [vmem:[#allocation66_spill] sm:$0xff]  ;;  %v10686_v17 = vld [vmem:[#allocation51_spill] sm:$0xff]  ;;  %v10690_v28 = vld [vmem:[#allocation24_spill] sm:$0xff] }
 0x131   :  { %v1305_v54 = vadd.f32 %v1303_v30, %v1285_v60  ;;  %v864_v36 = vmul.f32 %v8280_v42, %v8061_v62  ;;  %v838_v37 = vadd.f32 %v834_v13, %v794_v3  ;;  %v224_v61 = vadd.f32 %v222_v52, %v203_v18  ;;  %v10680_v30 = vld [vmem:[#allocation54_spill] sm:$0xff]  ;;  %v10688_v13 = vld [vmem:[#allocation64_spill] sm:$0xff] }
 0x132   :  { %v264_v56 = vmul.f32 %v7786_v34, %v7925_v6  ;;  %v921_v0 = vadd.f32 %v916_v32, %v885_v21  ;;  %1918 = vrot.lane.b32.xlu1 %v1913_v24, %s6248_s14  ;;  %v286_v16 = vadd.f32 %v284_v44, %v265_v46  ;;  %v326_v50 = vmul.f32 %v10681_v33, %v10680_v30  ;;  %v10682_v62 = vld [vmem:[#allocation50_spill] sm:$0xff]  ;;  %v10691_v35 = vld [vmem:[#allocation44_spill] sm:$0xff]  ;;  %v10692_v24 = vld [vmem:[#allocation43_spill] sm:$0xff] }
 0x133   :  { %v1325_v12 = vadd.f32 %v1323_v40, %v1305_v54  ;;  %v8290_v23 = vstv %s8252_s30  ;;  %v8293_v51 = vstv %s8255_s19  ;;  %v960_v58 = vpop.permute.xlu1 %959  ;;  %v245_v59 = vadd.f32 %v243_v20, %v224_v61  ;;  %v918_v53 = vpop.permute.xlu0 %917  ;;  %v10689_v1 = vld [vmem:[#allocation42_spill] sm:$0xff]  ;;  %v10695_v33 = vld [vmem:[#allocation45_spill] sm:$0xff]  ;;  %s8423_s30 = sld [smem:[#allocation6 + $0x2]] }
 0x134   :  { %v285_v8 = vmul.f32 %v10682_v62, %v7948_v41  ;;  %v965_v27 = vadd.f32 %v960_v58, %v921_v0  ;;  %v307_v6 = vadd.f32 %v305_v19, %v286_v16  ;;  %v347_v40 = vmul.f32 %v10684_v49, %v10683_v63  ;;  %v10693_v54 = vld [vmem:[#allocation18_spill] sm:$0xff]  ;;  %v10696_v62 = vld [vmem:[#allocation47_spill] sm:$0xff]  ;;  %s5596_s19 = sld [smem:[#allocation3 + $0x24]] }
 0x135   :  { %v1345_v34 = vadd.f32 %v1343_v14, %v1325_v12  ;;  %v866_v22 = vadd.f32 %v864_v36, %v838_v37  ;;  %v884_v39 = vmul.f32 %v8302_v31, %v10685_v7  ;;  %v266_v29 = vadd.f32 %v264_v56, %v245_v59  ;;  %v6048_v14 = vld [vmem:[%s10378_s0 + $0xb0] sm:$0x7f] }
 0x136   :  { %v306_v41 = vmul.f32 %v10686_v17, %v7980_v57  ;;  %v1001_v10 = vadd.f32 %v8197_v43, %v965_v27  ;;  %v328_v2 = vadd.f32 %v326_v50, %v307_v6  ;;  %v368_v26 = vmul.f32 %v10689_v1, %v10688_v13  ;;  %v10694_v56 = vld [vmem:[#allocation46_spill] sm:$0xff] }
 0x137   :  { %v1364_v15 = vadd.f32 %v10687_v38, %v1345_v34  ;;  %v1396_v55 = vmul.f32 %v6047_v47, %v8290_v23  ;;  %v1416_v57 = vmul.f32 %v6048_v14, %v8293_v51  ;;  %v1501_v48 = vpop.permute.xlu1 %1500  ;;  %v287_v52 = vadd.f32 %v285_v8, %v266_v29  ;;  %v1459_v4 = vpop.permute.xlu0 %1458 }
 0x138   :  { %v327_v60 = vmul.f32 %v10690_v28, %v10680_v30  ;;  %v1003_v5 = vmax.f32 %v1001_v10, 0.0  ;;  %v349_v3 = vadd.f32 %v347_v40, %v328_v2  ;;  %v389_v19 = vmul.f32 %v10691_v35, %v8065_v9 }
 0x139   :  { %v1366_v44 = vmax.f32 %v1364_v15, 0.0  ;;  %v886_v18 = vadd.f32 %v884_v39, %v866_v22  ;;  %v308_v20 = vadd.f32 %v306_v41, %v287_v52  ;;  %v348_v32 = vmul.f32 %v10692_v24, %v10683_v63  ;;  %v10697_v63 = vld [vmem:[#allocation31_spill] sm:$0xff]  ;;  %v10698_v41 = vld [vmem:[#allocation56_spill] sm:$0xff] }
 0x13a   :  { %1007 = vrot.lane.b32.xlu0 %v1003_v5, %s6248_s14  ;;  %v370_v21 = vadd.f32 %v368_v26, %v349_v3  ;;  %v410_v46 = vmul.f32 %v10693_v54, %v8079_v11  ;;  %v369_v0 = vmul.f32 %v10694_v56, %v10688_v13  ;;  %v1418_v12 = vadd.f32 %v1416_v57, %v1396_v55 }
 0x13b   :  { %1369 = vst.msk [vmem:[#allocation2 + $0x41] sm:$0x7f] %vm448_vm1, %v1366_v44  ;;  %v922_v36 = vadd.f32 %v918_v53, %v886_v18  ;;  %v1503_v37 = vpop.permute.xlu1 %1502  ;;  %v329_v61 = vadd.f32 %v327_v60, %v308_v20  ;;  %v962_v16 = vpop.permute.xlu0 %961  ;;  %v431_v50 = vmul.f32 %v10695_v33, %v8093_v25  ;;  %v390_v8 = vmul.f32 %v10696_v62, %v8065_v9  ;;  %v6052_v44 = vld [vmem:[%s10378_s0 + $0xf0] sm:$0x7f]  ;;  %v6053_v18 = vld [vmem:[%s10378_s0 + $0x20] sm:$0x7f] }
 0x13c   :  { %v391_v30 = vadd.f32 %v389_v19, %v370_v21  ;;  %v411_v49 = vmul.f32 %v10697_v63, %v8079_v11  ;;  %v1462_v40 = vadd.f32 %v8270_v45, %v1418_v12  ;;  %v8340_v39 = vstv %s5675_s3  ;;  %v6050_v11 = vld [vmem:[%s10378_s0 + $0xb8] sm:$0x7f]  ;;  %s8479_s3 = sld [smem:[#allocation3 + $0x29]] }
 0x13d   :  { %v966_v58 = vadd.f32 %v962_v16, %v922_v36  ;;  %v350_v59 = vadd.f32 %v348_v32, %v329_v61  ;;  %v432_v10 = vmul.f32 %v10698_v41, %v8093_v25  ;;  %v1417_v45 = vmul.f32 %v6050_v11, %v8293_v51  ;;  %v6051_v25 = vld [vmem:[%s10378_s0 + $0xe0] sm:$0x7f]  ;;  %v6057_v16 = vld [vmem:[%s10378_s0 + $0x38] sm:$0x7f] }
 0x13e   :  { %v412_v27 = vadd.f32 %v410_v46, %v391_v30  ;;  %v1524_v1 = vmul.f32 %v6051_v25, %v8340_v39  ;;  %v1506_v26 = vadd.f32 %v1501_v48, %v1462_v40  ;;  %v8358_v14 = vstv %s5680_s13  ;;  %v6061_v25 = vld [vmem:[%s10378_s0 + $0x70] sm:$0x7f]  ;;  %s9003_s13 = sld [smem:[#allocation8 + $0x67]] }
 0x13f   :  { %v1002_v53 = vadd.f32 %v8197_v43, %v966_v58  ;;  %v1585_v34 = vpop.permute.xlu1 %1584  ;;  %v371_v6 = vadd.f32 %v369_v0, %v350_v59  ;;  %v546_v22 = vpop.permute.xlu0 %545  ;;  %v6049_v43 = vld [vmem:[%s10378_s0 + $0xa8] sm:$0x7f]  ;;  %v1544_v3 = vmul.f32 %v6052_v44, %v8358_v14  ;;  %v485_v20 = vmul.f32 %v6053_v18, %v8290_v23 }
 0x140   :  { %v433_v7 = vadd.f32 %v431_v50, %v412_v27  ;;  %v1397_v15 = vmul.f32 %v6049_v43, %v8290_v23  ;;  %v1526_v5 = vadd.f32 %v1524_v1, %v1506_v26  ;;  %v8379_v61 = vstv %s5695_s24  ;;  %v6056_v0 = vld [vmem:[%s10378_s0 + $0x28] sm:$0x7f]  ;;  %s9050_s24 = sld [smem:[#allocation8 + $0x42]] }
 0x141   :  { %v1004_v29 = vmax.f32 %v1002_v53, 0.0  ;;  %v392_v17 = vadd.f32 %v390_v8, %v371_v6  ;;  %v486_v12 = vmul.f32 %v6056_v0, %v8290_v23  ;;  %v506_v30 = vmul.f32 %v6057_v16, %v8293_v51  ;;  %v6059_v23 = vld [vmem:[%s10378_s0 + $0xf8] sm:$0x7f] }
 0x142   :  { %v453_v9 = vadd.f32 %v10687_v38, %v433_v7  ;;  %v1419_v52 = vadd.f32 %v1417_v45, %v1397_v15  ;;  %v1546_v21 = vadd.f32 %v1544_v3, %v1526_v5  ;;  %v1545_v27 = vmul.f32 %v6059_v23, %v8358_v14  ;;  %v10702_v5 = vld [vmem:[#allocation55_spill] sm:$0xff]  ;;  %v10703_v3 = vld [vmem:[#allocation36_spill] sm:$0xff] }
 0x143   :  { %1009 = vrot.lane.b32.xlu1 %v1004_v29, %s6248_s14  ;;  %v590_v2 = vpop.permute.xlu1 %589  ;;  %v413_v13 = vadd.f32 %v411_v49, %v392_v17  ;;  %v548_v47 = vpop.permute.xlu0 %547  ;;  %v8397_v53 = vstv %s5700_s21  ;;  %v10699_v49 = vld [vmem:[#allocation28_spill] sm:$0xff]  ;;  %v633_v1 = vmul.f32 %v6061_v25, %v8358_v14  ;;  %v634_v44 = vmul.f32 %v10702_v5, %v8358_v14  ;;  %s5586_s21 = sld [smem:[#allocation3 + $0x22]] }
 0x144   :  { %v455_v55 = vmax.f32 %v453_v9, 0.0  ;;  %v1463_v19 = vadd.f32 %v1459_v4, %v1419_v52  ;;  %v6055_v4 = vld [vmem:[%s10378_s0 + $0xe8] sm:$0x7f]  ;;  %v1590_v56 = vadd.f32 %v1585_v34, %v1546_v21  ;;  %v1672_v40 = vmul.f32 %v10699_v49, %v8397_v53  ;;  %v6060_v29 = vld [vmem:[%s10378_s0 + $0x60] sm:$0x7f] }
 0x145   :  { %v434_v57 = vadd.f32 %v432_v10, %v413_v13  ;;  %v1525_v46 = vmul.f32 %v6055_v4, %v8340_v39  ;;  %v613_v17 = vmul.f32 %v6060_v29, %v8340_v39  ;;  %v8427_v0 = vstv %s5576_s26  ;;  %v10716_v5 = vld [vmem:[#allocation72_spill] sm:$0xff]  ;;  %s9081_s26 = sld [smem:[#allocation8 + $0x43]] }
 0x146   :  { %458 = vst.msk [vmem:[#allocation2 + $0xa0] sm:$0x7f] %vm448_vm1, %v455_v55  ;;  %v1507_v36 = vadd.f32 %v1503_v37, %v1463_v19  ;;  %v6058_v37 = vld [vmem:[%s10378_s0 + $0x21] sm:$0x7f]  ;;  %v8453_v25 = vstv %s5596_s19  ;;  %s8540_s19 = sld [smem:[#allocation3 + $0x2d]] }
 0x147   :  { %v1629_v28 = vpop.permute.xlu1 %1628  ;;  %v454_v60 = vadd.f32 %v10687_v38, %v434_v57  ;;  %v1587_v48 = vpop.permute.xlu0 %1586  ;;  %v6054_v38 = vld [vmem:[%s10378_s0 + $0x30] sm:$0x7f]  ;;  %v1652_v58 = vmul.f32 %v6058_v37, %v8379_v61 }
 0x148   :  { %v505_v24 = vmul.f32 %v6054_v38, %v8293_v51  ;;  %v1634_v59 = vadd.f32 %v1629_v28, %v1590_v56  ;;  %v1527_v8 = vadd.f32 %v1525_v46, %v1507_v36  ;;  %v508_v51 = vadd.f32 %v506_v30, %v486_v12  ;;  %v10704_v38 = vld [vmem:[#allocation59_spill] sm:$0xff] }
 0x149   :  { %v456_v35 = vmax.f32 %v454_v60, 0.0  ;;  %v10705_v46 = vld [vmem:[#allocation35_spill] sm:$0xff] }
 0x14a   :  { %v507_v33 = vadd.f32 %v505_v24, %v485_v20  ;;  %v1654_v63 = vadd.f32 %v1652_v58, %v1634_v59  ;;  %v1547_v10 = vadd.f32 %v1545_v27, %v1527_v8  ;;  %v552_v9 = vadd.f32 %v548_v47, %v508_v51  ;;  %v10706_v12 = vld [vmem:[#allocation63_spill] sm:$0xff]  ;;  %v10708_v59 = vld [vmem:[#allocation33_spill] sm:$0xff] }
 0x14b   :  { %v1631_v32 = vpop.permute.xlu1 %1630  ;;  %459 = vst.msk [vmem:[#allocation2 + $0xa8] sm:$0x7f] %vm448_vm1, %v456_v35  ;;  %v592_v54 = vpop.permute.xlu0 %591  ;;  %v8413_v47 = vstv %s5713_s29  ;;  %v1673_v24 = vmul.f32 %v10704_v38, %v8397_v53  ;;  %v741_v16 = vmul.f32 %v10706_v12, %v8379_v61  ;;  %v10709_v8 = vld [vmem:[#allocation61_spill] sm:$0xff]  ;;  %v8437_v27 = vstv %s5581_s27  ;;  %s8491_s29 = sld [smem:[#allocation3 + $0x2a]] }
 0x14c   :  { %v551_v34 = vadd.f32 %v546_v22, %v507_v33  ;;  %v1591_v43 = vadd.f32 %v1587_v48, %v1547_v10  ;;  %v10700_v22 = vld [vmem:[#allocation53_spill] sm:$0xff]  ;;  %v596_v45 = vadd.f32 %v592_v54, %v552_v9  ;;  %v1674_v13 = vadd.f32 %v1672_v40, %v1654_v63  ;;  %v10712_v10 = vld [vmem:[#allocation32_spill] sm:$0xff]  ;;  %s8523_s27 = sld [smem:[#allocation8 + $0xf]] }
 0x14d   :  { %v614_v11 = vmul.f32 %v10700_v22, %v8340_v39  ;;  %v1780_v48 = vmul.f32 %v10703_v3, %v8413_v47  ;;  %v761_v23 = vmul.f32 %v10709_v8, %v8397_v53 }
 0x14e   :  { %v595_v41 = vadd.f32 %v590_v2, %v551_v34  ;;  %v10701_v2 = vld [vmem:[#allocation52_spill] sm:$0xff]  ;;  %v1635_v52 = vadd.f32 %v1631_v32, %v1591_v43  ;;  %v8421_v32 = vstv %s5718_s22  ;;  %v10710_v34 = vld [vmem:[#allocation21_spill] sm:$0xff]  ;;  %v8449_v43 = vstv %s5591_s20  ;;  %s8809_s20 = sld [smem:[#allocation8 + $0x63]] }
 0x14f   :  { %v1713_v50 = vpop.permute.xlu1 %1712  ;;  %v674_v62 = vpop.permute.xlu0 %673  ;;  %v1653_v57 = vmul.f32 %v10701_v2, %v8379_v61  ;;  %v616_v39 = vadd.f32 %v614_v11, %v596_v45  ;;  %v1800_v36 = vmul.f32 %v10705_v46, %v8421_v32  ;;  %v742_v63 = vmul.f32 %v10710_v34, %v8379_v61  ;;  %v10713_v11 = vld [vmem:[#allocation16_spill] sm:$0xff]  ;;  %s8847_s22 = sld [smem:[#allocation8 + $0x12]] }
 0x150   :  { %v615_v55 = vadd.f32 %v613_v17, %v595_v41  ;;  %v1718_v28 = vadd.f32 %v1713_v50, %v1674_v13  ;;  %v10707_v50 = vld [vmem:[#allocation25_spill] sm:$0xff]  ;;  %v1109_v45 = vmul.f32 %v10713_v11, %v8449_v43 }
 0x151   :  { %v1655_v18 = vadd.f32 %v1653_v57, %v1635_v52  ;;  %v636_v14 = vadd.f32 %v634_v44, %v616_v39  ;;  %v1049_v37 = vmul.f32 %v10707_v50, %v8427_v0  ;;  %v10715_v52 = vld [vmem:[#allocation67_spill] sm:$0xff]  ;;  %v1801_v44 = vmul.f32 %v10716_v5, %v8421_v32  ;;  %v10717_v50 = vld [vmem:[#allocation57_spill] sm:$0xff] }
 0x152   :  { %v635_v20 = vadd.f32 %v633_v1, %v615_v55  ;;  %v10714_v1 = vld [vmem:[#allocation71_spill] sm:$0xff]  ;;  %v8458_v55 = vstv %s8423_s30  ;;  %s9107_s30 = sld [smem:[#allocation8 + $0x5]] }
 0x153   :  { %v718_v6 = vpop.permute.xlu1 %717  ;;  %v676_v7 = vpop.permute.xlu0 %675  ;;  %v1675_v33 = vadd.f32 %v1673_v24, %v1655_v18  ;;  %v6062_v18 = vld [vmem:[%s10378_s0 + $0xd0] sm:$0x7f]  ;;  %v8477_v24 = vstv %s5606_s11  ;;  %s8555_s11 = sld [smem:[#allocation3 + $0x2e]] }
 0x154   :  { %v679_v21 = vadd.f32 %v674_v62, %v635_v20  ;;  %v680_v58 = vadd.f32 %v676_v7, %v636_v14  ;;  %v1781_v62 = vmul.f32 %v10708_v59, %v8413_v47  ;;  %v8445_v7 = vstv %s5586_s21  ;;  %v8481_v14 = vld [vmem:[#allocation2 + $0x30] sm:$0x7f]  ;;  %s8528_s21 = sld [smem:[#allocation3 + $0x2c]] }
 0x155   :  { %v1089_v9 = vmul.f32 %v10712_v10, %v8445_v7  ;;  %v10718_v10 = vld [vmem:[#allocation58_spill] sm:$0xff] }
 0x156   :  { %v723_v30 = vadd.f32 %v718_v6, %v679_v21  ;;  %v10711_v6 = vld [vmem:[#allocation30_spill] sm:$0xff] }
 0x157   :  { %v1757_v15 = vpop.permute.xlu1 %1756  ;;  %v1715_v26 = vpop.permute.xlu0 %1714  ;;  %v1069_v40 = vmul.f32 %v10711_v6, %v8437_v27  ;;  %v6064_v6 = vld [vmem:[%s10378_s0 + $0xf0] sm:$0x7f] }
 0x158   :  { %v1762_v35 = vadd.f32 %v1757_v15, %v1718_v28  ;;  %v1719_v51 = vadd.f32 %v1715_v26, %v1675_v33  ;;  %v743_v15 = vadd.f32 %v741_v16, %v723_v30  ;;  %v762_v26 = vmul.f32 %v10714_v1, %v8397_v53 }
 0x159   :  { %v1071_v22 = vadd.f32 %v1069_v40, %v1049_v37  ;;  %v1129_v28 = vmul.f32 %v10715_v52, %v8453_v25  ;;  %v869_v37 = vmul.f32 %v10717_v50, %v8413_v47  ;;  %v2149_v1 = vstv %s8460_s17  ;;  %v6068_v50 = vld [vmem:[%s10378_s0 + $0x31] sm:$0x7f]  ;;  %s8895_s17 = sld [smem:[#allocation8 + $0x36]] }
 0x15a   :  { %v1782_v4 = vadd.f32 %v1780_v48, %v1762_v35  ;;  %v8466_v48 = vstv %s5601_s10  ;;  %v763_v35 = vadd.f32 %v761_v23, %v743_v15  ;;  %v8498_v23 = vstv %s8468_s12  ;;  %v6065_v15 = vld [vmem:[%s10378_s0 + $0x1] sm:$0x7f]  ;;  %s8558_s12 = sld [smem:[#allocation8 + $0x13]] }
 0x15b   :  { %v1759_v60 = vpop.permute.xlu1 %1758  ;;  %v720_v19 = vpop.permute.xlu0 %719  ;;  %v1091_v57 = vadd.f32 %v1089_v9, %v1071_v22  ;;  %v1149_v20 = vmul.f32 %v6062_v18, %v8466_v48  ;;  %v1189_v40 = vmul.f32 %v6064_v6, %v8498_v23  ;;  %v889_v9 = vmul.f32 %v10718_v10, %v8421_v32  ;;  %v8548_v18 = vld [vmem:[#allocation2 + $0x31] sm:$0x7f]  ;;  %v6071_v10 = vld [vmem:[%s10378_s0 + $0x41] sm:$0x7f]  ;;  %s8948_s10 = sld [smem:[#allocation8 + $0x16]] }
 0x15c   :  { %v724_v29 = vadd.f32 %v720_v19, %v680_v58  ;;  %v1802_v17 = vadd.f32 %v1800_v36, %v1782_v4  ;;  %v1763_v61 = vadd.f32 %v1759_v60, %v1719_v51  ;;  %v2025_v4 = vstv %s8441_s2  ;;  %v6063_v36 = vld [vmem:[%s10378_s0 + $0xe0] sm:$0x7f]  ;;  %s9131_s2 = sld [smem:[#allocation8 + $0x46]] }
 0x15d   :  { %v1111_v19 = vadd.f32 %v1109_v45, %v1091_v57  ;;  %v1169_v12 = vmul.f32 %v6063_v36, %v8477_v24  ;;  %v2026_v8 = vmul.f32 %v2025_v4, %v8481_v14  ;;  %v8521_v22 = vstv %s8479_s3  ;;  %v8531_v57 = vld [vmem:[#allocation2 + $0x90] sm:$0x7f]  ;;  %s8997_s3 = sld [smem:[#allocation8 + $0x1a]] }
 0x15e   :  { %v744_v60 = vadd.f32 %v742_v63, %v724_v29  ;;  %v1783_v53 = vadd.f32 %v1781_v62, %v1763_v61  ;;  %v8500_v63 = vld [vmem:[#allocation2 + $0x38] sm:$0x7f]  ;;  %v8507_v29 = vstv %s8474_s25  ;;  %v8587_v6 = vstv %s8528_s21  ;;  %s8610_s21 = sld [smem:[#allocation6 + $0x2]] }
 0x15f   :  { %v1841_v54 = vpop.permute.xlu1 %1840  ;;  %v1131_v46 = vadd.f32 %v1129_v28, %v1111_v19  ;;  %v1209_v61 = vmul.f32 %v6065_v15, %v8507_v29  ;;  %v6066_v28 = vld [vmem:[%s10378_s0 + $0x11] sm:$0x7f]  ;;  %v2150_v19 = vmul.f32 %v2149_v1, %v8531_v57  ;;  %s8956_s25 = sld [smem:[#allocation8 + $0x3a]] }
 0x160   :  { %v802_v56 = vpop.permute.xlu0 %801  ;;  %v1846_v13 = vadd.f32 %v1841_v54, %v1802_v17  ;;  %v764_v16 = vadd.f32 %v762_v26, %v744_v60  ;;  %v870_v17 = vmul.f32 %v8280_v42, %v8413_v47  ;;  %v2027_v47 = vmul.f32 %v2025_v4, %v8500_v63 }
 0x161   :  { %v807_v21 = vadd.f32 %v802_v56, %v763_v35  ;;  %v1803_v56 = vadd.f32 %v1801_v44, %v1783_v53  ;;  %v1151_v59 = vadd.f32 %v1149_v20, %v1131_v46  ;;  %v1229_v60 = vmul.f32 %v6066_v28, %v8521_v22 }
 0x162   :  { %v890_v53 = vmul.f32 %v8302_v31, %v8421_v32  ;;  %v2273_v20 = vstv %s8495_s1  ;;  %v8561_v4 = vstv %s8509_s23  ;;  %s8597_s23 = sld [smem:[#allocation8 + $0x2]] }
 0x163   :  { %v846_v49 = vpop.permute.xlu1 %845  ;;  %s9068_s1 = sld [smem:[#allocation8]] }
 0x164   :  { %v804_v41 = vpop.permute.xlu0 %803  ;;  %v851_v58 = vadd.f32 %v846_v49, %v807_v21  ;;  %v1171_v49 = vadd.f32 %v1169_v12, %v1151_v59  ;;  %v6070_v59 = vld [vmem:[%s10378_s0 + $0x98] sm:$0x7f] }
 0x165   :  { %v808_v62 = vadd.f32 %v804_v41, %v764_v16  ;;  %v2274_v16 = vmul.f32 %v2273_v20, %v8548_v18 }
 0x166   :  { %v871_v11 = vadd.f32 %v869_v37, %v851_v58  ;;  %v1191_v42 = vadd.f32 %v1189_v40, %v1171_v49  ;;  %v1269_v37 = vmul.f32 %v6068_v50, %v8561_v4  ;;  %v6069_v58 = vld [vmem:[%s10378_s0 + $0x88] sm:$0x7f]  ;;  %v8584_v49 = vld [vmem:[#allocation2 + $0x99] sm:$0x7f]  ;;  %v8590_v40 = vstv %s8540_s19  ;;  %s8623_s19 = sld [smem:[#allocation8 + $0x6]] }
 0x167   :  { %v1885_v2 = vpop.permute.xlu1 %1884 }
 0x168   :  { %v1890_v39 = vadd.f32 %v1885_v2, %v1846_v13  ;;  %v1843_v3 = vpop.permute.xlu0 %1842  ;;  %v1211_v52 = vadd.f32 %v1209_v61, %v1191_v42  ;;  %v891_v35 = vadd.f32 %v889_v9, %v871_v11  ;;  %v1289_v9 = vmul.f32 %v6071_v10, %v8587_v6 }
 0x169   :  { %v1847_v51 = vadd.f32 %v1843_v3, %v1803_v56  ;;  %v1050_v56 = vmul.f32 %v6069_v58, %v8427_v0  ;;  %v1983_v50 = vstv %s8597_s23  ;;  %v8662_v58 = vld [vmem:[#allocation2 + $0x91] sm:$0x7f]  ;;  %s8919_s23 = sld [smem:[#allocation8 + $0x62]] }
 0x16a   :  { %v1927_v38 = vadd.f32 %v8458_v55, %v1890_v39  ;;  %v8538_v39 = vstv %s8491_s29  ;;  %s5776_s29 = sld [smem:[#allocation8 + $0x3f]] }
 0x16b   :  { %v848_v54 = vpop.permute.xlu1 %847 }
 0x16c   :  { %v1929_v30 = vmax.f32 %v1927_v38, 0.0  ;;  %v1901_v33 = vpop.permute.xlu0 %1900  ;;  %v852_v45 = vadd.f32 %v848_v54, %v808_v62  ;;  %v6067_v38 = vld [vmem:[%s10378_s0 + $0x21] sm:$0x7f]  ;;  %v1231_v54 = vadd.f32 %v1229_v60, %v1211_v52  ;;  %v1070_v62 = vmul.f32 %v6070_v59, %v8437_v27  ;;  %v6073_v60 = vld [vmem:[%s10378_s0 + $0xa8] sm:$0x7f] }
 0x16d   :  { %1906 = vst.msk [vmem:[#allocation2 + $0x1] sm:$0x7f] %vm996_vm2, %v1901_v33  ;;  %v1249_v21 = vmul.f32 %v6067_v38, %v8538_v39  ;;  %v2521_v52 = vstv %s8558_s12  ;;  %v2107_v10 = vstv %s8623_s19  ;;  %s9114_s19 = sld [smem:[#allocation8 + $0x22]] }
 0x16e   :  { %1933 = vrot.lane.b32.xlu0 %v1929_v30, %s6248_s14  ;;  %v872_v44 = vadd.f32 %v870_v17, %v852_v45  ;;  %v2397_v30 = vstv %s8523_s27  ;;  %v1072_v28 = vadd.f32 %v1070_v62, %v1050_v56  ;;  %v8665_v56 = vstv %s8610_s21  ;;  %v6078_v62 = vld [vmem:[%s10378_s0 + $0xd8] sm:$0x7f]  ;;  %s8752_s21 = sld [smem:[#allocation8 + $0x32]] }
 0x16f   :  { %v1903_v34 = vpop.permute.xlu1 %1902  ;;  %v1251_v33 = vadd.f32 %v1249_v21, %v1231_v54  ;;  %v2399_v11 = vmul.f32 %v2397_v30, %v8584_v49  ;;  %v6075_v21 = vld [vmem:[%s10378_s0 + $0xb8] sm:$0x7f]  ;;  %v6076_v54 = vld [vmem:[%s10378_s0 + $0x71] sm:$0x7f]  ;;  %s9099_s27 = sld [smem:[#allocation8 + $0x4]] }
 0x170   :  { %1907 = vst.msk [vmem:[#allocation2 + $0x9] sm:$0x7f] %vm996_vm2, %v1903_v34  ;;  %v1887_v41 = vpop.permute.xlu0 %1886  ;;  %v892_v36 = vadd.f32 %v890_v53, %v872_v44  ;;  %v8621_v44 = vld [vmem:[#allocation2 + $0x98] sm:$0x7f]  ;;  %v6074_v53 = vld [vmem:[%s10378_s0 + $0x61] sm:$0x7f] }
 0x171   :  { %v1891_v13 = vadd.f32 %v1887_v41, %v1847_v51  ;;  %v1271_v41 = vadd.f32 %v1269_v37, %v1251_v33  ;;  %s9125_s12 = sld [smem:[#allocation8 + $0x6f]] }
 0x172   :  { %2030 = vrot.lane.b32.xlu0 %v2026_v8, %s6246_s15 }
 0x173   :  { %v1928_v26 = vadd.f32 %v8458_v55, %v1891_v13  ;;  %v932_v2 = vpop.permute.xlu1 %931  ;;  %v1291_v45 = vadd.f32 %v1289_v9, %v1271_v41  ;;  %v6072_v13 = vld [vmem:[%s10378_s0 + $0x51] sm:$0x7f] }
 0x174   :  { %v930_v5 = vpop.permute.xlu0 %929  ;;  %v936_v8 = vadd.f32 %v932_v2, %v892_v36  ;;  %v1309_v42 = vmul.f32 %v6072_v13, %v8590_v40  ;;  %v8614_v2 = vld [vmem:[#allocation2 + $0x48] sm:$0x7f] }
 0x175   :  { %v1930_v3 = vmax.f32 %v1928_v26, 0.0  ;;  %v935_v31 = vadd.f32 %v930_v5, %v891_v35  ;;  %v1090_v5 = vmul.f32 %v6073_v60, %v8445_v7 }
 0x176   :  { %2032 = vrot.lane.b32.xlu0 %v2027_v47, %s6246_s15  ;;  %v8608_v47 = vstv %s8555_s11  ;;  %s8636_s11 = sld [smem:[#allocation8 + $0xa]]  ;;  %v1311_v38 = vadd.f32 %v1309_v42, %v1291_v45  ;;  %v6080_v45 = vld [vmem:[%s10378_s0 + $0xf8] sm:$0x7f] }
 0x177   :  { %1935 = vrot.lane.b32.xlu1 %v1930_v3, %s6248_s14  ;;  %v990_v32 = vpop.permute.xlu1 %989  ;;  %v8626_v3 = vstv %s8564_s16  ;;  %v1329_v35 = vmul.f32 %v6074_v53, %v8608_v47  ;;  %s8646_s16 = sld [smem:[#allocation8 + $0x33]]  ;;  %v1092_v36 = vadd.f32 %v1090_v5, %v1072_v28  ;;  %v1190_v13 = vmul.f32 %v6080_v45, %v8498_v23  ;;  %v6083_v5 = vld [vmem:[%s10378_s0 + $0x20] sm:$0x7f] }
 0x178   :  { %v974_v46 = vpop.permute.xlu0 %973  ;;  %997 = vst.msk [vmem:[#allocation2 + $0x60] sm:$0x7f] %vm996_vm2, %v990_v32  ;;  %v2151_v32 = vmul.f32 %v2149_v1, %v8621_v44  ;;  %v8658_v1 = vld [vmem:[#allocation2] sm:$0x7f] }
 0x179   :  { %v979_v12 = vadd.f32 %v974_v46, %v935_v31  ;;  %v1110_v31 = vmul.f32 %v6075_v21, %v8449_v43  ;;  %v1349_v46 = vmul.f32 %v6076_v54, %v8626_v3  ;;  %v1331_v37 = vadd.f32 %v1329_v35, %v1311_v38  ;;  %v8714_v21 = vld [vmem:[#allocation2 + $0x1] sm:$0x7f] }
 0x17a   :  { %2154 = vrot.lane.b32.xlu0 %v2150_v19, %s6246_s15  ;;  %v2523_v19 = vmul.f32 %v2521_v52, %v8614_v2 }
 0x17b   :  { %v1018_v51 = vadd.f32 %v8458_v55, %v979_v12  ;;  %v992_v34 = vpop.permute.xlu1 %991  ;;  %v8652_v12 = vld [vmem:[#allocation2 + $0x39] sm:$0x7f]  ;;  %v1112_v59 = vadd.f32 %v1110_v31, %v1092_v36  ;;  %v6085_v36 = vld [vmem:[%s10378_s0 + $0x30] sm:$0x7f] }
 0x17c   :  { %v976_v17 = vpop.permute.xlu0 %975  ;;  %998 = vst.msk [vmem:[#allocation2 + $0x68] sm:$0x7f] %vm996_vm2, %v992_v34  ;;  %v1351_v34 = vadd.f32 %v1349_v46, %v1331_v37  ;;  %v6086_v37 = vld [vmem:[%s10378_s0 + $0x19] sm:$0x7f] }
 0x17d   :  { %v1020_v15 = vmax.f32 %v1018_v51, 0.0  ;;  %v980_v61 = vadd.f32 %v976_v17, %v936_v8  ;;  %v1150_v8 = vmul.f32 %v6078_v62, %v8466_v48  ;;  %v2275_v51 = vmul.f32 %v2273_v20, %v8652_v12 }
 0x17e   :  { %2278 = vrot.lane.b32.xlu0 %v2274_v16, %s6246_s15  ;;  %v6077_v16 = vld [vmem:[%s10378_s0 + $0xc8] sm:$0x7f]  ;;  %v1984_v17 = vmul.f32 %v1983_v50, %v8658_v1  ;;  %v2398_v20 = vmul.f32 %v2397_v30, %v8662_v58  ;;  %v6082_v30 = vld [vmem:[%s10378_s0 + $0x10] sm:$0x7f]  ;;  %v2039_v35 = vstv %s8646_s16  ;;  %s8724_s16 = sld [smem:[#allocation8 + $0x37]] }
 0x17f   :  { %v1019_v26 = vadd.f32 %v8458_v55, %v980_v61  ;;  %1024 = vrot.lane.b32.xlu1 %v1020_v15, %s6248_s14  ;;  %v1130_v33 = vmul.f32 %v6077_v16, %v8453_v25  ;;  %v8680_v41 = vld [vmem:[#allocation2 + $0x60] sm:$0x7f]  ;;  %v6079_v15 = vld [vmem:[%s10378_s0 + $0xe8] sm:$0x7f]  ;;  %v143_v60 = vmul.f32 %v6082_v30, %v8437_v27  ;;  %v185_v16 = vmul.f32 %v6085_v36, %v8449_v43 }
 0x180   :  { %v1170_v61 = vmul.f32 %v6079_v15, %v8477_v24  ;;  %v2108_v53 = vmul.f32 %v2107_v10, %v8680_v41  ;;  %v8742_v15 = vld [vmem:[#allocation2 + $0x61] sm:$0x7f] }
 0x181   :  { %v1021_v55 = vmax.f32 %v1019_v26, 0.0  ;;  %v1132_v9 = vadd.f32 %v1130_v33, %v1112_v59  ;;  %v6081_v26 = vld [vmem:[%s10378_s0] sm:$0x7f]  ;;  %v1230_v59 = vmul.f32 %v6086_v37, %v8521_v22 }
 0x182   :  { %2404 = vrot.lane.b32.xlu0 %v2399_v11, %s6246_s15  ;;  %v1373_v11 = vadd.f32 %v8665_v56, %v1351_v34  ;;  %v122_v28 = vmul.f32 %v6081_v26, %v8427_v0  ;;  %v2041_v34 = vmul.f32 %v2039_v35, %v8500_v63 }
 0x183   :  { %1026 = vrot.lane.b32.xlu1 %v1021_v55, %s6248_s14  ;;  %v1152_v42 = vadd.f32 %v1150_v8, %v1132_v9  ;;  %v164_v55 = vmul.f32 %v6083_v5, %v8445_v7  ;;  %v6087_v8 = vld [vmem:[%s10378_s0 + $0x40] sm:$0x7f]  ;;  %v2355_v9 = vstv %s8675_s18  ;;  %s5762_s14 = sld [smem:[#allocation8 + $0x6a]] }
 0x184   :  { %v1375_v38 = vmax.f32 %v1373_v11, 0.0  ;;  %v145_v46 = vadd.f32 %v143_v60, %v122_v28  ;;  %v6088_v11 = vld [vmem:[%s10378_s0 + $0x29] sm:$0x7f]  ;;  %v6090_v28 = vld [vmem:[%s10378_s0 + $0x39] sm:$0x7f]  ;;  %v2163_v37 = vstv %s8724_s16  ;;  %s9044_s16 = sld [smem:[#allocation8 + $0x6b]] }
 0x185   :  { %v1172_v31 = vadd.f32 %v1170_v61, %v1152_v42  ;;  %v1250_v45 = vmul.f32 %v6088_v11, %v8538_v39  ;;  %v1270_v30 = vmul.f32 %v6090_v28, %v8561_v4  ;;  %v6091_v5 = vld [vmem:[%s10378_s0 + $0x60] sm:$0x7f]  ;;  %s9093_s18 = sld [smem:[#allocation8 + $0x6e]] }
 0x186   :  { %2528 = vrot.lane.b32.xlu0 %v2523_v19, %s6246_s15  ;;  %v2231_v19 = vstv %s8636_s11  ;;  %1378 = vst.msk [vmem:[#allocation2 + $0x51] sm:$0x7f] %vm448_vm1, %v1375_v38  ;;  %v166_v62 = vadd.f32 %v164_v55, %v145_v46  ;;  %v248_v55 = vmul.f32 %v6091_v5, %v8477_v24  ;;  %v2356_v38 = vmul.f32 %v2355_v9, %v8742_v15  ;;  %v6092_v46 = vld [vmem:[%s10378_s0 + $0x49] sm:$0x7f]  ;;  %s8959_s11 = sld [smem:[#allocation8 + $0x17]] }
 0x187   :  { %2156 = vrot.lane.b32.xlu1 %v2151_v32, %s6246_s15  ;;  %v6084_v32 = vld [vmem:[%s10378_s0 + $0x9] sm:$0x7f]  ;;  %v1192_v33 = vadd.f32 %v1190_v13, %v1172_v31  ;;  %v8766_v31 = vld [vmem:[#allocation2 + $0x40] sm:$0x7f]  ;;  %v1290_v36 = vmul.f32 %v6092_v46, %v8587_v6 }
 0x188   :  { %v1210_v54 = vmul.f32 %v6084_v32, %v8507_v29  ;;  %v187_v13 = vadd.f32 %v185_v16, %v166_v62  ;;  %v8768_v32 = vld [vmem:[#allocation2 + $0x69] sm:$0x7f] }
 0x18a   :  { %1988 = vrot.lane.b32.xlu0 %v1984_v17, %s6246_s15  ;;  %v2232_v17 = vmul.f32 %v2231_v19, %v8714_v21  ;;  %v1212_v61 = vadd.f32 %v1210_v54, %v1192_v33  ;;  %v6093_v33 = vld [vmem:[%s10378_s0 + $0x70] sm:$0x7f] }
 0x18b   :  { %2280 = vrot.lane.b32.xlu1 %v2275_v51, %s6246_s15  ;;  %v206_v51 = vmul.f32 %v6087_v8, %v8453_v25  ;;  %v6095_v8 = vld [vmem:[%s10378_s0 + $0x8] sm:$0x7f] }
 0x18c   :  { %v1232_v26 = vadd.f32 %v1230_v59, %v1212_v61  ;;  %v6094_v59 = vld [vmem:[%s10378_s0 + $0x59] sm:$0x7f] }
 0x18d   :  { %v208_v60 = vadd.f32 %v206_v51, %v187_v13  ;;  %v1310_v62 = vmul.f32 %v6094_v59, %v8590_v40  ;;  %v123_v51 = vmul.f32 %v6095_v8, %v8427_v0  ;;  %v6098_v0 = vld [vmem:[%s10378_s0 + $0x28] sm:$0x7f]  ;;  %v2165_v8 = vmul.f32 %v2163_v37, %v8621_v44 }
 0x18e   :  { %2112 = vrot.lane.b32.xlu0 %v2108_v53, %s6246_s15  ;;  %v2040_v53 = vmul.f32 %v2039_v35, %v8481_v14  ;;  %v1252_v54 = vadd.f32 %v1250_v45, %v1232_v26  ;;  %v269_v35 = vmul.f32 %v6093_v33, %v8498_v23  ;;  %v6097_v45 = vld [vmem:[%s10378_s0 + $0x80] sm:$0x7f]  ;;  %v6099_v26 = vld [vmem:[%s10378_s0 + $0x69] sm:$0x7f] }
 0x18f   :  { %2402 = vrot.lane.b32.xlu1 %v2398_v20, %s6246_s15  ;;  %v6089_v20 = vld [vmem:[%s10378_s0 + $0x50] sm:$0x7f]  ;;  %v290_v13 = vmul.f32 %v6097_v45, %v8507_v29  ;;  %v1330_v28 = vmul.f32 %v6099_v26, %v8608_v47  ;;  %v6103_v33 = vld [vmem:[%s10378_s0 + $0xa0] sm:$0x7f]  ;;  %v6108_v26 = vld [vmem:[%s10378_s0 + $0x68] sm:$0x7f] }
 0x190   :  { %v227_v42 = vmul.f32 %v6089_v20, %v8466_v48  ;;  %v1272_v61 = vadd.f32 %v1270_v30, %v1252_v54  ;;  %v165_v20 = vmul.f32 %v6098_v0, %v8445_v7  ;;  %v6100_v7 = vld [vmem:[%s10378_s0 + $0x90] sm:$0x7f] }
 0x192   :  { %2236 = vrot.lane.b32.xlu0 %v2232_v17, %s6246_s15  ;;  %v229_v16 = vadd.f32 %v227_v42, %v208_v60  ;;  %v2357_v42 = vmul.f32 %v2355_v9, %v8768_v32  ;;  %v1292_v60 = vadd.f32 %v1290_v36, %v1272_v61  ;;  %v6105_v61 = vld [vmem:[%s10378_s0 + $0xb0] sm:$0x7f] }
 0x193   :  { %2046 = vrot.lane.b32.xlu1 %v2041_v34, %s6246_s15  ;;  %v6096_v34 = vld [vmem:[%s10378_s0 + $0x18] sm:$0x7f] }
 0x194   :  { %v144_v17 = vmul.f32 %v6096_v34, %v8437_v27  ;;  %v250_v11 = vadd.f32 %v248_v55, %v229_v16  ;;  %v2522_v27 = vmul.f32 %v2521_v52, %v8766_v31  ;;  %v311_v55 = vmul.f32 %v6100_v7, %v8521_v22  ;;  %v6101_v52 = vld [vmem:[%s10378_s0 + $0x38] sm:$0x7f] }
 0x195   :  { %v186_v9 = vmul.f32 %v6101_v52, %v8449_v43  ;;  %v1312_v36 = vadd.f32 %v1310_v62, %v1292_v60  ;;  %v6104_v43 = vld [vmem:[%s10378_s0 + $0x48] sm:$0x7f]  ;;  %v6109_v52 = vld [vmem:[%s10378_s0 + $0xd0] sm:$0x7f] }
 0x196   :  { %2360 = vrot.lane.b32.xlu0 %v2356_v38, %s6246_s15  ;;  %v146_v30 = vadd.f32 %v144_v17, %v123_v51  ;;  %v271_v5 = vadd.f32 %v269_v35, %v250_v11  ;;  %v6102_v38 = vld [vmem:[%s10378_s0 + $0x79] sm:$0x7f]  ;;  %v332_v35 = vmul.f32 %v6103_v33, %v8538_v39  ;;  %v207_v59 = vmul.f32 %v6104_v43, %v8453_v25  ;;  %v6112_v33 = vld [vmem:[%s10378_s0 + $0x88] sm:$0x7f] }
 0x197   :  { %2044 = vrot.lane.b32.xlu1 %v2040_v53, %s6246_s15  ;;  %v1997_v53 = vstv %s8752_s21  ;;  %v1350_v54 = vmul.f32 %v6102_v38, %v8626_v3  ;;  %v1332_v34 = vadd.f32 %v1330_v28, %v1312_v36  ;;  %v353_v11 = vmul.f32 %v6105_v61, %v8561_v4  ;;  %v6106_v25 = vld [vmem:[%s10378_s0 + $0x58] sm:$0x7f]  ;;  %v6111_v36 = vld [vmem:[%s10378_s0 + $0xe0] sm:$0x7f]  ;;  %s5750_s21 = sld [smem:[#allocation8 + $0x66]] }
 0x198   :  { %v167_v46 = vadd.f32 %v165_v20, %v146_v30  ;;  %v292_v16 = vadd.f32 %v290_v13, %v271_v5  ;;  %v1998_v62 = vmul.f32 %v1997_v53, %v8658_v1  ;;  %v228_v13 = vmul.f32 %v6106_v25, %v8466_v48  ;;  %v6115_v25 = vld [vmem:[%s10378_s0 + $0xa8] sm:$0x7f] }
 0x199   :  { %v1352_v0 = vadd.f32 %v1350_v54, %v1332_v34  ;;  %v249_v28 = vmul.f32 %v6108_v26, %v8477_v24  ;;  %v2164_v48 = vmul.f32 %v2163_v37, %v8531_v57  ;;  %v2053_v5 = vstv %s8809_s20  ;;  %v6110_v37 = vld [vmem:[%s10378_s0 + $0x78] sm:$0x7f]  ;;  %s5773_s20 = sld [smem:[#allocation8 + $0x3e]] }
 0x19a   :  { %2362 = vrot.lane.b32.xlu0 %v2357_v42, %s6246_s15  ;;  %v188_v51 = vadd.f32 %v186_v9, %v167_v46  ;;  %v313_v17 = vadd.f32 %v311_v55, %v292_v16  ;;  %v395_v9 = vmul.f32 %v6109_v52, %v8590_v40  ;;  %v270_v38 = vmul.f32 %v6110_v37, %v8498_v23 }
 0x19b   :  { %2526 = vrot.lane.b32.xlu1 %v2522_v27, %s6246_s15  ;;  %v6107_v27 = vld [vmem:[%s10378_s0 + $0xc0] sm:$0x7f]  ;;  %v1374_v7 = vadd.f32 %v8665_v56, %v1352_v0  ;;  %v416_v16 = vmul.f32 %v6111_v36, %v8608_v47  ;;  %v2055_v23 = vmul.f32 %v2053_v5, %v8500_v63  ;;  %v2479_v61 = vstv %s8847_s22  ;;  %s9054_s22 = sld [smem:[#allocation8 + $0x1f]] }
 0x19c   :  { %v209_v45 = vadd.f32 %v207_v59, %v188_v51  ;;  %v334_v20 = vadd.f32 %v332_v35, %v313_v17  ;;  %v374_v42 = vmul.f32 %v6107_v27, %v8587_v6  ;;  %v291_v35 = vmul.f32 %v6112_v33, %v8507_v29  ;;  %v6113_v51 = vld [vmem:[%s10378_s0 + $0xf0] sm:$0x7f]  ;;  %v6114_v29 = vld [vmem:[%s10378_s0 + $0x98] sm:$0x7f]  ;;  %v8892_v17 = vld [vmem:[#allocation2 + $0x8] sm:$0x7f] }
 0x19d   :  { %v1376_v54 = vmax.f32 %v1374_v7, 0.0  ;;  %v312_v34 = vmul.f32 %v6114_v29, %v8521_v22  ;;  %v6117_v7 = vld [vmem:[%s10378_s0 + $0xc8] sm:$0x7f]  ;;  %v6120_v33 = vld [vmem:[%s10378_s0 + $0xf8] sm:$0x7f] }
 0x19e   :  { %2002 = vrot.lane.b32.xlu0 %v1998_v62, %s6246_s15  ;;  %v230_v30 = vadd.f32 %v228_v13, %v209_v45  ;;  %v355_v55 = vadd.f32 %v353_v11, %v334_v20  ;;  %v437_v62 = vmul.f32 %v6113_v51, %v8626_v3  ;;  %v333_v13 = vmul.f32 %v6115_v25, %v8538_v39  ;;  %v6116_v39 = vld [vmem:[%s10378_s0 + $0xb8] sm:$0x7f] }
 0x19f   :  { %2170 = vrot.lane.b32.xlu1 %v2165_v8, %s6246_s15  ;;  %1379 = vst.msk [vmem:[#allocation2 + $0x59] sm:$0x7f] %vm448_vm1, %v1376_v54  ;;  %v1985_v20 = vmul.f32 %v1983_v50, %v8892_v17  ;;  %v6119_v54 = vld [vmem:[%s10378_s0 + $0xe8] sm:$0x7f] }
 0x1a0   :  { %v1917_v60 = vpop.permute.xlu0 %1916  ;;  %v251_v24 = vadd.f32 %v249_v28, %v230_v30  ;;  %v376_v46 = vadd.f32 %v374_v42, %v355_v55  ;;  %v8908_v42 = vld [vmem:[#allocation2 + $0x68] sm:$0x7f]  ;;  %v375_v55 = vmul.f32 %v6117_v7, %v8587_v6 }
 0x1a1   :  { %1923 = vst.msk [vmem:[#allocation2 + $0x11] sm:$0x7f] %vm996_vm2, %v1917_v60  ;;  %v2109_v52 = vmul.f32 %v2107_v10, %v8908_v42 }
 0x1a2   :  { %v272_v43 = vadd.f32 %v270_v38, %v251_v24  ;;  %v397_v8 = vadd.f32 %v395_v9, %v376_v46  ;;  %v8930_v9 = vld [vmem:[#allocation2 + $0x9] sm:$0x7f]  ;;  %v2121_v24 = vstv %s8895_s17  ;;  %v6118_v38 = vld [vmem:[%s10378_s0 + $0xd8] sm:$0x7f]  ;;  %v417_v46 = vmul.f32 %v6119_v54, %v8608_v47  ;;  %s5764_s0 = sld [smem:[#allocation8 + $0x3b]] }
 0x1a3   :  { %2168 = vrot.lane.b32.xlu1 %v2164_v48, %s6246_s15  ;;  %v354_v48 = vmul.f32 %v6116_v39, %v8561_v4  ;;  %v396_v6 = vmul.f32 %v6118_v38, %v8590_v40  ;;  %v2233_v36 = vmul.f32 %v2231_v19, %v8930_v9  ;;  %v2011_v47 = vstv %s8919_s23  ;;  %s9038_s17 = sld [smem:[#allocation8 + $0x1e]] }
 0x1a4   :  { %v1919_v59 = vpop.permute.xlu1 %1918  ;;  %v293_v63 = vadd.f32 %v291_v35, %v272_v43  ;;  %v418_v11 = vadd.f32 %v416_v16, %v397_v8  ;;  %v2122_v16 = vmul.f32 %v2121_v24, %v8680_v41  ;;  %v438_v35 = vmul.f32 %v6120_v33, %v8626_v3  ;;  %s9073_s23 = sld [smem:[#allocation8 + $0x1]] }
 0x1a5   :  { %1924 = vst.msk [vmem:[#allocation2 + $0x19] sm:$0x7f] %vm996_vm2, %v1919_v59  ;;  %v1999_v43 = vmul.f32 %v1997_v53, %v8892_v17  ;;  %v2013_v59 = vmul.f32 %v2011_v47, %v8892_v17  ;;  %v2123_v51 = vmul.f32 %v2121_v24, %v8908_v42  ;;  %v2369_v38 = vstv %s5773_s20  ;;  %s9199_s20 = sld [smem:[#allocation8 + $0x34]] }
 0x1a6   :  { %v314_v45 = vadd.f32 %v312_v34, %v293_v63  ;;  %v439_v22 = vadd.f32 %v437_v62, %v418_v11  ;;  %v2012_v62 = vmul.f32 %v2011_v47, %v8658_v1  ;;  %v2603_v34 = vstv %s8948_s10  ;;  %s9129_s10 = sld [smem:[#allocation8 + $0x8]] }
 0x1a7   :  { %2060 = vrot.lane.b32.xlu1 %v2055_v23, %s6246_s15  ;;  %v2245_v63 = vstv %s8956_s25  ;;  %v2645_v11 = vstv %s8959_s11  ;;  %v2371_v54 = vmul.f32 %v2369_v38, %v8768_v32  ;;  %v2411_v33 = vstv %s5776_s29  ;;  %s9141_s25 = sld [smem:[#allocation8 + $0x23]] }
 0x1a8   :  { %v8902_v0 = vld [vmem:[#allocation2 + $0x10] sm:$0x7f]  ;;  %v462_v26 = vadd.f32 %v8665_v56, %v439_v22  ;;  %v335_v28 = vadd.f32 %v333_v13, %v314_v45  ;;  %v2247_v45 = vmul.f32 %v2245_v63, %v8930_v9  ;;  %v2370_v47 = vmul.f32 %v2369_v38, %v8742_v15  ;;  %v9104_v38 = vld [vmem:[#allocation2 + $0xa9] sm:$0x7f]  ;;  %s9149_s11 = sld [smem:[#allocation8 + $0x30]] }
 0x1a9   :  { %v2480_v27 = vmul.f32 %v2479_v61, %v8902_v0  ;;  %v9011_v7 = vld [vmem:[#allocation2 + $0x11] sm:$0x7f]  ;;  %s9215_s29 = sld [smem:[#allocation8 + $0x10]] }
 0x1aa   :  { %v464_v60 = vmax.f32 %v462_v26, 0.0  ;;  %v356_v37 = vadd.f32 %v354_v48, %v335_v28  ;;  %v8994_v26 = vld [vmem:[#allocation2 + $0xa8] sm:$0x7f]  ;;  %v2246_v28 = vmul.f32 %v2245_v63, %v8714_v21  ;;  %v2301_v63 = vstv %s9044_s16  ;;  %s9241_s16 = sld [smem:[#allocation8 + $0x73]] }
 0x1ab   :  { %1990 = vrot.lane.b32.xlu1 %v1985_v20, %s6246_s15  ;;  %2484 = vrot.lane.b32.xlu0 %v2480_v27, %s6246_s15  ;;  %v2054_v20 = vmul.f32 %v2053_v5, %v8481_v14  ;;  %v2287_v27 = vstv %s5764_s0  ;;  %v2647_v48 = vmul.f32 %v2645_v11, %v8994_v26  ;;  %s9160_s0 = sld [smem:[#allocation8 + $0x31]] }
 0x1ac   :  { %v1008_v50 = vpop.permute.xlu0 %1007  ;;  %v8917_v30 = vld [vmem:[#allocation2 + $0x18] sm:$0x7f]  ;;  %467 = vst.msk [vmem:[#allocation2 + $0xb0] sm:$0x7f] %vm448_vm1, %v464_v60  ;;  %v377_v10 = vadd.f32 %v375_v55, %v356_v37  ;;  %v2289_v39 = vmul.f32 %v2287_v27, %v8652_v12  ;;  %v2288_v5 = vmul.f32 %v2287_v27, %v8548_v18  ;;  %v2727_v55 = vstv %s8997_s3  ;;  %v9078_v27 = vld [vmem:[#allocation2 + $0xa1] sm:$0x7f] }
 0x1ad   :  { %1014 = vst.msk [vmem:[#allocation2 + $0x70] sm:$0x7f] %vm996_vm2, %v1008_v50  ;;  %v2481_v4 = vmul.f32 %v2479_v61, %v8917_v30  ;;  %v8977_v61 = vld [vmem:[#allocation2 + $0xa0] sm:$0x7f]  ;;  %v2135_v50 = vstv %s5750_s21  ;;  %s9167_s21 = sld [smem:[#allocation8 + $0xc]] }
 0x1ae   :  { %v398_v40 = vadd.f32 %v396_v6, %v377_v10  ;;  %v2646_v13 = vmul.f32 %v2645_v11, %v8977_v61  ;;  %v2137_v60 = vmul.f32 %v2135_v50, %v8908_v42  ;;  %v2136_v24 = vmul.f32 %v2135_v50, %v8680_v41  ;;  %v9022_v6 = vld [vmem:[#allocation2 + $0x41] sm:$0x7f]  ;;  %s9173_s3 = sld [smem:[#allocation8 + $0xd]] }
 0x1af   :  { %2114 = vrot.lane.b32.xlu1 %v2109_v52, %s6246_s15  ;;  %2486 = vrot.lane.b32.xlu0 %v2481_v4, %s6246_s15  ;;  %v2177_v52 = vstv %s9003_s13  ;;  %v2728_v4 = vmul.f32 %v2727_v55, %v9011_v7  ;;  %v2769_v10 = vstv %s9008_s4  ;;  %s9180_s13 = sld [smem:[#allocation8 + $0x47]] }
 0x1b0   :  { %v419_v19 = vadd.f32 %v417_v46, %v398_v40  ;;  %v2179_v37 = vmul.f32 %v2177_v52, %v8621_v44  ;;  %v9026_v46 = vld [vmem:[#allocation2 + $0x19] sm:$0x7f]  ;;  %v2178_v40 = vmul.f32 %v2177_v52, %v8531_v57  ;;  %v2302_v52 = vmul.f32 %v2301_v63, %v8548_v18  ;;  %s9208_s4 = sld [smem:[#allocation8 + $0x72]] }
 0x1b2   :  { %v440_v3 = vadd.f32 %v438_v35, %v419_v19  ;;  %v9035_v35 = vld [vmem:[#allocation2 + $0x49] sm:$0x7f]  ;;  %v2413_v19 = vmul.f32 %v2411_v33, %v8584_v49 }
 0x1b3   :  { %2238 = vrot.lane.b32.xlu1 %v2233_v36, %s6246_s15  ;;  %2126 = vrot.lane.b32.xlu0 %v2122_v16, %s6246_s15  ;;  %v2770_v36 = vmul.f32 %v2769_v10, %v9022_v6  ;;  %v2729_v16 = vmul.f32 %v2727_v55, %v9026_v46 }
 0x1b4   :  { %v463_v8 = vadd.f32 %v8665_v56, %v440_v3  ;;  %v8971_v29 = vld [vmem:[#allocation2 + $0x70] sm:$0x7f] }
 0x1b5   :  { %v1010_v23 = vpop.permute.xlu1 %1009  ;;  %v2604_v56 = vmul.f32 %v2603_v34, %v8971_v29 }
 0x1b6   :  { %1015 = vst.msk [vmem:[#allocation2 + $0x78] sm:$0x7f] %vm996_vm2, %v1010_v23  ;;  %v465_v53 = vmax.f32 %v463_v8, 0.0  ;;  %v2771_v23 = vmul.f32 %v2769_v10, %v9035_v35  ;;  %v2259_v8 = vstv %s5762_s14  ;;  %v1945_v10 = vstv %s9068_s1  ;;  %s9222_s14 = sld [smem:[#allocation8 + $0x11]] }
 0x1b7   :  { %2004 = vrot.lane.b32.xlu1 %v1999_v43, %s6246_s15  ;;  %2018 = vrot.lane.b32.xlu0 %v2013_v59, %s6246_s15  ;;  %v2412_v59 = vmul.f32 %v2411_v33, %v8662_v58  ;;  %s9300_s1 = sld [smem:[#allocation8 + $0x4b]] }
 0x1b8   :  { %468 = vst.msk [vmem:[#allocation2 + $0xb8] sm:$0x7f] %vm448_vm1, %v465_v53 }
 0x1bb   :  { %2128 = vrot.lane.b32.xlu1 %v2123_v51, %s6246_s15  ;;  %2016 = vrot.lane.b32.xlu0 %v2012_v62, %s6246_s15  ;;  %v2261_v51 = vmul.f32 %v2259_v8, %v8930_v9  ;;  %v9057_v62 = vld [vmem:[#allocation2 + $0x71] sm:$0x7f] }
 0x1bd   :  { %v8983_v25 = vld [vmem:[#allocation2 + $0x78] sm:$0x7f] }
 0x1be   :  { %v2605_v22 = vmul.f32 %v2603_v34, %v8983_v25  ;;  %v2851_v34 = vstv %s9038_s17  ;;  %s9233_s17 = sld [smem:[#allocation8 + $0x26]] }
 0x1bf   :  { %2608 = vrot.lane.b32.xlu1 %v2604_v56, %s6246_s15  ;;  %2252 = vrot.lane.b32.xlu0 %v2247_v45, %s6246_s15  ;;  %v2852_v56 = vmul.f32 %v2851_v34, %v9057_v62  ;;  %v2260_v45 = vmul.f32 %v2259_v8, %v8714_v21 }
 0x1c3   :  { %2610 = vrot.lane.b32.xlu1 %v2605_v22, %s6246_s15  ;;  %2650 = vrot.lane.b32.xlu0 %v2646_v13, %s6246_s15  ;;  %v2303_v13 = vmul.f32 %v2301_v63, %v8652_v12  ;;  %v2089_v63 = vstv %s9107_s30  ;;  %s9336_s30 = sld [smem:[#allocation8 + $0x76]] }
 0x1c7   :  { %2058 = vrot.lane.b32.xlu1 %v2054_v20, %s6246_s15  ;;  %2250 = vrot.lane.b32.xlu0 %v2246_v28, %s6246_s15  ;;  %v2493_v20 = vstv %s9050_s24  ;;  %v2893_v28 = vstv %s9054_s22  ;;  %s9245_s24 = sld [smem:[#allocation8 + $0x4a]] }
 0x1c8   :  { %v2895_v33 = vmul.f32 %v2893_v28, %v9104_v38  ;;  %s9253_s22 = sld [smem:[#allocation8 + $0x14]] }
 0x1cb   :  { %2294 = vrot.lane.b32.xlu1 %v2289_v39, %s6246_s15  ;;  %2652 = vrot.lane.b32.xlu0 %v2647_v48, %s6246_s15  ;;  %v2495_v39 = vmul.f32 %v2493_v20, %v8917_v30  ;;  %v9084_v48 = vld [vmem:[#allocation2 + $0x79] sm:$0x7f] }
 0x1cc   :  { %v2853_v55 = vmul.f32 %v2851_v34, %v9084_v48  ;;  %v2069_v34 = vstv %s9099_s27  ;;  %s9328_s27 = sld [smem:[#allocation8 + $0x64]] }
 0x1cf   :  { %2292 = vrot.lane.b32.xlu1 %v2288_v5, %s6246_s15  ;;  %2142 = vrot.lane.b32.xlu0 %v2137_v60, %s6246_s15  ;;  %v2894_v5 = vmul.f32 %v2893_v28, %v9078_v27 }
 0x1d3   :  { %2732 = vrot.lane.b32.xlu1 %v2728_v4, %s6246_s15  ;;  %2140 = vrot.lane.b32.xlu0 %v2136_v24, %s6246_s15  ;;  %v1965_v4 = vstv %s9073_s23  ;;  %s9305_s23 = sld [smem:[#allocation8 + $0x38]] }
 0x1d7   :  { %2184 = vrot.lane.b32.xlu1 %v2179_v37, %s6246_s15  ;;  %2376 = vrot.lane.b32.xlu0 %v2371_v54, %s6246_s15  ;;  %v2535_v37 = vstv %s9081_s26  ;;  %s9258_s26 = sld [smem:[#allocation8 + $0x27]] }
 0x1db   :  { %2734 = vrot.lane.b32.xlu1 %v2729_v16, %s6246_s15  ;;  %2774 = vrot.lane.b32.xlu0 %v2770_v36, %s6246_s15  ;;  %v2494_v36 = vmul.f32 %v2493_v20, %v8902_v0  ;;  %v1966_v16 = vmul.f32 %v1965_v4, %v8481_v14  ;;  %v2975_v20 = vstv %s9114_s19  ;;  %s9289_s19 = sld [smem:[#allocation8 + $0x60]] }
 0x1df   :  { %2182 = vrot.lane.b32.xlu1 %v2178_v40, %s6246_s15  ;;  %2374 = vrot.lane.b32.xlu0 %v2370_v47, %s6246_s15  ;;  %v2537_v40 = vmul.f32 %v2535_v37, %v8614_v2  ;;  %v1946_v47 = vmul.f32 %v1945_v10, %v8658_v1 }
 0x1e0   :  { %v1934_v43 = vpop.permute.xlu0 %1933 }
 0x1e1   :  { %1940 = vst.msk [vmem:[#allocation2 + $0x21] sm:$0x7f] %vm996_vm2, %v1934_v43  ;;  %v1968_v43 = vadd.f32 %v1966_v16, %v1946_v47  ;;  %v2617_v47 = vstv %s9131_s2  ;;  %s9352_s2 = sld [smem:[#allocation8 + $0x15]] }
 0x1e3   :  { %2418 = vrot.lane.b32.xlu1 %v2413_v19, %s6246_s15  ;;  %2776 = vrot.lane.b32.xlu0 %v2771_v23, %s6246_s15 }
 0x1e4   :  { %v9052_v3 = vpop.permute.xlu0 %2030 }
 0x1e7   :  { %2416 = vrot.lane.b32.xlu1 %v2412_v59, %s6246_s15  ;;  %2266 = vrot.lane.b32.xlu0 %v2261_v51, %s6246_s15  ;;  %v2536_v59 = vmul.f32 %v2535_v37, %v8766_v31  ;;  %v2383_v51 = vstv %s9093_s18  ;;  %s9263_s18 = sld [smem:[#allocation8 + $0x35]] }
 0x1e8   :  { %v9062_v53 = vpop.permute.xlu0 %2032 }
 0x1e9   :  { %v1936_v11 = vpop.permute.xlu1 %1935 }
 0x1ea   :  { %1941 = vst.msk [vmem:[#allocation2 + $0x29] sm:$0x7f] %vm996_vm2, %v1936_v11 }
 0x1eb   :  { %2856 = vrot.lane.b32.xlu1 %v2852_v56, %s6246_s15  ;;  %2264 = vrot.lane.b32.xlu0 %v2260_v45, %s6246_s15  ;;  %v2385_v45 = vmul.f32 %v2383_v51, %v8768_v32 }
 0x1ec   :  { %v9075_v22 = vpop.permute.xlu0 %2154 }
 0x1ef   :  { %2308 = vrot.lane.b32.xlu1 %v2303_v13, %s6246_s15  ;;  %2500 = vrot.lane.b32.xlu0 %v2495_v39, %s6246_s15  ;;  %v9146_v13 = vld [vmem:[#allocation2 + $0x20] sm:$0x7f]  ;;  %v2070_v39 = vmul.f32 %v2069_v34, %v8680_v41 }
 0x1f0   :  { %v9089_v50 = vpop.permute.xlu0 %2278  ;;  %v2976_v37 = vmul.f32 %v2975_v20, %v9146_v13 }
 0x1f1   :  { %v1025_v60 = vpop.permute.xlu1 %1024 }
 0x1f2   :  { %1031 = vst.msk [vmem:[#allocation2 + $0x80] sm:$0x7f] %vm996_vm2, %v1025_v60 }
 0x1f3   :  { %2858 = vrot.lane.b32.xlu1 %v2853_v55, %s6246_s15  ;;  %2898 = vrot.lane.b32.xlu0 %v2894_v5, %s6246_s15  ;;  %v2090_v5 = vmul.f32 %v2089_v63, %v8531_v57  ;;  %v2425_v55 = vstv %s9125_s12  ;;  %v10480_v57 = vstv %s9129_s10  ;;  %s9291_s12 = sld [smem:[#allocation8 + $0x61]] }
 0x1f4   :  { %v9101_v24 = vpop.permute.xlu0 %2404  ;;  %v2427_v16 = vmul.f32 %v2425_v55, %v8584_v49  ;;  %v2194_v49 = vmul.f32 %v10480_v57, %v8714_v21 }
 0x1f5   :  { %v1027_v54 = vpop.permute.xlu1 %1026 }
 0x1f6   :  { %1032 = vst.msk [vmem:[#allocation2 + $0x88] sm:$0x7f] %vm996_vm2, %v1027_v54  ;;  %v2384_v54 = vmul.f32 %v2383_v51, %v8742_v15 }
 0x1f7   :  { %2306 = vrot.lane.b32.xlu1 %v2302_v52, %s6246_s15  ;;  %2498 = vrot.lane.b32.xlu0 %v2494_v36, %s6246_s15 }
 0x1f8   :  { %v9123_v19 = vpop.permute.xlu0 %2528 }
 0x1f9   :  { %v9127_v23 = vpop.permute.xlu1 %2156 }
 0x1fb   :  { %2542 = vrot.lane.b32.xlu1 %v2537_v40, %s6246_s15  ;;  %2900 = vrot.lane.b32.xlu0 %v2895_v33, %s6246_s15  ;;  %v10481_v40 = vstv %s9136_s28 }
 0x1fc   :  { %v1989_v8 = vpop.permute.xlu0 %1988 }
 0x1fd   :  { %v9143_v11 = vpop.permute.xlu1 %2280  ;;  %v1994_v56 = vadd.f32 %v1989_v8, %v1968_v43  ;;  %v9177_v43 = vld [vmem:[#allocation2 + $0x50] sm:$0x7f] }
 0x1ff   :  { %v2036_v28 = vadd.f32 %v9052_v3, %v1994_v56  ;;  %2540 = vrot.lane.b32.xlu1 %v2536_v59, %s6246_s15  ;;  %2390 = vrot.lane.b32.xlu0 %v2385_v45, %s6246_s15  ;;  %v3017_v59 = vstv %s9141_s25  ;;  %v2619_v56 = vmul.f32 %v2617_v47, %v8983_v25  ;;  %v9188_v45 = vld [vmem:[#allocation2 + $0x28] sm:$0x7f]  ;;  %s9360_s25 = sld [smem:[#allocation8 + $0x2a]] }
 0x200   :  { %v2113_v60 = vpop.permute.xlu0 %2112  ;;  %v2977_v57 = vmul.f32 %v2975_v20, %v9188_v45 }
 0x201   :  { %v9163_v52 = vpop.permute.xlu1 %2402  ;;  %v2072_v3 = vadd.f32 %v2070_v39, %v2036_v28  ;;  %v1951_v28 = vstv %s9149_s11  ;;  %s9380_s11 = sld [smem:[#allocation8 + $0x18]] }
 0x203   :  { %v2092_v36 = vadd.f32 %v2090_v5, %v2072_v3  ;;  %2980 = vrot.lane.b32.xlu1 %v2976_v37, %s6246_s15  ;;  %2388 = vrot.lane.b32.xlu0 %v2384_v54, %s6246_s15  ;;  %v2214_v5 = vmul.f32 %v10481_v40, %v8548_v18  ;;  %v1971_v3 = vstv %s9160_s0  ;;  %v1952_v18 = vmul.f32 %v1951_v28, %v8658_v1  ;;  %v9220_v1 = vld [vmem:[#allocation2 + $0x58] sm:$0x7f]  ;;  %s9394_s0 = sld [smem:[#allocation8 + $0x4e]] }
 0x204   :  { %v2237_v33 = vpop.permute.xlu0 %2236 }
 0x205   :  { %v2118_v8 = vadd.f32 %v2113_v60, %v2092_v36  ;;  %v9182_v51 = vpop.permute.xlu1 %2046  ;;  %v3018_v60 = vmul.f32 %v3017_v59, %v9177_v43 }
 0x207   :  { %v2160_v39 = vadd.f32 %v9075_v22, %v2118_v8  ;;  %2432 = vrot.lane.b32.xlu1 %v2427_v16, %s6246_s15  ;;  %2624 = vrot.lane.b32.xlu0 %v2619_v56, %s6246_s15  ;;  %v1972_v22 = vmul.f32 %v1971_v3, %v8481_v14  ;;  %v10486_v8 = vstv %s9167_s21  ;;  %v10484_v56 = vstv %s9173_s3 }
 0x208   :  { %v2361_v37 = vpop.permute.xlu0 %2360  ;;  %v2659_v14 = vstv %s9180_s13  ;;  %s9406_s13 = sld [smem:[#allocation8 + $0x2b]] }
 0x209   :  { %v2196_v54 = vadd.f32 %v2194_v49, %v2160_v39  ;;  %v2045_v36 = vpop.permute.xlu1 %2044  ;;  %v2426_v49 = vmul.f32 %v2425_v55, %v8662_v58  ;;  %v2338_v55 = vmul.f32 %v10484_v56, %v8662_v58 }
 0x20b   :  { %v2216_v16 = vadd.f32 %v2214_v5, %v2196_v54  ;;  %2982 = vrot.lane.b32.xlu1 %v2977_v57, %s6246_s15  ;;  %3022 = vrot.lane.b32.xlu0 %v3018_v60, %s6246_s15  ;;  %v2618_v54 = vmul.f32 %v2617_v47, %v8971_v29  ;;  %v2318_v57 = vmul.f32 %v10486_v8, %v8742_v15  ;;  %v2075_v15 = vstv %s9199_s20  ;;  %s9478_s20 = sld [smem:[#allocation8 + $0x65]] }
 0x20c   :  { %v9217_v20 = vpop.permute.xlu0 %2362  ;;  %v1974_v60 = vadd.f32 %v1972_v22, %v1952_v18  ;;  %v3019_v47 = vmul.f32 %v3017_v59, %v9220_v1  ;;  %v2660_v59 = vmul.f32 %v2659_v14, %v8977_v61 }
 0x20d   :  { %v2242_v39 = vadd.f32 %v2237_v33, %v2216_v16  ;;  %v9224_v5 = vpop.permute.xlu1 %2526  ;;  %v2661_v33 = vmul.f32 %v2659_v14, %v8994_v26 }
 0x20f   :  { %v2284_v40 = vadd.f32 %v9089_v50, %v2242_v39  ;;  %2430 = vrot.lane.b32.xlu1 %v2426_v49, %s6246_s15  ;;  %2622 = vrot.lane.b32.xlu0 %v2618_v54, %s6246_s15  ;;  %v2076_v50 = vmul.f32 %v2075_v15, %v8680_v41  ;;  %v10483_v54 = vstv %s9215_s29 }
 0x210   :  { %v2003_v16 = vpop.permute.xlu0 %2002 }
 0x211   :  { %v2320_v58 = vadd.f32 %v2318_v57, %v2284_v40  ;;  %v9243_v22 = vpop.permute.xlu1 %2170  ;;  %v2008_v18 = vadd.f32 %v2003_v16, %v1974_v60  ;;  %v2507_v40 = vstv %s9208_s4  ;;  %v10482_v57 = vstv %s9222_s14  ;;  %v9267_v60 = vld [vmem:[#allocation2 + $0x80] sm:$0x7f]  ;;  %s9494_s4 = sld [smem:[#allocation8 + $0x19]] }
 0x212   :  { %v2462_v16 = vmul.f32 %v10482_v57, %v8766_v31  ;;  %v2741_v57 = vstv %s9245_s24  ;;  %s9530_s24 = sld [smem:[#allocation8 + $0x1c]] }
 0x213   :  { %v2340_v49 = vadd.f32 %v2338_v55, %v2320_v58  ;;  %v2050_v39 = vadd.f32 %v2045_v36, %v2008_v18  ;;  %2666 = vrot.lane.b32.xlu1 %v2661_v33, %s6246_s15  ;;  %3024 = vrot.lane.b32.xlu0 %v3019_v47, %s6246_s15  ;;  %v2509_v55 = vmul.f32 %v2507_v40, %v8917_v30  ;;  %v3099_v33 = vstv %s9233_s17  ;;  %v6121_v58 = vld [vmem:[#allocation2 + $0x38] sm:$0x7f]  ;;  %s9520_s17 = sld [smem:[#allocation8 + $0x68]] }
 0x214   :  { %v1967_v18 = vmul.f32 %v6121_v58, %v1965_v4 }
 0x215   :  { %v2366_v41 = vadd.f32 %v2361_v37, %v2340_v49  ;;  %v9260_v36 = vpop.permute.xlu1 %2168  ;;  %v9265_v14 = vadd.f32 %v2076_v50, %v2050_v39  ;;  %v2442_v37 = vmul.f32 %v10483_v54, %v8902_v0  ;;  %v1947_v50 = vmul.f32 %v1945_v10, %v8892_v17  ;;  %v9297_v54 = vld [vmem:[#allocation2 + $0xb0] sm:$0x7f] }
 0x216   :  { %v2549_v49 = vstv %s9241_s16  ;;  %v3100_v39 = vmul.f32 %v3099_v33, %v9267_v60  ;;  %s9528_s16 = sld [smem:[#allocation8 + $0x7b]] }
 0x217   :  { %v2408_v47 = vadd.f32 %v9163_v52, %v2366_v41  ;;  %2664 = vrot.lane.b32.xlu1 %v2660_v59, %s6246_s15  ;;  %2514 = vrot.lane.b32.xlu0 %v2509_v55, %s6246_s15  ;;  %v2508_v59 = vmul.f32 %v2507_v40, %v8902_v0  ;;  %v2551_v10 = vmul.f32 %v2549_v49, %v8614_v2  ;;  %v3141_v0 = vstv %s9258_s26  ;;  %s9542_s26 = sld [smem:[#allocation8 + $0x3d]] }
 0x218   :  { %v1969_v55 = vadd.f32 %v1967_v18, %v1947_v50  ;;  %v9307_v18 = vld [vmem:[#allocation2 + $0x88] sm:$0x7f]  ;;  %v2071_v50 = vmul.f32 %v2069_v34, %v8908_v42  ;;  %v3142_v56 = vmul.f32 %v3141_v0, %v9297_v54 }
 0x219   :  { %v9285_v52 = vpop.permute.xlu1 %2060  ;;  %v2444_v41 = vadd.f32 %v2442_v37, %v2408_v47  ;;  %v2743_v37 = vmul.f32 %v2741_v57, %v9026_v46 }
 0x21b   :  { %3104 = vrot.lane.b32.xlu1 %v3100_v39, %s6246_s15  ;;  %2512 = vrot.lane.b32.xlu0 %v2508_v59, %s6246_s15  ;;  %v2464_v4 = vadd.f32 %v2462_v16, %v2444_v41  ;;  %v2095_v39 = vstv %s9263_s18  ;;  %v10485_v59 = vstv %s9253_s22  ;;  %v2091_v41 = vmul.f32 %v2089_v63, %v8621_v44  ;;  %s9545_s18 = sld [smem:[#allocation8 + $0x2f]] }
 0x21c   :  { %v2566_v34 = vmul.f32 %v10485_v59, %v8971_v29 }
 0x21d   :  { %v1991_v40 = vpop.permute.xlu1 %1990  ;;  %v2485_v47 = vpop.permute.xlu0 %2484 }
 0x21e   :  { %v1995_v2 = vadd.f32 %v1991_v40, %v1969_v55  ;;  %v2490_v16 = vadd.f32 %v2485_v47, %v2464_v4  ;;  %v9320_v40 = vld [vmem:[#allocation2 + $0x90] sm:$0x7f]  ;;  %v3101_v47 = vmul.f32 %v3099_v33, %v9307_v18  ;;  %v2550_v33 = vmul.f32 %v2549_v49, %v8766_v31 }
 0x21f   :  { %2556 = vrot.lane.b32.xlu1 %v2551_v10, %s6246_s15  ;;  %2748 = vrot.lane.b32.xlu0 %v2743_v37, %s6246_s15  ;;  %v2096_v10 = vmul.f32 %v9320_v40, %v2095_v39  ;;  %v2199_v31 = vstv %s9305_s23  ;;  %s9579_s23 = sld [smem:[#allocation8 + $0x1d]] }
 0x220   :  { %v2037_v4 = vadd.f32 %v9062_v53, %v1995_v2  ;;  %v2532_v55 = vadd.f32 %v9224_v5, %v2490_v16  ;;  %v1973_v53 = vmul.f32 %v6121_v58, %v1971_v3  ;;  %v10487_v5 = vstv %s9289_s19 }
 0x221   :  { %v2115_v44 = vpop.permute.xlu1 %2114  ;;  %v9330_v63 = vpop.permute.xlu0 %2486  ;;  %v1953_v2 = vmul.f32 %v1951_v28, %v8892_v17  ;;  %v1977_v16 = vstv %s9291_s12  ;;  %v1959_v3 = vmul.f32 %v10487_v5, %v8892_v17  ;;  %v2098_v28 = vadd.f32 %v2096_v10, %v9265_v14  ;;  %s9567_s12 = sld [smem:[#allocation8 + $0x40]] }
 0x222   :  { %v2073_v37 = vadd.f32 %v2071_v50, %v2037_v4  ;;  %v9342_v59 = vadd.f32 %v2566_v34, %v2532_v55  ;;  %v1979_v8 = vmul.f32 %v6121_v58, %v1977_v16  ;;  %v2783_v4 = vstv %s9300_s1  ;;  %v9356_v55 = vld [vmem:[#allocation2 + $0xb8] sm:$0x7f]  ;;  %s9571_s1 = sld [smem:[#allocation8 + $0x53]] }
 0x223   :  { %3106 = vrot.lane.b32.xlu1 %v3101_v47, %s6246_s15  ;;  %3146 = vrot.lane.b32.xlu0 %v3142_v56, %s6246_s15  ;;  %v2742_v56 = vmul.f32 %v2741_v57, %v9011_v7  ;;  %v10719_v58 = vstv %s9129_s10  ;;  %v1975_v14 = vadd.f32 %v1973_v53, %v1953_v2  ;;  %v3143_v57 = vmul.f32 %v3141_v0, %v9356_v55  ;;  %s9374_s10 = sld [smem:[#allocation8 + $0x77]] }
 0x224   :  { %v2093_v50 = vadd.f32 %v2091_v41, %v2073_v37  ;;  %v2195_v49 = vmul.f32 %v10719_v58, %v8930_v9  ;;  %v1981_v10 = vadd.f32 %v1979_v8, %v1959_v3  ;;  %v2785_v37 = vmul.f32 %v2783_v4, %v9035_v35 }
 0x225   :  { %v2239_v34 = vpop.permute.xlu1 %2238  ;;  %v2127_v47 = vpop.permute.xlu0 %2126  ;;  %v2200_v53 = vmul.f32 %v2199_v31, %v8714_v21  ;;  %v2081_v0 = vstv %s9328_s27  ;;  %v2077_v21 = vmul.f32 %v2075_v15, %v8908_v42  ;;  %s9603_s27 = sld [smem:[#allocation8 + $0x41]] }
 0x226   :  { %v2119_v17 = vadd.f32 %v2115_v44, %v2093_v50  ;;  %v2132_v41 = vadd.f32 %v2127_v47, %v2098_v28  ;;  %v10720_v44 = vstv %s9136_s28  ;;  %s9383_s28 = sld [smem:[#allocation8 + $0x39]]  ;;  %v2784_v28 = vmul.f32 %v2783_v4, %v9022_v6 }
 0x227   :  { %2554 = vrot.lane.b32.xlu1 %v2550_v33, %s6246_s15  ;;  %2746 = vrot.lane.b32.xlu0 %v2742_v56, %s6246_s15  ;;  %v2215_v50 = vmul.f32 %v10720_v44, %v8652_v12  ;;  %v2631_v33 = vstv %s9336_s30  ;;  %v2585_v47 = vstv %s9352_s2  ;;  %s9616_s30 = sld [smem:[#allocation8 + $0x7e]] }
 0x228   :  { %v2161_v5 = vadd.f32 %v9127_v23, %v2119_v17  ;;  %v2174_v58 = vadd.f32 %v9260_v36, %v2132_v41  ;;  %v9401_v41 = vld [vmem:[#allocation2 + $0x98] sm:$0x7f]  ;;  %s9618_s2 = sld [smem:[#allocation8 + $0x7f]] }
 0x229   :  { %v2005_v2 = vpop.permute.xlu1 %2004  ;;  %v2019_v8 = vpop.permute.xlu0 %2018  ;;  %v2097_v15 = vmul.f32 %v9401_v41, %v2095_v39  ;;  %v10721_v39 = vstv %s9167_s21  ;;  %s9454_s21 = sld [smem:[#allocation8 + $0x4f]] }
 0x22a   :  { %v2197_v23 = vadd.f32 %v2195_v49, %v2161_v5  ;;  %v2009_v3 = vadd.f32 %v2005_v2, %v1975_v14  ;;  %v2023_v12 = vadd.f32 %v2019_v8, %v1981_v10  ;;  %v9385_v36 = vadd.f32 %v2200_v53, %v2174_v58  ;;  %v6124_v58 = vld [vmem:[#allocation2 + $0x30] sm:$0x7f] }
 0x22b   :  { %2790 = vrot.lane.b32.xlu1 %v2785_v37, %s6246_s15  ;;  %3148 = vrot.lane.b32.xlu0 %v3143_v57, %s6246_s15  ;;  %v2083_v5 = vmul.f32 %v2081_v0, %v8908_v42  ;;  %v2633_v10 = vmul.f32 %v2631_v33, %v8983_v25  ;;  %v3223_v42 = vstv %s9360_s25  ;;  %v9413_v57 = vld [vmem:[#allocation2 + $0x21] sm:$0x7f]  ;;  %v1978_v53 = vmul.f32 %v6124_v58, %v1977_v16  ;;  %s9775_s25 = sld [smem:[#allocation8 + $0x48]] }
 0x22c   :  { %v2217_v56 = vadd.f32 %v2215_v50, %v2197_v23  ;;  %v2051_v17 = vadd.f32 %v9182_v51, %v2009_v3  ;;  %v2065_v49 = vadd.f32 %v9285_v52, %v2023_v12  ;;  %v2586_v52 = vmul.f32 %v2585_v47, %v8977_v61 }
 0x22d   :  { %v2129_v4 = vpop.permute.xlu1 %2128  ;;  %v2017_v14 = vpop.permute.xlu0 %2016  ;;  %v2319_v50 = vmul.f32 %v10721_v39, %v8768_v32  ;;  %v10722_v2 = vstv %s9173_s3  ;;  %v2673_v12 = vstv %s9374_s10  ;;  %v6126_v32 = vld [vmem:[#allocation2] sm:$0x7f]  ;;  %s9459_s3 = sld [smem:[#allocation8 + $0x3c]] }
 0x22e   :  { %v2243_v37 = vadd.f32 %v2239_v34, %v2217_v56  ;;  %v2079_v51 = vadd.f32 %v2077_v21, %v2051_v17  ;;  %v9415_v44 = vadd.f32 %v2083_v5, %v2065_v49  ;;  %v9424_v34 = vld [vmem:[#allocation2 + $0x99] sm:$0x7f]  ;;  %v10723_v21 = vstv %s9289_s19  ;;  %s9557_s19 = sld [smem:[#allocation8 + $0x69]] }
 0x22f   :  { %2788 = vrot.lane.b32.xlu1 %v2784_v28, %s6246_s15  ;;  %2638 = vrot.lane.b32.xlu0 %v2633_v10, %s6246_s15  ;;  %v2339_v8 = vmul.f32 %v9424_v34, %v10722_v2  ;;  %v1958_v5 = vmul.f32 %v6126_v32, %v10723_v21  ;;  %v3224_v28 = vmul.f32 %v3223_v42, %v9413_v57  ;;  %v10488_v49 = vstv %s9380_s11  ;;  %s9786_s10 = sld [smem:[#allocation8 + $0x49]] }
 0x230   :  { %v2285_v23 = vadd.f32 %v9143_v11, %v2243_v37  ;;  %v2099_v3 = vadd.f32 %v2097_v15, %v2079_v51  ;;  %v2632_v17 = vmul.f32 %v2631_v33, %v8971_v29  ;;  %v2588_v58 = vadd.f32 %v2586_v52, %v9342_v59  ;;  %v9443_v37 = vld [vmem:[#allocation2 + $0x39] sm:$0x7f]  ;;  %v9451_v52 = vld [vmem:[#allocation2 + $0x51] sm:$0x7f] }
 0x231   :  { %v2609_v16 = vpop.permute.xlu1 %2608  ;;  %v2253_v56 = vpop.permute.xlu0 %2252  ;;  %v2219_v11 = vstv %s9383_s28  ;;  %v2201_v15 = vmul.f32 %v2199_v31, %v8930_v9  ;;  %v2675_v29 = vmul.f32 %v2673_v12, %v8994_v26  ;;  %v2865_v33 = vstv %s9394_s0  ;;  %s9796_s28 = sld [smem:[#allocation8 + $0x25]] }
 0x232   :  { %v2321_v10 = vadd.f32 %v2319_v50, %v2285_v23  ;;  %v2133_v39 = vadd.f32 %v2129_v4, %v2099_v3  ;;  %v2221_v51 = vmul.f32 %v9443_v37, %v2219_v11  ;;  %v2614_v4 = vadd.f32 %v2609_v16, %v2588_v58  ;;  %s9800_s0 = sld [smem:[#allocation8 + $0x8b]] }
 0x233   :  { %3228 = vrot.lane.b32.xlu1 %v3224_v28, %s6246_s15  ;;  %2636 = vrot.lane.b32.xlu0 %v2632_v17, %s6246_s15  ;;  %v3265_v31 = vstv %s9406_s13  ;;  %v1980_v2 = vadd.f32 %v1978_v53, %v1958_v5  ;;  %v2867_v32 = vmul.f32 %v2865_v33, %v9084_v48  ;;  %v9465_v28 = vld [vmem:[#allocation2 + $0x29] sm:$0x7f]  ;;  %v10724_v17 = vstv %s9215_s29  ;;  %s9501_s29 = sld [smem:[#allocation8 + $0x7a]] }
 0x234   :  { %v2341_v50 = vadd.f32 %v2339_v8, %v2321_v10  ;;  %v2175_v59 = vadd.f32 %v9243_v22, %v2133_v39  ;;  %v2690_v22 = vmul.f32 %v10488_v49, %v9011_v7  ;;  %v2443_v53 = vmul.f32 %v10724_v17, %v8917_v30  ;;  %v9470_v5 = vld [vmem:[#allocation2 + $0x48] sm:$0x7f]  ;;  %v9488_v49 = vld [vmem:[#allocation2 + $0x31] sm:$0x7f] }
 0x235   :  { %v9456_v23 = vpop.permute.xlu1 %2610  ;;  %v2651_v3 = vpop.permute.xlu0 %2650  ;;  %v10725_v10 = vstv %s9222_s14  ;;  %s9510_s14 = sld [smem:[#allocation8 + $0x2e]] }
 0x236   :  { %v2367_v8 = vadd.f32 %v9217_v20, %v2341_v50  ;;  %v2203_v21 = vadd.f32 %v2201_v15, %v2175_v59  ;;  %v2656_v16 = vadd.f32 %v2651_v3, %v2614_v4  ;;  %v2463_v39 = vmul.f32 %v9470_v5, %v10725_v10 }
 0x237   :  { %2680 = vrot.lane.b32.xlu1 %v2675_v29, %s6246_s15  ;;  %2872 = vrot.lane.b32.xlu0 %v2867_v32, %s6246_s15  ;;  %v3266_v20 = vmul.f32 %v3265_v31, %v9451_v52  ;;  %v2022_v15 = vadd.f32 %v2017_v14, %v1980_v2  ;;  %v3225_v3 = vmul.f32 %v3223_v42, %v9465_v28  ;;  %v6129_v29 = vld [vmem:[#allocation2 + $0x60] sm:$0x7f] }
 0x238   :  { %v2409_v58 = vadd.f32 %v9101_v24, %v2367_v8  ;;  %v2223_v50 = vadd.f32 %v2221_v51, %v2203_v21  ;;  %v9481_v59 = vadd.f32 %v2690_v22, %v2656_v16  ;;  %v2082_v32 = vmul.f32 %v6129_v29, %v2081_v0  ;;  %v9499_v0 = vld [vmem:[#allocation2 + $0x59] sm:$0x7f] }
 0x239   :  { %v2059_v30 = vpop.permute.xlu1 %2058  ;;  %v2251_v4 = vpop.permute.xlu0 %2250  ;;  %v2220_v24 = vmul.f32 %v9488_v49, %v2219_v11  ;;  %v2674_v14 = vmul.f32 %v2673_v12, %v8977_v61  ;;  %v2907_v8 = vstv %s9454_s21  ;;  %v2323_v11 = vstv %s9459_s3  ;;  %s9646_s21 = sld [smem:[#allocation8 + $0x6c]] }
 0x23a   :  { %v2445_v17 = vadd.f32 %v2443_v53, %v2409_v58  ;;  %v2064_v10 = vadd.f32 %v2059_v30, %v2022_v15  ;;  %v2257_v51 = vadd.f32 %v2253_v56, %v2223_v50  ;;  %v2866_v16 = vmul.f32 %v2865_v33, %v9057_v62  ;;  %v9507_v56 = vld [vmem:[#allocation2 + $0x69] sm:$0x7f]  ;;  %s9652_s3 = sld [smem:[#allocation8 + $0x20]] }
 0x23b   :  { %3230 = vrot.lane.b32.xlu1 %v3225_v3, %s6246_s15  ;;  %3270 = vrot.lane.b32.xlu0 %v3266_v20, %s6246_s15  ;;  %v2222_v12 = vadd.f32 %v2220_v24, %v9385_v36  ;;  %v2325_v53 = vmul.f32 %v9507_v56, %v2323_v11  ;;  %v10726_v20 = vstv %s9253_s22  ;;  %v2101_v15 = vstv %s9478_s20  ;;  %s9536_s22 = sld [smem:[#allocation8 + $0x52]] }
 0x23c   :  { %v2465_v42 = vadd.f32 %v2463_v39, %v2445_v17  ;;  %v9496_v2 = vadd.f32 %v2082_v32, %v2064_v10  ;;  %v2567_v58 = vmul.f32 %v10726_v20, %v8983_v25  ;;  %v2909_v33 = vmul.f32 %v2907_v8, %v9104_v38  ;;  %s9659_s20 = sld [smem:[#allocation8 + $0x56]] }
 0x23d   :  { %v2295_v21 = vpop.permute.xlu1 %2294  ;;  %v2653_v22 = vpop.permute.xlu0 %2652  ;;  %v2587_v36 = vmul.f32 %v2585_v47, %v8994_v26  ;;  %v2256_v30 = vadd.f32 %v2251_v4, %v2222_v12  ;;  %v2103_v26 = vmul.f32 %v9401_v41, %v2101_v15  ;;  %v2908_v47 = vmul.f32 %v2907_v8, %v9078_v27 }
 0x23e   :  { %v2491_v61 = vadd.f32 %v9330_v63, %v2465_v42  ;;  %v2299_v39 = vadd.f32 %v2295_v21, %v2257_v51  ;;  %v3267_v63 = vmul.f32 %v3265_v31, %v9499_v0  ;;  %v9532_v31 = vld [vmem:[#allocation2 + $0x61] sm:$0x7f]  ;;  %v2205_v12 = vstv %s9520_s17  ;;  %s9688_s17 = sld [smem:[#allocation8 + $0x83]] }
 0x23f   :  { %2678 = vrot.lane.b32.xlu1 %v2674_v14, %s6246_s15  ;;  %2870 = vrot.lane.b32.xlu0 %v2866_v16, %s6246_s15  ;;  %v2324_v32 = vmul.f32 %v9532_v31, %v2323_v11  ;;  %v2755_v14 = vstv %s9501_s29  ;;  %v2105_v21 = vadd.f32 %v2103_v26, %v9415_v44  ;;  %v9551_v16 = vld [vmem:[#allocation2 + $0x81] sm:$0x7f]  ;;  %v2797_v44 = vstv %s9528_s16  ;;  %v9586_v26 = vld [vmem:[#allocation2 + $0xb1] sm:$0x7f]  ;;  %s9674_s29 = sld [smem:[#allocation8 + $0x6d]] }
 0x240   :  { %v2533_v50 = vadd.f32 %v9123_v19, %v2491_v61  ;;  %v9526_v3 = vadd.f32 %v2325_v53, %v2299_v39  ;;  %v2709_v19 = vstv %s9494_s4  ;;  %v2757_v42 = vmul.f32 %v2755_v14, %v9026_v46  ;;  %s9663_s4 = sld [smem:[#allocation8 + $0x57]] }
 0x241   :  { %v2293_v25 = vpop.permute.xlu1 %2292  ;;  %v2143_v17 = vpop.permute.xlu0 %2142  ;;  %v2710_v8 = vmul.f32 %v2709_v19, %v9022_v6  ;;  %v3347_v61 = vstv %s9510_s14  ;;  %v10727_v53 = vstv %s9380_s11  ;;  %s9682_s14 = sld [smem:[#allocation8 + $0x82]] }
 0x242   :  { %v2569_v29 = vadd.f32 %v2567_v58, %v2533_v50  ;;  %v2298_v10 = vadd.f32 %v2293_v25, %v2256_v30  ;;  %v2691_v39 = vmul.f32 %v10727_v53, %v9026_v46  ;;  %v2147_v20 = vadd.f32 %v2143_v17, %v2105_v21  ;;  %v9595_v21 = vld [vmem:[#allocation2 + $0x89] sm:$0x7f]  ;;  %s9691_s16 = sld [smem:[#allocation8 + $0x44]] }
 0x243   :  { %2914 = vrot.lane.b32.xlu1 %v2909_v33, %s6246_s15  ;;  %3272 = vrot.lane.b32.xlu0 %v3267_v63, %s6246_s15  ;;  %v2207_v58 = vmul.f32 %v2205_v12, %v8930_v9  ;;  %v2756_v50 = vmul.f32 %v2755_v14, %v9011_v7  ;;  %v2813_v30 = vstv %s9530_s24  ;;  %v2102_v46 = vmul.f32 %v9320_v40, %v2101_v15  ;;  %v9583_v40 = vld [vmem:[#allocation2 + $0x91] sm:$0x7f]  ;;  %s9701_s24 = sld [smem:[#allocation8 + $0x45]] }
 0x244   :  { %v2589_v4 = vadd.f32 %v2587_v36, %v2569_v29  ;;  %v2326_v24 = vadd.f32 %v2324_v32, %v2298_v10  ;;  %v3348_v36 = vmul.f32 %v3347_v61, %v9551_v16  ;;  %v2712_v29 = vadd.f32 %v2710_v8, %v9481_v59  ;;  %s9790_s11 = sld [smem:[#allocation8 + $0x8a]] }
 0x245   :  { %v2733_v41 = vpop.permute.xlu1 %2732  ;;  %v2141_v51 = vpop.permute.xlu0 %2140  ;;  %v2343_v9 = vstv %s9542_s26  ;;  %v2711_v7 = vmul.f32 %v2709_v19, %v9035_v35  ;;  %v2799_v17 = vmul.f32 %v2797_v44, %v9035_v35  ;;  %v2989_v32 = vstv %s9536_s22  ;;  %s9704_s22 = sld [smem:[#allocation8 + $0x5a]] }
 0x246   :  { %v2615_v11 = vadd.f32 %v9456_v23, %v2589_v4  ;;  %v2738_v59 = vadd.f32 %v2733_v41, %v2712_v29  ;;  %v2344_v15 = vmul.f32 %v9583_v40, %v2343_v9  ;;  %v2991_v19 = vmul.f32 %v2989_v32, %v9188_v45  ;;  %s9709_s26 = sld [smem:[#allocation8 + $0x21]] }
 0x247   :  { %2912 = vrot.lane.b32.xlu1 %v2908_v47, %s6246_s15  ;;  %2762 = vrot.lane.b32.xlu0 %v2757_v42, %s6246_s15  ;;  %v3389_v47 = vstv %s9545_s18  ;;  %v2104_v35 = vadd.f32 %v2102_v46, %v9496_v2  ;;  %v2345_v42 = vmul.f32 %v9424_v34, %v2343_v9  ;;  %v2814_v41 = vmul.f32 %v2813_v30, %v9057_v62  ;;  %v6134_v46 = vld [vmem:[#allocation2 + $0x1] sm:$0x7f]  ;;  %s9714_s18 = sld [smem:[#allocation8 + $0x5b]] }
 0x248   :  { %v2657_v23 = vadd.f32 %v2653_v22, %v2615_v11  ;;  %v3390_v8 = vmul.f32 %v3389_v47, %v9586_v26  ;;  %v2225_v53 = vstv %s9557_s19  ;;  %v2346_v2 = vadd.f32 %v2344_v15, %v2326_v24  ;;  %s9729_s19 = sld [smem:[#allocation8 + $0x70]] }
 0x249   :  { %v2185_v33 = vpop.permute.xlu1 %2184  ;;  %v2377_v63 = vpop.permute.xlu0 %2376  ;;  %v2798_v24 = vmul.f32 %v2797_v44, %v9022_v6  ;;  %v9623_v6 = vld [vmem:[#allocation2 + $0x18] sm:$0x7f] }
 0x24a   :  { %v2693_v25 = vadd.f32 %v2691_v39, %v2657_v23  ;;  %v2189_v22 = vadd.f32 %v2185_v33, %v2147_v20  ;;  %v2146_v39 = vadd.f32 %v2141_v51, %v2104_v35  ;;  %v3349_v33 = vmul.f32 %v3347_v61, %v9595_v21 }
 0x24b   :  { %3352 = vrot.lane.b32.xlu1 %v3348_v36, %s6246_s15  ;;  %2760 = vrot.lane.b32.xlu0 %v2756_v50, %s6246_s15  ;;  %v2447_v36 = vstv %s9567_s12  ;;  %v2347_v50 = vadd.f32 %v2345_v42, %v9526_v3  ;;  %v2227_v51 = vmul.f32 %v9443_v37, %v2225_v53  ;;  %s9735_s12 = sld [smem:[#allocation8 + $0x24]] }
 0x24c   :  { %v9581_v10 = vadd.f32 %v2207_v58, %v2189_v22  ;;  %v2713_v23 = vadd.f32 %v2711_v7, %v2693_v25  ;;  %v2206_v22 = vmul.f32 %v6134_v46, %v2205_v12  ;;  %v3031_v25 = vstv %s9571_s1  ;;  %v9613_v7 = vld [vmem:[#allocation2 + $0xb9] sm:$0x7f]  ;;  %s9742_s1 = sld [smem:[#allocation8 + $0x86]] }
 0x24d   :  { %v2735_v4 = vpop.permute.xlu1 %2734  ;;  %v2775_v14 = vpop.permute.xlu0 %2774  ;;  %v2381_v3 = vadd.f32 %v2377_v63, %v2347_v50  ;;  %v5877_v12 = vld [vmem:[%s10383_s5 + $0x18] sm:$0x7f]  ;;  %v2449_v37 = vmul.f32 %v9623_v6, %v2447_v36  ;;  %v5876_v63 = vld [vmem:[%s10383_s5 + $0x10] sm:$0x7f]  ;;  %v3391_v42 = vmul.f32 %v3389_v47, %v9613_v7  ;;  %v3449_v47 = vld [vmem:[%s10383_s5 + $0x8] sm:$0x7f]  ;;  %v2879_v50 = vstv %s9616_s30 }
 0x24e   :  { %v2780_v11 = vadd.f32 %v2775_v14, %v2738_v59  ;;  %v2739_v61 = vadd.f32 %v2735_v4, %v2713_v23  ;;  %v2990_v14 = vmul.f32 %v2989_v32, %v9146_v13  ;;  %5878 = vmatprep.subr.msk.mxu0 %vm3461_vm3, %v5877_v12  ;;  %v3033_v32 = vmul.f32 %v3031_v25, %v9220_v1  ;;  %s9766_s30 = sld [smem:[#allocation8 + $0x5e]] }
 0x24f   :  { %2804 = vrot.lane.b32.xlu1 %v2799_v17, %s6246_s15  ;;  %2996 = vrot.lane.b32.xlu0 %v2991_v19, %s6246_s15  ;;  %v2833_v17 = vstv %s9579_s23  ;;  %v2815_v19 = vmul.f32 %v2813_v30, %v9084_v48  ;;  %v2229_v30 = vadd.f32 %v2227_v51, %v9581_v10  ;;  %v2467_v23 = vstv %s9603_s27  ;;  %s9748_s23 = sld [smem:[#allocation8 + $0x87]] }
 0x250   :  { %v9601_v20 = vadd.f32 %v2814_v41, %v2780_v11  ;;  %5879 = vmatpush1.msk.msra.mxu0 %vm3461_vm3, %v5876_v63  ;;  %v2834_v41 = vmul.f32 %v2833_v17, %v9078_v27  ;;  %v2226_v11 = vmul.f32 %v9488_v49, %v2225_v53  ;;  %v3032_v10 = vmul.f32 %v3031_v25, %v9177_v43  ;;  %s9757_s27 = sld [smem:[#allocation8 + $0x71]] }
 0x251   :  { %v2183_v62 = vpop.permute.xlu1 %2182  ;;  %v2375_v58 = vpop.permute.xlu0 %2374  ;;  %5881 = vmatprep.subr.msk.mxu0 %vm3461_vm3, %v3449_v47 }
 0x252   :  { %v2188_v29 = vadd.f32 %v2183_v62, %v2146_v39  ;;  %v2380_v9 = vadd.f32 %v2375_v58, %v2346_v2  ;;  %v9649_v58 = vld [vmem:[#allocation2 + $0x10] sm:$0x7f] }
 0x253   :  { %3354 = vrot.lane.b32.xlu1 %v3349_v33, %s6246_s15  ;;  %3394 = vrot.lane.b32.xlu0 %v3390_v8, %s6246_s15  ;;  %v2448_v49 = vmul.f32 %v9649_v58, %v2447_v36 }
 0x254   :  { %v2208_v59 = vadd.f32 %v2206_v22, %v2188_v29  ;;  %v2469_v29 = vmul.f32 %v9470_v5, %v2467_v23  ;;  %v2836_v22 = vadd.f32 %v2834_v41, %v9601_v20  ;;  %v2835_v20 = vmul.f32 %v2833_v17, %v9104_v38  ;;  %v9684_v41 = vld [vmem:[#allocation2 + $0x40] sm:$0x7f] }
 0x255   :  { %v2419_v44 = vpop.permute.xlu1 %2418  ;;  %v2777_v15 = vpop.permute.xlu0 %2776 }
 0x256   :  { %v2423_v4 = vadd.f32 %v2419_v44, %v2381_v3  ;;  %v2781_v35 = vadd.f32 %v2777_v15, %v2739_v61  ;;  %v2228_v36 = vadd.f32 %v2226_v11, %v2208_v59  ;;  %v2881_v3 = vmul.f32 %v2879_v50, %v9084_v48 }
 0x257   :  { %2802 = vrot.lane.b32.xlu1 %v2798_v24, %s6246_s15  ;;  %2994 = vrot.lane.b32.xlu0 %v2990_v14, %s6246_s15  ;;  %v2329_v59 = vstv %s9646_s21  ;;  %v9671_v14 = vld [vmem:[#allocation2 + $0x71] sm:$0x7f]  ;;  %v2468_v11 = vmul.f32 %v9684_v41, %v2467_v23 }
 0x258   :  { %v2451_v8 = vadd.f32 %v2449_v37, %v2423_v4  ;;  %v2817_v39 = vadd.f32 %v2815_v19, %v2781_v35  ;;  %v2880_v48 = vmul.f32 %v9671_v14, %v2879_v50  ;;  %v2331_v63 = vmul.f32 %v9507_v56, %v2329_v59 }
 0x259   :  { %v2417_v2 = vpop.permute.xlu1 %2416  ;;  %v2267_v62 = vpop.permute.xlu0 %2266  ;;  %v2937_v35 = vstv %s9652_s3  ;;  %v2349_v50 = vstv %s9674_s29  ;;  %s9828_s29 = sld [smem:[#allocation8 + $0x28]] }
 0x25a   :  { %v2422_v53 = vadd.f32 %v2417_v2, %v2380_v9  ;;  %v2271_v33 = vadd.f32 %v2267_v62, %v2229_v30  ;;  %v2921_v9 = vstv %s9618_s2  ;;  %v2471_v37 = vadd.f32 %v2469_v29, %v2451_v8  ;;  %s9772_s2 = sld [smem:[#allocation8 + $0x5f]] }
 0x25b   :  { %3038 = vrot.lane.b32.xlu1 %v3033_v32, %s6246_s15  ;;  %3396 = vrot.lane.b32.xlu0 %v3391_v42, %s6246_s15  ;;  %v2923_v25 = vmul.f32 %v2921_v9, %v9104_v38  ;;  %v3113_v38 = vstv %s9659_s20  ;;  %v2922_v17 = vmul.f32 %v2921_v9, %v9078_v27  ;;  %v2837_v32 = vadd.f32 %v2835_v20, %v2817_v39  ;;  %s9990_s3 = sld [smem:[#allocation8 + $0x81]] }
 0x25c   :  { %v2450_v46 = vadd.f32 %v2448_v49, %v2422_v53  ;;  %v3155_v8 = vstv %s9663_s4  ;;  %v3115_v47 = vmul.f32 %v3113_v38, %v9307_v18  ;;  %v2938_v27 = vmul.f32 %v2937_v35, %v9146_v13  ;;  %s9821_s4 = sld [smem:[#allocation8 + $0x74]] }
 0x25d   :  { %v2857_v24 = vpop.permute.xlu1 %2856  ;;  %v2265_v51 = vpop.permute.xlu0 %2264  ;;  %v3157_v39 = vmul.f32 %v3155_v8, %v9356_v55  ;;  %v2330_v29 = vmul.f32 %v9532_v31, %v2329_v59  ;;  %v2571_v31 = vstv %s9691_s16 }
 0x25e   :  { %v2862_v61 = vadd.f32 %v2857_v24, %v2836_v22  ;;  %v2270_v12 = vadd.f32 %v2265_v51, %v2228_v36  ;;  %v2470_v49 = vadd.f32 %v2468_v11, %v2450_v46  ;;  %v3156_v46 = vmul.f32 %v3155_v8, %v9297_v54 }
 0x25f   :  { %3036 = vrot.lane.b32.xlu1 %v3032_v10, %s6246_s15  ;;  %2886 = vrot.lane.b32.xlu0 %v2881_v3, %s6246_s15  ;;  %v3114_v10 = vmul.f32 %v3113_v38, %v9267_v60  ;;  %v3003_v24 = vstv %s9682_s14  ;;  %v2351_v51 = vmul.f32 %v9424_v34, %v2349_v50  ;;  %v3045_v3 = vstv %s9688_s17  ;;  %s9836_s14 = sld [smem:[#allocation8 + $0x8e]] }
 0x260   :  { %v3047_v34 = vmul.f32 %v3045_v3, %v9220_v1  ;;  %v2350_v38 = vmul.f32 %v9583_v40, %v2349_v50  ;;  %v2957_v40 = vstv %s9709_s26  ;;  %s9846_s17 = sld [smem:[#allocation8 + $0x8f]] }
 0x261   :  { %v2309_v44 = vpop.permute.xlu1 %2308  ;;  %v2501_v15 = vpop.permute.xlu0 %2500  ;;  %s9877_s26 = sld [smem:[#allocation8 + $0x75]] }
 0x262   :  { %v2313_v4 = vadd.f32 %v2309_v44, %v2271_v33  ;;  %v2505_v19 = vadd.f32 %v2501_v15, %v2471_v37  ;;  %v9718_v37 = vld [vmem:[#allocation2 + $0x78] sm:$0x7f]  ;;  %v2939_v44 = vmul.f32 %v2937_v35, %v9188_v45  ;;  %v9732_v35 = vld [vmem:[#allocation2 + $0x70] sm:$0x7f] }
 0x263   :  { %2884 = vrot.lane.b32.xlu1 %v2880_v48, %s6246_s15  ;;  %2928 = vrot.lane.b32.xlu0 %v2923_v25, %s6246_s15  ;;  %v3005_v25 = vmul.f32 %v3003_v24, %v9188_v45  ;;  %v2573_v20 = vmul.f32 %v9718_v37, %v2571_v31  ;;  %v2591_v45 = vstv %s9701_s24  ;;  %v2572_v11 = vmul.f32 %v9732_v35, %v2571_v31  ;;  %s10110_s24 = sld [smem:[#allocation8 + $0x88]] }
 0x264   :  { %v2333_v42 = vadd.f32 %v2331_v63, %v2313_v4  ;;  %v3061_v31 = vstv %s9735_s12  ;;  %s9902_s12 = sld [smem:[#allocation8 + $0x2c]] }
 0x265   :  { %v2859_v56 = vpop.permute.xlu1 %2858  ;;  %v2899_v30 = vpop.permute.xlu0 %2898 }
 0x266   :  { %v2863_v2 = vadd.f32 %v2859_v56, %v2837_v32  ;;  %v2904_v62 = vadd.f32 %v2899_v30, %v2862_v61  ;;  %v2353_v4 = vadd.f32 %v2351_v51, %v2333_v42  ;;  %v3237_v42 = vstv %s9704_s22  ;;  %s9869_s22 = sld [smem:[#allocation8 + $0x4c]] }
 0x267   :  { %3120 = vrot.lane.b32.xlu1 %v3115_v47, %s6246_s15  ;;  %2926 = vrot.lane.b32.xlu0 %v2922_v17, %s6246_s15 }
 0x268   :  { %v9697_v23 = vadd.f32 %v2938_v27, %v2904_v62  ;;  %v3279_v62 = vstv %s9714_s18  ;;  %s9890_s18 = sld [smem:[#allocation8 + $0x29]] }
 0x269   :  { %v2307_v53 = vpop.permute.xlu1 %2306  ;;  %v2499_v33 = vpop.permute.xlu0 %2498  ;;  %v3281_v50 = vmul.f32 %v3279_v62, %v9499_v0 }
 0x26a   :  { %v2312_v22 = vadd.f32 %v2307_v53, %v2270_v12  ;;  %v2504_v36 = vadd.f32 %v2499_v33, %v2470_v49  ;;  %v3239_v53 = vmul.f32 %v3237_v42, %v9465_v28  ;;  %v2958_v33 = vmul.f32 %v2957_v40, %v9177_v43 }
 0x26b   :  { %3118 = vrot.lane.b32.xlu1 %v3114_v10, %s6246_s15  ;;  %3162 = vrot.lane.b32.xlu0 %v3157_v39, %s6246_s15 }
 0x26c   :  { %v2332_v9 = vadd.f32 %v2330_v29, %v2312_v22  ;;  %v2453_v22 = vstv %s9729_s19  ;;  %s9900_s19 = sld [smem:[#allocation8 + $0x78]] }
 0x26d   :  { %v2543_v61 = vpop.permute.xlu1 %2542  ;;  %v2901_v12 = vpop.permute.xlu0 %2900 }
 0x26e   :  { %v2547_v59 = vadd.f32 %v2543_v61, %v2505_v19  ;;  %v2905_v15 = vadd.f32 %v2901_v12, %v2863_v2  ;;  %v3004_v19 = vmul.f32 %v3003_v24, %v9146_v13  ;;  %v3046_v13 = vmul.f32 %v3045_v3, %v9177_v43  ;;  %v9744_v2 = vld [vmem:[#allocation2 + $0xa8] sm:$0x7f] }
 0x26f   :  { %3160 = vrot.lane.b32.xlu1 %v3156_v46, %s6246_s15  ;;  %3010 = vrot.lane.b32.xlu0 %v3005_v25, %s6246_s15  ;;  %v2352_v47 = vadd.f32 %v2350_v38, %v2332_v9  ;;  %v2593_v27 = vmul.f32 %v9744_v2, %v2591_v45  ;;  %v3238_v9 = vmul.f32 %v3237_v42, %v9413_v57  ;;  %v3127_v12 = vstv %s9742_s1  ;;  %s9907_s1 = sld [smem:[#allocation8 + $0x4d]] }
 0x270   :  { %v2575_v48 = vadd.f32 %v2573_v20, %v2547_v59  ;;  %v9725_v63 = vadd.f32 %v2939_v44, %v2905_v15  ;;  %v2960_v43 = vadd.f32 %v2958_v33, %v9697_v23  ;;  %v2455_v24 = vmul.f32 %v9623_v6, %v2453_v22  ;;  %v9768_v59 = vld [vmem:[#allocation2 + $0xa0] sm:$0x7f]  ;;  %v9804_v33 = vld [vmem:[#allocation2 + $0x19] sm:$0x7f] }
 0x271   :  { %v2541_v17 = vpop.permute.xlu1 %2540  ;;  %v2391_v32 = vpop.permute.xlu0 %2390  ;;  %v3280_v61 = vmul.f32 %v3279_v62, %v9451_v52  ;;  %v2592_v23 = vmul.f32 %v9768_v59, %v2591_v45  ;;  %v3169_v44 = vstv %s9748_s23  ;;  %s9922_s23 = sld [smem:[#allocation8 + $0x79]] }
 0x272   :  { %v2546_v8 = vadd.f32 %v2541_v17, %v2504_v36  ;;  %v2395_v56 = vadd.f32 %v2391_v32, %v2353_v4  ;;  %v2595_v29 = vadd.f32 %v2593_v27, %v2575_v48  ;;  %v2959_v48 = vmul.f32 %v2957_v40, %v9220_v1 }
 0x273   :  { %3008 = vrot.lane.b32.xlu1 %v3004_v19, %s6246_s15  ;;  %3052 = vrot.lane.b32.xlu0 %v3047_v34, %s6246_s15  ;;  %v3129_v34 = vmul.f32 %v3127_v12, %v9307_v18  ;;  %v3062_v4 = vmul.f32 %v3061_v31, %v9267_v60  ;;  %v3171_v17 = vmul.f32 %v3169_v44, %v9356_v55 }
 0x274   :  { %v2574_v30 = vadd.f32 %v2572_v11, %v2546_v8  ;;  %v3128_v8 = vmul.f32 %v3127_v12, %v9267_v60  ;;  %v2961_v1 = vadd.f32 %v2959_v48, %v9725_v63  ;;  %v2454_v40 = vmul.f32 %v9649_v58, %v2453_v22 }
 0x275   :  { %v2981_v39 = vpop.permute.xlu1 %2980  ;;  %v2389_v49 = vpop.permute.xlu0 %2388  ;;  %v3170_v60 = vmul.f32 %v3169_v44, %v9297_v54  ;;  %v3403_v63 = vstv %s9772_s2  ;;  %v2695_v58 = vstv %s9775_s25  ;;  %v3063_v54 = vmul.f32 %v3061_v31, %v9307_v18  ;;  %v5909_v18 = vld [vmem:[%s10383_s5 + $0x70] sm:$0x7f]  ;;  %s9943_s2 = sld [smem:[#allocation8 + $0x51]] }
 0x276   :  { %v2394_v10 = vadd.f32 %v2389_v49, %v2352_v47  ;;  %v2986_v25 = vadd.f32 %v2981_v39, %v2960_v43  ;;  %v2594_v19 = vadd.f32 %v2592_v23, %v2574_v30  ;;  %v3361_v30 = vstv %s9766_s30  ;;  %v5910_v43 = vld [vmem:[%s10383_s5 + $0x78] sm:$0x7f]  ;;  %s9936_s30 = sld [smem:[#allocation8 + $0x7c]] }
 0x277   :  { %3244 = vrot.lane.b32.xlu1 %v3239_v53, %s6246_s15  ;;  %3050 = vrot.lane.b32.xlu0 %v3046_v13, %s6246_s15  ;;  %v3363_v53 = vmul.f32 %v3361_v30, %v9595_v21  ;;  %v2715_v31 = vstv %s9786_s10  ;;  %v3404_v23 = vmul.f32 %v3403_v63, %v9586_v26  ;;  %v3251_v44 = vstv %s9790_s11  ;;  %s9946_s25 = sld [smem:[#allocation9]] }
 0x278   :  { %5911 = vmatprep.subr.msk.mxu1 %vm3461_vm3, %v5910_v43  ;;  %s9949_s10 = sld [smem:[#allocation8 + $0x7d]] }
 0x279   :  { %v2433_v36 = vpop.permute.xlu1 %2432  ;;  %v2625_v46 = vpop.permute.xlu0 %2624  ;;  %5912 = vmatpush1.msk.msra.mxu1 %vm3461_vm3, %v5909_v18  ;;  %s9954_s11 = sld [smem:[#allocation8 + $0x80]] }
 0x27a   :  { %v2437_v51 = vadd.f32 %v2433_v36, %v2395_v56  ;;  %v2629_v3 = vadd.f32 %v2625_v46, %v2595_v29  ;;  %v2473_v56 = vstv %s9757_s27  ;;  %s9928_s27 = sld [smem:[#allocation8 + $0x2d]] }
 0x27b   :  { %3242 = vrot.lane.b32.xlu1 %v3238_v9, %s6246_s15  ;;  %3286 = vrot.lane.b32.xlu0 %v3281_v50, %s6246_s15  ;;  %v2475_v62 = vmul.f32 %v9470_v5, %v2473_v56  ;;  %v3405_v5 = vmul.f32 %v3403_v63, %v9613_v7  ;;  %v2474_v9 = vmul.f32 %v9684_v41, %v2473_v56  ;;  %v9825_v41 = vld [vmem:[#allocation2 + $0x11] sm:$0x7f] }
 0x27c   :  { %v2457_v20 = vadd.f32 %v2455_v24, %v2437_v51 }
 0x27d   :  { %v2983_v6 = vpop.permute.xlu1 %2982  ;;  %v3023_v15 = vpop.permute.xlu0 %3022 }
 0x27e   :  { %v3028_v38 = vadd.f32 %v3023_v15, %v2986_v25  ;;  %v2987_v47 = vadd.f32 %v2983_v6, %v2961_v1  ;;  %v2477_v46 = vadd.f32 %v2475_v62, %v2457_v20  ;;  %v3081_v20 = vstv %s9796_s28  ;;  %s9956_s28 = sld [smem:[#allocation8 + $0x54]] }
 0x27f   :  { %3284 = vrot.lane.b32.xlu1 %v3280_v61, %s6246_s15  ;;  %3134 = vrot.lane.b32.xlu0 %v3129_v34, %s6246_s15  ;;  %v2696_v61 = vmul.f32 %v9825_v41, %v2695_v58  ;;  %v9840_v34 = vld [vmem:[#allocation2 + $0x49] sm:$0x7f] }
 0x280   :  { %v9782_v32 = vadd.f32 %v3062_v4, %v3028_v38  ;;  %v2717_v48 = vmul.f32 %v9840_v34, %v2715_v31  ;;  %v3293_v4 = vstv %s9800_s0  ;;  %v5920_v38 = vld [vmem:[%s10383_s5 + $0x98] sm:$0x7f]  ;;  %s9958_s0 = sld [smem:[#allocation8 + $0x55]] }
 0x281   :  { %v2431_v45 = vpop.permute.xlu1 %2430  ;;  %v2623_v11 = vpop.permute.xlu0 %2622  ;;  %5921 = vmatprep.subr.msk.mxu1 %vm3461_vm3, %v5920_v38  ;;  %v3295_v1 = vmul.f32 %v3293_v4, %v9499_v0 }
 0x282   :  { %v2436_v42 = vadd.f32 %v2431_v45, %v2394_v10  ;;  %v2628_v13 = vadd.f32 %v2623_v11, %v2594_v19  ;;  %v2697_v10 = vmul.f32 %v9804_v33, %v2695_v58  ;;  %v3253_v45 = vmul.f32 %v3251_v44, %v9465_v28  ;;  %v9853_v11 = vld [vmem:[#allocation2 + $0xb0] sm:$0x7f] }
 0x283   :  { %3132 = vrot.lane.b32.xlu1 %v3128_v8, %s6246_s15  ;;  %3176 = vrot.lane.b32.xlu0 %v3171_v17, %s6246_s15  ;;  %v3082_v8 = vmul.f32 %v9853_v11, %v3081_v20  ;;  %v3185_v58 = vstv %s9828_s29  ;;  %s9996_s29 = sld [smem:[#allocation8 + $0x58]] }
 0x284   :  { %v2456_v27 = vadd.f32 %v2454_v40, %v2436_v42  ;;  %v2577_v42 = vstv %s9821_s4  ;;  %s10095_s4 = sld [smem:[#allocation8 + $0x5d]] }
 0x285   :  { %v2667_v39 = vpop.permute.xlu1 %2666  ;;  %v3025_v49 = vpop.permute.xlu0 %3024 }
 0x286   :  { %v2671_v50 = vadd.f32 %v2667_v39, %v2629_v3  ;;  %v3029_v29 = vadd.f32 %v3025_v49, %v2987_v47  ;;  %v3362_v3 = vmul.f32 %v3361_v30, %v9551_v16  ;;  %v2476_v15 = vadd.f32 %v2474_v9, %v2456_v27 }
 0x287   :  { %3368 = vrot.lane.b32.xlu1 %v3363_v53, %s6246_s15  ;;  %3174 = vrot.lane.b32.xlu0 %v3170_v60, %s6246_s15  ;;  %v3252_v60 = vmul.f32 %v3251_v44, %v9413_v57  ;;  %v3084_v47 = vadd.f32 %v3082_v8, %v9782_v32  ;;  %v2579_v27 = vmul.f32 %v9718_v37, %v2577_v42 }
 0x288   :  { %v2699_v22 = vadd.f32 %v2697_v10, %v2671_v50  ;;  %v9811_v36 = vadd.f32 %v3063_v54, %v3029_v29  ;;  %v3294_v39 = vmul.f32 %v3293_v4, %v9451_v52  ;;  %v3375_v10 = vstv %s9836_s14 }
 0x289   :  { %v2665_v24 = vpop.permute.xlu1 %2664  ;;  %v2515_v51 = vpop.permute.xlu0 %2514  ;;  %v3417_v50 = vstv %s9846_s17  ;;  %v3377_v32 = vmul.f32 %v3375_v10, %v9595_v21  ;;  %v3083_v37 = vmul.f32 %v3081_v20, %v9356_v55  ;;  %v2578_v55 = vmul.f32 %v9732_v35, %v2577_v42 }
 0x28a   :  { %v2670_v12 = vadd.f32 %v2665_v24, %v2628_v13  ;;  %v2519_v25 = vadd.f32 %v2515_v51, %v2477_v46  ;;  %v2719_v40 = vadd.f32 %v2717_v48, %v2699_v22  ;;  %v3419_v46 = vmul.f32 %v3417_v50, %v9613_v7 }
 0x28b   :  { %3366 = vrot.lane.b32.xlu1 %v3362_v3, %s6246_s15  ;;  %3410 = vrot.lane.b32.xlu0 %v3405_v5, %s6246_s15  ;;  %v3186_v5 = vmul.f32 %v3185_v58, %v9413_v57  ;;  %v3376_v24 = vmul.f32 %v3375_v10, %v9551_v16  ;;  %v3085_v51 = vadd.f32 %v3083_v37, %v9811_v36  ;;  %v9882_v3 = vld [vmem:[#allocation2 + $0x41] sm:$0x7f]  ;;  %v2819_v36 = vstv %s9869_s22  ;;  %s10118_s22 = sld [smem:[#allocation8 + $0x89]] }
 0x28c   :  { %v9838_v6 = vadd.f32 %v2696_v61, %v2670_v12  ;;  %v2716_v61 = vmul.f32 %v9882_v3, %v2715_v31  ;;  %v3418_v12 = vmul.f32 %v3417_v50, %v9586_v26  ;;  %v3187_v4 = vmul.f32 %v3185_v58, %v9465_v28 }
 0x28d   :  { %v3105_v17 = vpop.permute.xlu1 %3104  ;;  %v2513_v19 = vpop.permute.xlu0 %2512  ;;  %v3205_v42 = vstv %s9890_s18  ;;  %s10030_s18 = sld [smem:[#allocation8 + $0x59]] }
 0x28e   :  { %v2518_v56 = vadd.f32 %v2513_v19, %v2476_v15  ;;  %v3110_v49 = vadd.f32 %v3105_v17, %v3084_v47  ;;  %v2718_v31 = vadd.f32 %v2716_v61, %v9838_v6  ;;  %v2597_v17 = vstv %s9877_s26  ;;  %s10121_s26 = sld [smem:[#allocation9 + $0x1]] }
 0x28f   :  { %3408 = vrot.lane.b32.xlu1 %v3404_v23, %s6246_s15  ;;  %3258 = vrot.lane.b32.xlu0 %v3253_v45, %s6246_s15  ;;  %v9893_v23 = vld [vmem:[#allocation2 + $0x79] sm:$0x7f]  ;;  %v2820_v6 = vmul.f32 %v9671_v14, %v2819_v36  ;;  %v2599_v28 = vmul.f32 %v9744_v2, %v2597_v17  ;;  %v2598_v50 = vmul.f32 %v9768_v59, %v2597_v17 }
 0x290   :  { %v2821_v35 = vmul.f32 %v9893_v23, %v2819_v36 }
 0x291   :  { %v2557_v13 = vpop.permute.xlu1 %2556  ;;  %v2749_v30 = vpop.permute.xlu0 %2748 }
 0x292   :  { %v2561_v62 = vadd.f32 %v2557_v13, %v2519_v25  ;;  %v2753_v63 = vadd.f32 %v2749_v30, %v2719_v40 }
 0x293   :  { %3256 = vrot.lane.b32.xlu1 %v3252_v60, %s6246_s15  ;;  %3300 = vrot.lane.b32.xlu0 %v3295_v1, %s6246_s15 }
 0x294   :  { %v2581_v53 = vadd.f32 %v2579_v27, %v2561_v62  ;;  %v3206_v27 = vmul.f32 %v3205_v42, %v9451_v52 }
 0x295   :  { %v3107_v54 = vpop.permute.xlu1 %3106  ;;  %v3147_v29 = vpop.permute.xlu0 %3146 }
 0x296   :  { %v3152_v22 = vadd.f32 %v3147_v29, %v3110_v49  ;;  %v3111_v25 = vadd.f32 %v3107_v54, %v3085_v51  ;;  %v2601_v47 = vadd.f32 %v2599_v28, %v2581_v53  ;;  %v3309_v49 = vstv %s9902_s12  ;;  %s10136_s12 = sld [smem:[#allocation9 + $0x2]] }
 0x297   :  { %3298 = vrot.lane.b32.xlu1 %v3294_v39, %s6246_s15  ;;  %3382 = vrot.lane.b32.xlu0 %v3377_v32, %s6246_s15  ;;  %v2839_v29 = vstv %s9907_s1  ;;  %v3310_v53 = vmul.f32 %v3309_v49, %v9551_v16  ;;  %s10036_s1 = sld [smem:[#allocation8 + $0x84]] }
 0x298   :  { %v3188_v9 = vadd.f32 %v3186_v5, %v3152_v22 }
 0x299   :  { %v2555_v43 = vpop.permute.xlu1 %2554  ;;  %v2747_v18 = vpop.permute.xlu0 %2746 }
 0x29a   :  { %v2560_v57 = vadd.f32 %v2555_v43, %v2518_v56  ;;  %v2752_v19 = vadd.f32 %v2747_v18, %v2718_v31  ;;  %v3208_v10 = vadd.f32 %v3206_v27, %v3188_v9  ;;  %v3207_v9 = vmul.f32 %v3205_v42, %v9499_v0 }
 0x29b   :  { %3380 = vrot.lane.b32.xlu1 %v3376_v24, %s6246_s15  ;;  %3424 = vrot.lane.b32.xlu0 %v3419_v46, %s6246_s15  ;;  %v9918_v46 = vld [vmem:[#allocation2 + $0xa9] sm:$0x7f] }
 0x29c   :  { %v2580_v20 = vadd.f32 %v2578_v55, %v2560_v57  ;;  %v2841_v43 = vmul.f32 %v9918_v46, %v2839_v29 }
 0x29d   :  { %v2791_v44 = vpop.permute.xlu1 %2790  ;;  %v3149_v15 = vpop.permute.xlu0 %3148 }
 0x29e   :  { %v2795_v48 = vadd.f32 %v2791_v44, %v2753_v63  ;;  %v3153_v38 = vadd.f32 %v3149_v15, %v3111_v25  ;;  %v2701_v63 = vstv %s9900_s19  ;;  %v2600_v22 = vadd.f32 %v2598_v50, %v2580_v20  ;;  %v9931_v44 = vld [vmem:[#allocation2 + $0x28] sm:$0x7f]  ;;  %s10126_s19 = sld [smem:[#allocation8 + $0x8d]] }
 0x29f   :  { %3422 = vrot.lane.b32.xlu1 %v3418_v12, %s6246_s15  ;;  %v2703_v2 = vmul.f32 %v9804_v33, %v2701_v63  ;;  %s9915_s15 = sld [smem:[#allocation8 + $0x50]]  ;;  %v2702_v24 = vmul.f32 %v9825_v41, %v2701_v63  ;;  %v9925_v12 = vld [vmem:[#allocation2 + $0xa1] sm:$0x7f] }
 0x2a0   :  { %v2823_v45 = vadd.f32 %v2821_v35, %v2795_v48  ;;  %v3189_v8 = vadd.f32 %v3187_v4, %v3153_v38  ;;  %v2840_v25 = vmul.f32 %v9925_v12, %v2839_v29  ;;  %v3311_v38 = vmul.f32 %v3309_v49, %v9595_v21 }
 0x2a1   :  { %v2789_v56 = vpop.permute.xlu1 %2788  ;;  %v2639_v1 = vpop.permute.xlu0 %2638 }
 0x2a2   :  { %v2794_v40 = vadd.f32 %v2789_v56, %v2752_v19  ;;  %v2643_v62 = vadd.f32 %v2639_v1, %v2601_v47  ;;  %v2843_v57 = vadd.f32 %v2841_v43, %v2823_v45  ;;  %v3209_v16 = vadd.f32 %v3207_v9, %v3189_v8 }
 0x2a3   :  { %v2721_v19 = vstv %s9922_s23 }
 0x2a4   :  { %v2822_v13 = vadd.f32 %v2820_v6, %v2794_v40  ;;  %v9938_v40 = vld [vmem:[#allocation2 + $0x20] sm:$0x7f] }
 0x2a5   :  { %v3229_v30 = vpop.permute.xlu1 %3228  ;;  %v2637_v60 = vpop.permute.xlu0 %2636  ;;  %v2943_v35 = vstv %s9915_s15 }
 0x2a6   :  { %v3234_v32 = vadd.f32 %v3229_v30, %v3208_v10  ;;  %v2642_v33 = vadd.f32 %v2637_v60, %v2600_v22  ;;  %v2945_v41 = vmul.f32 %v9931_v44, %v2943_v35  ;;  %v2842_v48 = vadd.f32 %v2840_v25, %v2822_v13 }
 0x2a7   :  { %v2944_v28 = vmul.f32 %v9938_v40, %v2943_v35  ;;  %v2723_v13 = vmul.f32 %v9840_v34, %v2721_v19  ;;  %v3329_v30 = vstv %s9928_s27  ;;  %v2722_v34 = vmul.f32 %v9882_v3, %v2721_v19 }
 0x2a8   :  { %v3431_v22 = vstv %s9946_s25 }
 0x2a9   :  { %v2681_v58 = vpop.permute.xlu1 %2680  ;;  %v2873_v39 = vpop.permute.xlu0 %2872 }
 0x2aa   :  { %v2685_v54 = vadd.f32 %v2681_v58, %v2643_v62  ;;  %v2877_v0 = vadd.f32 %v2873_v39, %v2843_v57  ;;  %v3330_v62 = vmul.f32 %v3329_v30, %v9586_v26  ;;  %v2825_v58 = vstv %s9936_s30  ;;  %s6249_s30 = smov [#allocation11]  }
 0x2ab   :  { %v2827_v50 = vmul.f32 %v9893_v23, %v2825_v58  ;;  %v3331_v23 = vmul.f32 %v3329_v30, %v9613_v7  ;;  %v2826_v9 = vmul.f32 %v9671_v14, %v2825_v58 }
 0x2ac   :  { %v2705_v37 = vadd.f32 %v2703_v2, %v2685_v54  ;;  %v2963_v54 = vstv %s9943_s2 }
 0x2ad   :  { %v3231_v5 = vpop.permute.xlu1 %3230  ;;  %v3271_v52 = vpop.permute.xlu0 %3270 }
 0x2ae   :  { %v3276_v59 = vadd.f32 %v3271_v52, %v3234_v32  ;;  %v3235_v20 = vadd.f32 %v3231_v5, %v3209_v16  ;;  %v2725_v27 = vadd.f32 %v2723_v13, %v2705_v37 }
 0x2b0   :  { %v3312_v18 = vadd.f32 %v3310_v53, %v3276_v59  ;;  %v9960_v53 = vld [vmem:[#allocation2 + $0x58] sm:$0x7f] }
 0x2b1   :  { %v2679_v51 = vpop.permute.xlu1 %2678  ;;  %v2871_v55 = vpop.permute.xlu0 %2870  ;;  %v2965_v3 = vmul.f32 %v9960_v53, %v2963_v54 }
 0x2b2   :  { %v2684_v61 = vadd.f32 %v2679_v51, %v2642_v33  ;;  %v2876_v45 = vadd.f32 %v2871_v55, %v2842_v48  ;;  %v3332_v10 = vadd.f32 %v3330_v62, %v3312_v18  ;;  %v9966_v33 = vld [vmem:[#allocation2 + $0x50] sm:$0x7f]  ;;  %v2845_v51 = vstv %s9949_s10  ;;  %s10064_s10 = sld [smem:[#allocation8 + $0x85]] }
 0x2b3   :  { %v2964_v18 = vmul.f32 %v9966_v33, %v2963_v54  ;;  %v3087_v48 = vstv %s9958_s0  ;;  %v2846_v30 = vmul.f32 %v9925_v12, %v2845_v51  ;;  %s10070_s0 = sld [smem:[#allocation8 + $0x5c]] }
 0x2b4   :  { %v2704_v36 = vadd.f32 %v2702_v24, %v2684_v61 }
 0x2b5   :  { %v2915_v15 = vpop.permute.xlu1 %2914  ;;  %v3273_v31 = vpop.permute.xlu0 %3272 }
 0x2b6   :  { %v2919_v4 = vadd.f32 %v2915_v15, %v2877_v0  ;;  %v3277_v17 = vadd.f32 %v3273_v31, %v3235_v20  ;;  %v2724_v5 = vadd.f32 %v2722_v34, %v2704_v36  ;;  %v3067_v20 = vstv %s9956_s28  ;;  %v9971_v36 = vld [vmem:[#allocation2 + $0x88] sm:$0x7f] }
 0x2b7   :  { %v3069_v14 = vmul.f32 %v9971_v36, %v3067_v20  ;;  %v2847_v15 = vmul.f32 %v9918_v46, %v2845_v51  ;;  %v2949_v31 = vstv %s9954_s11 }
 0x2b8   :  { %v2947_v8 = vadd.f32 %v2945_v41, %v2919_v4  ;;  %v3313_v56 = vadd.f32 %v3311_v38, %v3277_v17 }
 0x2b9   :  { %v2913_v1 = vpop.permute.xlu1 %2912  ;;  %v2763_v6 = vpop.permute.xlu0 %2762 }
 0x2ba   :  { %v2918_v42 = vadd.f32 %v2913_v1, %v2876_v45  ;;  %v2767_v63 = vadd.f32 %v2763_v6, %v2725_v27  ;;  %v2967_v55 = vadd.f32 %v2965_v3, %v2947_v8  ;;  %v3333_v57 = vadd.f32 %v3331_v23, %v3313_v56  ;;  %v9977_v45 = vld [vmem:[#allocation2 + $0x80] sm:$0x7f] }
 0x2bb   :  { %v3068_v8 = vmul.f32 %v9977_v45, %v3067_v20  ;;  %v2951_v56 = vmul.f32 %v9931_v44, %v2949_v31  ;;  %v3448_v44 = vld [vmem:[%s10383_s5] sm:$0x7f] }
 0x2bc   :  { %v2946_v21 = vadd.f32 %v2944_v28, %v2918_v42 }
 0x2bd   :  { %v3353_v60 = vpop.permute.xlu1 %3352  ;;  %v2761_v47 = vpop.permute.xlu0 %2760 }
 0x2be   :  { %v3358_v29 = vadd.f32 %v3353_v60, %v3332_v10  ;;  %v2766_v43 = vadd.f32 %v2761_v47, %v2724_v5  ;;  %v2966_v38 = vadd.f32 %v2964_v18, %v2946_v21  ;;  %v9982_v21 = vld [vmem:[#allocation2 + $0xb8] sm:$0x7f] }
 0x2bf   :  { %v3089_v60 = vmul.f32 %v9982_v21, %v3087_v48 }
 0x2c1   :  { %v2805_v39 = vpop.permute.xlu1 %2804  ;;  %v2997_v49 = vpop.permute.xlu0 %2996 }
 0x2c2   :  { %v2809_v2 = vadd.f32 %v2805_v39, %v2767_v63  ;;  %v3001_v7 = vadd.f32 %v2997_v49, %v2967_v55 }
 0x2c4   :  { %v2829_v26 = vadd.f32 %v2827_v50, %v2809_v2  ;;  %v5885_v2 = vld [vmem:[%s10383_s5 + $0x28] sm:$0x7f] }
 0x2c5   :  { %v3355_v32 = vpop.permute.xlu1 %3354  ;;  %v3395_v37 = vpop.permute.xlu0 %3394 }
 0x2c6   :  { %v3400_v52 = vadd.f32 %v3395_v37, %v3358_v29  ;;  %v3359_v25 = vadd.f32 %v3355_v32, %v3333_v57  ;;  %v2849_v13 = vadd.f32 %v2847_v15, %v2829_v26  ;;  %v5889_v15 = vld [vmem:[%s10383_s5 + $0x30] sm:$0x7f] }
 0x2c8   :  { %v3432_v16 = vadd.f32 %v3431_v22, %v3400_v52 }
 0x2c9   :  { %v2803_v59 = vpop.permute.xlu1 %2802  ;;  %v2995_v24 = vpop.permute.xlu0 %2994 }
 0x2ca   :  { %v2808_v61 = vadd.f32 %v2803_v59, %v2766_v43  ;;  %v3434_v4 = vmax.f32 %v3432_v16, 0.0  ;;  %v3000_v1 = vadd.f32 %v2995_v24, %v2966_v38  ;;  %v5884_v59 = vld [vmem:[%s10383_s5 + $0x20] sm:$0x7f]  ;;  %v5890_v16 = vld [vmem:[%s10383_s5 + $0x38] sm:$0x7f]  ;;  %v3191_v38 = vstv %s9996_s29 }
 0x2cc   :  { %v2828_v0 = vadd.f32 %v2826_v9, %v2808_v61  ;;  %v3455_v62 = vrot.slane %v3434_v4, 1  ;;  %v3623_v63 = vrot.slane %v3434_v4, 2  ;;  %v3710_v39 = vrot.slane %v3434_v4, 3 }
 0x2cd   :  { %v3039_v35 = vpop.permute.xlu1 %3038  ;;  %v3397_v41 = vpop.permute.xlu0 %3396  ;;  %v3797_v49 = vrot.slane %v3434_v4, 4  ;;  %v3884_v12 = vrot.slane %v3434_v4, 5  ;;  %v3971_v9 = vrot.slane %v3434_v4, 6 }
 0x2ce   :  { %v3043_v17 = vadd.f32 %v3039_v35, %v3001_v7  ;;  %v3401_v19 = vadd.f32 %v3397_v41, %v3359_v25  ;;  %v2848_v23 = vadd.f32 %v2846_v30, %v2828_v0  ;;  %v2950_v0 = vmul.f32 %v9938_v40, %v2949_v31  ;;  %v5900_v30 = vld [vmem:[%s10383_s5 + $0x58] sm:$0x7f] }
 0x2cf   :  { %v3088_v41 = vmul.f32 %v9853_v11, %v3087_v48  ;;  %v5895_v48 = vld [vmem:[%s10383_s5 + $0x48] sm:$0x7f] }
 0x2d0   :  { %v3071_v6 = vadd.f32 %v3069_v14, %v3043_v17  ;;  %v3433_v28 = vadd.f32 %v3431_v22, %v3401_v19  ;;  %v10728_v22 = vmov 0.0   ;;  %v10038_v19 = vld [vmem:[#allocation2 + $0x29] sm:$0x7f] }
 0x2d1   :  { %v3037_v42 = vpop.permute.xlu1 %3036  ;;  %v2887_v46 = vpop.permute.xlu0 %2886 }
 0x2d2   :  { %v3435_v47 = vmax.f32 %v3433_v28, 0.0  ;;  %v3042_v27 = vadd.f32 %v3037_v42, %v3000_v1  ;;  %v2891_v58 = vadd.f32 %v2887_v46, %v2849_v13  ;;  %v3091_v14 = vadd.f32 %v3089_v60, %v3071_v6  ;;  %v5894_v42 = vld [vmem:[%s10383_s5 + $0x40] sm:$0x7f] }
 0x2d3   :  { %v10052_v60 = vld [vmem:[#allocation2 + $0x21] sm:$0x7f] }
 0x2d4   :  { %v3070_v10 = vadd.f32 %v3068_v8, %v3042_v27  ;;  %v3457_v34 = vsel %vm3456_vm4, %v3435_v47, %v3455_v62  ;;  %v3539_v50 = vrot.slane %v3435_v47, 7  ;;  %v3624_v54 = vrot.slane %v3435_v47, 1 }
 0x2d5   :  { %v2885_v29 = vpop.permute.xlu1 %2884  ;;  %v2929_v26 = vpop.permute.xlu0 %2928  ;;  %5880 = vmatmul.mubr.msk.f32.vlgmr.msra.gmra.mxu0 %vm3458_vm5, %v3457_v34  ;;  %v3711_v32 = vrot.slane %v3435_v47, 2  ;;  %v3798_v37 = vrot.slane %v3435_v47, 3  ;;  %v3885_v5 = vrot.slane %v3435_v47, 4  ;;  %v3972_v3 = vrot.slane %v3435_v47, 5 }
 0x2d6   :  { %v2933_v52 = vadd.f32 %v2929_v26, %v2891_v58  ;;  %5882 = vmatpush1.msk.msra.mxu0 %vm3461_vm3, %v3448_v44  ;;  %3613 = vmatprep.mubr.f32.mxu0 %v10728_v22  ;;  %v3540_v43 = vsel %vm3456_vm4, %v3539_v50, %v3434_v4  ;;  %v3625_v18 = vsel %vm3456_vm4, %v3624_v54, %v3623_v63  ;;  %v2969_v4 = vstv %s9990_s3  ;;  %v10074_v26 = vld [vmem:[#allocation2 + $0x59] sm:$0x7f] }
 0x2d7   :  { %5886 = vmatprep.subr.msk.mxu0 %vm3461_vm3, %v5885_v2  ;;  %v3712_v24 = vsel %vm3456_vm4, %v3711_v32, %v3710_v39  ;;  %v3799_v51 = vsel %vm3456_vm4, %v3798_v37, %v3797_v49  ;;  %v2890_v55 = vadd.f32 %v2885_v29, %v2848_v23  ;;  %v10013_v61 = vsel %vm3456_vm4, %v3885_v5, %v3884_v12  ;;  %v5899_v39 = vld [vmem:[%s10383_s5 + $0x50] sm:$0x7f] }
 0x2d8   :  { %v2953_v57 = vadd.f32 %v2951_v56, %v2933_v52  ;;  %v10016_v7 = vsel %vm3456_vm4, %v3972_v3, %v3971_v9  ;;  %v3193_v8 = vmul.f32 %v10038_v19, %v3191_v38  ;;  %v3090_v1 = vadd.f32 %v3088_v41, %v3070_v10  ;;  %v5915_v3 = vld [vmem:[%s10383_s5 + $0x88] sm:$0x7f] }
 0x2d9   :  { %v3121_v25 = vpop.permute.xlu1 %3120  ;;  %v2927_v20 = vpop.permute.xlu0 %2926  ;;  %5883 = vmatmul.mubr.msk.f32.vlgmr.msra.gmra.mxu0 %vm3458_vm5, %v3540_v43  ;;  %v2971_v28 = vmul.f32 %v9960_v53, %v2969_v4  ;;  %v3192_v47 = vmul.f32 %v10052_v60, %v3191_v38  ;;  %v2970_v63 = vmul.f32 %v9966_v33, %v2969_v4  ;;  %v3211_v58 = vstv %s10030_s18  ;;  %v5905_v33 = vld [vmem:[%s10383_s5 + $0x68] sm:$0x7f]  ;;  %s5864_s18 = sld [smem:[#allocation8 + $0x8c]] }
 0x2da   :  { %v2932_v35 = vadd.f32 %v2927_v20, %v2890_v55  ;;  %5887 = vmatpush1.msk.msra.mxu0 %vm3461_vm3, %v5884_v59  ;;  %3698 = vmatprep.mubr.f32.mxu0 %v10728_v22  ;;  %v3125_v40 = vadd.f32 %v3121_v25, %v3091_v14  ;;  %v3073_v10 = vstv %s10036_s1  ;;  %v3213_v32 = vmul.f32 %v10074_v26, %v3211_v58 }
 0x2db   :  { %5891 = vmatprep.subr.msk.mxu0 %vm3461_vm3, %v5890_v16  ;;  %v2973_v44 = vadd.f32 %v2971_v28, %v2953_v57  ;;  %v3075_v50 = vmul.f32 %v9971_v36, %v3073_v10  ;;  %v5904_v36 = vld [vmem:[%s10383_s5 + $0x60] sm:$0x7f]  ;;  %v3074_v52 = vmul.f32 %v9977_v45, %v3073_v10  ;;  %v3315_v16 = vstv %s10070_s0 }
 0x2dc   :  { %v2952_v31 = vadd.f32 %v2950_v0, %v2932_v35  ;;  %v5914_v45 = vld [vmem:[%s10383_s5 + $0x80] sm:$0x7f]  ;;  %v10105_v0 = vld [vmem:[#allocation2 + $0x89] sm:$0x7f] }
 0x2dd   :  { %v3119_v17 = vpop.permute.xlu1 %3118  ;;  %v3163_v56 = vpop.permute.xlu0 %3162  ;;  %5888 = vmatmul.mubr.msk.f32.vlgmr.msra.gmra.mxu0 %vm3458_vm5, %v3625_v18  ;;  %v10089_v18 = vld [vmem:[#allocation2 + $0x51] sm:$0x7f]  ;;  %v3317_v20 = vmul.f32 %v10105_v0, %v3315_v16 }
 0x2de   :  { %v3167_v6 = vadd.f32 %v3163_v56, %v3125_v40  ;;  %5892 = vmatpush1.msk.msra.mxu0 %vm3461_vm3, %v5889_v15  ;;  %3785 = vmatprep.mubr.f32.mxu0 %v10728_v22  ;;  %v3124_v13 = vadd.f32 %v3119_v17, %v3090_v1  ;;  %v2972_v54 = vadd.f32 %v2970_v63, %v2952_v31  ;;  %v3335_v1 = vstv %s10095_s4 }
 0x2df   :  { %5896 = vmatprep.subr.msk.mxu0 %vm3461_vm3, %v5895_v48  ;;  %v6163_v48 = vld [vmem:[#allocation2 + $0x81] sm:$0x7f] }
 0x2e0   :  { %v3195_v46 = vadd.f32 %v3193_v8, %v3167_v6 }
 0x2e1   :  { %v3161_v27 = vpop.permute.xlu1 %3160  ;;  %v3011_v53 = vpop.permute.xlu0 %3010  ;;  %5893 = vmatmul.mubr.msk.f32.vlgmr.msra.gmra.mxu0 %vm3458_vm5, %v3712_v24  ;;  %v3212_v24 = vmul.f32 %v10089_v18, %v3211_v58 }
 0x2e2   :  { %v3166_v62 = vadd.f32 %v3161_v27, %v3124_v13  ;;  %5897 = vmatpush1.msk.msra.mxu0 %vm3461_vm3, %v5894_v42  ;;  %3872 = vmatprep.mubr.f32.mxu0 %v10728_v22  ;;  %v3015_v12 = vadd.f32 %v3011_v53, %v2973_v44  ;;  %v3215_v9 = vadd.f32 %v3213_v32, %v3195_v46  ;;  %v3197_v42 = vstv %s10110_s24  ;;  %v6164_v27 = vld [vmem:[#allocation2 + $0xb9] sm:$0x7f] }
 0x2e3   :  { %5901 = vmatprep.subr.msk.mxu0 %vm3461_vm3, %v5900_v30  ;;  %v3199_v30 = vmul.f32 %v10038_v19, %v3197_v42  ;;  %v3337_v53 = vmul.f32 %v6164_v27, %v3335_v1 }
 0x2e4   :  { %v3194_v49 = vadd.f32 %v3192_v47, %v3166_v62 }
 0x2e5   :  { %v3009_v34 = vpop.permute.xlu1 %3008  ;;  %v3053_v2 = vpop.permute.xlu0 %3052  ;;  %5898 = vmatmul.mubr.msk.f32.vlgmr.msra.gmra.mxu0 %vm3458_vm5, %v3799_v51  ;;  %v3093_v51 = vstv %s10064_s10 }
 0x2e6   :  { %v3057_v29 = vadd.f32 %v3053_v2, %v3015_v12  ;;  %5902 = vmatpush1.msk.msra.mxu0 %vm3461_vm3, %v5899_v39  ;;  %3959 = vmatprep.mubr.f32.mxu0 %v10728_v22  ;;  %v3014_v37 = vadd.f32 %v3009_v34, %v2972_v54  ;;  %v3214_v35 = vadd.f32 %v3212_v24, %v3194_v49  ;;  %v6165_v12 = vld [vmem:[#allocation2 + $0xb1] sm:$0x7f]  ;;  %v3437_v2 = vstv %s10121_s26 }
 0x2e7   :  { %5906 = vmatprep.subr.msk.mxu0 %vm3461_vm3, %v5905_v33  ;;  %v3095_v15 = vmul.f32 %v9982_v21, %v3093_v51  ;;  %v3094_v56 = vmul.f32 %v9853_v11, %v3093_v51  ;;  %v3198_v39 = vmul.f32 %v10052_v60, %v3197_v42  ;;  %v3336_v10 = vmul.f32 %v6165_v12, %v3335_v1  ;;  %v5924_v1 = vld [vmem:[%s10383_s5 + $0xa0] sm:$0x7f] }
 0x2e8   :  { %v3077_v5 = vadd.f32 %v3075_v50, %v3057_v29  ;;  %v3217_v33 = vstv %s10118_s22  ;;  %v3341_v24 = vstv %s10126_s19 }
 0x2e9   :  { %v3245_v23 = vpop.permute.xlu1 %3244  ;;  %v3051_v43 = vpop.permute.xlu0 %3050  ;;  %5903 = vmatmul.mubr.msk.f32.vlgmr.msra.gmra.mxu0 %vm3458_vm5, %v10013_v61  ;;  %v5925_v61 = vld [vmem:[%s10383_s5 + $0xa8] sm:$0x7f] }
 0x2ea   :  { %v3056_v59 = vadd.f32 %v3051_v43, %v3014_v37  ;;  %5907 = vmatpush1.msk.msra.mxu0 %vm3461_vm3, %v5904_v36  ;;  %4046 = vmatprep.mubr.f32.mxu0 %v10728_v22  ;;  %v3249_v55 = vadd.f32 %v3245_v23, %v3215_v9  ;;  %v3097_v8 = vadd.f32 %v3095_v15, %v3077_v5  ;;  %v5919_v15 = vld [vmem:[%s10383_s5 + $0x90] sm:$0x7f] }
 0x2eb   :  { %5916 = vmatprep.subr.msk.mxu0 %vm3461_vm3, %v5915_v3  ;;  %v3219_v36 = vmul.f32 %v10074_v26, %v3217_v33  ;;  %v3218_v23 = vmul.f32 %v10089_v18, %v3217_v33  ;;  %v3443_v33 = vstv %s10136_s12 }
 0x2ec   :  { %v3076_v57 = vadd.f32 %v3074_v52, %v3056_v59  ;;  %v3321_v59 = vstv %s5864_s18 }
 0x2ed   :  { %v3243_v25 = vpop.permute.xlu1 %3242  ;;  %v3287_v14 = vpop.permute.xlu0 %3286  ;;  %5908 = vmatmul.mubr.msk.f32.vlgmr.msra.gmra.mxu0 %vm3458_vm5, %v10016_v7  ;;  %v3316_v7 = vmul.f32 %v6163_v48, %v3315_v16  ;;  %v3323_v26 = vmul.f32 %v10105_v0, %v3321_v59 }
 0x2ee   :  { %v3291_v41 = vadd.f32 %v3287_v14, %v3249_v55  ;;  %5917 = vmatpush1.msk.msra.mxu0 %vm3461_vm3, %v5914_v45  ;;  %4220 = vmatprep.mubr.f32.mxu0 %v10728_v22  ;;  %v3248_v4 = vadd.f32 %v3243_v25, %v3214_v35  ;;  %v3096_v46 = vadd.f32 %v3094_v56, %v3076_v57 }
 0x2ef   :  { %5926 = vmatprep.subr.msk.mxu0 %vm3461_vm3, %v5925_v61  ;;  %v3322_v25 = vmul.f32 %v6163_v48, %v3321_v59  ;;  %v3343_v14 = vmul.f32 %v6164_v27, %v3341_v24  ;;  %v3342_v35 = vmul.f32 %v6165_v12, %v3341_v24 }
 0x2f0   :  { %v3319_v40 = vadd.f32 %v3317_v20, %v3291_v41 }
 0x2f1   :  { %v3285_v31 = vpop.permute.xlu1 %3284  ;;  %v3135_v38 = vpop.permute.xlu0 %3134 }
 0x2f2   :  { %v3290_v17 = vadd.f32 %v3285_v31, %v3248_v4  ;;  %v3139_v6 = vadd.f32 %v3135_v38, %v3097_v8  ;;  %v3339_v58 = vadd.f32 %v3337_v53, %v3319_v40 }
 0x2f4   :  { %v3318_v21 = vadd.f32 %v3316_v7, %v3290_v17  ;;  %v5930_v17 = vld [vmem:[%s10383_s5 + $0xb8] sm:$0x7f] }
 0x2f5   :  { %v3133_v28 = vpop.permute.xlu1 %3132  ;;  %v3177_v13 = vpop.permute.xlu0 %3176 }
 0x2f6   :  { %v3181_v47 = vadd.f32 %v3177_v13, %v3139_v6  ;;  %v3138_v62 = vadd.f32 %v3133_v28, %v3096_v46  ;;  %v3338_v29 = vadd.f32 %v3336_v10, %v3318_v21 }
 0x2f8   :  { %v3201_v11 = vadd.f32 %v3199_v30, %v3181_v47  ;;  %v5935_v47 = vld [vmem:[%s10383_s5 + $0xc8] sm:$0x7f] }
 0x2f9   :  { %v3369_v44 = vpop.permute.xlu1 %3368  ;;  %v3175_v63 = vpop.permute.xlu0 %3174 }
 0x2fa   :  { %v3180_v49 = vadd.f32 %v3175_v63, %v3138_v62  ;;  %v3373_v34 = vadd.f32 %v3369_v44, %v3339_v58  ;;  %v3221_v9 = vadd.f32 %v3219_v36, %v3201_v11  ;;  %v5929_v11 = vld [vmem:[%s10383_s5 + $0xb0] sm:$0x7f] }
 0x2fc   :  { %v3200_v19 = vadd.f32 %v3198_v39, %v3180_v49  ;;  %v5940_v49 = vld [vmem:[%s10383_s5 + $0xd8] sm:$0x7f] }
 0x2fd   :  { %v3367_v50 = vpop.permute.xlu1 %3366  ;;  %v3411_v54 = vpop.permute.xlu0 %3410 }
 0x2fe   :  { %v3415_v32 = vadd.f32 %v3411_v54, %v3373_v34  ;;  %v3372_v37 = vadd.f32 %v3367_v50, %v3338_v29  ;;  %v3220_v16 = vadd.f32 %v3218_v23, %v3200_v19  ;;  %v5934_v19 = vld [vmem:[%s10383_s5 + $0xc0] sm:$0x7f]  ;;  %v5945_v29 = vld [vmem:[%s10383_s5 + $0xe8] sm:$0x7f] }
 0x300   :  { %v3439_v5 = vadd.f32 %v3437_v2, %v3415_v32  ;;  %v5939_v32 = vld [vmem:[%s10383_s5 + $0xd0] sm:$0x7f] }
 0x301   :  { %v3409_v60 = vpop.permute.xlu1 %3408  ;;  %v3259_v3 = vpop.permute.xlu0 %3258 }
 0x302   :  { %v10131_v52 = vmax.f32 %v3439_v5, 0.0  ;;  %v3414_v43 = vadd.f32 %v3409_v60, %v3372_v37  ;;  %v3263_v45 = vadd.f32 %v3259_v3, %v3221_v9  ;;  %v5950_v5 = vld [vmem:[%s10383_s5 + $0xf8] sm:$0x7f]  ;;  %v5944_v3 = vld [vmem:[%s10383_s5 + $0xe0] sm:$0x7f] }
 0x303   :  { %v5949_v9 = vld [vmem:[%s10383_s5 + $0xf0] sm:$0x7f] }
 0x304   :  { %v3438_v51 = vadd.f32 %v3437_v2, %v3414_v43  ;;  %v4060_v55 = vrot.slane %v10131_v52, 7  ;;  %v4233_v4 = vrot.slane %v10131_v52, 1  ;;  %v4320_v40 = vrot.slane %v10131_v52, 2  ;;  %v5955_v43 = vld [vmem:[%s10383_s5 + $0x108] sm:$0x7f] }
 0x305   :  { %v3257_v57 = vpop.permute.xlu1 %3256  ;;  %v3301_v61 = vpop.permute.xlu0 %3300  ;;  %v4407_v31 = vrot.slane %v10131_v52, 3  ;;  %v4494_v27 = vrot.slane %v10131_v52, 4  ;;  %v4581_v63 = vrot.slane %v10131_v52, 5 }
 0x306   :  { %v3440_v20 = vmax.f32 %v3438_v51, 0.0  ;;  %v3305_v18 = vadd.f32 %v3301_v61, %v3263_v45  ;;  %v3262_v41 = vadd.f32 %v3257_v57, %v3220_v16  ;;  %v5960_v51 = vld [vmem:[%s10383_s5 + $0x118] sm:$0x7f] }
 0x308   :  { %v3325_v0 = vadd.f32 %v3323_v26, %v3305_v18  ;;  %v4061_v38 = vsel %vm3456_vm4, %v4060_v55, %v3440_v20  ;;  %v4146_v48 = vrot.slane %v3440_v20, 1  ;;  %v4232_v7 = vrot.slane %v3440_v20, 2  ;;  %v5954_v55 = vld [vmem:[%s10383_s5 + $0x100] sm:$0x7f]  ;;  %v5965_v18 = vld [vmem:[%s10383_s5 + $0x128] sm:$0x7f] }
 0x309   :  { %v3299_v8 = vpop.permute.xlu1 %3298  ;;  %5913 = vmatmul.mubr.msk.f32.vlgmr.msra.gmra.mxu1 %vm3458_vm5, %v4061_v38  ;;  %v3383_v56 = vpop.permute.xlu0 %3382  ;;  %v4319_v21 = vrot.slane %v3440_v20, 3  ;;  %v4406_v6 = vrot.slane %v3440_v20, 4  ;;  %v4493_v28 = vrot.slane %v3440_v20, 5  ;;  %v4580_v42 = vrot.slane %v3440_v20, 6 }
 0x30a   :  { %v3304_v13 = vadd.f32 %v3299_v8, %v3262_v41  ;;  %v3345_v46 = vadd.f32 %v3343_v14, %v3325_v0  ;;  %v4147_v30 = vsel %vm3456_vm4, %v10131_v52, %v4146_v48  ;;  %5922 = vmatpush1.msk.msra.mxu1 %vm3461_vm3, %v5919_v15  ;;  %4307 = vmatprep.mubr.f32.mxu1 %v10728_v22  ;;  %v5959_v41 = vld [vmem:[%s10383_s5 + $0x110] sm:$0x7f]  ;;  %v5970_v48 = vld [vmem:[%s10383_s5 + $0x138] sm:$0x7f] }
 0x30b   :  { %5918 = vmatmul.mubr.msk.f32.vlgmr.msra.gmra.mxu0 %vm3458_vm5, %v4147_v30  ;;  %v4234_v53 = vsel %vm3456_vm4, %v4233_v4, %v4232_v7  ;;  %5931 = vmatprep.subr.msk.mxu1 %vm3461_vm3, %v5930_v17  ;;  %v4321_v62 = vsel %vm3456_vm4, %v4320_v40, %v4319_v21  ;;  %v4408_v44 = vsel %vm3456_vm4, %v4407_v31, %v4406_v6  ;;  %v5964_v17 = vld [vmem:[%s10383_s5 + $0x120] sm:$0x7f]  ;;  %v5975_v21 = vld [vmem:[%s10383_s5 + $0x148] sm:$0x7f]  ;;  %v5969_v6 = vld [vmem:[%s10383_s5 + $0x130] sm:$0x7f] }
 0x30c   :  { %v3324_v58 = vadd.f32 %v3322_v25, %v3304_v13  ;;  %v3387_v39 = vadd.f32 %v3383_v56, %v3345_v46  ;;  %5927 = vmatpush1.msk.msra.mxu0 %vm3461_vm3, %v5924_v1  ;;  %4394 = vmatprep.mubr.f32.mxu0 %v10728_v22  ;;  %v4495_v12 = vsel %vm3456_vm4, %v4494_v27, %v4493_v28  ;;  %v5974_v28 = vld [vmem:[%s10383_s5 + $0x140] sm:$0x7f]  ;;  %v5302_v13 = vld [vmem:[%s10385_s7 + $0x78] sm:$0xff]  ;;  %v5317_v46 = vld [vmem:[%s10385_s7 + $0xf0] sm:$0xff] }
 0x30d   :  { %v3381_v10 = vpop.permute.xlu1 %3380  ;;  %5923 = vmatmul.mubr.msk.f32.vlgmr.msra.gmra.mxu1 %vm3458_vm5, %v4234_v53  ;;  %v3425_v34 = vpop.permute.xlu0 %3424  ;;  %5936 = vmatprep.subr.msk.mxu0 %vm3461_vm3, %v5935_v47  ;;  %v4582_v50 = vsel %vm3456_vm4, %v4581_v63, %v4580_v42  ;;  %v5318_v42 = vld [vmem:[%s10385_s7 + $0xf8] sm:$0xff]  ;;  %v5316_v30 = vld [vmem:[%s10385_s7 + $0xe8] sm:$0xff]  ;;  %v5315_v27 = vld [vmem:[%s10385_s7 + $0xe0] sm:$0xff] }
 0x30e   :  { %v3344_v2 = vadd.f32 %v3342_v35, %v3324_v58  ;;  %v3429_v54 = vadd.f32 %v3425_v34, %v3387_v39  ;;  %5932 = vmatpush1.msk.msra.mxu1 %vm3461_vm3, %v5929_v11  ;;  %4481 = vmatprep.mubr.f32.mxu1 %v10728_v22  ;;  %v5300_v47 = vld [vmem:[%s10385_s7 + $0x68] sm:$0xff]  ;;  %v5299_v53 = vld [vmem:[%s10385_s7 + $0x60] sm:$0xff]  ;;  %v5298_v11 = vld [vmem:[%s10385_s7 + $0x58] sm:$0xff] }
 0x30f   :  { %5928 = vmatmul.mubr.msk.f32.vlgmr.msra.gmra.mxu0 %vm3458_vm5, %v4321_v62  ;;  %5941 = vmatprep.subr.msk.mxu1 %vm3461_vm3, %v5940_v49  ;;  %v5314_v62 = vld [vmem:[%s10385_s7 + $0xd8] sm:$0xff]  ;;  %v5297_v63 = vld [vmem:[%s10385_s7 + $0x50] sm:$0xff]  ;;  %v5312_v58 = vld [vmem:[%s10385_s7 + $0xc8] sm:$0xff] }
 0x310   :  { %v3386_v36 = vadd.f32 %v3381_v10, %v3344_v2  ;;  %v3445_v37 = vadd.f32 %v3443_v33, %v3429_v54  ;;  %5937 = vmatpush1.msk.msra.mxu0 %vm3461_vm3, %v5934_v19  ;;  %4568 = vmatprep.mubr.f32.mxu0 %v10728_v22  ;;  %v5296_v39 = vld [vmem:[%s10385_s7 + $0x48] sm:$0xff]  ;;  %v5311_v49 = vld [vmem:[%s10385_s7 + $0xc0] sm:$0xff]  ;;  %v5310_v10 = vld [vmem:[%s10385_s7 + $0xb8] sm:$0xff] }
 0x311   :  { %v3423_v60 = vpop.permute.xlu1 %3422  ;;  %5933 = vmatmul.mubr.msk.f32.vlgmr.msra.gmra.mxu1 %vm3458_vm5, %v4408_v44  ;;  %5946 = vmatprep.subr.msk.mxu0 %vm3461_vm3, %v5945_v29  ;;  %v5313_v44 = vld [vmem:[%s10385_s7 + $0xd0] sm:$0xff]  ;;  %v5292_v2 = vld [vmem:[%s10385_s7 + $0x28] sm:$0xff]  ;;  %v5307_v54 = vld [vmem:[%s10385_s7 + $0xa0] sm:$0xff] }
 0x312   :  { %v3447_v23 = vmax.f32 %v3445_v37, 0.0  ;;  %v3428_v52 = vadd.f32 %v3423_v60, %v3386_v36  ;;  %5942 = vmatpush1.msk.msra.mxu1 %vm3461_vm3, %v5939_v32  ;;  %4655 = vmatprep.mubr.f32.mxu1 %v10728_v22  ;;  %v5309_v34 = vld [vmem:[%s10385_s7 + $0xb0] sm:$0xff]  ;;  %v5291_v29 = vld [vmem:[%s10385_s7 + $0x20] sm:$0xff]  ;;  %v5306_v32 = vld [vmem:[%s10385_s7 + $0x98] sm:$0xff] }
 0x313   :  { %5938 = vmatmul.mubr.msk.f32.vlgmr.msra.gmra.mxu0 %vm3458_vm5, %v4495_v12  ;;  %5951 = vmatprep.subr.msk.mxu1 %vm3461_vm3, %v5950_v5  ;;  %v5295_v12 = vld [vmem:[%s10385_s7 + $0x40] sm:$0xff]  ;;  %v5293_v19 = vld [vmem:[%s10385_s7 + $0x30] sm:$0xff]  ;;  %v5290_v36 = vld [vmem:[%s10385_s7 + $0x18] sm:$0xff] }
 0x314   :  { %v3444_v59 = vadd.f32 %v3443_v33, %v3428_v52  ;;  %5947 = vmatpush1.msk.msra.mxu0 %vm3461_vm3, %v5944_v3  ;;  %4743 = vmatprep.mubr.f32.mxu0 %v10728_v22  ;;  %v4669_v24 = vrot.slane %v3447_v23, 7  ;;  %v4842_v57 = vrot.slane %v3447_v23, 1  ;;  %v4929_v16 = vrot.slane %v3447_v23, 2  ;;  %v5294_v33 = vld [vmem:[%s10385_s7 + $0x38] sm:$0xff]  ;;  %v5305_v37 = vld [vmem:[%s10385_s7 + $0x90] sm:$0xff]  ;;  %v5304_v60 = vld [vmem:[%s10385_s7 + $0x88] sm:$0xff] }
 0x315   :  { %5943 = vmatmul.mubr.msk.f32.vlgmr.msra.gmra.mxu1 %vm3458_vm5, %v4582_v50  ;;  %5956 = vmatprep.subr.msk.mxu0 %vm3461_vm3, %v5955_v43  ;;  %v5016_v26 = vrot.slane %v3447_v23, 3  ;;  %v5103_v61 = vrot.slane %v3447_v23, 4  ;;  %v5190_v31 = vrot.slane %v3447_v23, 5  ;;  %v5308_v50 = vld [vmem:[%s10385_s7 + $0xa8] sm:$0xff]  ;;  %v5289_v5 = vld [vmem:[%s10385_s7 + $0x10] sm:$0xff]  ;;  %v5287_v52 = vld [vmem:[%s10385_s7] sm:$0xff] }
 0x316   :  { %v3446_v45 = vmax.f32 %v3444_v59, 0.0  ;;  %5952 = vmatpush1.msk.msra.mxu1 %vm3461_vm3, %v5949_v9  ;;  %4829 = vmatprep.mubr.f32.mxu1 %v10728_v22  ;;  %v5288_v3 = vld [vmem:[%s10385_s7 + $0x8] sm:$0xff] }
 0x317   :  { %5961 = vmatprep.subr.msk.mxu1 %vm3461_vm3, %v5960_v51 }
 0x318   :  { %v4670_v25 = vsel %vm3456_vm4, %v4669_v24, %v3446_v45  ;;  %v4755_v20 = vrot.slane %v3446_v45, 1  ;;  %v4841_v14 = vrot.slane %v3446_v45, 2  ;;  %v4928_v35 = vrot.slane %v3446_v45, 3 }
 0x319   :  { %5948 = vmatmul.mubr.msk.f32.vlgmr.msra.gmra.mxu0 %vm3458_vm5, %v4670_v25  ;;  %v5015_v15 = vrot.slane %v3446_v45, 4  ;;  %v5102_v4 = vrot.slane %v3446_v45, 5  ;;  %v5189_v40 = vrot.slane %v3446_v45, 6 }
 0x31a   :  { %5957 = vmatpush1.msk.msra.mxu0 %vm3461_vm3, %v5954_v55  ;;  %v4756_v0 = vsel %vm3456_vm4, %v3447_v23, %v4755_v20  ;;  %4916 = vmatprep.mubr.f32.mxu0 %v10728_v22  ;;  %v4843_v38 = vsel %vm3456_vm4, %v4842_v57, %v4841_v14  ;;  %v4930_v7 = vsel %vm3456_vm4, %v4929_v16, %v4928_v35  ;;  %v5303_v23 = vld [vmem:[%s10385_s7 + $0x80] sm:$0xff] }
 0x31b   :  { %5953 = vmatmul.mubr.msk.f32.vlgmr.msra.gmra.mxu1 %vm3458_vm5, %v4756_v0  ;;  %5966 = vmatprep.subr.msk.mxu0 %vm3461_vm3, %v5965_v18  ;;  %v5017_v8 = vsel %vm3456_vm4, %v5016_v26, %v5015_v15  ;;  %v5104_v56 = vsel %vm3456_vm4, %v5103_v61, %v5102_v4  ;;  %v5191_v1 = vsel %vm3456_vm4, %v5190_v31, %v5189_v40 }
 0x31c   :  { %5962 = vmatpush1.msk.msra.mxu1 %vm3461_vm3, %v5959_v41  ;;  %5003 = vmatprep.mubr.f32.mxu1 %v10728_v22 }
 0x31d   :  { %5958 = vmatmul.mubr.msk.f32.vlgmr.msra.gmra.mxu0 %vm3458_vm5, %v4843_v38  ;;  %5971 = vmatprep.subr.msk.mxu1 %vm3461_vm3, %v5970_v48 }
 0x31e   :  { %5967 = vmatpush1.msk.msra.mxu0 %vm3461_vm3, %v5964_v17  ;;  %5090 = vmatprep.mubr.f32.mxu0 %v10728_v22 }
 0x31f   :  { %5963 = vmatmul.mubr.msk.f32.vlgmr.msra.gmra.mxu1 %vm3458_vm5, %v4930_v7  ;;  %5976 = vmatprep.subr.msk.mxu0 %vm3461_vm3, %v5975_v21 }
 0x320   :  { %5972 = vmatpush1.msk.msra.mxu1 %vm3461_vm3, %v5969_v6  ;;  %5177 = vmatprep.mubr.f32.mxu1 %v10728_v22 }
 0x321   :  { %5968 = vmatmul.mubr.msk.f32.vlgmr.msra.gmra.mxu0 %vm3458_vm5, %v5017_v8  ;;  %5980 = vmatprep.subr.mxu1 %v5318_v42 }
 0x322   :  { %5977 = vmatpush1.msk.msra.mxu0 %vm3461_vm3, %v5974_v28  ;;  %5264 = vmatprep.mubr.f32.mxu0 %v10728_v22  ;;  %v5301_v22 = vld [vmem:[%s10385_s7 + $0x70] sm:$0xff] }
 0x323   :  { %5973 = vmatmul.mubr.msk.f32.vlgmr.msra.gmra.mxu1 %vm3458_vm5, %v5104_v56 }
 0x324   :  { %5981 = vmatpush3.msra.mxu1 %v5302_v13 }
 0x325   :  { %5978 = vmatmul.mubr.msk.f32.vlgmr.msra.gmra.mxu0 %vm3458_vm5, %v5191_v1  ;;  %5982 = vmatprep.subr.mxu1 %v5317_v46 }
 0x326   :  { %5983 = vmatpush3.msra.mxu1 %v5301_v22 }
 0x327   :  { %5984 = vmatprep.subr.mxu1 %v5316_v30 }
 0x328   :  { %5985 = vmatpush3.msra.mxu1 %v5300_v47 }
 0x329   :  { %5986 = vmatprep.subr.mxu1 %v5315_v27 }
 0x32a   :  { %5987 = vmatpush3.msra.mxu1 %v5299_v53 }
 0x32b   :  { %5988 = vmatprep.subr.mxu1 %v5314_v62 }
 0x32c   :  { %5989 = vmatpush3.msra.mxu1 %v5298_v11 }
 0x32d   :  { %5990 = vmatprep.subr.mxu1 %v5313_v44 }
 0x32e   :  { %5991 = vmatpush3.msra.mxu1 %v5297_v63 }
 0x32f   :  { %5992 = vmatprep.subr.mxu1 %v5312_v58 }
 0x330   :  { %5993 = vmatpush3.msra.mxu1 %v5296_v39 }
 0x331   :  { %5994 = vmatprep.subr.mxu1 %v5311_v49 }
 0x332   :  { %5995 = vmatpush3.msra.mxu1 %v5295_v12 }
 0x333   :  { %5996 = vmatprep.subr.mxu1 %v5310_v10 }
 0x334   :  { %5997 = vmatpush3.msra.mxu1 %v5294_v33 }
 0x335   :  { %5998 = vmatprep.subr.mxu1 %v5309_v34 }
 0x336   :  { %5999 = vmatpush3.msra.mxu1 %v5293_v19 }
 0x337   :  { %6000 = vmatprep.subr.mxu1 %v5308_v50 }
 0x338   :  { %6001 = vmatpush3.msra.mxu1 %v5292_v2 }
 0x339   :  { %6002 = vmatprep.subr.mxu1 %v5307_v54 }
 0x33a   :  { %6003 = vmatpush3.msra.mxu1 %v5291_v29 }
 0x33b   :  { %6004 = vmatprep.subr.mxu1 %v5306_v32 }
 0x33c   :  { %6005 = vmatpush3.msra.mxu1 %v5290_v36 }
 0x33d   :  { %6006 = vmatprep.subr.mxu1 %v5305_v37  ;;  %v5275_v37 = vlaneseq }
 0x33e   :  { %6007 = vmatpush3.msra.mxu1 %v5289_v5 }
 0x33f   :  { %6008 = vmatprep.subr.mxu1 %v5304_v60 }
 0x340   :  { %6009 = vmatpush3.msra.mxu1 %v5288_v3 }
 0x341   :  { %6010 = vmatprep.subr.mxu1 %v5303_v23 }
 0x342   :  { %6011 = vmatpush3.msra.mxu1 %v5287_v52 }
 0x395   :  { %v3534_v43 = vpop.f32.mrf.mxu0 }
 0x397   :  { %v3536_v9 = vpop.f32.mrf.mxu0 }
 0x399   :  { %v3615_v59 = vpop.f32.mrf.mxu0 }
 0x39a   :  { %v3616_v25 = vadd.f32 %v3615_v59, %v3534_v43 }
 0x39b   :  { %v3617_v24 = vpop.f32.mrf.mxu0 }
 0x39c   :  { %v3618_v18 = vadd.f32 %v3617_v24, %v3536_v9  ;;  %v5276_v24 = vshrl.u32 %v5275_v37, 7 }
 0x39d   :  { %v3700_v51 = vpop.f32.mrf.mxu0 }
 0x39e   :  { %v3705_v14 = vadd.f32 %v3700_v51, %v3616_v25 }
 0x39f   :  { %v3702_v45 = vpop.f32.mrf.mxu0 }
 0x3a0   :  { %v3706_v35 = vadd.f32 %v3702_v45, %v3618_v18  ;;  %v5277_v18 = vsub.s32 0, %v5276_v24 }
 0x3a1   :  { %v3787_v55 = vpop.f32.mrf.mxu0 }
 0x3a2   :  { %v3792_v41 = vadd.f32 %v3787_v55, %v3705_v14 }
 0x3a3   :  { %v3789_v57 = vpop.f32.mrf.mxu0 }
 0x3a4   :  { %v3793_v4 = vadd.f32 %v3789_v57, %v3706_v35 }
 0x3a5   :  { %v3874_v16 = vpop.f32.mrf.mxu0 }
 0x3a6   :  { %v3879_v40 = vadd.f32 %v3874_v16, %v3792_v41  ;;  %v5273_v41 = vld [vmem:[%s10384_s6] sm:$0x3]  ;;  %s5404_s6 = sshll.u32 %s6249_s30, 4  ;;  %s5405_s6 = int_to_ptr.vmem [resolvable:$true] %s5404_s6 }
 0x3a7   :  { %v3876_v26 = vpop.f32.mrf.mxu0  ;;  %s6214_s2 = scalar_lea.vmem %s5405_s6, 32  ;;  %p6219_p7 = scmp.lt.s32.totalorder %s5405_s6, %s5405_s6 }
 0x3a8   :  { %v3880_v31 = vadd.f32 %v3876_v26, %v3793_v4  ;;  %p6215_p6 = scmp.ne.s32.totalorder %s5405_s6, %s6214_s2  ;;  %p6220_p8 = scmp.lt.s32.totalorder %s6214_s2, %s6214_s2 }
 0x3a9   :  { %v3961_v61 = vpop.f32.mrf.mxu0 }
 0x3aa   :  { %v3966_v0 = vadd.f32 %v3961_v61, %v3879_v40  ;;  %v5281_v61 = vsub.s32 1, %v5276_v24  ;;  %p6221_p9 = por %p6220_p8, %p6219_p7 }
 0x3ab   :  { %v3963_v20 = vpop.f32.mrf.mxu0 }
 0x3ac   :  { %v3967_v48 = vadd.f32 %v3963_v20, %v3880_v31  ;;  %v5282_v31 = vrot.slane %v5273_v41, %v5281_v61  ;;  %p6222_p10 = pnand %p6221_p9, %p6215_p6 }
 0x3ad   :  { %v4048_v15 = vpop.f32.mrf.mxu0 }
 0x3ae   :  { %v4053_v7 = vadd.f32 %v4048_v15, %v3966_v0 }
 0x3af   :  { %v4050_v38 = vpop.f32.mrf.mxu0 }
 0x3b0   :  { %v4054_v8 = vadd.f32 %v4050_v38, %v3967_v48  ;;  %v5278_v38 = vrot.slane %v5273_v41, %v5277_v18 }
 0x3c9   :  { %v4136_v17 = vpop.f32.mrf.mxu1 }
 0x3ca   :  { %v4141_v56 = vadd.f32 %v4136_v17, %v4053_v7 }
 0x3cb   :  { %v4138_v1 = vpop.f32.mrf.mxu1  ;;  %v4222_v21 = vpop.f32.mrf.mxu0 }
 0x3cc   :  { %v4142_v6 = vadd.f32 %v4138_v1, %v4054_v8  ;;  %v4227_v28 = vadd.f32 %v4222_v21, %v4141_v56  ;;  %v5979_v21 = vld [vmem:[%s10386_s8] ss:$0 sm:$0xff] }
 0x3cd   :  { %v4224_v42 = vpop.f32.mrf.mxu0  ;;  %v4309_v13 = vpop.f32.mrf.mxu1 }
 0x3ce   :  { %v4228_v46 = vadd.f32 %v4224_v42, %v4142_v6  ;;  %v4314_v22 = vadd.f32 %v4309_v13, %v4227_v28 }
 0x3cf   :  { %v4311_v30 = vpop.f32.mrf.mxu1  ;;  %v4396_v47 = vpop.f32.mrf.mxu0 }
 0x3d0   :  { %v4315_v27 = vadd.f32 %v4311_v30, %v4228_v46  ;;  %v4401_v53 = vadd.f32 %v4396_v47, %v4314_v22 }
 0x3d1   :  { %v4398_v62 = vpop.f32.mrf.mxu0  ;;  %v4483_v11 = vpop.f32.mrf.mxu1 }
 0x3d2   :  { %v4402_v44 = vadd.f32 %v4398_v62, %v4315_v27  ;;  %v4488_v63 = vadd.f32 %v4483_v11, %v4401_v53 }
 0x3d3   :  { %v4485_v58 = vpop.f32.mrf.mxu1  ;;  %v4570_v39 = vpop.f32.mrf.mxu0 }
 0x3d4   :  { %v4489_v49 = vadd.f32 %v4485_v58, %v4402_v44  ;;  %v4575_v12 = vadd.f32 %v4570_v39, %v4488_v63 }
 0x3d5   :  { %v4572_v10 = vpop.f32.mrf.mxu0  ;;  %v4657_v33 = vpop.f32.mrf.mxu1 }
 0x3d6   :  { %v4576_v34 = vadd.f32 %v4572_v10, %v4489_v49  ;;  %v4662_v50 = vadd.f32 %v4657_v33, %v4575_v12 }
 0x3d7   :  { %v4659_v19 = vpop.f32.mrf.mxu1 }
 0x3d8   :  { %v4663_v54 = vadd.f32 %v4659_v19, %v4576_v34 }
 0x3d9   :  { %v4745_v2 = vpop.f32.mrf.mxu0 }
 0x3da   :  { %v4750_v29 = vadd.f32 %v4745_v2, %v4662_v50 }
 0x3db   :  { %v4747_v32 = vpop.f32.mrf.mxu0  ;;  %v4831_v36 = vpop.f32.mrf.mxu1 }
 0x3dc   :  { %v4751_v5 = vadd.f32 %v4747_v32, %v4663_v54  ;;  %v4836_v60 = vadd.f32 %v4831_v36, %v4750_v29 }
 0x3dd   :  { %v4833_v3 = vpop.f32.mrf.mxu1  ;;  %v4918_v23 = vpop.f32.mrf.mxu0 }
 0x3de   :  { %v4837_v52 = vadd.f32 %v4833_v3, %v4751_v5  ;;  %v4923_v43 = vadd.f32 %v4918_v23, %v4836_v60 }
 0x3df   :  { %v4920_v9 = vpop.f32.mrf.mxu0  ;;  %v5005_v59 = vpop.f32.mrf.mxu1 }
 0x3e0   :  { %v4924_v51 = vadd.f32 %v4920_v9, %v4837_v52  ;;  %v5010_v45 = vadd.f32 %v5005_v59, %v4923_v43 }
 0x3e1   :  { %v5007_v55 = vpop.f32.mrf.mxu1  ;;  %v5092_v57 = vpop.f32.mrf.mxu0 }
 0x3e2   :  { %v5011_v16 = vadd.f32 %v5007_v55, %v4924_v51  ;;  %v5097_v26 = vadd.f32 %v5092_v57, %v5010_v45 }
 0x3e3   :  { %v5094_v25 = vpop.f32.mrf.mxu0  ;;  %v5179_v20 = vpop.f32.mrf.mxu1 }
 0x3e4   :  { %v5098_v14 = vadd.f32 %v5094_v25, %v5011_v16  ;;  %v5184_v35 = vadd.f32 %v5179_v20, %v5097_v26 }
 0x3e5   :  { %v5181_v15 = vpop.f32.mrf.mxu1  ;;  %v5266_v4 = vpop.f32.mrf.mxu0 }
 0x3e6   :  { %v5185_v40 = vadd.f32 %v5181_v15, %v5098_v14  ;;  %v5271_v0 = vadd.f32 %v5266_v4, %v5184_v35 }
 0x3e7   :  { %v5268_v48 = vpop.f32.mrf.mxu0 }
 0x3e8   :  { %v5272_v7 = vadd.f32 %v5268_v48, %v5185_v40  ;;  %v5285_v8 = vadd.f32 %v5278_v38, %v5271_v0 }
 0x3ea   :  { %v5286_v17 = vadd.f32 %v5282_v31, %v5272_v7 }
 0x3ec   :  { %5390 = vmatprep.mubr.f32.mxu1 %v5286_v17 }
 0x3ed   :  { %5391 = vmatmul.mubr.f32.vlgmr.msra.gmra.mxu1 %v5285_v8 }
 0x4ad   :  { %v6012_v56 = vpop.f32.mrf.mxu1 }
 0x4af   :  { %v6013_v1 = vpop.f32.mrf.mxu1 }
 0x4b0   :  { %v6014_v6 = vadd.f32 %v6013_v1, %v6012_v56 }
 0x4b2   :  { %v5393_v28 = vadd.f32 %v6014_v6, %v5979_v21 }
 0x4b4   :  { %5397 = vst.msk [vmem:[#allocation11] sm:$0x3] %vm5396_vm6, %v5393_v28 }
 0x4b5   :  { %6225 = shalt.err (!%p6222_p10)
}
 0x4b6   :  { %5407 = dma.vmem_to_hbm [thread:$0]  %s5405_s6, 32, %s10387_s9, [#allocation4]  }
 0x4b7   :  { %6240 = dma.done.wait [#allocation4], 32  }
 0x4b8   :  { %6241 = vsyncadd [#allocation4], 4294967264 }
 0x4b9   :  { %5411 = vsyncpa [#allocation4], 1 }
 0x4ba   :  { %5412 = vsyncpa [#allocation5], 1 }
 0x4bb   :  { %5413 = vsyncpa [#allocation7], 1 }
 0x4bc   :  { %5414 = vsyncpa [#allocation10], 1 }

</bundles_post_ra>
